<compile_context>
chip_gen: v7x
topology: tpu7x:2x2x1
jax: 0.10.0
libtpu: 0.0.40
codegen_flags: <defaults>
</compile_context>

<pallas_src>
import jax
import jax.numpy as jnp
from jax.experimental import pallas as pl
from jax.experimental.pallas import tpu as pltpu

# ----------------------- config (small synthetic Vicuna) -----------------------
NUM_LAYERS = 8
HIDDEN = 32
N_HEADS = 4
HEAD_DIM = HIDDEN // N_HEADS
INTERMEDIATE = 64
RMS_EPS = 1e-6
ROPE_BASE = 10000.0


# ------------------------------ fused stack kernel ------------------------------
def _stack_kernel(x_ref, mask_ref, cos_ref, sin_ref, ln1_ref, ln2_ref,
                  wproj_ref, wo_ref, wgu_ref, wd_ref, pastkv_ref,
                  out_h_ref, newkv_ref):
    """Whole 8-layer decoder stack for one batch row (grid axis = batch).

    x_ref     : (1, S, H)              hidden states for this batch row
    mask_ref  : (1, nH, S, T)          additive attention mask (per head)
    cos_ref   : (1, S, H)              rotary cos, tiled across heads
    sin_ref   : (1, S, H)              rotary sin, tiled across heads
    ln1/ln2   : (L, 1, H)              RMSNorm weights
    wproj_ref : (L, H, 5H)             fused [Wq | Wk | Wv | Wq@R | Wk@R]
    wo_ref    : (L, H, H)
    wgu_ref   : (L, H, 2I)             fused [Wgate | Wup]
    wd_ref    : (L, I, H)
    pastkv_ref: (1, L, 2, nH, P, D)    past K/V cache
    out_h_ref : (1, S, H)
    newkv_ref : (1, L, 2, S, H)        NEW (RoPE'd K, V) rows only, lane-dense
    """
    _, S, H = x_ref.shape
    _, L, _, nH, P, D = pastkv_ref.shape
    inter = wgu_ref.shape[-1] // 2
    scale = 1.0 / (D ** 0.5)

    # Hoisted loads, shared by all 8 layers.
    x = x_ref[0].astype(jnp.float32)          # (S, H)
    cos = cos_ref[0]                          # (S, H)
    sin = sin_ref[0]
    mask = mask_ref[0]                        # (nH, S, T)

    def split_heads(t):                       # (S, H) -> (nH, S, D)
        return jnp.stack([t[:, h * D:(h + 1) * D] for h in range(nH)], axis=0)

    for l in range(L):
        # ---------------------------- self-attention ----------------------------
        var = jnp.mean(x * x, axis=-1, keepdims=True)
        normed = x * jax.lax.rsqrt(var + RMS_EPS) * ln1_ref[l]                  # (S, H)
        proj = jnp.dot(normed, wproj_ref[l],
                       preferred_element_type=jnp.float32)                      # (S, 5H)
        q = proj[:, 0 * H:1 * H]
        k = proj[:, 1 * H:2 * H]
        v = proj[:, 2 * H:3 * H]
        q_rot = proj[:, 3 * H:4 * H]          # rotate_half(q), from folded Wq@R
        k_rot = proj[:, 4 * H:5 * H]          # rotate_half(k), from folded Wk@R

        # RoPE = two wide VPU FMAs (rotation permutation already in the weights).
        q = q * cos + q_rot * sin
        k = k * cos + k_rot * sin

        # Lane-dense store of ONLY the S new cache rows (past is never touched).
        newkv_ref[0, l, 0] = k.astype(newkv_ref.dtype)
        newkv_ref[0, l, 1] = v.astype(newkv_ref.dtype)

        # Heads as a batch dimension.
        qh = split_heads(q)                                                     # (nH, S, D)
        kh = split_heads(k)
        vh = split_heads(v)
        k_full = jnp.concatenate([pastkv_ref[0, l, 0], kh], axis=1)             # (nH, T, D)
        v_full = jnp.concatenate([pastkv_ref[0, l, 1], vh], axis=1)

        s = jax.lax.dot_general(qh, k_full, (((2,), (2,)), ((0,), (0,))),
                                preferred_element_type=jnp.float32)             # (nH, S, T)
        s = s * scale + mask
        s = s - jnp.max(s, axis=-1, keepdims=True)
        p = jnp.exp(s)
        p = p * pl.reciprocal(jnp.sum(p, axis=-1, keepdims=True), approx=True)
        ctx = jax.lax.dot_general(p, v_full, (((2,), (1,)), ((0,), (0,))),
                                  preferred_element_type=jnp.float32)           # (nH, S, D)
        attn = jnp.concatenate([ctx[h] for h in range(nH)], axis=-1)            # (S, H)
        x = x + jnp.dot(attn, wo_ref[l], preferred_element_type=jnp.float32)

        # --------------------------------- MLP ----------------------------------
        var2 = jnp.mean(x * x, axis=-1, keepdims=True)
        n2 = x * jax.lax.rsqrt(var2 + RMS_EPS) * ln2_ref[l]                     # (S, H)
        gu = jnp.dot(n2, wgu_ref[l], preferred_element_type=jnp.float32)        # (S, 2I)
        g = gu[:, :inter]
        u = gu[:, inter:]
        x = x + jnp.dot(g * jax.nn.sigmoid(g) * u, wd_ref[l],
                        preferred_element_type=jnp.float32)

    out_h_ref[0] = x.astype(out_h_ref.dtype)


# --------------------------------- forward glue ---------------------------------
def make_forward(layers_params):
    H, D, nH, L = HIDDEN, HEAD_DIM, N_HEADS, NUM_LAYERS
    half = D // 2

    # rotate_half as a constant per-head matrix (block-diagonal across heads),
    # pre-multiplied into Wq / Wk: the position-independent part of RoPE.
    R = jnp.block([[jnp.zeros((half, half), jnp.float32), jnp.eye(half, dtype=jnp.float32)],
                   [-jnp.eye(half, dtype=jnp.float32), jnp.zeros((half, half), jnp.float32)]])
    Rb = jnp.kron(jnp.eye(nH, dtype=jnp.float32), R)                            # (H, H)

    # Stack / fuse per-layer weights ONCE (jit constants, VMEM-resident).
    ln1 = jnp.stack([p["ln1"] for p in layers_params])[:, None, :]              # (L,1,H)
    ln2 = jnp.stack([p["ln2"] for p in layers_params])[:, None, :]
    wproj = jnp.stack([jnp.concatenate(
        [p["wq"], p["wk"], p["wv"], p["wq"] @ Rb, p["wk"] @ Rb], axis=1)
        for p in layers_params])                                                # (L,H,5H)
    wo = jnp.stack([p["wo"] for p in layers_params])                            # (L,H,H)
    wgu = jnp.stack([jnp.concatenate([p["wg"], p["wu"]], axis=1)
                     for p in layers_params])                                   # (L,H,2I)
    wd = jnp.stack([p["wd"] for p in layers_params])                            # (L,I,H)

    def forward(hidden_states, attention_mask, position_ids, *pkv_flat):
        assert len(pkv_flat) == 2 * L
        B, S, _ = hidden_states.shape
        P = pkv_flat[0].shape[2]
        T = P + S

        # Rotary cos/sin from position_ids (shared by all layers), tiled per head.
        inv_freq = 1.0 / (ROPE_BASE ** (jnp.arange(0, D, 2, dtype=jnp.float32) / D))
        freqs = position_ids.astype(jnp.float32)[..., None] * inv_freq          # (B,S,D/2)
        emb = jnp.concatenate([freqs, freqs], axis=-1)                          # (B,S,D)
        cos = jnp.tile(jnp.cos(emb), (1, 1, nH))                                # (B,S,H)
        sin = jnp.tile(jnp.sin(emb), (1, 1, nH))

        # Explicit broadcast handles both (B,1,S,T) and (B,1,1,T)-style masks.
        mask = jnp.broadcast_to(attention_mask.astype(jnp.float32), (B, nH, S, T))

        past_ks = pkv_flat[0::2]
        past_vs = pkv_flat[1::2]
        pastkv = jnp.stack([jnp.stack(past_ks), jnp.stack(past_vs)], axis=1)    # (L,2,B,nH,P,D)
        pastkv = jnp.transpose(pastkv, (2, 0, 1, 3, 4, 5))                      # (B,L,2,nH,P,D)

        out_shape = (
            jax.ShapeDtypeStruct((B, S, H), hidden_states.dtype),
            jax.ShapeDtypeStruct((B, L, 2, S, H), jnp.float32),
        )
        h_out, newkv = pl.pallas_call(
            _stack_kernel,
            out_shape=out_shape,
            grid=(B,),
            in_specs=[
                pl.BlockSpec((1, S, H), lambda b: (b, 0, 0)),                    # x
                pl.BlockSpec((1, nH, S, T), lambda b: (b, 0, 0, 0)),             # mask
                pl.BlockSpec((1, S, H), lambda b: (b, 0, 0)),                    # cos
                pl.BlockSpec((1, S, H), lambda b: (b, 0, 0)),                    # sin
                pl.BlockSpec((L, 1, H), lambda b: (0, 0, 0)),                    # ln1
                pl.BlockSpec((L, 1, H), lambda b: (0, 0, 0)),                    # ln2
                pl.BlockSpec((L, H, 5 * H), lambda b: (0, 0, 0)),                # wproj
                pl.BlockSpec((L, H, H), lambda b: (0, 0, 0)),                    # wo
                pl.BlockSpec((L, H, 2 * INTERMEDIATE), lambda b: (0, 0, 0)),     # wgu
                pl.BlockSpec((L, INTERMEDIATE, H), lambda b: (0, 0, 0)),         # wd
                pl.BlockSpec((1, L, 2, nH, P, D),
                             lambda b: (b, 0, 0, 0, 0, 0)),                      # past K/V
            ],
            out_specs=(
                pl.BlockSpec((1, S, H), lambda b: (b, 0, 0)),
                pl.BlockSpec((1, L, 2, S, H), lambda b: (b, 0, 0, 0, 0)),
            ),
            compiler_params=pltpu.CompilerParams(
                dimension_semantics=("parallel",)),
        )(hidden_states, mask, cos, sin, ln1, ln2, wproj, wo, wgu, wd, pastkv)

        # Cache assembly: bulk HBM copy done by XLA, never through kernel vregs.
        newkv = newkv.reshape(B, L, 2, S, nH, D)
        newkv = jnp.transpose(newkv, (1, 2, 0, 4, 3, 5))                         # (L,2,B,nH,S,D)
        result = [h_out]
        for l in range(L):
            result.append(jnp.concatenate([past_ks[l], newkv[l, 0]], axis=2))    # (B,nH,T,D)
            result.append(jnp.concatenate([past_vs[l], newkv[l, 1]], axis=2))
        return tuple(result)

    return forward


# --------------------------- deterministic param init ---------------------------
def init_layer_params(key):
    ks = jax.random.split(key, 9)
    s = 0.02
    return {
        "ln1": 1.0 + 0.01 * jax.random.normal(ks[0], (HIDDEN,), jnp.float32),
        "ln2": 1.0 + 0.01 * jax.random.normal(ks[1], (HIDDEN,), jnp.float32),
        "wq": s * jax.random.normal(ks[2], (HIDDEN, HIDDEN), jnp.float32),
        "wk": s * jax.random.normal(ks[3], (HIDDEN, HIDDEN), jnp.float32),
        "wv": s * jax.random.normal(ks[4], (HIDDEN, HIDDEN), jnp.float32),
        "wo": s * jax.random.normal(ks[5], (HIDDEN, HIDDEN), jnp.float32),
        "wg": s * jax.random.normal(ks[6], (HIDDEN, INTERMEDIATE), jnp.float32),
        "wu": s * jax.random.normal(ks[7], (HIDDEN, INTERMEDIATE), jnp.float32),
        "wd": s * jax.random.normal(ks[8], (INTERMEDIATE, HIDDEN), jnp.float32),
    }


# ------------------------------------ main ---------------------------------------
if __name__ == "__main__":
    B, S, P = 2, 8, 8          # batch, new tokens, past length
    T = P + S

    root = jax.random.PRNGKey(0)
    k_params, k_hidden, k_kv = jax.random.split(root, 3)

    layers_params = [init_layer_params(k)
                     for k in jax.random.split(k_params, NUM_LAYERS)]

    hidden_states = jax.random.normal(k_hidden, (B, S, HIDDEN), jnp.float32)

    # position ids for the new tokens (they come after P cached tokens)
    position_ids = jnp.broadcast_to(
        jnp.arange(P, P + S, dtype=jnp.int32)[None, :], (B, S)
    )

    # additive causal mask over (new queries) x (past + new keys)
    q_pos = P + jnp.arange(S)
    k_pos = jnp.arange(T)
    allowed = k_pos[None, :] <= q_pos[:, None]
    attention_mask = jnp.broadcast_to(
        jnp.where(allowed, 0.0, -1e9).astype(jnp.float32)[None, None], (B, 1, S, T)
    )

    # 16 past key/value tensors (8 layers x (k, v))
    kv_keys = jax.random.split(k_kv, 16)
    pkvs = [
        jax.random.normal(kk, (B, N_HEADS, P, HEAD_DIM), jnp.float32)
        for kk in kv_keys
    ]

    forward = jax.jit(make_forward(layers_params))
    outputs = forward(hidden_states, attention_mask, position_ids, *pkvs)
    outputs = jax.block_until_ready(outputs)

    assert len(outputs) == 17
    assert outputs[0].shape == (B, S, HIDDEN)
    for o in outputs[1:]:
        assert o.shape == (B, N_HEADS, T, HEAD_DIM)
    assert all(bool(jnp.all(jnp.isfinite(o))) for o in outputs)

    print("KERNEL_OK")
</pallas_src>

<mosaic_0001>
module attributes {stable_mosaic.version = 11 : i64} {
  func.func @_stack_kernel(%arg0: i32, %arg1: memref<1x8x32xf32, #tpu.memory_space<vmem>>, %arg2: memref<1x4x8x16xf32, #tpu.memory_space<vmem>>, %arg3: memref<1x8x32xf32, #tpu.memory_space<vmem>>, %arg4: memref<1x8x32xf32, #tpu.memory_space<vmem>>, %arg5: memref<8x1x32xf32, #tpu.memory_space<vmem>>, %arg6: memref<8x1x32xf32, #tpu.memory_space<vmem>>, %arg7: memref<8x32x160xf32, #tpu.memory_space<vmem>>, %arg8: memref<8x32x32xf32, #tpu.memory_space<vmem>>, %arg9: memref<8x32x128xf32, #tpu.memory_space<vmem>>, %arg10: memref<8x64x32xf32, #tpu.memory_space<vmem>>, %arg11: memref<1x8x2x4x8x8xf32, #tpu.memory_space<vmem>>, %arg12: memref<1x8x32xf32, #tpu.memory_space<vmem>>, %arg13: memref<1x8x2x8x32xf32, #tpu.memory_space<vmem>>) attributes {dimension_semantics = [#tpu.dimension_semantics<parallel>], iteration_bounds = array<i64: 2>, scalar_prefetch = 0 : i64, scratch_operands = 0 : i64, tpu.core_type = #tpu.core_type<tc>, window_params = [{transform_indices = @transform_0, window_bounds = array<i64: 1, 8, 32>}, {transform_indices = @transform_1, window_bounds = array<i64: 1, 4, 8, 16>}, {transform_indices = @transform_2, window_bounds = array<i64: 1, 8, 32>}, {transform_indices = @transform_3, window_bounds = array<i64: 1, 8, 32>}, {pipeline_mode = #tpu.pipeline_mode<synchronous>, transform_indices = @transform_4, window_bounds = array<i64: 8, 1, 32>}, {pipeline_mode = #tpu.pipeline_mode<synchronous>, transform_indices = @transform_5, window_bounds = array<i64: 8, 1, 32>}, {pipeline_mode = #tpu.pipeline_mode<synchronous>, transform_indices = @transform_6, window_bounds = array<i64: 8, 32, 160>}, {pipeline_mode = #tpu.pipeline_mode<synchronous>, transform_indices = @transform_7, window_bounds = array<i64: 8, 32, 32>}, {pipeline_mode = #tpu.pipeline_mode<synchronous>, transform_indices = @transform_8, window_bounds = array<i64: 8, 32, 128>}, {pipeline_mode = #tpu.pipeline_mode<synchronous>, transform_indices = @transform_9, window_bounds = array<i64: 8, 64, 32>}, {transform_indices = @transform_10, window_bounds = array<i64: 1, 8, 2, 4, 8, 8>}, {transform_indices = @transform_11, window_bounds = array<i64: 1, 8, 32>}, {transform_indices = @transform_12, window_bounds = array<i64: 1, 8, 2, 8, 32>}]} {
    %c0 = arith.constant 0 : index
    %c0_0 = arith.constant 0 : index
    %c0_1 = arith.constant 0 : index
    %0 = vector.load %arg1[%c0, %c0_0, %c0_1] : memref<1x8x32xf32, #tpu.memory_space<vmem>>, vector<1x8x32xf32>
    %1 = vector.shape_cast %0 : vector<1x8x32xf32> to vector<8x32xf32>
    %c0_2 = arith.constant 0 : index
    %c0_3 = arith.constant 0 : index
    %c0_4 = arith.constant 0 : index
    %2 = vector.load %arg3[%c0_2, %c0_3, %c0_4] : memref<1x8x32xf32, #tpu.memory_space<vmem>>, vector<1x8x32xf32>
    %3 = vector.shape_cast %2 : vector<1x8x32xf32> to vector<8x32xf32>
    %c0_5 = arith.constant 0 : index
    %c0_6 = arith.constant 0 : index
    %c0_7 = arith.constant 0 : index
    %4 = vector.load %arg4[%c0_5, %c0_6, %c0_7] : memref<1x8x32xf32, #tpu.memory_space<vmem>>, vector<1x8x32xf32>
    %5 = vector.shape_cast %4 : vector<1x8x32xf32> to vector<8x32xf32>
    %c0_8 = arith.constant 0 : index
    %c0_9 = arith.constant 0 : index
    %c0_10 = arith.constant 0 : index
    %c0_11 = arith.constant 0 : index
    %6 = vector.load %arg2[%c0_8, %c0_9, %c0_10, %c0_11] : memref<1x4x8x16xf32, #tpu.memory_space<vmem>>, vector<1x4x8x16xf32>
    %7 = vector.shape_cast %6 : vector<1x4x8x16xf32> to vector<4x8x16xf32>
    %8 = arith.mulf %1, %1 : vector<8x32xf32>
    %cst = arith.constant dense<0.000000e+00> : vector<8xf32>
    %9 = vector.multi_reduction <add>, %8, %cst [1] : vector<8x32xf32> to vector<8xf32>
    %10 = vector.shape_cast %9 : vector<8xf32> to vector<8x1xf32>
    %cst_12 = arith.constant 3.200000e+01 : f32
    %11 = vector.broadcast %cst_12 : f32 to vector<8x1xf32>
    %12 = arith.divf %10, %11 : vector<8x1xf32>
    %cst_13 = arith.constant 9.99999997E-7 : f32
    %13 = vector.broadcast %cst_13 : f32 to vector<8x1xf32>
    %14 = arith.addf %12, %13 : vector<8x1xf32>
    %15 = math.rsqrt %14 : vector<8x1xf32>
    %16 = vector.broadcast %15 : vector<8x1xf32> to vector<8x32xf32>
    %17 = arith.mulf %1, %16 : vector<8x32xf32>
    %c0_14 = arith.constant 0 : index
    %c0_15 = arith.constant 0 : index
    %c0_16 = arith.constant 0 : index
    %18 = vector.load %arg5[%c0_14, %c0_15, %c0_16] : memref<8x1x32xf32, #tpu.memory_space<vmem>>, vector<1x1x32xf32>
    %19 = vector.shape_cast %18 : vector<1x1x32xf32> to vector<1x32xf32>
    %20 = vector.broadcast %19 : vector<1x32xf32> to vector<8x32xf32>
    %21 = arith.mulf %17, %20 : vector<8x32xf32>
    %c0_17 = arith.constant 0 : index
    %c0_18 = arith.constant 0 : index
    %c0_19 = arith.constant 0 : index
    %22 = vector.load %arg7[%c0_17, %c0_18, %c0_19] : memref<8x32x160xf32, #tpu.memory_space<vmem>>, vector<1x32x160xf32>
    %23 = vector.shape_cast %22 : vector<1x32x160xf32> to vector<32x160xf32>
    %cst_20 = arith.constant dense<0.000000e+00> : vector<8x160xf32>
    %24 = tpu.matmul %21, %23, %cst_20 {dimension_numbers = #tpu.dot_dimension_numbers<[1], [0], [0], [1], [0, 0, 1, 1], [], []>} : vector<8x32xf32>, vector<32x160xf32>, vector<8x160xf32> -> vector<8x160xf32>
    %25 = vector.extract_strided_slice %24 {offsets = [0, 0], sizes = [8, 32], strides = [1, 1]} : vector<8x160xf32> to vector<8x32xf32>
    %26 = vector.extract_strided_slice %24 {offsets = [0, 32], sizes = [8, 32], strides = [1, 1]} : vector<8x160xf32> to vector<8x32xf32>
    %27 = vector.extract_strided_slice %24 {offsets = [0, 64], sizes = [8, 32], strides = [1, 1]} : vector<8x160xf32> to vector<8x32xf32>
    %28 = vector.extract_strided_slice %24 {offsets = [0, 96], sizes = [8, 32], strides = [1, 1]} : vector<8x160xf32> to vector<8x32xf32>
    %29 = vector.extract_strided_slice %24 {offsets = [0, 128], sizes = [8, 32], strides = [1, 1]} : vector<8x160xf32> to vector<8x32xf32>
    %30 = arith.mulf %25, %3 : vector<8x32xf32>
    %31 = arith.mulf %28, %5 : vector<8x32xf32>
    %32 = arith.addf %30, %31 : vector<8x32xf32>
    %33 = arith.mulf %26, %3 : vector<8x32xf32>
    %34 = arith.mulf %29, %5 : vector<8x32xf32>
    %35 = arith.addf %33, %34 : vector<8x32xf32>
    %c0_21 = arith.constant 0 : index
    %c0_22 = arith.constant 0 : index
    %c0_23 = arith.constant 0 : index
    %c0_24 = arith.constant 0 : index
    %c0_25 = arith.constant 0 : index
    %36 = vector.load %arg13[%c0_21, %c0_22, %c0_23, %c0_24, %c0_25] : memref<1x8x2x8x32xf32, #tpu.memory_space<vmem>>, vector<1x1x1x8x32xf32>
    %37 = vector.shape_cast %36 : vector<1x1x1x8x32xf32> to vector<8x32xf32>
    %38 = vector.shape_cast %35 : vector<8x32xf32> to vector<1x1x1x8x32xf32>
    tpu.vector_store %arg13[%c0_21, %c0_22, %c0_23, %c0_24, %c0_25], %38 {strides = array<i32>} : memref<1x8x2x8x32xf32, #tpu.memory_space<vmem>>, vector<1x1x1x8x32xf32>,
    %c0_26 = arith.constant 0 : index
    %c0_27 = arith.constant 0 : index
    %c1 = arith.constant 1 : index
    %c0_28 = arith.constant 0 : index
    %c0_29 = arith.constant 0 : index
    %39 = vector.load %arg13[%c0_26, %c0_27, %c1, %c0_28, %c0_29] : memref<1x8x2x8x32xf32, #tpu.memory_space<vmem>>, vector<1x1x1x8x32xf32>
    %40 = vector.shape_cast %39 : vector<1x1x1x8x32xf32> to vector<8x32xf32>
    %41 = vector.shape_cast %27 : vector<8x32xf32> to vector<1x1x1x8x32xf32>
    tpu.vector_store %arg13[%c0_26, %c0_27, %c1, %c0_28, %c0_29], %41 {strides = array<i32>} : memref<1x8x2x8x32xf32, #tpu.memory_space<vmem>>, vector<1x1x1x8x32xf32>,
    %42 = vector.extract_strided_slice %32 {offsets = [0, 0], sizes = [8, 8], strides = [1, 1]} : vector<8x32xf32> to vector<8x8xf32>
    %43 = vector.extract_strided_slice %32 {offsets = [0, 8], sizes = [8, 8], strides = [1, 1]} : vector<8x32xf32> to vector<8x8xf32>
    %44 = vector.extract_strided_slice %32 {offsets = [0, 16], sizes = [8, 8], strides = [1, 1]} : vector<8x32xf32> to vector<8x8xf32>
    %45 = vector.extract_strided_slice %32 {offsets = [0, 24], sizes = [8, 8], strides = [1, 1]} : vector<8x32xf32> to vector<8x8xf32>
    %46 = vector.shape_cast %42 : vector<8x8xf32> to vector<1x8x8xf32>
    %47 = vector.shape_cast %43 : vector<8x8xf32> to vector<1x8x8xf32>
    %48 = vector.shape_cast %44 : vector<8x8xf32> to vector<1x8x8xf32>
    %49 = vector.shape_cast %45 : vector<8x8xf32> to vector<1x8x8xf32>
    %50 = tpu.concatenate %46, %47, %48, %49 in 0 : vector<1x8x8xf32>, vector<1x8x8xf32>, vector<1x8x8xf32>, vector<1x8x8xf32> -> vector<4x8x8xf32>
    %51 = vector.extract_strided_slice %35 {offsets = [0, 0], sizes = [8, 8], strides = [1, 1]} : vector<8x32xf32> to vector<8x8xf32>
    %52 = vector.extract_strided_slice %35 {offsets = [0, 8], sizes = [8, 8], strides = [1, 1]} : vector<8x32xf32> to vector<8x8xf32>
    %53 = vector.extract_strided_slice %35 {offsets = [0, 16], sizes = [8, 8], strides = [1, 1]} : vector<8x32xf32> to vector<8x8xf32>
    %54 = vector.extract_strided_slice %35 {offsets = [0, 24], sizes = [8, 8], strides = [1, 1]} : vector<8x32xf32> to vector<8x8xf32>
    %55 = vector.shape_cast %51 : vector<8x8xf32> to vector<1x8x8xf32>
    %56 = vector.shape_cast %52 : vector<8x8xf32> to vector<1x8x8xf32>
    %57 = vector.shape_cast %53 : vector<8x8xf32> to vector<1x8x8xf32>
    %58 = vector.shape_cast %54 : vector<8x8xf32> to vector<1x8x8xf32>
    %59 = tpu.concatenate %55, %56, %57, %58 in 0 : vector<1x8x8xf32>, vector<1x8x8xf32>, vector<1x8x8xf32>, vector<1x8x8xf32> -> vector<4x8x8xf32>
    %60 = vector.extract_strided_slice %27 {offsets = [0, 0], sizes = [8, 8], strides = [1, 1]} : vector<8x32xf32> to vector<8x8xf32>
    %61 = vector.extract_strided_slice %27 {offsets = [0, 8], sizes = [8, 8], strides = [1, 1]} : vector<8x32xf32> to vector<8x8xf32>
    %62 = vector.extract_strided_slice %27 {offsets = [0, 16], sizes = [8, 8], strides = [1, 1]} : vector<8x32xf32> to vector<8x8xf32>
    %63 = vector.extract_strided_slice %27 {offsets = [0, 24], sizes = [8, 8], strides = [1, 1]} : vector<8x32xf32> to vector<8x8xf32>
    %64 = vector.shape_cast %60 : vector<8x8xf32> to vector<1x8x8xf32>
    %65 = vector.shape_cast %61 : vector<8x8xf32> to vector<1x8x8xf32>
    %66 = vector.shape_cast %62 : vector<8x8xf32> to vector<1x8x8xf32>
    %67 = vector.shape_cast %63 : vector<8x8xf32> to vector<1x8x8xf32>
    %68 = tpu.concatenate %64, %65, %66, %67 in 0 : vector<1x8x8xf32>, vector<1x8x8xf32>, vector<1x8x8xf32>, vector<1x8x8xf32> -> vector<4x8x8xf32>
    %c0_30 = arith.constant 0 : index
    %c0_31 = arith.constant 0 : index
    %c0_32 = arith.constant 0 : index
    %c0_33 = arith.constant 0 : index
    %c0_34 = arith.constant 0 : index
    %c0_35 = arith.constant 0 : index
    %69 = vector.load %arg11[%c0_30, %c0_31, %c0_32, %c0_33, %c0_34, %c0_35] : memref<1x8x2x4x8x8xf32, #tpu.memory_space<vmem>>, vector<1x1x1x4x8x8xf32>
    %70 = vector.shape_cast %69 : vector<1x1x1x4x8x8xf32> to vector<4x8x8xf32>
    %71 = tpu.concatenate %70, %59 in 1 : vector<4x8x8xf32>, vector<4x8x8xf32> -> vector<4x16x8xf32>
    %c0_36 = arith.constant 0 : index
    %c0_37 = arith.constant 0 : index
    %c1_38 = arith.constant 1 : index
    %c0_39 = arith.constant 0 : index
    %c0_40 = arith.constant 0 : index
    %c0_41 = arith.constant 0 : index
    %72 = vector.load %arg11[%c0_36, %c0_37, %c1_38, %c0_39, %c0_40, %c0_41] : memref<1x8x2x4x8x8xf32, #tpu.memory_space<vmem>>, vector<1x1x1x4x8x8xf32>
    %73 = vector.shape_cast %72 : vector<1x1x1x4x8x8xf32> to vector<4x8x8xf32>
    %74 = tpu.concatenate %73, %68 in 1 : vector<4x8x8xf32>, vector<4x8x8xf32> -> vector<4x16x8xf32>
    %cst_42 = arith.constant dense<0.000000e+00> : vector<4x8x16xf32>
    %75 = tpu.matmul %50, %71, %cst_42 {dimension_numbers = #tpu.dot_dimension_numbers<[2], [2], [1], [1], [0, 0, 0, 1, 1, 1], [0], [0]>} : vector<4x8x8xf32>, vector<4x16x8xf32>, vector<4x8x16xf32> -> vector<4x8x16xf32>
    %cst_43 = arith.constant 0.353553385 : f32
    %76 = vector.broadcast %cst_43 : f32 to vector<4x8x16xf32>
    %77 = arith.mulf %75, %76 : vector<4x8x16xf32>
    %78 = arith.addf %77, %7 : vector<4x8x16xf32>
    %cst_44 = arith.constant dense<0xFF800000> : vector<4x8xf32>
    %79 = vector.multi_reduction <maximumf>, %78, %cst_44 [2] : vector<4x8x16xf32> to vector<4x8xf32>
    %80 = vector.shape_cast %79 : vector<4x8xf32> to vector<4x8x1xf32>
    %81 = vector.broadcast %80 : vector<4x8x1xf32> to vector<4x8x16xf32>
    %82 = arith.subf %78, %81 : vector<4x8x16xf32>
    %83 = math.exp %82 : vector<4x8x16xf32>
    %cst_45 = arith.constant dense<0.000000e+00> : vector<4x8xf32>
    %84 = vector.multi_reduction <add>, %83, %cst_45 [2] : vector<4x8x16xf32> to vector<4x8xf32>
    %85 = vector.shape_cast %84 : vector<4x8xf32> to vector<4x8x1xf32>
    %86 = tpu.reciprocal %85 {approx = true} : vector<4x8x1xf32> -> vector<4x8x1xf32>
    %87 = vector.broadcast %86 : vector<4x8x1xf32> to vector<4x8x16xf32>
    %88 = arith.mulf %83, %87 : vector<4x8x16xf32>
    %cst_46 = arith.constant dense<0.000000e+00> : vector<4x8x8xf32>
    %89 = tpu.matmul %88, %74, %cst_46 {dimension_numbers = #tpu.dot_dimension_numbers<[2], [1], [1], [2], [0, 0, 0, 1, 1, 2], [0], [0]>} : vector<4x8x16xf32>, vector<4x16x8xf32>, vector<4x8x8xf32> -> vector<4x8x8xf32>
    %90 = vector.extract_strided_slice %89 {offsets = [0, 0, 0], sizes = [1, 8, 8], strides = [1, 1, 1]} : vector<4x8x8xf32> to vector<1x8x8xf32>
    %91 = vector.shape_cast %90 : vector<1x8x8xf32> to vector<8x8xf32>
    %92 = vector.extract_strided_slice %89 {offsets = [1, 0, 0], sizes = [1, 8, 8], strides = [1, 1, 1]} : vector<4x8x8xf32> to vector<1x8x8xf32>
    %93 = vector.shape_cast %92 : vector<1x8x8xf32> to vector<8x8xf32>
    %94 = vector.extract_strided_slice %89 {offsets = [2, 0, 0], sizes = [1, 8, 8], strides = [1, 1, 1]} : vector<4x8x8xf32> to vector<1x8x8xf32>
    %95 = vector.shape_cast %94 : vector<1x8x8xf32> to vector<8x8xf32>
    %96 = vector.extract_strided_slice %89 {offsets = [3, 0, 0], sizes = [1, 8, 8], strides = [1, 1, 1]} : vector<4x8x8xf32> to vector<1x8x8xf32>
    %97 = vector.shape_cast %96 : vector<1x8x8xf32> to vector<8x8xf32>
    %98 = tpu.concatenate %91, %93, %95, %97 in 1 : vector<8x8xf32>, vector<8x8xf32>, vector<8x8xf32>, vector<8x8xf32> -> vector<8x32xf32>
    %c0_47 = arith.constant 0 : index
    %c0_48 = arith.constant 0 : index
    %c0_49 = arith.constant 0 : index
    %99 = vector.load %arg8[%c0_47, %c0_48, %c0_49] : memref<8x32x32xf32, #tpu.memory_space<vmem>>, vector<1x32x32xf32>
    %100 = vector.shape_cast %99 : vector<1x32x32xf32> to vector<32x32xf32>
    %cst_50 = arith.constant dense<0.000000e+00> : vector<8x32xf32>
    %101 = tpu.matmul %98, %100, %cst_50 {dimension_numbers = #tpu.dot_dimension_numbers<[1], [0], [0], [1], [0, 0, 1, 1], [], []>} : vector<8x32xf32>, vector<32x32xf32>, vector<8x32xf32> -> vector<8x32xf32>
    %102 = arith.addf %1, %101 : vector<8x32xf32>
    %103 = arith.mulf %102, %102 : vector<8x32xf32>
    %cst_51 = arith.constant dense<0.000000e+00> : vector<8xf32>
    %104 = vector.multi_reduction <add>, %103, %cst_51 [1] : vector<8x32xf32> to vector<8xf32>
    %105 = vector.shape_cast %104 : vector<8xf32> to vector<8x1xf32>
    %cst_52 = arith.constant 3.200000e+01 : f32
    %106 = vector.broadcast %cst_52 : f32 to vector<8x1xf32>
    %107 = arith.divf %105, %106 : vector<8x1xf32>
    %cst_53 = arith.constant 9.99999997E-7 : f32
    %108 = vector.broadcast %cst_53 : f32 to vector<8x1xf32>
    %109 = arith.addf %107, %108 : vector<8x1xf32>
    %110 = math.rsqrt %109 : vector<8x1xf32>
    %111 = vector.broadcast %110 : vector<8x1xf32> to vector<8x32xf32>
    %112 = arith.mulf %102, %111 : vector<8x32xf32>
    %c0_54 = arith.constant 0 : index
    %c0_55 = arith.constant 0 : index
    %c0_56 = arith.constant 0 : index
    %113 = vector.load %arg6[%c0_54, %c0_55, %c0_56] : memref<8x1x32xf32, #tpu.memory_space<vmem>>, vector<1x1x32xf32>
    %114 = vector.shape_cast %113 : vector<1x1x32xf32> to vector<1x32xf32>
    %115 = vector.broadcast %114 : vector<1x32xf32> to vector<8x32xf32>
    %116 = arith.mulf %112, %115 : vector<8x32xf32>
    %c0_57 = arith.constant 0 : index
    %c0_58 = arith.constant 0 : index
    %c0_59 = arith.constant 0 : index
    %117 = vector.load %arg9[%c0_57, %c0_58, %c0_59] : memref<8x32x128xf32, #tpu.memory_space<vmem>>, vector<1x32x128xf32>
    %118 = vector.shape_cast %117 : vector<1x32x128xf32> to vector<32x128xf32>
    %cst_60 = arith.constant dense<0.000000e+00> : vector<8x128xf32>
    %119 = tpu.matmul %116, %118, %cst_60 {dimension_numbers = #tpu.dot_dimension_numbers<[1], [0], [0], [1], [0, 0, 1, 1], [], []>} : vector<8x32xf32>, vector<32x128xf32>, vector<8x128xf32> -> vector<8x128xf32>
    %120 = vector.extract_strided_slice %119 {offsets = [0, 0], sizes = [8, 64], strides = [1, 1]} : vector<8x128xf32> to vector<8x64xf32>
    %121 = vector.extract_strided_slice %119 {offsets = [0, 64], sizes = [8, 64], strides = [1, 1]} : vector<8x128xf32> to vector<8x64xf32>
    %122 = arith.negf %120 : vector<8x64xf32>
    %123 = math.exp %122 : vector<8x64xf32>
    %cst_61 = arith.constant 1.000000e+00 : f32
    %124 = vector.broadcast %cst_61 : f32 to vector<8x64xf32>
    %125 = arith.addf %124, %123 : vector<8x64xf32>
    %126 = arith.divf %124, %125 : vector<8x64xf32>
    %127 = arith.mulf %120, %126 : vector<8x64xf32>
    %128 = arith.mulf %127, %121 : vector<8x64xf32>
    %c0_62 = arith.constant 0 : index
    %c0_63 = arith.constant 0 : index
    %c0_64 = arith.constant 0 : index
    %129 = vector.load %arg10[%c0_62, %c0_63, %c0_64] : memref<8x64x32xf32, #tpu.memory_space<vmem>>, vector<1x64x32xf32>
    %130 = vector.shape_cast %129 : vector<1x64x32xf32> to vector<64x32xf32>
    %cst_65 = arith.constant dense<0.000000e+00> : vector<8x32xf32>
    %131 = tpu.matmul %128, %130, %cst_65 {dimension_numbers = #tpu.dot_dimension_numbers<[1], [0], [0], [1], [0, 0, 1, 1], [], []>} : vector<8x64xf32>, vector<64x32xf32>, vector<8x32xf32> -> vector<8x32xf32>
    %132 = arith.addf %102, %131 : vector<8x32xf32>
    %133 = arith.mulf %132, %132 : vector<8x32xf32>
    %cst_66 = arith.constant dense<0.000000e+00> : vector<8xf32>
    %134 = vector.multi_reduction <add>, %133, %cst_66 [1] : vector<8x32xf32> to vector<8xf32>
    %135 = vector.shape_cast %134 : vector<8xf32> to vector<8x1xf32>
    %cst_67 = arith.constant 3.200000e+01 : f32
    %136 = vector.broadcast %cst_67 : f32 to vector<8x1xf32>
    %137 = arith.divf %135, %136 : vector<8x1xf32>
    %cst_68 = arith.constant 9.99999997E-7 : f32
    %138 = vector.broadcast %cst_68 : f32 to vector<8x1xf32>
    %139 = arith.addf %137, %138 : vector<8x1xf32>
    %140 = math.rsqrt %139 : vector<8x1xf32>
    %141 = vector.broadcast %140 : vector<8x1xf32> to vector<8x32xf32>
    %142 = arith.mulf %132, %141 : vector<8x32xf32>
    %c1_69 = arith.constant 1 : index
    %c0_70 = arith.constant 0 : index
    %c0_71 = arith.constant 0 : index
    %143 = vector.load %arg5[%c1_69, %c0_70, %c0_71] : memref<8x1x32xf32, #tpu.memory_space<vmem>>, vector<1x1x32xf32>
    %144 = vector.shape_cast %143 : vector<1x1x32xf32> to vector<1x32xf32>
    %145 = vector.broadcast %144 : vector<1x32xf32> to vector<8x32xf32>
    %146 = arith.mulf %142, %145 : vector<8x32xf32>
    %c1_72 = arith.constant 1 : index
    %c0_73 = arith.constant 0 : index
    %c0_74 = arith.constant 0 : index
    %147 = vector.load %arg7[%c1_72, %c0_73, %c0_74] : memref<8x32x160xf32, #tpu.memory_space<vmem>>, vector<1x32x160xf32>
    %148 = vector.shape_cast %147 : vector<1x32x160xf32> to vector<32x160xf32>
    %cst_75 = arith.constant dense<0.000000e+00> : vector<8x160xf32>
    %149 = tpu.matmul %146, %148, %cst_75 {dimension_numbers = #tpu.dot_dimension_numbers<[1], [0], [0], [1], [0, 0, 1, 1], [], []>} : vector<8x32xf32>, vector<32x160xf32>, vector<8x160xf32> -> vector<8x160xf32>
    %150 = vector.extract_strided_slice %149 {offsets = [0, 0], sizes = [8, 32], strides = [1, 1]} : vector<8x160xf32> to vector<8x32xf32>
    %151 = vector.extract_strided_slice %149 {offsets = [0, 32], sizes = [8, 32], strides = [1, 1]} : vector<8x160xf32> to vector<8x32xf32>
    %152 = vector.extract_strided_slice %149 {offsets = [0, 64], sizes = [8, 32], strides = [1, 1]} : vector<8x160xf32> to vector<8x32xf32>
    %153 = vector.extract_strided_slice %149 {offsets = [0, 96], sizes = [8, 32], strides = [1, 1]} : vector<8x160xf32> to vector<8x32xf32>
    %154 = vector.extract_strided_slice %149 {offsets = [0, 128], sizes = [8, 32], strides = [1, 1]} : vector<8x160xf32> to vector<8x32xf32>
    %155 = arith.mulf %150, %3 : vector<8x32xf32>
    %156 = arith.mulf %153, %5 : vector<8x32xf32>
    %157 = arith.addf %155, %156 : vector<8x32xf32>
    %158 = arith.mulf %151, %3 : vector<8x32xf32>
    %159 = arith.mulf %154, %5 : vector<8x32xf32>
    %160 = arith.addf %158, %159 : vector<8x32xf32>
    %c0_76 = arith.constant 0 : index
    %c1_77 = arith.constant 1 : index
    %c0_78 = arith.constant 0 : index
    %c0_79 = arith.constant 0 : index
    %c0_80 = arith.constant 0 : index
    %161 = vector.load %arg13[%c0_76, %c1_77, %c0_78, %c0_79, %c0_80] : memref<1x8x2x8x32xf32, #tpu.memory_space<vmem>>, vector<1x1x1x8x32xf32>
    %162 = vector.shape_cast %161 : vector<1x1x1x8x32xf32> to vector<8x32xf32>
    %163 = vector.shape_cast %160 : vector<8x32xf32> to vector<1x1x1x8x32xf32>
    tpu.vector_store %arg13[%c0_76, %c1_77, %c0_78, %c0_79, %c0_80], %163 {strides = array<i32>} : memref<1x8x2x8x32xf32, #tpu.memory_space<vmem>>, vector<1x1x1x8x32xf32>,
    %c0_81 = arith.constant 0 : index
    %c1_82 = arith.constant 1 : index
    %c1_83 = arith.constant 1 : index
    %c0_84 = arith.constant 0 : index
    %c0_85 = arith.constant 0 : index
    %164 = vector.load %arg13[%c0_81, %c1_82, %c1_83, %c0_84, %c0_85] : memref<1x8x2x8x32xf32, #tpu.memory_space<vmem>>, vector<1x1x1x8x32xf32>
    %165 = vector.shape_cast %164 : vector<1x1x1x8x32xf32> to vector<8x32xf32>
    %166 = vector.shape_cast %152 : vector<8x32xf32> to vector<1x1x1x8x32xf32>
    tpu.vector_store %arg13[%c0_81, %c1_82, %c1_83, %c0_84, %c0_85], %166 {strides = array<i32>} : memref<1x8x2x8x32xf32, #tpu.memory_space<vmem>>, vector<1x1x1x8x32xf32>,
    %167 = vector.extract_strided_slice %157 {offsets = [0, 0], sizes = [8, 8], strides = [1, 1]} : vector<8x32xf32> to vector<8x8xf32>
    %168 = vector.extract_strided_slice %157 {offsets = [0, 8], sizes = [8, 8], strides = [1, 1]} : vector<8x32xf32> to vector<8x8xf32>
    %169 = vector.extract_strided_slice %157 {offsets = [0, 16], sizes = [8, 8], strides = [1, 1]} : vector<8x32xf32> to vector<8x8xf32>
    %170 = vector.extract_strided_slice %157 {offsets = [0, 24], sizes = [8, 8], strides = [1, 1]} : vector<8x32xf32> to vector<8x8xf32>
    %171 = vector.shape_cast %167 : vector<8x8xf32> to vector<1x8x8xf32>
    %172 = vector.shape_cast %168 : vector<8x8xf32> to vector<1x8x8xf32>
    %173 = vector.shape_cast %169 : vector<8x8xf32> to vector<1x8x8xf32>
    %174 = vector.shape_cast %170 : vector<8x8xf32> to vector<1x8x8xf32>
    %175 = tpu.concatenate %171, %172, %173, %174 in 0 : vector<1x8x8xf32>, vector<1x8x8xf32>, vector<1x8x8xf32>, vector<1x8x8xf32> -> vector<4x8x8xf32>
    %176 = vector.extract_strided_slice %160 {offsets = [0, 0], sizes = [8, 8], strides = [1, 1]} : vector<8x32xf32> to vector<8x8xf32>
    %177 = vector.extract_strided_slice %160 {offsets = [0, 8], sizes = [8, 8], strides = [1, 1]} : vector<8x32xf32> to vector<8x8xf32>
    %178 = vector.extract_strided_slice %160 {offsets = [0, 16], sizes = [8, 8], strides = [1, 1]} : vector<8x32xf32> to vector<8x8xf32>
    %179 = vector.extract_strided_slice %160 {offsets = [0, 24], sizes = [8, 8], strides = [1, 1]} : vector<8x32xf32> to vector<8x8xf32>
    %180 = vector.shape_cast %176 : vector<8x8xf32> to vector<1x8x8xf32>
    %181 = vector.shape_cast %177 : vector<8x8xf32> to vector<1x8x8xf32>
    %182 = vector.shape_cast %178 : vector<8x8xf32> to vector<1x8x8xf32>
    %183 = vector.shape_cast %179 : vector<8x8xf32> to vector<1x8x8xf32>
    %184 = tpu.concatenate %180, %181, %182, %183 in 0 : vector<1x8x8xf32>, vector<1x8x8xf32>, vector<1x8x8xf32>, vector<1x8x8xf32> -> vector<4x8x8xf32>
    %185 = vector.extract_strided_slice %152 {offsets = [0, 0], sizes = [8, 8], strides = [1, 1]} : vector<8x32xf32> to vector<8x8xf32>
    %186 = vector.extract_strided_slice %152 {offsets = [0, 8], sizes = [8, 8], strides = [1, 1]} : vector<8x32xf32> to vector<8x8xf32>
    %187 = vector.extract_strided_slice %152 {offsets = [0, 16], sizes = [8, 8], strides = [1, 1]} : vector<8x32xf32> to vector<8x8xf32>
    %188 = vector.extract_strided_slice %152 {offsets = [0, 24], sizes = [8, 8], strides = [1, 1]} : vector<8x32xf32> to vector<8x8xf32>
    %189 = vector.shape_cast %185 : vector<8x8xf32> to vector<1x8x8xf32>
    %190 = vector.shape_cast %186 : vector<8x8xf32> to vector<1x8x8xf32>
    %191 = vector.shape_cast %187 : vector<8x8xf32> to vector<1x8x8xf32>
    %192 = vector.shape_cast %188 : vector<8x8xf32> to vector<1x8x8xf32>
    %193 = tpu.concatenate %189, %190, %191, %192 in 0 : vector<1x8x8xf32>, vector<1x8x8xf32>, vector<1x8x8xf32>, vector<1x8x8xf32> -> vector<4x8x8xf32>
    %c0_86 = arith.constant 0 : index
    %c1_87 = arith.constant 1 : index
    %c0_88 = arith.constant 0 : index
    %c0_89 = arith.constant 0 : index
    %c0_90 = arith.constant 0 : index
    %c0_91 = arith.constant 0 : index
    %194 = vector.load %arg11[%c0_86, %c1_87, %c0_88, %c0_89, %c0_90, %c0_91] : memref<1x8x2x4x8x8xf32, #tpu.memory_space<vmem>>, vector<1x1x1x4x8x8xf32>
    %195 = vector.shape_cast %194 : vector<1x1x1x4x8x8xf32> to vector<4x8x8xf32>
    %196 = tpu.concatenate %195, %184 in 1 : vector<4x8x8xf32>, vector<4x8x8xf32> -> vector<4x16x8xf32>
    %c0_92 = arith.constant 0 : index
    %c1_93 = arith.constant 1 : index
    %c1_94 = arith.constant 1 : index
    %c0_95 = arith.constant 0 : index
    %c0_96 = arith.constant 0 : index
    %c0_97 = arith.constant 0 : index
    %197 = vector.load %arg11[%c0_92, %c1_93, %c1_94, %c0_95, %c0_96, %c0_97] : memref<1x8x2x4x8x8xf32, #tpu.memory_space<vmem>>, vector<1x1x1x4x8x8xf32>
    %198 = vector.shape_cast %197 : vector<1x1x1x4x8x8xf32> to vector<4x8x8xf32>
    %199 = tpu.concatenate %198, %193 in 1 : vector<4x8x8xf32>, vector<4x8x8xf32> -> vector<4x16x8xf32>
    %cst_98 = arith.constant dense<0.000000e+00> : vector<4x8x16xf32>
    %200 = tpu.matmul %175, %196, %cst_98 {dimension_numbers = #tpu.dot_dimension_numbers<[2], [2], [1], [1], [0, 0, 0, 1, 1, 1], [0], [0]>} : vector<4x8x8xf32>, vector<4x16x8xf32>, vector<4x8x16xf32> -> vector<4x8x16xf32>
    %cst_99 = arith.constant 0.353553385 : f32
    %201 = vector.broadcast %cst_99 : f32 to vector<4x8x16xf32>
    %202 = arith.mulf %200, %201 : vector<4x8x16xf32>
    %203 = arith.addf %202, %7 : vector<4x8x16xf32>
    %cst_100 = arith.constant dense<0xFF800000> : vector<4x8xf32>
    %204 = vector.multi_reduction <maximumf>, %203, %cst_100 [2] : vector<4x8x16xf32> to vector<4x8xf32>
    %205 = vector.shape_cast %204 : vector<4x8xf32> to vector<4x8x1xf32>
    %206 = vector.broadcast %205 : vector<4x8x1xf32> to vector<4x8x16xf32>
    %207 = arith.subf %203, %206 : vector<4x8x16xf32>
    %208 = math.exp %207 : vector<4x8x16xf32>
    %cst_101 = arith.constant dense<0.000000e+00> : vector<4x8xf32>
    %209 = vector.multi_reduction <add>, %208, %cst_101 [2] : vector<4x8x16xf32> to vector<4x8xf32>
    %210 = vector.shape_cast %209 : vector<4x8xf32> to vector<4x8x1xf32>
    %211 = tpu.reciprocal %210 {approx = true} : vector<4x8x1xf32> -> vector<4x8x1xf32>
    %212 = vector.broadcast %211 : vector<4x8x1xf32> to vector<4x8x16xf32>
    %213 = arith.mulf %208, %212 : vector<4x8x16xf32>
    %cst_102 = arith.constant dense<0.000000e+00> : vector<4x8x8xf32>
    %214 = tpu.matmul %213, %199, %cst_102 {dimension_numbers = #tpu.dot_dimension_numbers<[2], [1], [1], [2], [0, 0, 0, 1, 1, 2], [0], [0]>} : vector<4x8x16xf32>, vector<4x16x8xf32>, vector<4x8x8xf32> -> vector<4x8x8xf32>
    %215 = vector.extract_strided_slice %214 {offsets = [0, 0, 0], sizes = [1, 8, 8], strides = [1, 1, 1]} : vector<4x8x8xf32> to vector<1x8x8xf32>
    %216 = vector.shape_cast %215 : vector<1x8x8xf32> to vector<8x8xf32>
    %217 = vector.extract_strided_slice %214 {offsets = [1, 0, 0], sizes = [1, 8, 8], strides = [1, 1, 1]} : vector<4x8x8xf32> to vector<1x8x8xf32>
    %218 = vector.shape_cast %217 : vector<1x8x8xf32> to vector<8x8xf32>
    %219 = vector.extract_strided_slice %214 {offsets = [2, 0, 0], sizes = [1, 8, 8], strides = [1, 1, 1]} : vector<4x8x8xf32> to vector<1x8x8xf32>
    %220 = vector.shape_cast %219 : vector<1x8x8xf32> to vector<8x8xf32>
    %221 = vector.extract_strided_slice %214 {offsets = [3, 0, 0], sizes = [1, 8, 8], strides = [1, 1, 1]} : vector<4x8x8xf32> to vector<1x8x8xf32>
    %222 = vector.shape_cast %221 : vector<1x8x8xf32> to vector<8x8xf32>
    %223 = tpu.concatenate %216, %218, %220, %222 in 1 : vector<8x8xf32>, vector<8x8xf32>, vector<8x8xf32>, vector<8x8xf32> -> vector<8x32xf32>
    %c1_103 = arith.constant 1 : index
    %c0_104 = arith.constant 0 : index
    %c0_105 = arith.constant 0 : index
    %224 = vector.load %arg8[%c1_103, %c0_104, %c0_105] : memref<8x32x32xf32, #tpu.memory_space<vmem>>, vector<1x32x32xf32>
    %225 = vector.shape_cast %224 : vector<1x32x32xf32> to vector<32x32xf32>
    %cst_106 = arith.constant dense<0.000000e+00> : vector<8x32xf32>
    %226 = tpu.matmul %223, %225, %cst_106 {dimension_numbers = #tpu.dot_dimension_numbers<[1], [0], [0], [1], [0, 0, 1, 1], [], []>} : vector<8x32xf32>, vector<32x32xf32>, vector<8x32xf32> -> vector<8x32xf32>
    %227 = arith.addf %132, %226 : vector<8x32xf32>
    %228 = arith.mulf %227, %227 : vector<8x32xf32>
    %cst_107 = arith.constant dense<0.000000e+00> : vector<8xf32>
    %229 = vector.multi_reduction <add>, %228, %cst_107 [1] : vector<8x32xf32> to vector<8xf32>
    %230 = vector.shape_cast %229 : vector<8xf32> to vector<8x1xf32>
    %cst_108 = arith.constant 3.200000e+01 : f32
    %231 = vector.broadcast %cst_108 : f32 to vector<8x1xf32>
    %232 = arith.divf %230, %231 : vector<8x1xf32>
    %cst_109 = arith.constant 9.99999997E-7 : f32
    %233 = vector.broadcast %cst_109 : f32 to vector<8x1xf32>
    %234 = arith.addf %232, %233 : vector<8x1xf32>
    %235 = math.rsqrt %234 : vector<8x1xf32>
    %236 = vector.broadcast %235 : vector<8x1xf32> to vector<8x32xf32>
    %237 = arith.mulf %227, %236 : vector<8x32xf32>
    %c1_110 = arith.constant 1 : index
    %c0_111 = arith.constant 0 : index
    %c0_112 = arith.constant 0 : index
    %238 = vector.load %arg6[%c1_110, %c0_111, %c0_112] : memref<8x1x32xf32, #tpu.memory_space<vmem>>, vector<1x1x32xf32>
    %239 = vector.shape_cast %238 : vector<1x1x32xf32> to vector<1x32xf32>
    %240 = vector.broadcast %239 : vector<1x32xf32> to vector<8x32xf32>
    %241 = arith.mulf %237, %240 : vector<8x32xf32>
    %c1_113 = arith.constant 1 : index
    %c0_114 = arith.constant 0 : index
    %c0_115 = arith.constant 0 : index
    %242 = vector.load %arg9[%c1_113, %c0_114, %c0_115] : memref<8x32x128xf32, #tpu.memory_space<vmem>>, vector<1x32x128xf32>
    %243 = vector.shape_cast %242 : vector<1x32x128xf32> to vector<32x128xf32>
    %cst_116 = arith.constant dense<0.000000e+00> : vector<8x128xf32>
    %244 = tpu.matmul %241, %243, %cst_116 {dimension_numbers = #tpu.dot_dimension_numbers<[1], [0], [0], [1], [0, 0, 1, 1], [], []>} : vector<8x32xf32>, vector<32x128xf32>, vector<8x128xf32> -> vector<8x128xf32>
    %245 = vector.extract_strided_slice %244 {offsets = [0, 0], sizes = [8, 64], strides = [1, 1]} : vector<8x128xf32> to vector<8x64xf32>
    %246 = vector.extract_strided_slice %244 {offsets = [0, 64], sizes = [8, 64], strides = [1, 1]} : vector<8x128xf32> to vector<8x64xf32>
    %247 = arith.negf %245 : vector<8x64xf32>
    %248 = math.exp %247 : vector<8x64xf32>
    %cst_117 = arith.constant 1.000000e+00 : f32
    %249 = vector.broadcast %cst_117 : f32 to vector<8x64xf32>
    %250 = arith.addf %249, %248 : vector<8x64xf32>
    %251 = arith.divf %249, %250 : vector<8x64xf32>
    %252 = arith.mulf %245, %251 : vector<8x64xf32>
    %253 = arith.mulf %252, %246 : vector<8x64xf32>
    %c1_118 = arith.constant 1 : index
    %c0_119 = arith.constant 0 : index
    %c0_120 = arith.constant 0 : index
    %254 = vector.load %arg10[%c1_118, %c0_119, %c0_120] : memref<8x64x32xf32, #tpu.memory_space<vmem>>, vector<1x64x32xf32>
    %255 = vector.shape_cast %254 : vector<1x64x32xf32> to vector<64x32xf32>
    %cst_121 = arith.constant dense<0.000000e+00> : vector<8x32xf32>
    %256 = tpu.matmul %253, %255, %cst_121 {dimension_numbers = #tpu.dot_dimension_numbers<[1], [0], [0], [1], [0, 0, 1, 1], [], []>} : vector<8x64xf32>, vector<64x32xf32>, vector<8x32xf32> -> vector<8x32xf32>
    %257 = arith.addf %227, %256 : vector<8x32xf32>
    %258 = arith.mulf %257, %257 : vector<8x32xf32>
    %cst_122 = arith.constant dense<0.000000e+00> : vector<8xf32>
    %259 = vector.multi_reduction <add>, %258, %cst_122 [1] : vector<8x32xf32> to vector<8xf32>
    %260 = vector.shape_cast %259 : vector<8xf32> to vector<8x1xf32>
    %cst_123 = arith.constant 3.200000e+01 : f32
    %261 = vector.broadcast %cst_123 : f32 to vector<8x1xf32>
    %262 = arith.divf %260, %261 : vector<8x1xf32>
    %cst_124 = arith.constant 9.99999997E-7 : f32
    %263 = vector.broadcast %cst_124 : f32 to vector<8x1xf32>
    %264 = arith.addf %262, %263 : vector<8x1xf32>
    %265 = math.rsqrt %264 : vector<8x1xf32>
    %266 = vector.broadcast %265 : vector<8x1xf32> to vector<8x32xf32>
    %267 = arith.mulf %257, %266 : vector<8x32xf32>
    %c2 = arith.constant 2 : index
    %c0_125 = arith.constant 0 : index
    %c0_126 = arith.constant 0 : index
    %268 = vector.load %arg5[%c2, %c0_125, %c0_126] : memref<8x1x32xf32, #tpu.memory_space<vmem>>, vector<1x1x32xf32>
    %269 = vector.shape_cast %268 : vector<1x1x32xf32> to vector<1x32xf32>
    %270 = vector.broadcast %269 : vector<1x32xf32> to vector<8x32xf32>
    %271 = arith.mulf %267, %270 : vector<8x32xf32>
    %c2_127 = arith.constant 2 : index
    %c0_128 = arith.constant 0 : index
    %c0_129 = arith.constant 0 : index
    %272 = vector.load %arg7[%c2_127, %c0_128, %c0_129] : memref<8x32x160xf32, #tpu.memory_space<vmem>>, vector<1x32x160xf32>
    %273 = vector.shape_cast %272 : vector<1x32x160xf32> to vector<32x160xf32>
    %cst_130 = arith.constant dense<0.000000e+00> : vector<8x160xf32>
    %274 = tpu.matmul %271, %273, %cst_130 {dimension_numbers = #tpu.dot_dimension_numbers<[1], [0], [0], [1], [0, 0, 1, 1], [], []>} : vector<8x32xf32>, vector<32x160xf32>, vector<8x160xf32> -> vector<8x160xf32>
    %275 = vector.extract_strided_slice %274 {offsets = [0, 0], sizes = [8, 32], strides = [1, 1]} : vector<8x160xf32> to vector<8x32xf32>
    %276 = vector.extract_strided_slice %274 {offsets = [0, 32], sizes = [8, 32], strides = [1, 1]} : vector<8x160xf32> to vector<8x32xf32>
    %277 = vector.extract_strided_slice %274 {offsets = [0, 64], sizes = [8, 32], strides = [1, 1]} : vector<8x160xf32> to vector<8x32xf32>
    %278 = vector.extract_strided_slice %274 {offsets = [0, 96], sizes = [8, 32], strides = [1, 1]} : vector<8x160xf32> to vector<8x32xf32>
    %279 = vector.extract_strided_slice %274 {offsets = [0, 128], sizes = [8, 32], strides = [1, 1]} : vector<8x160xf32> to vector<8x32xf32>
    %280 = arith.mulf %275, %3 : vector<8x32xf32>
    %281 = arith.mulf %278, %5 : vector<8x32xf32>
    %282 = arith.addf %280, %281 : vector<8x32xf32>
    %283 = arith.mulf %276, %3 : vector<8x32xf32>
    %284 = arith.mulf %279, %5 : vector<8x32xf32>
    %285 = arith.addf %283, %284 : vector<8x32xf32>
    %c0_131 = arith.constant 0 : index
    %c2_132 = arith.constant 2 : index
    %c0_133 = arith.constant 0 : index
    %c0_134 = arith.constant 0 : index
    %c0_135 = arith.constant 0 : index
    %286 = vector.load %arg13[%c0_131, %c2_132, %c0_133, %c0_134, %c0_135] : memref<1x8x2x8x32xf32, #tpu.memory_space<vmem>>, vector<1x1x1x8x32xf32>
    %287 = vector.shape_cast %286 : vector<1x1x1x8x32xf32> to vector<8x32xf32>
    %288 = vector.shape_cast %285 : vector<8x32xf32> to vector<1x1x1x8x32xf32>
    tpu.vector_store %arg13[%c0_131, %c2_132, %c0_133, %c0_134, %c0_135], %288 {strides = array<i32>} : memref<1x8x2x8x32xf32, #tpu.memory_space<vmem>>, vector<1x1x1x8x32xf32>,
    %c0_136 = arith.constant 0 : index
    %c2_137 = arith.constant 2 : index
    %c1_138 = arith.constant 1 : index
    %c0_139 = arith.constant 0 : index
    %c0_140 = arith.constant 0 : index
    %289 = vector.load %arg13[%c0_136, %c2_137, %c1_138, %c0_139, %c0_140] : memref<1x8x2x8x32xf32, #tpu.memory_space<vmem>>, vector<1x1x1x8x32xf32>
    %290 = vector.shape_cast %289 : vector<1x1x1x8x32xf32> to vector<8x32xf32>
    %291 = vector.shape_cast %277 : vector<8x32xf32> to vector<1x1x1x8x32xf32>
    tpu.vector_store %arg13[%c0_136, %c2_137, %c1_138, %c0_139, %c0_140], %291 {strides = array<i32>} : memref<1x8x2x8x32xf32, #tpu.memory_space<vmem>>, vector<1x1x1x8x32xf32>,
    %292 = vector.extract_strided_slice %282 {offsets = [0, 0], sizes = [8, 8], strides = [1, 1]} : vector<8x32xf32> to vector<8x8xf32>
    %293 = vector.extract_strided_slice %282 {offsets = [0, 8], sizes = [8, 8], strides = [1, 1]} : vector<8x32xf32> to vector<8x8xf32>
    %294 = vector.extract_strided_slice %282 {offsets = [0, 16], sizes = [8, 8], strides = [1, 1]} : vector<8x32xf32> to vector<8x8xf32>
    %295 = vector.extract_strided_slice %282 {offsets = [0, 24], sizes = [8, 8], strides = [1, 1]} : vector<8x32xf32> to vector<8x8xf32>
    %296 = vector.shape_cast %292 : vector<8x8xf32> to vector<1x8x8xf32>
    %297 = vector.shape_cast %293 : vector<8x8xf32> to vector<1x8x8xf32>
    %298 = vector.shape_cast %294 : vector<8x8xf32> to vector<1x8x8xf32>
    %299 = vector.shape_cast %295 : vector<8x8xf32> to vector<1x8x8xf32>
    %300 = tpu.concatenate %296, %297, %298, %299 in 0 : vector<1x8x8xf32>, vector<1x8x8xf32>, vector<1x8x8xf32>, vector<1x8x8xf32> -> vector<4x8x8xf32>
    %301 = vector.extract_strided_slice %285 {offsets = [0, 0], sizes = [8, 8], strides = [1, 1]} : vector<8x32xf32> to vector<8x8xf32>
    %302 = vector.extract_strided_slice %285 {offsets = [0, 8], sizes = [8, 8], strides = [1, 1]} : vector<8x32xf32> to vector<8x8xf32>
    %303 = vector.extract_strided_slice %285 {offsets = [0, 16], sizes = [8, 8], strides = [1, 1]} : vector<8x32xf32> to vector<8x8xf32>
    %304 = vector.extract_strided_slice %285 {offsets = [0, 24], sizes = [8, 8], strides = [1, 1]} : vector<8x32xf32> to vector<8x8xf32>
    %305 = vector.shape_cast %301 : vector<8x8xf32> to vector<1x8x8xf32>
    %306 = vector.shape_cast %302 : vector<8x8xf32> to vector<1x8x8xf32>
    %307 = vector.shape_cast %303 : vector<8x8xf32> to vector<1x8x8xf32>
    %308 = vector.shape_cast %304 : vector<8x8xf32> to vector<1x8x8xf32>
    %309 = tpu.concatenate %305, %306, %307, %308 in 0 : vector<1x8x8xf32>, vector<1x8x8xf32>, vector<1x8x8xf32>, vector<1x8x8xf32> -> vector<4x8x8xf32>
    %310 = vector.extract_strided_slice %277 {offsets = [0, 0], sizes = [8, 8], strides = [1, 1]} : vector<8x32xf32> to vector<8x8xf32>
    %311 = vector.extract_strided_slice %277 {offsets = [0, 8], sizes = [8, 8], strides = [1, 1]} : vector<8x32xf32> to vector<8x8xf32>
    %312 = vector.extract_strided_slice %277 {offsets = [0, 16], sizes = [8, 8], strides = [1, 1]} : vector<8x32xf32> to vector<8x8xf32>
    %313 = vector.extract_strided_slice %277 {offsets = [0, 24], sizes = [8, 8], strides = [1, 1]} : vector<8x32xf32> to vector<8x8xf32>
    %314 = vector.shape_cast %310 : vector<8x8xf32> to vector<1x8x8xf32>
    %315 = vector.shape_cast %311 : vector<8x8xf32> to vector<1x8x8xf32>
    %316 = vector.shape_cast %312 : vector<8x8xf32> to vector<1x8x8xf32>
    %317 = vector.shape_cast %313 : vector<8x8xf32> to vector<1x8x8xf32>
    %318 = tpu.concatenate %314, %315, %316, %317 in 0 : vector<1x8x8xf32>, vector<1x8x8xf32>, vector<1x8x8xf32>, vector<1x8x8xf32> -> vector<4x8x8xf32>
    %c0_141 = arith.constant 0 : index
    %c2_142 = arith.constant 2 : index
    %c0_143 = arith.constant 0 : index
    %c0_144 = arith.constant 0 : index
    %c0_145 = arith.constant 0 : index
    %c0_146 = arith.constant 0 : index
    %319 = vector.load %arg11[%c0_141, %c2_142, %c0_143, %c0_144, %c0_145, %c0_146] : memref<1x8x2x4x8x8xf32, #tpu.memory_space<vmem>>, vector<1x1x1x4x8x8xf32>
    %320 = vector.shape_cast %319 : vector<1x1x1x4x8x8xf32> to vector<4x8x8xf32>
    %321 = tpu.concatenate %320, %309 in 1 : vector<4x8x8xf32>, vector<4x8x8xf32> -> vector<4x16x8xf32>
    %c0_147 = arith.constant 0 : index
    %c2_148 = arith.constant 2 : index
    %c1_149 = arith.constant 1 : index
    %c0_150 = arith.constant 0 : index
    %c0_151 = arith.constant 0 : index
    %c0_152 = arith.constant 0 : index
    %322 = vector.load %arg11[%c0_147, %c2_148, %c1_149, %c0_150, %c0_151, %c0_152] : memref<1x8x2x4x8x8xf32, #tpu.memory_space<vmem>>, vector<1x1x1x4x8x8xf32>
    %323 = vector.shape_cast %322 : vector<1x1x1x4x8x8xf32> to vector<4x8x8xf32>
    %324 = tpu.concatenate %323, %318 in 1 : vector<4x8x8xf32>, vector<4x8x8xf32> -> vector<4x16x8xf32>
    %cst_153 = arith.constant dense<0.000000e+00> : vector<4x8x16xf32>
    %325 = tpu.matmul %300, %321, %cst_153 {dimension_numbers = #tpu.dot_dimension_numbers<[2], [2], [1], [1], [0, 0, 0, 1, 1, 1], [0], [0]>} : vector<4x8x8xf32>, vector<4x16x8xf32>, vector<4x8x16xf32> -> vector<4x8x16xf32>
    %cst_154 = arith.constant 0.353553385 : f32
    %326 = vector.broadcast %cst_154 : f32 to vector<4x8x16xf32>
    %327 = arith.mulf %325, %326 : vector<4x8x16xf32>
    %328 = arith.addf %327, %7 : vector<4x8x16xf32>
    %cst_155 = arith.constant dense<0xFF800000> : vector<4x8xf32>
    %329 = vector.multi_reduction <maximumf>, %328, %cst_155 [2] : vector<4x8x16xf32> to vector<4x8xf32>
    %330 = vector.shape_cast %329 : vector<4x8xf32> to vector<4x8x1xf32>
    %331 = vector.broadcast %330 : vector<4x8x1xf32> to vector<4x8x16xf32>
    %332 = arith.subf %328, %331 : vector<4x8x16xf32>
    %333 = math.exp %332 : vector<4x8x16xf32>
    %cst_156 = arith.constant dense<0.000000e+00> : vector<4x8xf32>
    %334 = vector.multi_reduction <add>, %333, %cst_156 [2] : vector<4x8x16xf32> to vector<4x8xf32>
    %335 = vector.shape_cast %334 : vector<4x8xf32> to vector<4x8x1xf32>
    %336 = tpu.reciprocal %335 {approx = true} : vector<4x8x1xf32> -> vector<4x8x1xf32>
    %337 = vector.broadcast %336 : vector<4x8x1xf32> to vector<4x8x16xf32>
    %338 = arith.mulf %333, %337 : vector<4x8x16xf32>
    %cst_157 = arith.constant dense<0.000000e+00> : vector<4x8x8xf32>
    %339 = tpu.matmul %338, %324, %cst_157 {dimension_numbers = #tpu.dot_dimension_numbers<[2], [1], [1], [2], [0, 0, 0, 1, 1, 2], [0], [0]>} : vector<4x8x16xf32>, vector<4x16x8xf32>, vector<4x8x8xf32> -> vector<4x8x8xf32>
    %340 = vector.extract_strided_slice %339 {offsets = [0, 0, 0], sizes = [1, 8, 8], strides = [1, 1, 1]} : vector<4x8x8xf32> to vector<1x8x8xf32>
    %341 = vector.shape_cast %340 : vector<1x8x8xf32> to vector<8x8xf32>
    %342 = vector.extract_strided_slice %339 {offsets = [1, 0, 0], sizes = [1, 8, 8], strides = [1, 1, 1]} : vector<4x8x8xf32> to vector<1x8x8xf32>
    %343 = vector.shape_cast %342 : vector<1x8x8xf32> to vector<8x8xf32>
    %344 = vector.extract_strided_slice %339 {offsets = [2, 0, 0], sizes = [1, 8, 8], strides = [1, 1, 1]} : vector<4x8x8xf32> to vector<1x8x8xf32>
    %345 = vector.shape_cast %344 : vector<1x8x8xf32> to vector<8x8xf32>
    %346 = vector.extract_strided_slice %339 {offsets = [3, 0, 0], sizes = [1, 8, 8], strides = [1, 1, 1]} : vector<4x8x8xf32> to vector<1x8x8xf32>
    %347 = vector.shape_cast %346 : vector<1x8x8xf32> to vector<8x8xf32>
    %348 = tpu.concatenate %341, %343, %345, %347 in 1 : vector<8x8xf32>, vector<8x8xf32>, vector<8x8xf32>, vector<8x8xf32> -> vector<8x32xf32>
    %c2_158 = arith.constant 2 : index
    %c0_159 = arith.constant 0 : index
    %c0_160 = arith.constant 0 : index
    %349 = vector.load %arg8[%c2_158, %c0_159, %c0_160] : memref<8x32x32xf32, #tpu.memory_space<vmem>>, vector<1x32x32xf32>
    %350 = vector.shape_cast %349 : vector<1x32x32xf32> to vector<32x32xf32>
    %cst_161 = arith.constant dense<0.000000e+00> : vector<8x32xf32>
    %351 = tpu.matmul %348, %350, %cst_161 {dimension_numbers = #tpu.dot_dimension_numbers<[1], [0], [0], [1], [0, 0, 1, 1], [], []>} : vector<8x32xf32>, vector<32x32xf32>, vector<8x32xf32> -> vector<8x32xf32>
    %352 = arith.addf %257, %351 : vector<8x32xf32>
    %353 = arith.mulf %352, %352 : vector<8x32xf32>
    %cst_162 = arith.constant dense<0.000000e+00> : vector<8xf32>
    %354 = vector.multi_reduction <add>, %353, %cst_162 [1] : vector<8x32xf32> to vector<8xf32>
    %355 = vector.shape_cast %354 : vector<8xf32> to vector<8x1xf32>
    %cst_163 = arith.constant 3.200000e+01 : f32
    %356 = vector.broadcast %cst_163 : f32 to vector<8x1xf32>
    %357 = arith.divf %355, %356 : vector<8x1xf32>
    %cst_164 = arith.constant 9.99999997E-7 : f32
    %358 = vector.broadcast %cst_164 : f32 to vector<8x1xf32>
    %359 = arith.addf %357, %358 : vector<8x1xf32>
    %360 = math.rsqrt %359 : vector<8x1xf32>
    %361 = vector.broadcast %360 : vector<8x1xf32> to vector<8x32xf32>
    %362 = arith.mulf %352, %361 : vector<8x32xf32>
    %c2_165 = arith.constant 2 : index
    %c0_166 = arith.constant 0 : index
    %c0_167 = arith.constant 0 : index
    %363 = vector.load %arg6[%c2_165, %c0_166, %c0_167] : memref<8x1x32xf32, #tpu.memory_space<vmem>>, vector<1x1x32xf32>
    %364 = vector.shape_cast %363 : vector<1x1x32xf32> to vector<1x32xf32>
    %365 = vector.broadcast %364 : vector<1x32xf32> to vector<8x32xf32>
    %366 = arith.mulf %362, %365 : vector<8x32xf32>
    %c2_168 = arith.constant 2 : index
    %c0_169 = arith.constant 0 : index
    %c0_170 = arith.constant 0 : index
    %367 = vector.load %arg9[%c2_168, %c0_169, %c0_170] : memref<8x32x128xf32, #tpu.memory_space<vmem>>, vector<1x32x128xf32>
    %368 = vector.shape_cast %367 : vector<1x32x128xf32> to vector<32x128xf32>
    %cst_171 = arith.constant dense<0.000000e+00> : vector<8x128xf32>
    %369 = tpu.matmul %366, %368, %cst_171 {dimension_numbers = #tpu.dot_dimension_numbers<[1], [0], [0], [1], [0, 0, 1, 1], [], []>} : vector<8x32xf32>, vector<32x128xf32>, vector<8x128xf32> -> vector<8x128xf32>
    %370 = vector.extract_strided_slice %369 {offsets = [0, 0], sizes = [8, 64], strides = [1, 1]} : vector<8x128xf32> to vector<8x64xf32>
    %371 = vector.extract_strided_slice %369 {offsets = [0, 64], sizes = [8, 64], strides = [1, 1]} : vector<8x128xf32> to vector<8x64xf32>
    %372 = arith.negf %370 : vector<8x64xf32>
    %373 = math.exp %372 : vector<8x64xf32>
    %cst_172 = arith.constant 1.000000e+00 : f32
    %374 = vector.broadcast %cst_172 : f32 to vector<8x64xf32>
    %375 = arith.addf %374, %373 : vector<8x64xf32>
    %376 = arith.divf %374, %375 : vector<8x64xf32>
    %377 = arith.mulf %370, %376 : vector<8x64xf32>
    %378 = arith.mulf %377, %371 : vector<8x64xf32>
    %c2_173 = arith.constant 2 : index
    %c0_174 = arith.constant 0 : index
    %c0_175 = arith.constant 0 : index
    %379 = vector.load %arg10[%c2_173, %c0_174, %c0_175] : memref<8x64x32xf32, #tpu.memory_space<vmem>>, vector<1x64x32xf32>
    %380 = vector.shape_cast %379 : vector<1x64x32xf32> to vector<64x32xf32>
    %cst_176 = arith.constant dense<0.000000e+00> : vector<8x32xf32>
    %381 = tpu.matmul %378, %380, %cst_176 {dimension_numbers = #tpu.dot_dimension_numbers<[1], [0], [0], [1], [0, 0, 1, 1], [], []>} : vector<8x64xf32>, vector<64x32xf32>, vector<8x32xf32> -> vector<8x32xf32>
    %382 = arith.addf %352, %381 : vector<8x32xf32>
    %383 = arith.mulf %382, %382 : vector<8x32xf32>
    %cst_177 = arith.constant dense<0.000000e+00> : vector<8xf32>
    %384 = vector.multi_reduction <add>, %383, %cst_177 [1] : vector<8x32xf32> to vector<8xf32>
    %385 = vector.shape_cast %384 : vector<8xf32> to vector<8x1xf32>
    %cst_178 = arith.constant 3.200000e+01 : f32
    %386 = vector.broadcast %cst_178 : f32 to vector<8x1xf32>
    %387 = arith.divf %385, %386 : vector<8x1xf32>
    %cst_179 = arith.constant 9.99999997E-7 : f32
    %388 = vector.broadcast %cst_179 : f32 to vector<8x1xf32>
    %389 = arith.addf %387, %388 : vector<8x1xf32>
    %390 = math.rsqrt %389 : vector<8x1xf32>
    %391 = vector.broadcast %390 : vector<8x1xf32> to vector<8x32xf32>
    %392 = arith.mulf %382, %391 : vector<8x32xf32>
    %c3 = arith.constant 3 : index
    %c0_180 = arith.constant 0 : index
    %c0_181 = arith.constant 0 : index
    %393 = vector.load %arg5[%c3, %c0_180, %c0_181] : memref<8x1x32xf32, #tpu.memory_space<vmem>>, vector<1x1x32xf32>
    %394 = vector.shape_cast %393 : vector<1x1x32xf32> to vector<1x32xf32>
    %395 = vector.broadcast %394 : vector<1x32xf32> to vector<8x32xf32>
    %396 = arith.mulf %392, %395 : vector<8x32xf32>
    %c3_182 = arith.constant 3 : index
    %c0_183 = arith.constant 0 : index
    %c0_184 = arith.constant 0 : index
    %397 = vector.load %arg7[%c3_182, %c0_183, %c0_184] : memref<8x32x160xf32, #tpu.memory_space<vmem>>, vector<1x32x160xf32>
    %398 = vector.shape_cast %397 : vector<1x32x160xf32> to vector<32x160xf32>
    %cst_185 = arith.constant dense<0.000000e+00> : vector<8x160xf32>
    %399 = tpu.matmul %396, %398, %cst_185 {dimension_numbers = #tpu.dot_dimension_numbers<[1], [0], [0], [1], [0, 0, 1, 1], [], []>} : vector<8x32xf32>, vector<32x160xf32>, vector<8x160xf32> -> vector<8x160xf32>
    %400 = vector.extract_strided_slice %399 {offsets = [0, 0], sizes = [8, 32], strides = [1, 1]} : vector<8x160xf32> to vector<8x32xf32>
    %401 = vector.extract_strided_slice %399 {offsets = [0, 32], sizes = [8, 32], strides = [1, 1]} : vector<8x160xf32> to vector<8x32xf32>
    %402 = vector.extract_strided_slice %399 {offsets = [0, 64], sizes = [8, 32], strides = [1, 1]} : vector<8x160xf32> to vector<8x32xf32>
    %403 = vector.extract_strided_slice %399 {offsets = [0, 96], sizes = [8, 32], strides = [1, 1]} : vector<8x160xf32> to vector<8x32xf32>
    %404 = vector.extract_strided_slice %399 {offsets = [0, 128], sizes = [8, 32], strides = [1, 1]} : vector<8x160xf32> to vector<8x32xf32>
    %405 = arith.mulf %400, %3 : vector<8x32xf32>
    %406 = arith.mulf %403, %5 : vector<8x32xf32>
    %407 = arith.addf %405, %406 : vector<8x32xf32>
    %408 = arith.mulf %401, %3 : vector<8x32xf32>
    %409 = arith.mulf %404, %5 : vector<8x32xf32>
    %410 = arith.addf %408, %409 : vector<8x32xf32>
    %c0_186 = arith.constant 0 : index
    %c3_187 = arith.constant 3 : index
    %c0_188 = arith.constant 0 : index
    %c0_189 = arith.constant 0 : index
    %c0_190 = arith.constant 0 : index
    %411 = vector.load %arg13[%c0_186, %c3_187, %c0_188, %c0_189, %c0_190] : memref<1x8x2x8x32xf32, #tpu.memory_space<vmem>>, vector<1x1x1x8x32xf32>
    %412 = vector.shape_cast %411 : vector<1x1x1x8x32xf32> to vector<8x32xf32>
    %413 = vector.shape_cast %410 : vector<8x32xf32> to vector<1x1x1x8x32xf32>
    tpu.vector_store %arg13[%c0_186, %c3_187, %c0_188, %c0_189, %c0_190], %413 {strides = array<i32>} : memref<1x8x2x8x32xf32, #tpu.memory_space<vmem>>, vector<1x1x1x8x32xf32>,
    %c0_191 = arith.constant 0 : index
    %c3_192 = arith.constant 3 : index
    %c1_193 = arith.constant 1 : index
    %c0_194 = arith.constant 0 : index
    %c0_195 = arith.constant 0 : index
    %414 = vector.load %arg13[%c0_191, %c3_192, %c1_193, %c0_194, %c0_195] : memref<1x8x2x8x32xf32, #tpu.memory_space<vmem>>, vector<1x1x1x8x32xf32>
    %415 = vector.shape_cast %414 : vector<1x1x1x8x32xf32> to vector<8x32xf32>
    %416 = vector.shape_cast %402 : vector<8x32xf32> to vector<1x1x1x8x32xf32>
    tpu.vector_store %arg13[%c0_191, %c3_192, %c1_193, %c0_194, %c0_195], %416 {strides = array<i32>} : memref<1x8x2x8x32xf32, #tpu.memory_space<vmem>>, vector<1x1x1x8x32xf32>,
    %417 = vector.extract_strided_slice %407 {offsets = [0, 0], sizes = [8, 8], strides = [1, 1]} : vector<8x32xf32> to vector<8x8xf32>
    %418 = vector.extract_strided_slice %407 {offsets = [0, 8], sizes = [8, 8], strides = [1, 1]} : vector<8x32xf32> to vector<8x8xf32>
    %419 = vector.extract_strided_slice %407 {offsets = [0, 16], sizes = [8, 8], strides = [1, 1]} : vector<8x32xf32> to vector<8x8xf32>
    %420 = vector.extract_strided_slice %407 {offsets = [0, 24], sizes = [8, 8], strides = [1, 1]} : vector<8x32xf32> to vector<8x8xf32>
    %421 = vector.shape_cast %417 : vector<8x8xf32> to vector<1x8x8xf32>
    %422 = vector.shape_cast %418 : vector<8x8xf32> to vector<1x8x8xf32>
    %423 = vector.shape_cast %419 : vector<8x8xf32> to vector<1x8x8xf32>
    %424 = vector.shape_cast %420 : vector<8x8xf32> to vector<1x8x8xf32>
    %425 = tpu.concatenate %421, %422, %423, %424 in 0 : vector<1x8x8xf32>, vector<1x8x8xf32>, vector<1x8x8xf32>, vector<1x8x8xf32> -> vector<4x8x8xf32>
    %426 = vector.extract_strided_slice %410 {offsets = [0, 0], sizes = [8, 8], strides = [1, 1]} : vector<8x32xf32> to vector<8x8xf32>
    %427 = vector.extract_strided_slice %410 {offsets = [0, 8], sizes = [8, 8], strides = [1, 1]} : vector<8x32xf32> to vector<8x8xf32>
    %428 = vector.extract_strided_slice %410 {offsets = [0, 16], sizes = [8, 8], strides = [1, 1]} : vector<8x32xf32> to vector<8x8xf32>
    %429 = vector.extract_strided_slice %410 {offsets = [0, 24], sizes = [8, 8], strides = [1, 1]} : vector<8x32xf32> to vector<8x8xf32>
    %430 = vector.shape_cast %426 : vector<8x8xf32> to vector<1x8x8xf32>
    %431 = vector.shape_cast %427 : vector<8x8xf32> to vector<1x8x8xf32>
    %432 = vector.shape_cast %428 : vector<8x8xf32> to vector<1x8x8xf32>
    %433 = vector.shape_cast %429 : vector<8x8xf32> to vector<1x8x8xf32>
    %434 = tpu.concatenate %430, %431, %432, %433 in 0 : vector<1x8x8xf32>, vector<1x8x8xf32>, vector<1x8x8xf32>, vector<1x8x8xf32> -> vector<4x8x8xf32>
    %435 = vector.extract_strided_slice %402 {offsets = [0, 0], sizes = [8, 8], strides = [1, 1]} : vector<8x32xf32> to vector<8x8xf32>
    %436 = vector.extract_strided_slice %402 {offsets = [0, 8], sizes = [8, 8], strides = [1, 1]} : vector<8x32xf32> to vector<8x8xf32>
    %437 = vector.extract_strided_slice %402 {offsets = [0, 16], sizes = [8, 8], strides = [1, 1]} : vector<8x32xf32> to vector<8x8xf32>
    %438 = vector.extract_strided_slice %402 {offsets = [0, 24], sizes = [8, 8], strides = [1, 1]} : vector<8x32xf32> to vector<8x8xf32>
    %439 = vector.shape_cast %435 : vector<8x8xf32> to vector<1x8x8xf32>
    %440 = vector.shape_cast %436 : vector<8x8xf32> to vector<1x8x8xf32>
    %441 = vector.shape_cast %437 : vector<8x8xf32> to vector<1x8x8xf32>
    %442 = vector.shape_cast %438 : vector<8x8xf32> to vector<1x8x8xf32>
    %443 = tpu.concatenate %439, %440, %441, %442 in 0 : vector<1x8x8xf32>, vector<1x8x8xf32>, vector<1x8x8xf32>, vector<1x8x8xf32> -> vector<4x8x8xf32>
    %c0_196 = arith.constant 0 : index
    %c3_197 = arith.constant 3 : index
    %c0_198 = arith.constant 0 : index
    %c0_199 = arith.constant 0 : index
    %c0_200 = arith.constant 0 : index
    %c0_201 = arith.constant 0 : index
    %444 = vector.load %arg11[%c0_196, %c3_197, %c0_198, %c0_199, %c0_200, %c0_201] : memref<1x8x2x4x8x8xf32, #tpu.memory_space<vmem>>, vector<1x1x1x4x8x8xf32>
    %445 = vector.shape_cast %444 : vector<1x1x1x4x8x8xf32> to vector<4x8x8xf32>
    %446 = tpu.concatenate %445, %434 in 1 : vector<4x8x8xf32>, vector<4x8x8xf32> -> vector<4x16x8xf32>
    %c0_202 = arith.constant 0 : index
    %c3_203 = arith.constant 3 : index
    %c1_204 = arith.constant 1 : index
    %c0_205 = arith.constant 0 : index
    %c0_206 = arith.constant 0 : index
    %c0_207 = arith.constant 0 : index
    %447 = vector.load %arg11[%c0_202, %c3_203, %c1_204, %c0_205, %c0_206, %c0_207] : memref<1x8x2x4x8x8xf32, #tpu.memory_space<vmem>>, vector<1x1x1x4x8x8xf32>
    %448 = vector.shape_cast %447 : vector<1x1x1x4x8x8xf32> to vector<4x8x8xf32>
    %449 = tpu.concatenate %448, %443 in 1 : vector<4x8x8xf32>, vector<4x8x8xf32> -> vector<4x16x8xf32>
    %cst_208 = arith.constant dense<0.000000e+00> : vector<4x8x16xf32>
    %450 = tpu.matmul %425, %446, %cst_208 {dimension_numbers = #tpu.dot_dimension_numbers<[2], [2], [1], [1], [0, 0, 0, 1, 1, 1], [0], [0]>} : vector<4x8x8xf32>, vector<4x16x8xf32>, vector<4x8x16xf32> -> vector<4x8x16xf32>
    %cst_209 = arith.constant 0.353553385 : f32
    %451 = vector.broadcast %cst_209 : f32 to vector<4x8x16xf32>
    %452 = arith.mulf %450, %451 : vector<4x8x16xf32>
    %453 = arith.addf %452, %7 : vector<4x8x16xf32>
    %cst_210 = arith.constant dense<0xFF800000> : vector<4x8xf32>
    %454 = vector.multi_reduction <maximumf>, %453, %cst_210 [2] : vector<4x8x16xf32> to vector<4x8xf32>
    %455 = vector.shape_cast %454 : vector<4x8xf32> to vector<4x8x1xf32>
    %456 = vector.broadcast %455 : vector<4x8x1xf32> to vector<4x8x16xf32>
    %457 = arith.subf %453, %456 : vector<4x8x16xf32>
    %458 = math.exp %457 : vector<4x8x16xf32>
    %cst_211 = arith.constant dense<0.000000e+00> : vector<4x8xf32>
    %459 = vector.multi_reduction <add>, %458, %cst_211 [2] : vector<4x8x16xf32> to vector<4x8xf32>
    %460 = vector.shape_cast %459 : vector<4x8xf32> to vector<4x8x1xf32>
    %461 = tpu.reciprocal %460 {approx = true} : vector<4x8x1xf32> -> vector<4x8x1xf32>
    %462 = vector.broadcast %461 : vector<4x8x1xf32> to vector<4x8x16xf32>
    %463 = arith.mulf %458, %462 : vector<4x8x16xf32>
    %cst_212 = arith.constant dense<0.000000e+00> : vector<4x8x8xf32>
    %464 = tpu.matmul %463, %449, %cst_212 {dimension_numbers = #tpu.dot_dimension_numbers<[2], [1], [1], [2], [0, 0, 0, 1, 1, 2], [0], [0]>} : vector<4x8x16xf32>, vector<4x16x8xf32>, vector<4x8x8xf32> -> vector<4x8x8xf32>
    %465 = vector.extract_strided_slice %464 {offsets = [0, 0, 0], sizes = [1, 8, 8], strides = [1, 1, 1]} : vector<4x8x8xf32> to vector<1x8x8xf32>
    %466 = vector.shape_cast %465 : vector<1x8x8xf32> to vector<8x8xf32>
    %467 = vector.extract_strided_slice %464 {offsets = [1, 0, 0], sizes = [1, 8, 8], strides = [1, 1, 1]} : vector<4x8x8xf32> to vector<1x8x8xf32>
    %468 = vector.shape_cast %467 : vector<1x8x8xf32> to vector<8x8xf32>
    %469 = vector.extract_strided_slice %464 {offsets = [2, 0, 0], sizes = [1, 8, 8], strides = [1, 1, 1]} : vector<4x8x8xf32> to vector<1x8x8xf32>
    %470 = vector.shape_cast %469 : vector<1x8x8xf32> to vector<8x8xf32>
    %471 = vector.extract_strided_slice %464 {offsets = [3, 0, 0], sizes = [1, 8, 8], strides = [1, 1, 1]} : vector<4x8x8xf32> to vector<1x8x8xf32>
    %472 = vector.shape_cast %471 : vector<1x8x8xf32> to vector<8x8xf32>
    %473 = tpu.concatenate %466, %468, %470, %472 in 1 : vector<8x8xf32>, vector<8x8xf32>, vector<8x8xf32>, vector<8x8xf32> -> vector<8x32xf32>
    %c3_213 = arith.constant 3 : index
    %c0_214 = arith.constant 0 : index
    %c0_215 = arith.constant 0 : index
    %474 = vector.load %arg8[%c3_213, %c0_214, %c0_215] : memref<8x32x32xf32, #tpu.memory_space<vmem>>, vector<1x32x32xf32>
    %475 = vector.shape_cast %474 : vector<1x32x32xf32> to vector<32x32xf32>
    %cst_216 = arith.constant dense<0.000000e+00> : vector<8x32xf32>
    %476 = tpu.matmul %473, %475, %cst_216 {dimension_numbers = #tpu.dot_dimension_numbers<[1], [0], [0], [1], [0, 0, 1, 1], [], []>} : vector<8x32xf32>, vector<32x32xf32>, vector<8x32xf32> -> vector<8x32xf32>
    %477 = arith.addf %382, %476 : vector<8x32xf32>
    %478 = arith.mulf %477, %477 : vector<8x32xf32>
    %cst_217 = arith.constant dense<0.000000e+00> : vector<8xf32>
    %479 = vector.multi_reduction <add>, %478, %cst_217 [1] : vector<8x32xf32> to vector<8xf32>
    %480 = vector.shape_cast %479 : vector<8xf32> to vector<8x1xf32>
    %cst_218 = arith.constant 3.200000e+01 : f32
    %481 = vector.broadcast %cst_218 : f32 to vector<8x1xf32>
    %482 = arith.divf %480, %481 : vector<8x1xf32>
    %cst_219 = arith.constant 9.99999997E-7 : f32
    %483 = vector.broadcast %cst_219 : f32 to vector<8x1xf32>
    %484 = arith.addf %482, %483 : vector<8x1xf32>
    %485 = math.rsqrt %484 : vector<8x1xf32>
    %486 = vector.broadcast %485 : vector<8x1xf32> to vector<8x32xf32>
    %487 = arith.mulf %477, %486 : vector<8x32xf32>
    %c3_220 = arith.constant 3 : index
    %c0_221 = arith.constant 0 : index
    %c0_222 = arith.constant 0 : index
    %488 = vector.load %arg6[%c3_220, %c0_221, %c0_222] : memref<8x1x32xf32, #tpu.memory_space<vmem>>, vector<1x1x32xf32>
    %489 = vector.shape_cast %488 : vector<1x1x32xf32> to vector<1x32xf32>
    %490 = vector.broadcast %489 : vector<1x32xf32> to vector<8x32xf32>
    %491 = arith.mulf %487, %490 : vector<8x32xf32>
    %c3_223 = arith.constant 3 : index
    %c0_224 = arith.constant 0 : index
    %c0_225 = arith.constant 0 : index
    %492 = vector.load %arg9[%c3_223, %c0_224, %c0_225] : memref<8x32x128xf32, #tpu.memory_space<vmem>>, vector<1x32x128xf32>
    %493 = vector.shape_cast %492 : vector<1x32x128xf32> to vector<32x128xf32>
    %cst_226 = arith.constant dense<0.000000e+00> : vector<8x128xf32>
    %494 = tpu.matmul %491, %493, %cst_226 {dimension_numbers = #tpu.dot_dimension_numbers<[1], [0], [0], [1], [0, 0, 1, 1], [], []>} : vector<8x32xf32>, vector<32x128xf32>, vector<8x128xf32> -> vector<8x128xf32>
    %495 = vector.extract_strided_slice %494 {offsets = [0, 0], sizes = [8, 64], strides = [1, 1]} : vector<8x128xf32> to vector<8x64xf32>
    %496 = vector.extract_strided_slice %494 {offsets = [0, 64], sizes = [8, 64], strides = [1, 1]} : vector<8x128xf32> to vector<8x64xf32>
    %497 = arith.negf %495 : vector<8x64xf32>
    %498 = math.exp %497 : vector<8x64xf32>
    %cst_227 = arith.constant 1.000000e+00 : f32
    %499 = vector.broadcast %cst_227 : f32 to vector<8x64xf32>
    %500 = arith.addf %499, %498 : vector<8x64xf32>
    %501 = arith.divf %499, %500 : vector<8x64xf32>
    %502 = arith.mulf %495, %501 : vector<8x64xf32>
    %503 = arith.mulf %502, %496 : vector<8x64xf32>
    %c3_228 = arith.constant 3 : index
    %c0_229 = arith.constant 0 : index
    %c0_230 = arith.constant 0 : index
    %504 = vector.load %arg10[%c3_228, %c0_229, %c0_230] : memref<8x64x32xf32, #tpu.memory_space<vmem>>, vector<1x64x32xf32>
    %505 = vector.shape_cast %504 : vector<1x64x32xf32> to vector<64x32xf32>
    %cst_231 = arith.constant dense<0.000000e+00> : vector<8x32xf32>
    %506 = tpu.matmul %503, %505, %cst_231 {dimension_numbers = #tpu.dot_dimension_numbers<[1], [0], [0], [1], [0, 0, 1, 1], [], []>} : vector<8x64xf32>, vector<64x32xf32>, vector<8x32xf32> -> vector<8x32xf32>
    %507 = arith.addf %477, %506 : vector<8x32xf32>
    %508 = arith.mulf %507, %507 : vector<8x32xf32>
    %cst_232 = arith.constant dense<0.000000e+00> : vector<8xf32>
    %509 = vector.multi_reduction <add>, %508, %cst_232 [1] : vector<8x32xf32> to vector<8xf32>
    %510 = vector.shape_cast %509 : vector<8xf32> to vector<8x1xf32>
    %cst_233 = arith.constant 3.200000e+01 : f32
    %511 = vector.broadcast %cst_233 : f32 to vector<8x1xf32>
    %512 = arith.divf %510, %511 : vector<8x1xf32>
    %cst_234 = arith.constant 9.99999997E-7 : f32
    %513 = vector.broadcast %cst_234 : f32 to vector<8x1xf32>
    %514 = arith.addf %512, %513 : vector<8x1xf32>
    %515 = math.rsqrt %514 : vector<8x1xf32>
    %516 = vector.broadcast %515 : vector<8x1xf32> to vector<8x32xf32>
    %517 = arith.mulf %507, %516 : vector<8x32xf32>
    %c4 = arith.constant 4 : index
    %c0_235 = arith.constant 0 : index
    %c0_236 = arith.constant 0 : index
    %518 = vector.load %arg5[%c4, %c0_235, %c0_236] : memref<8x1x32xf32, #tpu.memory_space<vmem>>, vector<1x1x32xf32>
    %519 = vector.shape_cast %518 : vector<1x1x32xf32> to vector<1x32xf32>
    %520 = vector.broadcast %519 : vector<1x32xf32> to vector<8x32xf32>
    %521 = arith.mulf %517, %520 : vector<8x32xf32>
    %c4_237 = arith.constant 4 : index
    %c0_238 = arith.constant 0 : index
    %c0_239 = arith.constant 0 : index
    %522 = vector.load %arg7[%c4_237, %c0_238, %c0_239] : memref<8x32x160xf32, #tpu.memory_space<vmem>>, vector<1x32x160xf32>
    %523 = vector.shape_cast %522 : vector<1x32x160xf32> to vector<32x160xf32>
    %cst_240 = arith.constant dense<0.000000e+00> : vector<8x160xf32>
    %524 = tpu.matmul %521, %523, %cst_240 {dimension_numbers = #tpu.dot_dimension_numbers<[1], [0], [0], [1], [0, 0, 1, 1], [], []>} : vector<8x32xf32>, vector<32x160xf32>, vector<8x160xf32> -> vector<8x160xf32>
    %525 = vector.extract_strided_slice %524 {offsets = [0, 0], sizes = [8, 32], strides = [1, 1]} : vector<8x160xf32> to vector<8x32xf32>
    %526 = vector.extract_strided_slice %524 {offsets = [0, 32], sizes = [8, 32], strides = [1, 1]} : vector<8x160xf32> to vector<8x32xf32>
    %527 = vector.extract_strided_slice %524 {offsets = [0, 64], sizes = [8, 32], strides = [1, 1]} : vector<8x160xf32> to vector<8x32xf32>
    %528 = vector.extract_strided_slice %524 {offsets = [0, 96], sizes = [8, 32], strides = [1, 1]} : vector<8x160xf32> to vector<8x32xf32>
    %529 = vector.extract_strided_slice %524 {offsets = [0, 128], sizes = [8, 32], strides = [1, 1]} : vector<8x160xf32> to vector<8x32xf32>
    %530 = arith.mulf %525, %3 : vector<8x32xf32>
    %531 = arith.mulf %528, %5 : vector<8x32xf32>
    %532 = arith.addf %530, %531 : vector<8x32xf32>
    %533 = arith.mulf %526, %3 : vector<8x32xf32>
    %534 = arith.mulf %529, %5 : vector<8x32xf32>
    %535 = arith.addf %533, %534 : vector<8x32xf32>
    %c0_241 = arith.constant 0 : index
    %c4_242 = arith.constant 4 : index
    %c0_243 = arith.constant 0 : index
    %c0_244 = arith.constant 0 : index
    %c0_245 = arith.constant 0 : index
    %536 = vector.load %arg13[%c0_241, %c4_242, %c0_243, %c0_244, %c0_245] : memref<1x8x2x8x32xf32, #tpu.memory_space<vmem>>, vector<1x1x1x8x32xf32>
    %537 = vector.shape_cast %536 : vector<1x1x1x8x32xf32> to vector<8x32xf32>
    %538 = vector.shape_cast %535 : vector<8x32xf32> to vector<1x1x1x8x32xf32>
    tpu.vector_store %arg13[%c0_241, %c4_242, %c0_243, %c0_244, %c0_245], %538 {strides = array<i32>} : memref<1x8x2x8x32xf32, #tpu.memory_space<vmem>>, vector<1x1x1x8x32xf32>,
    %c0_246 = arith.constant 0 : index
    %c4_247 = arith.constant 4 : index
    %c1_248 = arith.constant 1 : index
    %c0_249 = arith.constant 0 : index
    %c0_250 = arith.constant 0 : index
    %539 = vector.load %arg13[%c0_246, %c4_247, %c1_248, %c0_249, %c0_250] : memref<1x8x2x8x32xf32, #tpu.memory_space<vmem>>, vector<1x1x1x8x32xf32>
    %540 = vector.shape_cast %539 : vector<1x1x1x8x32xf32> to vector<8x32xf32>
    %541 = vector.shape_cast %527 : vector<8x32xf32> to vector<1x1x1x8x32xf32>
    tpu.vector_store %arg13[%c0_246, %c4_247, %c1_248, %c0_249, %c0_250], %541 {strides = array<i32>} : memref<1x8x2x8x32xf32, #tpu.memory_space<vmem>>, vector<1x1x1x8x32xf32>,
    %542 = vector.extract_strided_slice %532 {offsets = [0, 0], sizes = [8, 8], strides = [1, 1]} : vector<8x32xf32> to vector<8x8xf32>
    %543 = vector.extract_strided_slice %532 {offsets = [0, 8], sizes = [8, 8], strides = [1, 1]} : vector<8x32xf32> to vector<8x8xf32>
    %544 = vector.extract_strided_slice %532 {offsets = [0, 16], sizes = [8, 8], strides = [1, 1]} : vector<8x32xf32> to vector<8x8xf32>
    %545 = vector.extract_strided_slice %532 {offsets = [0, 24], sizes = [8, 8], strides = [1, 1]} : vector<8x32xf32> to vector<8x8xf32>
    %546 = vector.shape_cast %542 : vector<8x8xf32> to vector<1x8x8xf32>
    %547 = vector.shape_cast %543 : vector<8x8xf32> to vector<1x8x8xf32>
    %548 = vector.shape_cast %544 : vector<8x8xf32> to vector<1x8x8xf32>
    %549 = vector.shape_cast %545 : vector<8x8xf32> to vector<1x8x8xf32>
    %550 = tpu.concatenate %546, %547, %548, %549 in 0 : vector<1x8x8xf32>, vector<1x8x8xf32>, vector<1x8x8xf32>, vector<1x8x8xf32> -> vector<4x8x8xf32>
    %551 = vector.extract_strided_slice %535 {offsets = [0, 0], sizes = [8, 8], strides = [1, 1]} : vector<8x32xf32> to vector<8x8xf32>
    %552 = vector.extract_strided_slice %535 {offsets = [0, 8], sizes = [8, 8], strides = [1, 1]} : vector<8x32xf32> to vector<8x8xf32>
    %553 = vector.extract_strided_slice %535 {offsets = [0, 16], sizes = [8, 8], strides = [1, 1]} : vector<8x32xf32> to vector<8x8xf32>
    %554 = vector.extract_strided_slice %535 {offsets = [0, 24], sizes = [8, 8], strides = [1, 1]} : vector<8x32xf32> to vector<8x8xf32>
    %555 = vector.shape_cast %551 : vector<8x8xf32> to vector<1x8x8xf32>
    %556 = vector.shape_cast %552 : vector<8x8xf32> to vector<1x8x8xf32>
    %557 = vector.shape_cast %553 : vector<8x8xf32> to vector<1x8x8xf32>
    %558 = vector.shape_cast %554 : vector<8x8xf32> to vector<1x8x8xf32>
    %559 = tpu.concatenate %555, %556, %557, %558 in 0 : vector<1x8x8xf32>, vector<1x8x8xf32>, vector<1x8x8xf32>, vector<1x8x8xf32> -> vector<4x8x8xf32>
    %560 = vector.extract_strided_slice %527 {offsets = [0, 0], sizes = [8, 8], strides = [1, 1]} : vector<8x32xf32> to vector<8x8xf32>
    %561 = vector.extract_strided_slice %527 {offsets = [0, 8], sizes = [8, 8], strides = [1, 1]} : vector<8x32xf32> to vector<8x8xf32>
    %562 = vector.extract_strided_slice %527 {offsets = [0, 16], sizes = [8, 8], strides = [1, 1]} : vector<8x32xf32> to vector<8x8xf32>
    %563 = vector.extract_strided_slice %527 {offsets = [0, 24], sizes = [8, 8], strides = [1, 1]} : vector<8x32xf32> to vector<8x8xf32>
    %564 = vector.shape_cast %560 : vector<8x8xf32> to vector<1x8x8xf32>
    %565 = vector.shape_cast %561 : vector<8x8xf32> to vector<1x8x8xf32>
    %566 = vector.shape_cast %562 : vector<8x8xf32> to vector<1x8x8xf32>
    %567 = vector.shape_cast %563 : vector<8x8xf32> to vector<1x8x8xf32>
    %568 = tpu.concatenate %564, %565, %566, %567 in 0 : vector<1x8x8xf32>, vector<1x8x8xf32>, vector<1x8x8xf32>, vector<1x8x8xf32> -> vector<4x8x8xf32>
    %c0_251 = arith.constant 0 : index
    %c4_252 = arith.constant 4 : index
    %c0_253 = arith.constant 0 : index
    %c0_254 = arith.constant 0 : index
    %c0_255 = arith.constant 0 : index
    %c0_256 = arith.constant 0 : index
    %569 = vector.load %arg11[%c0_251, %c4_252, %c0_253, %c0_254, %c0_255, %c0_256] : memref<1x8x2x4x8x8xf32, #tpu.memory_space<vmem>>, vector<1x1x1x4x8x8xf32>
    %570 = vector.shape_cast %569 : vector<1x1x1x4x8x8xf32> to vector<4x8x8xf32>
    %571 = tpu.concatenate %570, %559 in 1 : vector<4x8x8xf32>, vector<4x8x8xf32> -> vector<4x16x8xf32>
    %c0_257 = arith.constant 0 : index
    %c4_258 = arith.constant 4 : index
    %c1_259 = arith.constant 1 : index
    %c0_260 = arith.constant 0 : index
    %c0_261 = arith.constant 0 : index
    %c0_262 = arith.constant 0 : index
    %572 = vector.load %arg11[%c0_257, %c4_258, %c1_259, %c0_260, %c0_261, %c0_262] : memref<1x8x2x4x8x8xf32, #tpu.memory_space<vmem>>, vector<1x1x1x4x8x8xf32>
    %573 = vector.shape_cast %572 : vector<1x1x1x4x8x8xf32> to vector<4x8x8xf32>
    %574 = tpu.concatenate %573, %568 in 1 : vector<4x8x8xf32>, vector<4x8x8xf32> -> vector<4x16x8xf32>
    %cst_263 = arith.constant dense<0.000000e+00> : vector<4x8x16xf32>
    %575 = tpu.matmul %550, %571, %cst_263 {dimension_numbers = #tpu.dot_dimension_numbers<[2], [2], [1], [1], [0, 0, 0, 1, 1, 1], [0], [0]>} : vector<4x8x8xf32>, vector<4x16x8xf32>, vector<4x8x16xf32> -> vector<4x8x16xf32>
    %cst_264 = arith.constant 0.353553385 : f32
    %576 = vector.broadcast %cst_264 : f32 to vector<4x8x16xf32>
    %577 = arith.mulf %575, %576 : vector<4x8x16xf32>
    %578 = arith.addf %577, %7 : vector<4x8x16xf32>
    %cst_265 = arith.constant dense<0xFF800000> : vector<4x8xf32>
    %579 = vector.multi_reduction <maximumf>, %578, %cst_265 [2] : vector<4x8x16xf32> to vector<4x8xf32>
    %580 = vector.shape_cast %579 : vector<4x8xf32> to vector<4x8x1xf32>
    %581 = vector.broadcast %580 : vector<4x8x1xf32> to vector<4x8x16xf32>
    %582 = arith.subf %578, %581 : vector<4x8x16xf32>
    %583 = math.exp %582 : vector<4x8x16xf32>
    %cst_266 = arith.constant dense<0.000000e+00> : vector<4x8xf32>
    %584 = vector.multi_reduction <add>, %583, %cst_266 [2] : vector<4x8x16xf32> to vector<4x8xf32>
    %585 = vector.shape_cast %584 : vector<4x8xf32> to vector<4x8x1xf32>
    %586 = tpu.reciprocal %585 {approx = true} : vector<4x8x1xf32> -> vector<4x8x1xf32>
    %587 = vector.broadcast %586 : vector<4x8x1xf32> to vector<4x8x16xf32>
    %588 = arith.mulf %583, %587 : vector<4x8x16xf32>
    %cst_267 = arith.constant dense<0.000000e+00> : vector<4x8x8xf32>
    %589 = tpu.matmul %588, %574, %cst_267 {dimension_numbers = #tpu.dot_dimension_numbers<[2], [1], [1], [2], [0, 0, 0, 1, 1, 2], [0], [0]>} : vector<4x8x16xf32>, vector<4x16x8xf32>, vector<4x8x8xf32> -> vector<4x8x8xf32>
    %590 = vector.extract_strided_slice %589 {offsets = [0, 0, 0], sizes = [1, 8, 8], strides = [1, 1, 1]} : vector<4x8x8xf32> to vector<1x8x8xf32>
    %591 = vector.shape_cast %590 : vector<1x8x8xf32> to vector<8x8xf32>
    %592 = vector.extract_strided_slice %589 {offsets = [1, 0, 0], sizes = [1, 8, 8], strides = [1, 1, 1]} : vector<4x8x8xf32> to vector<1x8x8xf32>
    %593 = vector.shape_cast %592 : vector<1x8x8xf32> to vector<8x8xf32>
    %594 = vector.extract_strided_slice %589 {offsets = [2, 0, 0], sizes = [1, 8, 8], strides = [1, 1, 1]} : vector<4x8x8xf32> to vector<1x8x8xf32>
    %595 = vector.shape_cast %594 : vector<1x8x8xf32> to vector<8x8xf32>
    %596 = vector.extract_strided_slice %589 {offsets = [3, 0, 0], sizes = [1, 8, 8], strides = [1, 1, 1]} : vector<4x8x8xf32> to vector<1x8x8xf32>
    %597 = vector.shape_cast %596 : vector<1x8x8xf32> to vector<8x8xf32>
    %598 = tpu.concatenate %591, %593, %595, %597 in 1 : vector<8x8xf32>, vector<8x8xf32>, vector<8x8xf32>, vector<8x8xf32> -> vector<8x32xf32>
    %c4_268 = arith.constant 4 : index
    %c0_269 = arith.constant 0 : index
    %c0_270 = arith.constant 0 : index
    %599 = vector.load %arg8[%c4_268, %c0_269, %c0_270] : memref<8x32x32xf32, #tpu.memory_space<vmem>>, vector<1x32x32xf32>
    %600 = vector.shape_cast %599 : vector<1x32x32xf32> to vector<32x32xf32>
    %cst_271 = arith.constant dense<0.000000e+00> : vector<8x32xf32>
    %601 = tpu.matmul %598, %600, %cst_271 {dimension_numbers = #tpu.dot_dimension_numbers<[1], [0], [0], [1], [0, 0, 1, 1], [], []>} : vector<8x32xf32>, vector<32x32xf32>, vector<8x32xf32> -> vector<8x32xf32>
    %602 = arith.addf %507, %601 : vector<8x32xf32>
    %603 = arith.mulf %602, %602 : vector<8x32xf32>
    %cst_272 = arith.constant dense<0.000000e+00> : vector<8xf32>
    %604 = vector.multi_reduction <add>, %603, %cst_272 [1] : vector<8x32xf32> to vector<8xf32>
    %605 = vector.shape_cast %604 : vector<8xf32> to vector<8x1xf32>
    %cst_273 = arith.constant 3.200000e+01 : f32
    %606 = vector.broadcast %cst_273 : f32 to vector<8x1xf32>
    %607 = arith.divf %605, %606 : vector<8x1xf32>
    %cst_274 = arith.constant 9.99999997E-7 : f32
    %608 = vector.broadcast %cst_274 : f32 to vector<8x1xf32>
    %609 = arith.addf %607, %608 : vector<8x1xf32>
    %610 = math.rsqrt %609 : vector<8x1xf32>
    %611 = vector.broadcast %610 : vector<8x1xf32> to vector<8x32xf32>
    %612 = arith.mulf %602, %611 : vector<8x32xf32>
    %c4_275 = arith.constant 4 : index
    %c0_276 = arith.constant 0 : index
    %c0_277 = arith.constant 0 : index
    %613 = vector.load %arg6[%c4_275, %c0_276, %c0_277] : memref<8x1x32xf32, #tpu.memory_space<vmem>>, vector<1x1x32xf32>
    %614 = vector.shape_cast %613 : vector<1x1x32xf32> to vector<1x32xf32>
    %615 = vector.broadcast %614 : vector<1x32xf32> to vector<8x32xf32>
    %616 = arith.mulf %612, %615 : vector<8x32xf32>
    %c4_278 = arith.constant 4 : index
    %c0_279 = arith.constant 0 : index
    %c0_280 = arith.constant 0 : index
    %617 = vector.load %arg9[%c4_278, %c0_279, %c0_280] : memref<8x32x128xf32, #tpu.memory_space<vmem>>, vector<1x32x128xf32>
    %618 = vector.shape_cast %617 : vector<1x32x128xf32> to vector<32x128xf32>
    %cst_281 = arith.constant dense<0.000000e+00> : vector<8x128xf32>
    %619 = tpu.matmul %616, %618, %cst_281 {dimension_numbers = #tpu.dot_dimension_numbers<[1], [0], [0], [1], [0, 0, 1, 1], [], []>} : vector<8x32xf32>, vector<32x128xf32>, vector<8x128xf32> -> vector<8x128xf32>
    %620 = vector.extract_strided_slice %619 {offsets = [0, 0], sizes = [8, 64], strides = [1, 1]} : vector<8x128xf32> to vector<8x64xf32>
    %621 = vector.extract_strided_slice %619 {offsets = [0, 64], sizes = [8, 64], strides = [1, 1]} : vector<8x128xf32> to vector<8x64xf32>
    %622 = arith.negf %620 : vector<8x64xf32>
    %623 = math.exp %622 : vector<8x64xf32>
    %cst_282 = arith.constant 1.000000e+00 : f32
    %624 = vector.broadcast %cst_282 : f32 to vector<8x64xf32>
    %625 = arith.addf %624, %623 : vector<8x64xf32>
    %626 = arith.divf %624, %625 : vector<8x64xf32>
    %627 = arith.mulf %620, %626 : vector<8x64xf32>
    %628 = arith.mulf %627, %621 : vector<8x64xf32>
    %c4_283 = arith.constant 4 : index
    %c0_284 = arith.constant 0 : index
    %c0_285 = arith.constant 0 : index
    %629 = vector.load %arg10[%c4_283, %c0_284, %c0_285] : memref<8x64x32xf32, #tpu.memory_space<vmem>>, vector<1x64x32xf32>
    %630 = vector.shape_cast %629 : vector<1x64x32xf32> to vector<64x32xf32>
    %cst_286 = arith.constant dense<0.000000e+00> : vector<8x32xf32>
    %631 = tpu.matmul %628, %630, %cst_286 {dimension_numbers = #tpu.dot_dimension_numbers<[1], [0], [0], [1], [0, 0, 1, 1], [], []>} : vector<8x64xf32>, vector<64x32xf32>, vector<8x32xf32> -> vector<8x32xf32>
    %632 = arith.addf %602, %631 : vector<8x32xf32>
    %633 = arith.mulf %632, %632 : vector<8x32xf32>
    %cst_287 = arith.constant dense<0.000000e+00> : vector<8xf32>
    %634 = vector.multi_reduction <add>, %633, %cst_287 [1] : vector<8x32xf32> to vector<8xf32>
    %635 = vector.shape_cast %634 : vector<8xf32> to vector<8x1xf32>
    %cst_288 = arith.constant 3.200000e+01 : f32
    %636 = vector.broadcast %cst_288 : f32 to vector<8x1xf32>
    %637 = arith.divf %635, %636 : vector<8x1xf32>
    %cst_289 = arith.constant 9.99999997E-7 : f32
    %638 = vector.broadcast %cst_289 : f32 to vector<8x1xf32>
    %639 = arith.addf %637, %638 : vector<8x1xf32>
    %640 = math.rsqrt %639 : vector<8x1xf32>
    %641 = vector.broadcast %640 : vector<8x1xf32> to vector<8x32xf32>
    %642 = arith.mulf %632, %641 : vector<8x32xf32>
    %c5 = arith.constant 5 : index
    %c0_290 = arith.constant 0 : index
    %c0_291 = arith.constant 0 : index
    %643 = vector.load %arg5[%c5, %c0_290, %c0_291] : memref<8x1x32xf32, #tpu.memory_space<vmem>>, vector<1x1x32xf32>
    %644 = vector.shape_cast %643 : vector<1x1x32xf32> to vector<1x32xf32>
    %645 = vector.broadcast %644 : vector<1x32xf32> to vector<8x32xf32>
    %646 = arith.mulf %642, %645 : vector<8x32xf32>
    %c5_292 = arith.constant 5 : index
    %c0_293 = arith.constant 0 : index
    %c0_294 = arith.constant 0 : index
    %647 = vector.load %arg7[%c5_292, %c0_293, %c0_294] : memref<8x32x160xf32, #tpu.memory_space<vmem>>, vector<1x32x160xf32>
    %648 = vector.shape_cast %647 : vector<1x32x160xf32> to vector<32x160xf32>
    %cst_295 = arith.constant dense<0.000000e+00> : vector<8x160xf32>
    %649 = tpu.matmul %646, %648, %cst_295 {dimension_numbers = #tpu.dot_dimension_numbers<[1], [0], [0], [1], [0, 0, 1, 1], [], []>} : vector<8x32xf32>, vector<32x160xf32>, vector<8x160xf32> -> vector<8x160xf32>
    %650 = vector.extract_strided_slice %649 {offsets = [0, 0], sizes = [8, 32], strides = [1, 1]} : vector<8x160xf32> to vector<8x32xf32>
    %651 = vector.extract_strided_slice %649 {offsets = [0, 32], sizes = [8, 32], strides = [1, 1]} : vector<8x160xf32> to vector<8x32xf32>
    %652 = vector.extract_strided_slice %649 {offsets = [0, 64], sizes = [8, 32], strides = [1, 1]} : vector<8x160xf32> to vector<8x32xf32>
    %653 = vector.extract_strided_slice %649 {offsets = [0, 96], sizes = [8, 32], strides = [1, 1]} : vector<8x160xf32> to vector<8x32xf32>
    %654 = vector.extract_strided_slice %649 {offsets = [0, 128], sizes = [8, 32], strides = [1, 1]} : vector<8x160xf32> to vector<8x32xf32>
    %655 = arith.mulf %650, %3 : vector<8x32xf32>
    %656 = arith.mulf %653, %5 : vector<8x32xf32>
    %657 = arith.addf %655, %656 : vector<8x32xf32>
    %658 = arith.mulf %651, %3 : vector<8x32xf32>
    %659 = arith.mulf %654, %5 : vector<8x32xf32>
    %660 = arith.addf %658, %659 : vector<8x32xf32>
    %c0_296 = arith.constant 0 : index
    %c5_297 = arith.constant 5 : index
    %c0_298 = arith.constant 0 : index
    %c0_299 = arith.constant 0 : index
    %c0_300 = arith.constant 0 : index
    %661 = vector.load %arg13[%c0_296, %c5_297, %c0_298, %c0_299, %c0_300] : memref<1x8x2x8x32xf32, #tpu.memory_space<vmem>>, vector<1x1x1x8x32xf32>
    %662 = vector.shape_cast %661 : vector<1x1x1x8x32xf32> to vector<8x32xf32>
    %663 = vector.shape_cast %660 : vector<8x32xf32> to vector<1x1x1x8x32xf32>
    tpu.vector_store %arg13[%c0_296, %c5_297, %c0_298, %c0_299, %c0_300], %663 {strides = array<i32>} : memref<1x8x2x8x32xf32, #tpu.memory_space<vmem>>, vector<1x1x1x8x32xf32>,
    %c0_301 = arith.constant 0 : index
    %c5_302 = arith.constant 5 : index
    %c1_303 = arith.constant 1 : index
    %c0_304 = arith.constant 0 : index
    %c0_305 = arith.constant 0 : index
    %664 = vector.load %arg13[%c0_301, %c5_302, %c1_303, %c0_304, %c0_305] : memref<1x8x2x8x32xf32, #tpu.memory_space<vmem>>, vector<1x1x1x8x32xf32>
    %665 = vector.shape_cast %664 : vector<1x1x1x8x32xf32> to vector<8x32xf32>
    %666 = vector.shape_cast %652 : vector<8x32xf32> to vector<1x1x1x8x32xf32>
    tpu.vector_store %arg13[%c0_301, %c5_302, %c1_303, %c0_304, %c0_305], %666 {strides = array<i32>} : memref<1x8x2x8x32xf32, #tpu.memory_space<vmem>>, vector<1x1x1x8x32xf32>,
    %667 = vector.extract_strided_slice %657 {offsets = [0, 0], sizes = [8, 8], strides = [1, 1]} : vector<8x32xf32> to vector<8x8xf32>
    %668 = vector.extract_strided_slice %657 {offsets = [0, 8], sizes = [8, 8], strides = [1, 1]} : vector<8x32xf32> to vector<8x8xf32>
    %669 = vector.extract_strided_slice %657 {offsets = [0, 16], sizes = [8, 8], strides = [1, 1]} : vector<8x32xf32> to vector<8x8xf32>
    %670 = vector.extract_strided_slice %657 {offsets = [0, 24], sizes = [8, 8], strides = [1, 1]} : vector<8x32xf32> to vector<8x8xf32>
    %671 = vector.shape_cast %667 : vector<8x8xf32> to vector<1x8x8xf32>
    %672 = vector.shape_cast %668 : vector<8x8xf32> to vector<1x8x8xf32>
    %673 = vector.shape_cast %669 : vector<8x8xf32> to vector<1x8x8xf32>
    %674 = vector.shape_cast %670 : vector<8x8xf32> to vector<1x8x8xf32>
    %675 = tpu.concatenate %671, %672, %673, %674 in 0 : vector<1x8x8xf32>, vector<1x8x8xf32>, vector<1x8x8xf32>, vector<1x8x8xf32> -> vector<4x8x8xf32>
    %676 = vector.extract_strided_slice %660 {offsets = [0, 0], sizes = [8, 8], strides = [1, 1]} : vector<8x32xf32> to vector<8x8xf32>
    %677 = vector.extract_strided_slice %660 {offsets = [0, 8], sizes = [8, 8], strides = [1, 1]} : vector<8x32xf32> to vector<8x8xf32>
    %678 = vector.extract_strided_slice %660 {offsets = [0, 16], sizes = [8, 8], strides = [1, 1]} : vector<8x32xf32> to vector<8x8xf32>
    %679 = vector.extract_strided_slice %660 {offsets = [0, 24], sizes = [8, 8], strides = [1, 1]} : vector<8x32xf32> to vector<8x8xf32>
    %680 = vector.shape_cast %676 : vector<8x8xf32> to vector<1x8x8xf32>
    %681 = vector.shape_cast %677 : vector<8x8xf32> to vector<1x8x8xf32>
    %682 = vector.shape_cast %678 : vector<8x8xf32> to vector<1x8x8xf32>
    %683 = vector.shape_cast %679 : vector<8x8xf32> to vector<1x8x8xf32>
    %684 = tpu.concatenate %680, %681, %682, %683 in 0 : vector<1x8x8xf32>, vector<1x8x8xf32>, vector<1x8x8xf32>, vector<1x8x8xf32> -> vector<4x8x8xf32>
    %685 = vector.extract_strided_slice %652 {offsets = [0, 0], sizes = [8, 8], strides = [1, 1]} : vector<8x32xf32> to vector<8x8xf32>
    %686 = vector.extract_strided_slice %652 {offsets = [0, 8], sizes = [8, 8], strides = [1, 1]} : vector<8x32xf32> to vector<8x8xf32>
    %687 = vector.extract_strided_slice %652 {offsets = [0, 16], sizes = [8, 8], strides = [1, 1]} : vector<8x32xf32> to vector<8x8xf32>
    %688 = vector.extract_strided_slice %652 {offsets = [0, 24], sizes = [8, 8], strides = [1, 1]} : vector<8x32xf32> to vector<8x8xf32>
    %689 = vector.shape_cast %685 : vector<8x8xf32> to vector<1x8x8xf32>
    %690 = vector.shape_cast %686 : vector<8x8xf32> to vector<1x8x8xf32>
    %691 = vector.shape_cast %687 : vector<8x8xf32> to vector<1x8x8xf32>
    %692 = vector.shape_cast %688 : vector<8x8xf32> to vector<1x8x8xf32>
    %693 = tpu.concatenate %689, %690, %691, %692 in 0 : vector<1x8x8xf32>, vector<1x8x8xf32>, vector<1x8x8xf32>, vector<1x8x8xf32> -> vector<4x8x8xf32>
    %c0_306 = arith.constant 0 : index
    %c5_307 = arith.constant 5 : index
    %c0_308 = arith.constant 0 : index
    %c0_309 = arith.constant 0 : index
    %c0_310 = arith.constant 0 : index
    %c0_311 = arith.constant 0 : index
    %694 = vector.load %arg11[%c0_306, %c5_307, %c0_308, %c0_309, %c0_310, %c0_311] : memref<1x8x2x4x8x8xf32, #tpu.memory_space<vmem>>, vector<1x1x1x4x8x8xf32>
    %695 = vector.shape_cast %694 : vector<1x1x1x4x8x8xf32> to vector<4x8x8xf32>
    %696 = tpu.concatenate %695, %684 in 1 : vector<4x8x8xf32>, vector<4x8x8xf32> -> vector<4x16x8xf32>
    %c0_312 = arith.constant 0 : index
    %c5_313 = arith.constant 5 : index
    %c1_314 = arith.constant 1 : index
    %c0_315 = arith.constant 0 : index
    %c0_316 = arith.constant 0 : index
    %c0_317 = arith.constant 0 : index
    %697 = vector.load %arg11[%c0_312, %c5_313, %c1_314, %c0_315, %c0_316, %c0_317] : memref<1x8x2x4x8x8xf32, #tpu.memory_space<vmem>>, vector<1x1x1x4x8x8xf32>
    %698 = vector.shape_cast %697 : vector<1x1x1x4x8x8xf32> to vector<4x8x8xf32>
    %699 = tpu.concatenate %698, %693 in 1 : vector<4x8x8xf32>, vector<4x8x8xf32> -> vector<4x16x8xf32>
    %cst_318 = arith.constant dense<0.000000e+00> : vector<4x8x16xf32>
    %700 = tpu.matmul %675, %696, %cst_318 {dimension_numbers = #tpu.dot_dimension_numbers<[2], [2], [1], [1], [0, 0, 0, 1, 1, 1], [0], [0]>} : vector<4x8x8xf32>, vector<4x16x8xf32>, vector<4x8x16xf32> -> vector<4x8x16xf32>
    %cst_319 = arith.constant 0.353553385 : f32
    %701 = vector.broadcast %cst_319 : f32 to vector<4x8x16xf32>
    %702 = arith.mulf %700, %701 : vector<4x8x16xf32>
    %703 = arith.addf %702, %7 : vector<4x8x16xf32>
    %cst_320 = arith.constant dense<0xFF800000> : vector<4x8xf32>
    %704 = vector.multi_reduction <maximumf>, %703, %cst_320 [2] : vector<4x8x16xf32> to vector<4x8xf32>
    %705 = vector.shape_cast %704 : vector<4x8xf32> to vector<4x8x1xf32>
    %706 = vector.broadcast %705 : vector<4x8x1xf32> to vector<4x8x16xf32>
    %707 = arith.subf %703, %706 : vector<4x8x16xf32>
    %708 = math.exp %707 : vector<4x8x16xf32>
    %cst_321 = arith.constant dense<0.000000e+00> : vector<4x8xf32>
    %709 = vector.multi_reduction <add>, %708, %cst_321 [2] : vector<4x8x16xf32> to vector<4x8xf32>
    %710 = vector.shape_cast %709 : vector<4x8xf32> to vector<4x8x1xf32>
    %711 = tpu.reciprocal %710 {approx = true} : vector<4x8x1xf32> -> vector<4x8x1xf32>
    %712 = vector.broadcast %711 : vector<4x8x1xf32> to vector<4x8x16xf32>
    %713 = arith.mulf %708, %712 : vector<4x8x16xf32>
    %cst_322 = arith.constant dense<0.000000e+00> : vector<4x8x8xf32>
    %714 = tpu.matmul %713, %699, %cst_322 {dimension_numbers = #tpu.dot_dimension_numbers<[2], [1], [1], [2], [0, 0, 0, 1, 1, 2], [0], [0]>} : vector<4x8x16xf32>, vector<4x16x8xf32>, vector<4x8x8xf32> -> vector<4x8x8xf32>
    %715 = vector.extract_strided_slice %714 {offsets = [0, 0, 0], sizes = [1, 8, 8], strides = [1, 1, 1]} : vector<4x8x8xf32> to vector<1x8x8xf32>
    %716 = vector.shape_cast %715 : vector<1x8x8xf32> to vector<8x8xf32>
    %717 = vector.extract_strided_slice %714 {offsets = [1, 0, 0], sizes = [1, 8, 8], strides = [1, 1, 1]} : vector<4x8x8xf32> to vector<1x8x8xf32>
    %718 = vector.shape_cast %717 : vector<1x8x8xf32> to vector<8x8xf32>
    %719 = vector.extract_strided_slice %714 {offsets = [2, 0, 0], sizes = [1, 8, 8], strides = [1, 1, 1]} : vector<4x8x8xf32> to vector<1x8x8xf32>
    %720 = vector.shape_cast %719 : vector<1x8x8xf32> to vector<8x8xf32>
    %721 = vector.extract_strided_slice %714 {offsets = [3, 0, 0], sizes = [1, 8, 8], strides = [1, 1, 1]} : vector<4x8x8xf32> to vector<1x8x8xf32>
    %722 = vector.shape_cast %721 : vector<1x8x8xf32> to vector<8x8xf32>
    %723 = tpu.concatenate %716, %718, %720, %722 in 1 : vector<8x8xf32>, vector<8x8xf32>, vector<8x8xf32>, vector<8x8xf32> -> vector<8x32xf32>
    %c5_323 = arith.constant 5 : index
    %c0_324 = arith.constant 0 : index
    %c0_325 = arith.constant 0 : index
    %724 = vector.load %arg8[%c5_323, %c0_324, %c0_325] : memref<8x32x32xf32, #tpu.memory_space<vmem>>, vector<1x32x32xf32>
    %725 = vector.shape_cast %724 : vector<1x32x32xf32> to vector<32x32xf32>
    %cst_326 = arith.constant dense<0.000000e+00> : vector<8x32xf32>
    %726 = tpu.matmul %723, %725, %cst_326 {dimension_numbers = #tpu.dot_dimension_numbers<[1], [0], [0], [1], [0, 0, 1, 1], [], []>} : vector<8x32xf32>, vector<32x32xf32>, vector<8x32xf32> -> vector<8x32xf32>
    %727 = arith.addf %632, %726 : vector<8x32xf32>
    %728 = arith.mulf %727, %727 : vector<8x32xf32>
    %cst_327 = arith.constant dense<0.000000e+00> : vector<8xf32>
    %729 = vector.multi_reduction <add>, %728, %cst_327 [1] : vector<8x32xf32> to vector<8xf32>
    %730 = vector.shape_cast %729 : vector<8xf32> to vector<8x1xf32>
    %cst_328 = arith.constant 3.200000e+01 : f32
    %731 = vector.broadcast %cst_328 : f32 to vector<8x1xf32>
    %732 = arith.divf %730, %731 : vector<8x1xf32>
    %cst_329 = arith.constant 9.99999997E-7 : f32
    %733 = vector.broadcast %cst_329 : f32 to vector<8x1xf32>
    %734 = arith.addf %732, %733 : vector<8x1xf32>
    %735 = math.rsqrt %734 : vector<8x1xf32>
    %736 = vector.broadcast %735 : vector<8x1xf32> to vector<8x32xf32>
    %737 = arith.mulf %727, %736 : vector<8x32xf32>
    %c5_330 = arith.constant 5 : index
    %c0_331 = arith.constant 0 : index
    %c0_332 = arith.constant 0 : index
    %738 = vector.load %arg6[%c5_330, %c0_331, %c0_332] : memref<8x1x32xf32, #tpu.memory_space<vmem>>, vector<1x1x32xf32>
    %739 = vector.shape_cast %738 : vector<1x1x32xf32> to vector<1x32xf32>
    %740 = vector.broadcast %739 : vector<1x32xf32> to vector<8x32xf32>
    %741 = arith.mulf %737, %740 : vector<8x32xf32>
    %c5_333 = arith.constant 5 : index
    %c0_334 = arith.constant 0 : index
    %c0_335 = arith.constant 0 : index
    %742 = vector.load %arg9[%c5_333, %c0_334, %c0_335] : memref<8x32x128xf32, #tpu.memory_space<vmem>>, vector<1x32x128xf32>
    %743 = vector.shape_cast %742 : vector<1x32x128xf32> to vector<32x128xf32>
    %cst_336 = arith.constant dense<0.000000e+00> : vector<8x128xf32>
    %744 = tpu.matmul %741, %743, %cst_336 {dimension_numbers = #tpu.dot_dimension_numbers<[1], [0], [0], [1], [0, 0, 1, 1], [], []>} : vector<8x32xf32>, vector<32x128xf32>, vector<8x128xf32> -> vector<8x128xf32>
    %745 = vector.extract_strided_slice %744 {offsets = [0, 0], sizes = [8, 64], strides = [1, 1]} : vector<8x128xf32> to vector<8x64xf32>
    %746 = vector.extract_strided_slice %744 {offsets = [0, 64], sizes = [8, 64], strides = [1, 1]} : vector<8x128xf32> to vector<8x64xf32>
    %747 = arith.negf %745 : vector<8x64xf32>
    %748 = math.exp %747 : vector<8x64xf32>
    %cst_337 = arith.constant 1.000000e+00 : f32
    %749 = vector.broadcast %cst_337 : f32 to vector<8x64xf32>
    %750 = arith.addf %749, %748 : vector<8x64xf32>
    %751 = arith.divf %749, %750 : vector<8x64xf32>
    %752 = arith.mulf %745, %751 : vector<8x64xf32>
    %753 = arith.mulf %752, %746 : vector<8x64xf32>
    %c5_338 = arith.constant 5 : index
    %c0_339 = arith.constant 0 : index
    %c0_340 = arith.constant 0 : index
    %754 = vector.load %arg10[%c5_338, %c0_339, %c0_340] : memref<8x64x32xf32, #tpu.memory_space<vmem>>, vector<1x64x32xf32>
    %755 = vector.shape_cast %754 : vector<1x64x32xf32> to vector<64x32xf32>
    %cst_341 = arith.constant dense<0.000000e+00> : vector<8x32xf32>
    %756 = tpu.matmul %753, %755, %cst_341 {dimension_numbers = #tpu.dot_dimension_numbers<[1], [0], [0], [1], [0, 0, 1, 1], [], []>} : vector<8x64xf32>, vector<64x32xf32>, vector<8x32xf32> -> vector<8x32xf32>
    %757 = arith.addf %727, %756 : vector<8x32xf32>
    %758 = arith.mulf %757, %757 : vector<8x32xf32>
    %cst_342 = arith.constant dense<0.000000e+00> : vector<8xf32>
    %759 = vector.multi_reduction <add>, %758, %cst_342 [1] : vector<8x32xf32> to vector<8xf32>
    %760 = vector.shape_cast %759 : vector<8xf32> to vector<8x1xf32>
    %cst_343 = arith.constant 3.200000e+01 : f32
    %761 = vector.broadcast %cst_343 : f32 to vector<8x1xf32>
    %762 = arith.divf %760, %761 : vector<8x1xf32>
    %cst_344 = arith.constant 9.99999997E-7 : f32
    %763 = vector.broadcast %cst_344 : f32 to vector<8x1xf32>
    %764 = arith.addf %762, %763 : vector<8x1xf32>
    %765 = math.rsqrt %764 : vector<8x1xf32>
    %766 = vector.broadcast %765 : vector<8x1xf32> to vector<8x32xf32>
    %767 = arith.mulf %757, %766 : vector<8x32xf32>
    %c6 = arith.constant 6 : index
    %c0_345 = arith.constant 0 : index
    %c0_346 = arith.constant 0 : index
    %768 = vector.load %arg5[%c6, %c0_345, %c0_346] : memref<8x1x32xf32, #tpu.memory_space<vmem>>, vector<1x1x32xf32>
    %769 = vector.shape_cast %768 : vector<1x1x32xf32> to vector<1x32xf32>
    %770 = vector.broadcast %769 : vector<1x32xf32> to vector<8x32xf32>
    %771 = arith.mulf %767, %770 : vector<8x32xf32>
    %c6_347 = arith.constant 6 : index
    %c0_348 = arith.constant 0 : index
    %c0_349 = arith.constant 0 : index
    %772 = vector.load %arg7[%c6_347, %c0_348, %c0_349] : memref<8x32x160xf32, #tpu.memory_space<vmem>>, vector<1x32x160xf32>
    %773 = vector.shape_cast %772 : vector<1x32x160xf32> to vector<32x160xf32>
    %cst_350 = arith.constant dense<0.000000e+00> : vector<8x160xf32>
    %774 = tpu.matmul %771, %773, %cst_350 {dimension_numbers = #tpu.dot_dimension_numbers<[1], [0], [0], [1], [0, 0, 1, 1], [], []>} : vector<8x32xf32>, vector<32x160xf32>, vector<8x160xf32> -> vector<8x160xf32>
    %775 = vector.extract_strided_slice %774 {offsets = [0, 0], sizes = [8, 32], strides = [1, 1]} : vector<8x160xf32> to vector<8x32xf32>
    %776 = vector.extract_strided_slice %774 {offsets = [0, 32], sizes = [8, 32], strides = [1, 1]} : vector<8x160xf32> to vector<8x32xf32>
    %777 = vector.extract_strided_slice %774 {offsets = [0, 64], sizes = [8, 32], strides = [1, 1]} : vector<8x160xf32> to vector<8x32xf32>
    %778 = vector.extract_strided_slice %774 {offsets = [0, 96], sizes = [8, 32], strides = [1, 1]} : vector<8x160xf32> to vector<8x32xf32>
    %779 = vector.extract_strided_slice %774 {offsets = [0, 128], sizes = [8, 32], strides = [1, 1]} : vector<8x160xf32> to vector<8x32xf32>
    %780 = arith.mulf %775, %3 : vector<8x32xf32>
    %781 = arith.mulf %778, %5 : vector<8x32xf32>
    %782 = arith.addf %780, %781 : vector<8x32xf32>
    %783 = arith.mulf %776, %3 : vector<8x32xf32>
    %784 = arith.mulf %779, %5 : vector<8x32xf32>
    %785 = arith.addf %783, %784 : vector<8x32xf32>
    %c0_351 = arith.constant 0 : index
    %c6_352 = arith.constant 6 : index
    %c0_353 = arith.constant 0 : index
    %c0_354 = arith.constant 0 : index
    %c0_355 = arith.constant 0 : index
    %786 = vector.load %arg13[%c0_351, %c6_352, %c0_353, %c0_354, %c0_355] : memref<1x8x2x8x32xf32, #tpu.memory_space<vmem>>, vector<1x1x1x8x32xf32>
    %787 = vector.shape_cast %786 : vector<1x1x1x8x32xf32> to vector<8x32xf32>
    %788 = vector.shape_cast %785 : vector<8x32xf32> to vector<1x1x1x8x32xf32>
    tpu.vector_store %arg13[%c0_351, %c6_352, %c0_353, %c0_354, %c0_355], %788 {strides = array<i32>} : memref<1x8x2x8x32xf32, #tpu.memory_space<vmem>>, vector<1x1x1x8x32xf32>,
    %c0_356 = arith.constant 0 : index
    %c6_357 = arith.constant 6 : index
    %c1_358 = arith.constant 1 : index
    %c0_359 = arith.constant 0 : index
    %c0_360 = arith.constant 0 : index
    %789 = vector.load %arg13[%c0_356, %c6_357, %c1_358, %c0_359, %c0_360] : memref<1x8x2x8x32xf32, #tpu.memory_space<vmem>>, vector<1x1x1x8x32xf32>
    %790 = vector.shape_cast %789 : vector<1x1x1x8x32xf32> to vector<8x32xf32>
    %791 = vector.shape_cast %777 : vector<8x32xf32> to vector<1x1x1x8x32xf32>
    tpu.vector_store %arg13[%c0_356, %c6_357, %c1_358, %c0_359, %c0_360], %791 {strides = array<i32>} : memref<1x8x2x8x32xf32, #tpu.memory_space<vmem>>, vector<1x1x1x8x32xf32>,
    %792 = vector.extract_strided_slice %782 {offsets = [0, 0], sizes = [8, 8], strides = [1, 1]} : vector<8x32xf32> to vector<8x8xf32>
    %793 = vector.extract_strided_slice %782 {offsets = [0, 8], sizes = [8, 8], strides = [1, 1]} : vector<8x32xf32> to vector<8x8xf32>
    %794 = vector.extract_strided_slice %782 {offsets = [0, 16], sizes = [8, 8], strides = [1, 1]} : vector<8x32xf32> to vector<8x8xf32>
    %795 = vector.extract_strided_slice %782 {offsets = [0, 24], sizes = [8, 8], strides = [1, 1]} : vector<8x32xf32> to vector<8x8xf32>
    %796 = vector.shape_cast %792 : vector<8x8xf32> to vector<1x8x8xf32>
    %797 = vector.shape_cast %793 : vector<8x8xf32> to vector<1x8x8xf32>
    %798 = vector.shape_cast %794 : vector<8x8xf32> to vector<1x8x8xf32>
    %799 = vector.shape_cast %795 : vector<8x8xf32> to vector<1x8x8xf32>
    %800 = tpu.concatenate %796, %797, %798, %799 in 0 : vector<1x8x8xf32>, vector<1x8x8xf32>, vector<1x8x8xf32>, vector<1x8x8xf32> -> vector<4x8x8xf32>
    %801 = vector.extract_strided_slice %785 {offsets = [0, 0], sizes = [8, 8], strides = [1, 1]} : vector<8x32xf32> to vector<8x8xf32>
    %802 = vector.extract_strided_slice %785 {offsets = [0, 8], sizes = [8, 8], strides = [1, 1]} : vector<8x32xf32> to vector<8x8xf32>
    %803 = vector.extract_strided_slice %785 {offsets = [0, 16], sizes = [8, 8], strides = [1, 1]} : vector<8x32xf32> to vector<8x8xf32>
    %804 = vector.extract_strided_slice %785 {offsets = [0, 24], sizes = [8, 8], strides = [1, 1]} : vector<8x32xf32> to vector<8x8xf32>
    %805 = vector.shape_cast %801 : vector<8x8xf32> to vector<1x8x8xf32>
    %806 = vector.shape_cast %802 : vector<8x8xf32> to vector<1x8x8xf32>
    %807 = vector.shape_cast %803 : vector<8x8xf32> to vector<1x8x8xf32>
    %808 = vector.shape_cast %804 : vector<8x8xf32> to vector<1x8x8xf32>
    %809 = tpu.concatenate %805, %806, %807, %808 in 0 : vector<1x8x8xf32>, vector<1x8x8xf32>, vector<1x8x8xf32>, vector<1x8x8xf32> -> vector<4x8x8xf32>
    %810 = vector.extract_strided_slice %777 {offsets = [0, 0], sizes = [8, 8], strides = [1, 1]} : vector<8x32xf32> to vector<8x8xf32>
    %811 = vector.extract_strided_slice %777 {offsets = [0, 8], sizes = [8, 8], strides = [1, 1]} : vector<8x32xf32> to vector<8x8xf32>
    %812 = vector.extract_strided_slice %777 {offsets = [0, 16], sizes = [8, 8], strides = [1, 1]} : vector<8x32xf32> to vector<8x8xf32>
    %813 = vector.extract_strided_slice %777 {offsets = [0, 24], sizes = [8, 8], strides = [1, 1]} : vector<8x32xf32> to vector<8x8xf32>
    %814 = vector.shape_cast %810 : vector<8x8xf32> to vector<1x8x8xf32>
    %815 = vector.shape_cast %811 : vector<8x8xf32> to vector<1x8x8xf32>
    %816 = vector.shape_cast %812 : vector<8x8xf32> to vector<1x8x8xf32>
    %817 = vector.shape_cast %813 : vector<8x8xf32> to vector<1x8x8xf32>
    %818 = tpu.concatenate %814, %815, %816, %817 in 0 : vector<1x8x8xf32>, vector<1x8x8xf32>, vector<1x8x8xf32>, vector<1x8x8xf32> -> vector<4x8x8xf32>
    %c0_361 = arith.constant 0 : index
    %c6_362 = arith.constant 6 : index
    %c0_363 = arith.constant 0 : index
    %c0_364 = arith.constant 0 : index
    %c0_365 = arith.constant 0 : index
    %c0_366 = arith.constant 0 : index
    %819 = vector.load %arg11[%c0_361, %c6_362, %c0_363, %c0_364, %c0_365, %c0_366] : memref<1x8x2x4x8x8xf32, #tpu.memory_space<vmem>>, vector<1x1x1x4x8x8xf32>
    %820 = vector.shape_cast %819 : vector<1x1x1x4x8x8xf32> to vector<4x8x8xf32>
    %821 = tpu.concatenate %820, %809 in 1 : vector<4x8x8xf32>, vector<4x8x8xf32> -> vector<4x16x8xf32>
    %c0_367 = arith.constant 0 : index
    %c6_368 = arith.constant 6 : index
    %c1_369 = arith.constant 1 : index
    %c0_370 = arith.constant 0 : index
    %c0_371 = arith.constant 0 : index
    %c0_372 = arith.constant 0 : index
    %822 = vector.load %arg11[%c0_367, %c6_368, %c1_369, %c0_370, %c0_371, %c0_372] : memref<1x8x2x4x8x8xf32, #tpu.memory_space<vmem>>, vector<1x1x1x4x8x8xf32>
    %823 = vector.shape_cast %822 : vector<1x1x1x4x8x8xf32> to vector<4x8x8xf32>
    %824 = tpu.concatenate %823, %818 in 1 : vector<4x8x8xf32>, vector<4x8x8xf32> -> vector<4x16x8xf32>
    %cst_373 = arith.constant dense<0.000000e+00> : vector<4x8x16xf32>
    %825 = tpu.matmul %800, %821, %cst_373 {dimension_numbers = #tpu.dot_dimension_numbers<[2], [2], [1], [1], [0, 0, 0, 1, 1, 1], [0], [0]>} : vector<4x8x8xf32>, vector<4x16x8xf32>, vector<4x8x16xf32> -> vector<4x8x16xf32>
    %cst_374 = arith.constant 0.353553385 : f32
    %826 = vector.broadcast %cst_374 : f32 to vector<4x8x16xf32>
    %827 = arith.mulf %825, %826 : vector<4x8x16xf32>
    %828 = arith.addf %827, %7 : vector<4x8x16xf32>
    %cst_375 = arith.constant dense<0xFF800000> : vector<4x8xf32>
    %829 = vector.multi_reduction <maximumf>, %828, %cst_375 [2] : vector<4x8x16xf32> to vector<4x8xf32>
    %830 = vector.shape_cast %829 : vector<4x8xf32> to vector<4x8x1xf32>
    %831 = vector.broadcast %830 : vector<4x8x1xf32> to vector<4x8x16xf32>
    %832 = arith.subf %828, %831 : vector<4x8x16xf32>
    %833 = math.exp %832 : vector<4x8x16xf32>
    %cst_376 = arith.constant dense<0.000000e+00> : vector<4x8xf32>
    %834 = vector.multi_reduction <add>, %833, %cst_376 [2] : vector<4x8x16xf32> to vector<4x8xf32>
    %835 = vector.shape_cast %834 : vector<4x8xf32> to vector<4x8x1xf32>
    %836 = tpu.reciprocal %835 {approx = true} : vector<4x8x1xf32> -> vector<4x8x1xf32>
    %837 = vector.broadcast %836 : vector<4x8x1xf32> to vector<4x8x16xf32>
    %838 = arith.mulf %833, %837 : vector<4x8x16xf32>
    %cst_377 = arith.constant dense<0.000000e+00> : vector<4x8x8xf32>
    %839 = tpu.matmul %838, %824, %cst_377 {dimension_numbers = #tpu.dot_dimension_numbers<[2], [1], [1], [2], [0, 0, 0, 1, 1, 2], [0], [0]>} : vector<4x8x16xf32>, vector<4x16x8xf32>, vector<4x8x8xf32> -> vector<4x8x8xf32>
    %840 = vector.extract_strided_slice %839 {offsets = [0, 0, 0], sizes = [1, 8, 8], strides = [1, 1, 1]} : vector<4x8x8xf32> to vector<1x8x8xf32>
    %841 = vector.shape_cast %840 : vector<1x8x8xf32> to vector<8x8xf32>
    %842 = vector.extract_strided_slice %839 {offsets = [1, 0, 0], sizes = [1, 8, 8], strides = [1, 1, 1]} : vector<4x8x8xf32> to vector<1x8x8xf32>
    %843 = vector.shape_cast %842 : vector<1x8x8xf32> to vector<8x8xf32>
    %844 = vector.extract_strided_slice %839 {offsets = [2, 0, 0], sizes = [1, 8, 8], strides = [1, 1, 1]} : vector<4x8x8xf32> to vector<1x8x8xf32>
    %845 = vector.shape_cast %844 : vector<1x8x8xf32> to vector<8x8xf32>
    %846 = vector.extract_strided_slice %839 {offsets = [3, 0, 0], sizes = [1, 8, 8], strides = [1, 1, 1]} : vector<4x8x8xf32> to vector<1x8x8xf32>
    %847 = vector.shape_cast %846 : vector<1x8x8xf32> to vector<8x8xf32>
    %848 = tpu.concatenate %841, %843, %845, %847 in 1 : vector<8x8xf32>, vector<8x8xf32>, vector<8x8xf32>, vector<8x8xf32> -> vector<8x32xf32>
    %c6_378 = arith.constant 6 : index
    %c0_379 = arith.constant 0 : index
    %c0_380 = arith.constant 0 : index
    %849 = vector.load %arg8[%c6_378, %c0_379, %c0_380] : memref<8x32x32xf32, #tpu.memory_space<vmem>>, vector<1x32x32xf32>
    %850 = vector.shape_cast %849 : vector<1x32x32xf32> to vector<32x32xf32>
    %cst_381 = arith.constant dense<0.000000e+00> : vector<8x32xf32>
    %851 = tpu.matmul %848, %850, %cst_381 {dimension_numbers = #tpu.dot_dimension_numbers<[1], [0], [0], [1], [0, 0, 1, 1], [], []>} : vector<8x32xf32>, vector<32x32xf32>, vector<8x32xf32> -> vector<8x32xf32>
    %852 = arith.addf %757, %851 : vector<8x32xf32>
    %853 = arith.mulf %852, %852 : vector<8x32xf32>
    %cst_382 = arith.constant dense<0.000000e+00> : vector<8xf32>
    %854 = vector.multi_reduction <add>, %853, %cst_382 [1] : vector<8x32xf32> to vector<8xf32>
    %855 = vector.shape_cast %854 : vector<8xf32> to vector<8x1xf32>
    %cst_383 = arith.constant 3.200000e+01 : f32
    %856 = vector.broadcast %cst_383 : f32 to vector<8x1xf32>
    %857 = arith.divf %855, %856 : vector<8x1xf32>
    %cst_384 = arith.constant 9.99999997E-7 : f32
    %858 = vector.broadcast %cst_384 : f32 to vector<8x1xf32>
    %859 = arith.addf %857, %858 : vector<8x1xf32>
    %860 = math.rsqrt %859 : vector<8x1xf32>
    %861 = vector.broadcast %860 : vector<8x1xf32> to vector<8x32xf32>
    %862 = arith.mulf %852, %861 : vector<8x32xf32>
    %c6_385 = arith.constant 6 : index
    %c0_386 = arith.constant 0 : index
    %c0_387 = arith.constant 0 : index
    %863 = vector.load %arg6[%c6_385, %c0_386, %c0_387] : memref<8x1x32xf32, #tpu.memory_space<vmem>>, vector<1x1x32xf32>
    %864 = vector.shape_cast %863 : vector<1x1x32xf32> to vector<1x32xf32>
    %865 = vector.broadcast %864 : vector<1x32xf32> to vector<8x32xf32>
    %866 = arith.mulf %862, %865 : vector<8x32xf32>
    %c6_388 = arith.constant 6 : index
    %c0_389 = arith.constant 0 : index
    %c0_390 = arith.constant 0 : index
    %867 = vector.load %arg9[%c6_388, %c0_389, %c0_390] : memref<8x32x128xf32, #tpu.memory_space<vmem>>, vector<1x32x128xf32>
    %868 = vector.shape_cast %867 : vector<1x32x128xf32> to vector<32x128xf32>
    %cst_391 = arith.constant dense<0.000000e+00> : vector<8x128xf32>
    %869 = tpu.matmul %866, %868, %cst_391 {dimension_numbers = #tpu.dot_dimension_numbers<[1], [0], [0], [1], [0, 0, 1, 1], [], []>} : vector<8x32xf32>, vector<32x128xf32>, vector<8x128xf32> -> vector<8x128xf32>
    %870 = vector.extract_strided_slice %869 {offsets = [0, 0], sizes = [8, 64], strides = [1, 1]} : vector<8x128xf32> to vector<8x64xf32>
    %871 = vector.extract_strided_slice %869 {offsets = [0, 64], sizes = [8, 64], strides = [1, 1]} : vector<8x128xf32> to vector<8x64xf32>
    %872 = arith.negf %870 : vector<8x64xf32>
    %873 = math.exp %872 : vector<8x64xf32>
    %cst_392 = arith.constant 1.000000e+00 : f32
    %874 = vector.broadcast %cst_392 : f32 to vector<8x64xf32>
    %875 = arith.addf %874, %873 : vector<8x64xf32>
    %876 = arith.divf %874, %875 : vector<8x64xf32>
    %877 = arith.mulf %870, %876 : vector<8x64xf32>
    %878 = arith.mulf %877, %871 : vector<8x64xf32>
    %c6_393 = arith.constant 6 : index
    %c0_394 = arith.constant 0 : index
    %c0_395 = arith.constant 0 : index
    %879 = vector.load %arg10[%c6_393, %c0_394, %c0_395] : memref<8x64x32xf32, #tpu.memory_space<vmem>>, vector<1x64x32xf32>
    %880 = vector.shape_cast %879 : vector<1x64x32xf32> to vector<64x32xf32>
    %cst_396 = arith.constant dense<0.000000e+00> : vector<8x32xf32>
    %881 = tpu.matmul %878, %880, %cst_396 {dimension_numbers = #tpu.dot_dimension_numbers<[1], [0], [0], [1], [0, 0, 1, 1], [], []>} : vector<8x64xf32>, vector<64x32xf32>, vector<8x32xf32> -> vector<8x32xf32>
    %882 = arith.addf %852, %881 : vector<8x32xf32>
    %883 = arith.mulf %882, %882 : vector<8x32xf32>
    %cst_397 = arith.constant dense<0.000000e+00> : vector<8xf32>
    %884 = vector.multi_reduction <add>, %883, %cst_397 [1] : vector<8x32xf32> to vector<8xf32>
    %885 = vector.shape_cast %884 : vector<8xf32> to vector<8x1xf32>
    %cst_398 = arith.constant 3.200000e+01 : f32
    %886 = vector.broadcast %cst_398 : f32 to vector<8x1xf32>
    %887 = arith.divf %885, %886 : vector<8x1xf32>
    %cst_399 = arith.constant 9.99999997E-7 : f32
    %888 = vector.broadcast %cst_399 : f32 to vector<8x1xf32>
    %889 = arith.addf %887, %888 : vector<8x1xf32>
    %890 = math.rsqrt %889 : vector<8x1xf32>
    %891 = vector.broadcast %890 : vector<8x1xf32> to vector<8x32xf32>
    %892 = arith.mulf %882, %891 : vector<8x32xf32>
    %c7 = arith.constant 7 : index
    %c0_400 = arith.constant 0 : index
    %c0_401 = arith.constant 0 : index
    %893 = vector.load %arg5[%c7, %c0_400, %c0_401] : memref<8x1x32xf32, #tpu.memory_space<vmem>>, vector<1x1x32xf32>
    %894 = vector.shape_cast %893 : vector<1x1x32xf32> to vector<1x32xf32>
    %895 = vector.broadcast %894 : vector<1x32xf32> to vector<8x32xf32>
    %896 = arith.mulf %892, %895 : vector<8x32xf32>
    %c7_402 = arith.constant 7 : index
    %c0_403 = arith.constant 0 : index
    %c0_404 = arith.constant 0 : index
    %897 = vector.load %arg7[%c7_402, %c0_403, %c0_404] : memref<8x32x160xf32, #tpu.memory_space<vmem>>, vector<1x32x160xf32>
    %898 = vector.shape_cast %897 : vector<1x32x160xf32> to vector<32x160xf32>
    %cst_405 = arith.constant dense<0.000000e+00> : vector<8x160xf32>
    %899 = tpu.matmul %896, %898, %cst_405 {dimension_numbers = #tpu.dot_dimension_numbers<[1], [0], [0], [1], [0, 0, 1, 1], [], []>} : vector<8x32xf32>, vector<32x160xf32>, vector<8x160xf32> -> vector<8x160xf32>
    %900 = vector.extract_strided_slice %899 {offsets = [0, 0], sizes = [8, 32], strides = [1, 1]} : vector<8x160xf32> to vector<8x32xf32>
    %901 = vector.extract_strided_slice %899 {offsets = [0, 32], sizes = [8, 32], strides = [1, 1]} : vector<8x160xf32> to vector<8x32xf32>
    %902 = vector.extract_strided_slice %899 {offsets = [0, 64], sizes = [8, 32], strides = [1, 1]} : vector<8x160xf32> to vector<8x32xf32>
    %903 = vector.extract_strided_slice %899 {offsets = [0, 96], sizes = [8, 32], strides = [1, 1]} : vector<8x160xf32> to vector<8x32xf32>
    %904 = vector.extract_strided_slice %899 {offsets = [0, 128], sizes = [8, 32], strides = [1, 1]} : vector<8x160xf32> to vector<8x32xf32>
    %905 = arith.mulf %900, %3 : vector<8x32xf32>
    %906 = arith.mulf %903, %5 : vector<8x32xf32>
    %907 = arith.addf %905, %906 : vector<8x32xf32>
    %908 = arith.mulf %901, %3 : vector<8x32xf32>
    %909 = arith.mulf %904, %5 : vector<8x32xf32>
    %910 = arith.addf %908, %909 : vector<8x32xf32>
    %c0_406 = arith.constant 0 : index
    %c7_407 = arith.constant 7 : index
    %c0_408 = arith.constant 0 : index
    %c0_409 = arith.constant 0 : index
    %c0_410 = arith.constant 0 : index
    %911 = vector.load %arg13[%c0_406, %c7_407, %c0_408, %c0_409, %c0_410] : memref<1x8x2x8x32xf32, #tpu.memory_space<vmem>>, vector<1x1x1x8x32xf32>
    %912 = vector.shape_cast %911 : vector<1x1x1x8x32xf32> to vector<8x32xf32>
    %913 = vector.shape_cast %910 : vector<8x32xf32> to vector<1x1x1x8x32xf32>
    tpu.vector_store %arg13[%c0_406, %c7_407, %c0_408, %c0_409, %c0_410], %913 {strides = array<i32>} : memref<1x8x2x8x32xf32, #tpu.memory_space<vmem>>, vector<1x1x1x8x32xf32>,
    %c0_411 = arith.constant 0 : index
    %c7_412 = arith.constant 7 : index
    %c1_413 = arith.constant 1 : index
    %c0_414 = arith.constant 0 : index
    %c0_415 = arith.constant 0 : index
    %914 = vector.load %arg13[%c0_411, %c7_412, %c1_413, %c0_414, %c0_415] : memref<1x8x2x8x32xf32, #tpu.memory_space<vmem>>, vector<1x1x1x8x32xf32>
    %915 = vector.shape_cast %914 : vector<1x1x1x8x32xf32> to vector<8x32xf32>
    %916 = vector.shape_cast %902 : vector<8x32xf32> to vector<1x1x1x8x32xf32>
    tpu.vector_store %arg13[%c0_411, %c7_412, %c1_413, %c0_414, %c0_415], %916 {strides = array<i32>} : memref<1x8x2x8x32xf32, #tpu.memory_space<vmem>>, vector<1x1x1x8x32xf32>,
    %917 = vector.extract_strided_slice %907 {offsets = [0, 0], sizes = [8, 8], strides = [1, 1]} : vector<8x32xf32> to vector<8x8xf32>
    %918 = vector.extract_strided_slice %907 {offsets = [0, 8], sizes = [8, 8], strides = [1, 1]} : vector<8x32xf32> to vector<8x8xf32>
    %919 = vector.extract_strided_slice %907 {offsets = [0, 16], sizes = [8, 8], strides = [1, 1]} : vector<8x32xf32> to vector<8x8xf32>
    %920 = vector.extract_strided_slice %907 {offsets = [0, 24], sizes = [8, 8], strides = [1, 1]} : vector<8x32xf32> to vector<8x8xf32>
    %921 = vector.shape_cast %917 : vector<8x8xf32> to vector<1x8x8xf32>
    %922 = vector.shape_cast %918 : vector<8x8xf32> to vector<1x8x8xf32>
    %923 = vector.shape_cast %919 : vector<8x8xf32> to vector<1x8x8xf32>
    %924 = vector.shape_cast %920 : vector<8x8xf32> to vector<1x8x8xf32>
    %925 = tpu.concatenate %921, %922, %923, %924 in 0 : vector<1x8x8xf32>, vector<1x8x8xf32>, vector<1x8x8xf32>, vector<1x8x8xf32> -> vector<4x8x8xf32>
    %926 = vector.extract_strided_slice %910 {offsets = [0, 0], sizes = [8, 8], strides = [1, 1]} : vector<8x32xf32> to vector<8x8xf32>
    %927 = vector.extract_strided_slice %910 {offsets = [0, 8], sizes = [8, 8], strides = [1, 1]} : vector<8x32xf32> to vector<8x8xf32>
    %928 = vector.extract_strided_slice %910 {offsets = [0, 16], sizes = [8, 8], strides = [1, 1]} : vector<8x32xf32> to vector<8x8xf32>
    %929 = vector.extract_strided_slice %910 {offsets = [0, 24], sizes = [8, 8], strides = [1, 1]} : vector<8x32xf32> to vector<8x8xf32>
    %930 = vector.shape_cast %926 : vector<8x8xf32> to vector<1x8x8xf32>
    %931 = vector.shape_cast %927 : vector<8x8xf32> to vector<1x8x8xf32>
    %932 = vector.shape_cast %928 : vector<8x8xf32> to vector<1x8x8xf32>
    %933 = vector.shape_cast %929 : vector<8x8xf32> to vector<1x8x8xf32>
    %934 = tpu.concatenate %930, %931, %932, %933 in 0 : vector<1x8x8xf32>, vector<1x8x8xf32>, vector<1x8x8xf32>, vector<1x8x8xf32> -> vector<4x8x8xf32>
    %935 = vector.extract_strided_slice %902 {offsets = [0, 0], sizes = [8, 8], strides = [1, 1]} : vector<8x32xf32> to vector<8x8xf32>
    %936 = vector.extract_strided_slice %902 {offsets = [0, 8], sizes = [8, 8], strides = [1, 1]} : vector<8x32xf32> to vector<8x8xf32>
    %937 = vector.extract_strided_slice %902 {offsets = [0, 16], sizes = [8, 8], strides = [1, 1]} : vector<8x32xf32> to vector<8x8xf32>
    %938 = vector.extract_strided_slice %902 {offsets = [0, 24], sizes = [8, 8], strides = [1, 1]} : vector<8x32xf32> to vector<8x8xf32>
    %939 = vector.shape_cast %935 : vector<8x8xf32> to vector<1x8x8xf32>
    %940 = vector.shape_cast %936 : vector<8x8xf32> to vector<1x8x8xf32>
    %941 = vector.shape_cast %937 : vector<8x8xf32> to vector<1x8x8xf32>
    %942 = vector.shape_cast %938 : vector<8x8xf32> to vector<1x8x8xf32>
    %943 = tpu.concatenate %939, %940, %941, %942 in 0 : vector<1x8x8xf32>, vector<1x8x8xf32>, vector<1x8x8xf32>, vector<1x8x8xf32> -> vector<4x8x8xf32>
    %c0_416 = arith.constant 0 : index
    %c7_417 = arith.constant 7 : index
    %c0_418 = arith.constant 0 : index
    %c0_419 = arith.constant 0 : index
    %c0_420 = arith.constant 0 : index
    %c0_421 = arith.constant 0 : index
    %944 = vector.load %arg11[%c0_416, %c7_417, %c0_418, %c0_419, %c0_420, %c0_421] : memref<1x8x2x4x8x8xf32, #tpu.memory_space<vmem>>, vector<1x1x1x4x8x8xf32>
    %945 = vector.shape_cast %944 : vector<1x1x1x4x8x8xf32> to vector<4x8x8xf32>
    %946 = tpu.concatenate %945, %934 in 1 : vector<4x8x8xf32>, vector<4x8x8xf32> -> vector<4x16x8xf32>
    %c0_422 = arith.constant 0 : index
    %c7_423 = arith.constant 7 : index
    %c1_424 = arith.constant 1 : index
    %c0_425 = arith.constant 0 : index
    %c0_426 = arith.constant 0 : index
    %c0_427 = arith.constant 0 : index
    %947 = vector.load %arg11[%c0_422, %c7_423, %c1_424, %c0_425, %c0_426, %c0_427] : memref<1x8x2x4x8x8xf32, #tpu.memory_space<vmem>>, vector<1x1x1x4x8x8xf32>
    %948 = vector.shape_cast %947 : vector<1x1x1x4x8x8xf32> to vector<4x8x8xf32>
    %949 = tpu.concatenate %948, %943 in 1 : vector<4x8x8xf32>, vector<4x8x8xf32> -> vector<4x16x8xf32>
    %cst_428 = arith.constant dense<0.000000e+00> : vector<4x8x16xf32>
    %950 = tpu.matmul %925, %946, %cst_428 {dimension_numbers = #tpu.dot_dimension_numbers<[2], [2], [1], [1], [0, 0, 0, 1, 1, 1], [0], [0]>} : vector<4x8x8xf32>, vector<4x16x8xf32>, vector<4x8x16xf32> -> vector<4x8x16xf32>
    %cst_429 = arith.constant 0.353553385 : f32
    %951 = vector.broadcast %cst_429 : f32 to vector<4x8x16xf32>
    %952 = arith.mulf %950, %951 : vector<4x8x16xf32>
    %953 = arith.addf %952, %7 : vector<4x8x16xf32>
    %cst_430 = arith.constant dense<0xFF800000> : vector<4x8xf32>
    %954 = vector.multi_reduction <maximumf>, %953, %cst_430 [2] : vector<4x8x16xf32> to vector<4x8xf32>
    %955 = vector.shape_cast %954 : vector<4x8xf32> to vector<4x8x1xf32>
    %956 = vector.broadcast %955 : vector<4x8x1xf32> to vector<4x8x16xf32>
    %957 = arith.subf %953, %956 : vector<4x8x16xf32>
    %958 = math.exp %957 : vector<4x8x16xf32>
    %cst_431 = arith.constant dense<0.000000e+00> : vector<4x8xf32>
    %959 = vector.multi_reduction <add>, %958, %cst_431 [2] : vector<4x8x16xf32> to vector<4x8xf32>
    %960 = vector.shape_cast %959 : vector<4x8xf32> to vector<4x8x1xf32>
    %961 = tpu.reciprocal %960 {approx = true} : vector<4x8x1xf32> -> vector<4x8x1xf32>
    %962 = vector.broadcast %961 : vector<4x8x1xf32> to vector<4x8x16xf32>
    %963 = arith.mulf %958, %962 : vector<4x8x16xf32>
    %cst_432 = arith.constant dense<0.000000e+00> : vector<4x8x8xf32>
    %964 = tpu.matmul %963, %949, %cst_432 {dimension_numbers = #tpu.dot_dimension_numbers<[2], [1], [1], [2], [0, 0, 0, 1, 1, 2], [0], [0]>} : vector<4x8x16xf32>, vector<4x16x8xf32>, vector<4x8x8xf32> -> vector<4x8x8xf32>
    %965 = vector.extract_strided_slice %964 {offsets = [0, 0, 0], sizes = [1, 8, 8], strides = [1, 1, 1]} : vector<4x8x8xf32> to vector<1x8x8xf32>
    %966 = vector.shape_cast %965 : vector<1x8x8xf32> to vector<8x8xf32>
    %967 = vector.extract_strided_slice %964 {offsets = [1, 0, 0], sizes = [1, 8, 8], strides = [1, 1, 1]} : vector<4x8x8xf32> to vector<1x8x8xf32>
    %968 = vector.shape_cast %967 : vector<1x8x8xf32> to vector<8x8xf32>
    %969 = vector.extract_strided_slice %964 {offsets = [2, 0, 0], sizes = [1, 8, 8], strides = [1, 1, 1]} : vector<4x8x8xf32> to vector<1x8x8xf32>
    %970 = vector.shape_cast %969 : vector<1x8x8xf32> to vector<8x8xf32>
    %971 = vector.extract_strided_slice %964 {offsets = [3, 0, 0], sizes = [1, 8, 8], strides = [1, 1, 1]} : vector<4x8x8xf32> to vector<1x8x8xf32>
    %972 = vector.shape_cast %971 : vector<1x8x8xf32> to vector<8x8xf32>
    %973 = tpu.concatenate %966, %968, %970, %972 in 1 : vector<8x8xf32>, vector<8x8xf32>, vector<8x8xf32>, vector<8x8xf32> -> vector<8x32xf32>
    %c7_433 = arith.constant 7 : index
    %c0_434 = arith.constant 0 : index
    %c0_435 = arith.constant 0 : index
    %974 = vector.load %arg8[%c7_433, %c0_434, %c0_435] : memref<8x32x32xf32, #tpu.memory_space<vmem>>, vector<1x32x32xf32>
    %975 = vector.shape_cast %974 : vector<1x32x32xf32> to vector<32x32xf32>
    %cst_436 = arith.constant dense<0.000000e+00> : vector<8x32xf32>
    %976 = tpu.matmul %973, %975, %cst_436 {dimension_numbers = #tpu.dot_dimension_numbers<[1], [0], [0], [1], [0, 0, 1, 1], [], []>} : vector<8x32xf32>, vector<32x32xf32>, vector<8x32xf32> -> vector<8x32xf32>
    %977 = arith.addf %882, %976 : vector<8x32xf32>
    %978 = arith.mulf %977, %977 : vector<8x32xf32>
    %cst_437 = arith.constant dense<0.000000e+00> : vector<8xf32>
    %979 = vector.multi_reduction <add>, %978, %cst_437 [1] : vector<8x32xf32> to vector<8xf32>
    %980 = vector.shape_cast %979 : vector<8xf32> to vector<8x1xf32>
    %cst_438 = arith.constant 3.200000e+01 : f32
    %981 = vector.broadcast %cst_438 : f32 to vector<8x1xf32>
    %982 = arith.divf %980, %981 : vector<8x1xf32>
    %cst_439 = arith.constant 9.99999997E-7 : f32
    %983 = vector.broadcast %cst_439 : f32 to vector<8x1xf32>
    %984 = arith.addf %982, %983 : vector<8x1xf32>
    %985 = math.rsqrt %984 : vector<8x1xf32>
    %986 = vector.broadcast %985 : vector<8x1xf32> to vector<8x32xf32>
    %987 = arith.mulf %977, %986 : vector<8x32xf32>
    %c7_440 = arith.constant 7 : index
    %c0_441 = arith.constant 0 : index
    %c0_442 = arith.constant 0 : index
    %988 = vector.load %arg6[%c7_440, %c0_441, %c0_442] : memref<8x1x32xf32, #tpu.memory_space<vmem>>, vector<1x1x32xf32>
    %989 = vector.shape_cast %988 : vector<1x1x32xf32> to vector<1x32xf32>
    %990 = vector.broadcast %989 : vector<1x32xf32> to vector<8x32xf32>
    %991 = arith.mulf %987, %990 : vector<8x32xf32>
    %c7_443 = arith.constant 7 : index
    %c0_444 = arith.constant 0 : index
    %c0_445 = arith.constant 0 : index
    %992 = vector.load %arg9[%c7_443, %c0_444, %c0_445] : memref<8x32x128xf32, #tpu.memory_space<vmem>>, vector<1x32x128xf32>
    %993 = vector.shape_cast %992 : vector<1x32x128xf32> to vector<32x128xf32>
    %cst_446 = arith.constant dense<0.000000e+00> : vector<8x128xf32>
    %994 = tpu.matmul %991, %993, %cst_446 {dimension_numbers = #tpu.dot_dimension_numbers<[1], [0], [0], [1], [0, 0, 1, 1], [], []>} : vector<8x32xf32>, vector<32x128xf32>, vector<8x128xf32> -> vector<8x128xf32>
    %995 = vector.extract_strided_slice %994 {offsets = [0, 0], sizes = [8, 64], strides = [1, 1]} : vector<8x128xf32> to vector<8x64xf32>
    %996 = vector.extract_strided_slice %994 {offsets = [0, 64], sizes = [8, 64], strides = [1, 1]} : vector<8x128xf32> to vector<8x64xf32>
    %997 = arith.negf %995 : vector<8x64xf32>
    %998 = math.exp %997 : vector<8x64xf32>
    %cst_447 = arith.constant 1.000000e+00 : f32
    %999 = vector.broadcast %cst_447 : f32 to vector<8x64xf32>
    %1000 = arith.addf %999, %998 : vector<8x64xf32>
    %1001 = arith.divf %999, %1000 : vector<8x64xf32>
    %1002 = arith.mulf %995, %1001 : vector<8x64xf32>
    %1003 = arith.mulf %1002, %996 : vector<8x64xf32>
    %c7_448 = arith.constant 7 : index
    %c0_449 = arith.constant 0 : index
    %c0_450 = arith.constant 0 : index
    %1004 = vector.load %arg10[%c7_448, %c0_449, %c0_450] : memref<8x64x32xf32, #tpu.memory_space<vmem>>, vector<1x64x32xf32>
    %1005 = vector.shape_cast %1004 : vector<1x64x32xf32> to vector<64x32xf32>
    %cst_451 = arith.constant dense<0.000000e+00> : vector<8x32xf32>
    %1006 = tpu.matmul %1003, %1005, %cst_451 {dimension_numbers = #tpu.dot_dimension_numbers<[1], [0], [0], [1], [0, 0, 1, 1], [], []>} : vector<8x64xf32>, vector<64x32xf32>, vector<8x32xf32> -> vector<8x32xf32>
    %1007 = arith.addf %977, %1006 : vector<8x32xf32>
    %c0_452 = arith.constant 0 : index
    %c0_453 = arith.constant 0 : index
    %c0_454 = arith.constant 0 : index
    %1008 = vector.load %arg12[%c0_452, %c0_453, %c0_454] : memref<1x8x32xf32, #tpu.memory_space<vmem>>, vector<1x8x32xf32>
    %1009 = vector.shape_cast %1008 : vector<1x8x32xf32> to vector<8x32xf32>
    %1010 = vector.shape_cast %1007 : vector<8x32xf32> to vector<1x8x32xf32>
    tpu.vector_store %arg12[%c0_452, %c0_453, %c0_454], %1010 {strides = array<i32>} : memref<1x8x32xf32, #tpu.memory_space<vmem>>, vector<1x8x32xf32>,
    return
  }
  func.func @transform_0(%arg0: i32) -> (i32, i32, i32) {
    %c0_i32 = arith.constant 0 : i32
    %c0_i32_0 = arith.constant 0 : i32
    %c0_i32_1 = arith.constant 0 : i32
    return %arg0, %c0_i32, %c0_i32_0 : i32, i32, i32
  }
  func.func @transform_1(%arg0: i32) -> (i32, i32, i32, i32) {
    %c0_i32 = arith.constant 0 : i32
    %c0_i32_0 = arith.constant 0 : i32
    %c0_i32_1 = arith.constant 0 : i32
    %c0_i32_2 = arith.constant 0 : i32
    return %arg0, %c0_i32, %c0_i32_0, %c0_i32_1 : i32, i32, i32, i32
  }
  func.func @transform_2(%arg0: i32) -> (i32, i32, i32) {
    %c0_i32 = arith.constant 0 : i32
    %c0_i32_0 = arith.constant 0 : i32
    %c0_i32_1 = arith.constant 0 : i32
    return %arg0, %c0_i32, %c0_i32_0 : i32, i32, i32
  }
  func.func @transform_3(%arg0: i32) -> (i32, i32, i32) {
    %c0_i32 = arith.constant 0 : i32
    %c0_i32_0 = arith.constant 0 : i32
    %c0_i32_1 = arith.constant 0 : i32
    return %arg0, %c0_i32, %c0_i32_0 : i32, i32, i32
  }
  func.func @transform_4(%arg0: i32) -> (i32, i32, i32) {
    %c0_i32 = arith.constant 0 : i32
    %c0_i32_0 = arith.constant 0 : i32
    %c0_i32_1 = arith.constant 0 : i32
    %c0_i32_2 = arith.constant 0 : i32
    return %c0_i32, %c0_i32_0, %c0_i32_1 : i32, i32, i32
  }
  func.func @transform_5(%arg0: i32) -> (i32, i32, i32) {
    %c0_i32 = arith.constant 0 : i32
    %c0_i32_0 = arith.constant 0 : i32
    %c0_i32_1 = arith.constant 0 : i32
    %c0_i32_2 = arith.constant 0 : i32
    return %c0_i32, %c0_i32_0, %c0_i32_1 : i32, i32, i32
  }
  func.func @transform_6(%arg0: i32) -> (i32, i32, i32) {
    %c0_i32 = arith.constant 0 : i32
    %c0_i32_0 = arith.constant 0 : i32
    %c0_i32_1 = arith.constant 0 : i32
    %c0_i32_2 = arith.constant 0 : i32
    return %c0_i32, %c0_i32_0, %c0_i32_1 : i32, i32, i32
  }
  func.func @transform_7(%arg0: i32) -> (i32, i32, i32) {
    %c0_i32 = arith.constant 0 : i32
    %c0_i32_0 = arith.constant 0 : i32
    %c0_i32_1 = arith.constant 0 : i32
    %c0_i32_2 = arith.constant 0 : i32
    return %c0_i32, %c0_i32_0, %c0_i32_1 : i32, i32, i32
  }
  func.func @transform_8(%arg0: i32) -> (i32, i32, i32) {
    %c0_i32 = arith.constant 0 : i32
    %c0_i32_0 = arith.constant 0 : i32
    %c0_i32_1 = arith.constant 0 : i32
    %c0_i32_2 = arith.constant 0 : i32
    return %c0_i32, %c0_i32_0, %c0_i32_1 : i32, i32, i32
  }
  func.func @transform_9(%arg0: i32) -> (i32, i32, i32) {
    %c0_i32 = arith.constant 0 : i32
    %c0_i32_0 = arith.constant 0 : i32
    %c0_i32_1 = arith.constant 0 : i32
    %c0_i32_2 = arith.constant 0 : i32
    return %c0_i32, %c0_i32_0, %c0_i32_1 : i32, i32, i32
  }
  func.func @transform_10(%arg0: i32) -> (i32, i32, i32, i32, i32, i32) {
    %c0_i32 = arith.constant 0 : i32
    %c0_i32_0 = arith.constant 0 : i32
    %c0_i32_1 = arith.constant 0 : i32
    %c0_i32_2 = arith.constant 0 : i32
    %c0_i32_3 = arith.constant 0 : i32
    %c0_i32_4 = arith.constant 0 : i32
    return %arg0, %c0_i32, %c0_i32_0, %c0_i32_1, %c0_i32_2, %c0_i32_3 : i32, i32, i32, i32, i32, i32
  }
  func.func @transform_11(%arg0: i32) -> (i32, i32, i32) {
    %c0_i32 = arith.constant 0 : i32
    %c0_i32_0 = arith.constant 0 : i32
    %c0_i32_1 = arith.constant 0 : i32
    return %arg0, %c0_i32, %c0_i32_0 : i32, i32, i32
  }
  func.func @transform_12(%arg0: i32) -> (i32, i32, i32, i32, i32) {
    %c0_i32 = arith.constant 0 : i32
    %c0_i32_0 = arith.constant 0 : i32
    %c0_i32_1 = arith.constant 0 : i32
    %c0_i32_2 = arith.constant 0 : i32
    %c0_i32_3 = arith.constant 0 : i32
    return %arg0, %c0_i32, %c0_i32_0, %c0_i32_1, %c0_i32_2 : i32, i32, i32, i32, i32
  }
}

</mosaic_0001>

<bundles_post_ra>
// kernel: tile.14
= control target key start
LH: loop header
LB: loop body
LE: loop exit
PB: predicated region body
PF: predicated region fallthrough
CT: control target
= control target key end

     0   :  { %vm82_vm0 = vcmask 1047556   ;;  %vm84_vm1 = vcmask 64512   ;;  %s195_s9 = smov 24   ;;  %s196_s14 = smov 8   ;;  %vm103_vm2 = vcmask 261312   ;;  %vm124_vm3 = vcmask 195712   ;;  %s289_s0 = inlined_call_operand.vmem [shape: f32[2,8,4,8], index: 0, kind: input, shape index: {}]   ;;  %s290_s1 = inlined_call_operand.vmem [shape: f32[2,8,32], index: 1, kind: output, shape index: {}]  }
   0x1   :  { %v180_v0 = vld [vmem:[%s289_s0 + $0x1c] sm:$0xf]  ;;  %v181_v1 = vld [vmem:[%s289_s0 + $0x18] sm:$0xf]  ;;  %v182_v2 = vld [vmem:[%s289_s0 + $0x14] sm:$0xf] }
   0x2   :  { %48 = vst [vmem:[#allocation0 + $0x38] sm:$0xf] %v180_v0  ;;  %53 = vst [vmem:[#allocation0 + $0x30] sm:$0xf] %v181_v1  ;;  %v183_v3 = vld [vmem:[%s289_s0 + $0x10] sm:$0xf] }
   0x3   :  { %58 = vst [vmem:[#allocation0 + $0x28] sm:$0xf] %v182_v2  ;;  %v184_v4 = vld [vmem:[%s289_s0 + $0xc] sm:$0xf]  ;;  %v185_v5 = vld [vmem:[%s289_s0 + $0x8] sm:$0xf] }
   0x4   :  { %63 = vst [vmem:[#allocation0 + $0x20] sm:$0xf] %v183_v3  ;;  %68 = vst [vmem:[#allocation0 + $0x18] sm:$0xf] %v184_v4  ;;  %v186_v6 = vld [vmem:[%s289_s0 + $0x4] sm:$0xf] }
   0x5   :  { %73 = vst [vmem:[#allocation0 + $0x10] sm:$0xf] %v185_v5  ;;  %v78_v7 = vld [vmem:[%s289_s0] sm:$0xf]  ;;  %77 = vst [vmem:[#allocation0 + $0x8] sm:$0xf] %v186_v6 }
   0x6   :  { %79 = vst [vmem:[#allocation0] sm:$0xf] %v78_v7  ;;  %v172_v8 = vld [vmem:[%s289_s0 + $0x3c] sm:$0xf]  ;;  %v173_v9 = vld [vmem:[%s289_s0 + $0x38] sm:$0xf] }
   0x7   :  { %8 = vst [vmem:[#allocation0 + $0x78] sm:$0xf] %v172_v8  ;;  %13 = vst [vmem:[#allocation0 + $0x70] sm:$0xf] %v173_v9  ;;  %v174_v10 = vld [vmem:[%s289_s0 + $0x34] sm:$0xf] }
   0x8   :  { %v175_v11 = vld [vmem:[%s289_s0 + $0x30] sm:$0xf]  ;;  %v176_v12 = vld [vmem:[%s289_s0 + $0x2c] sm:$0xf]  ;;  %18 = vst [vmem:[#allocation0 + $0x68] sm:$0xf] %v174_v10 }
   0x9   :  { %23 = vst [vmem:[#allocation0 + $0x60] sm:$0xf] %v175_v11  ;;  %28 = vst [vmem:[#allocation0 + $0x58] sm:$0xf] %v176_v12  ;;  %v177_v13 = vld [vmem:[%s289_s0 + $0x28] sm:$0xf] }
   0xa   :  { %v178_v14 = vld [vmem:[%s289_s0 + $0x24] sm:$0xf]  ;;  %v179_v15 = vld [vmem:[%s289_s0 + $0x20] sm:$0xf]  ;;  %33 = vst [vmem:[#allocation0 + $0x50] sm:$0xf] %v177_v13 }
   0xb   :  { %38 = vst [vmem:[#allocation0 + $0x48] sm:$0xf] %v178_v14  ;;  %43 = vst [vmem:[#allocation0 + $0x40] sm:$0xf] %v179_v15  ;;  %s194_s0 = smov 16   ;;  %vm145_vm4 = vcmask 130112  }
   0xc   :  { %v119_v16 = vld [vmem:[#allocation0 + $0x2] ss:$8 sm:$0xf0]   ;;  %v98_v17 = vld [vmem:[#allocation0 + $0x3] ss:$8 sm:$0xf0]  }
   0xd   :  { %v117_v18 = vld [vmem:[#allocation0 + $0x2] ss:$8 sm:$0xf]   ;;  %v96_v19 = vld [vmem:[#allocation0 + $0x3] ss:$8 sm:$0xf]  }
   0xe   :  { %v121_v20 = vsel %vm82_vm0, %v119_v16, %v117_v18  ;;  %v100_v21 = vsel %vm82_vm0, %v98_v17, %v96_v19  ;;  %v138_v24 = vld [vmem:[#allocation0 + $0x1] ss:$8 sm:$0xf]   ;;  %v80_v32 = vld [vmem:[#allocation0] ss:$8 sm:$0xf]  }
   0xf   :  { %122 = vrot.lane.b32.xlu1 %v121_v20, %s194_s0  ;;  %101 = vrot.lane.b32.xlu0 %v100_v21, %s195_s9  ;;  %v140_v25 = vld [vmem:[#allocation0 + $0x1] ss:$8 sm:$0xf0]   ;;  %v81_v33 = vld [vmem:[#allocation0] ss:$8 sm:$0xf0]  }
  0x10   :  { %v129_v22 = vld [vmem:[#allocation0 + $0x42] ss:$8 sm:$0xf0]   ;;  %v108_v23 = vld [vmem:[#allocation0 + $0x43] ss:$8 sm:$0xf0]   ;;  %v83_v34 = vsel %vm82_vm0, %v81_v33, %v80_v32  ;;  %v142_v38 = vsel %vm82_vm0, %v140_v25, %v138_v24 }
  0x11   :  { %v150_v31 = vld [vmem:[#allocation0 + $0x41] ss:$8 sm:$0xf0]   ;;  %v89_v36 = vld [vmem:[#allocation0 + $0x40] ss:$8 sm:$0xf0]  }
  0x12   :  { %v127_v26 = vld [vmem:[#allocation0 + $0x42] ss:$8 sm:$0xf]   ;;  %v106_v27 = vld [vmem:[#allocation0 + $0x43] ss:$8 sm:$0xf]  }
  0x13   :  { %v131_v28 = vsel %vm82_vm0, %v129_v22, %v127_v26  ;;  %v110_v29 = vsel %vm82_vm0, %v108_v23, %v106_v27  ;;  %v148_v30 = vld [vmem:[#allocation0 + $0x41] ss:$8 sm:$0xf]   ;;  %v87_v35 = vld [vmem:[#allocation0 + $0x40] ss:$8 sm:$0xf]  }
  0x14   :  { %132 = vrot.lane.b32.xlu1 %v131_v28, %s194_s0  ;;  %111 = vrot.lane.b32.xlu0 %v110_v29, %s195_s9  ;;  %v152_v37 = vsel %vm82_vm0, %v150_v31, %v148_v30  ;;  %85 = vst.msk [vmem:[%s290_s1] sm:$0xff] %vm84_vm1, %v83_v34   ;;  %v91_v39 = vsel %vm82_vm0, %v89_v36, %v87_v35 }
  0x15   :  { %187 = vst.msk [vmem:[%s290_s1 + $0x8] sm:$0xff] %vm84_vm1, %v91_v39  }
  0x18   :  { %153 = vrot.lane.b32.xlu1 %v152_v37, %s196_s14  ;;  %143 = vrot.lane.b32.xlu0 %v142_v38, %s196_s14 }
  0x81   :  { %v123_v40 = vpop.permute.xlu1 %122   ;;  %v102_v41 = vpop.permute.xlu0 %101  }
  0x82   :  { %104 = vst.msk [vmem:[%s290_s1] sm:$0xff] %vm103_vm2, %v102_v41  }
  0x83   :  { %125 = vst.msk [vmem:[%s290_s1] sm:$0xff] %vm124_vm3, %v123_v40  }
  0x86   :  { %v133_v42 = vpop.permute.xlu1 %132   ;;  %v112_v43 = vpop.permute.xlu0 %111  }
  0x87   :  { %188 = vst.msk [vmem:[%s290_s1 + $0x8] sm:$0xff] %vm103_vm2, %v112_v43  }
  0x88   :  { %189 = vst.msk [vmem:[%s290_s1 + $0x8] sm:$0xff] %vm124_vm3, %v133_v42  }
  0x8a   :  { %v154_v44 = vpop.permute.xlu1 %153   ;;  %v144_v45 = vpop.permute.xlu0 %143  }
  0x8b   :  { %190 = vst.msk [vmem:[%s290_s1 + $0x8] sm:$0xff] %vm145_vm4, %v154_v44   ;;  %146 = vst.msk [vmem:[%s290_s1] sm:$0xff] %vm145_vm4, %v144_v45  }

// kernel: forward.1
= control target key start
LH: loop header
LB: loop body
LE: loop exit
PB: predicated region body
PF: predicated region fallthrough
CT: control target
= control target key end

     0   :  { %s13928_s0 = inlined_call_operand.vmem [shape: f32[2,8,32], index: 0, kind: input, shape index: {}]   ;;  %s13929_s1 = inlined_call_operand.vmem [shape: f32[2,4,8,16], index: 1, kind: input, shape index: {}]   ;;  %s13930_s2 = inlined_call_operand.vmem [shape: f32[2,8,32], index: 2, kind: input, shape index: {}]   ;;  %s13931_s3 = inlined_call_operand.vmem [shape: f32[2,8,32], index: 3, kind: input, shape index: {}]   ;;  %s13932_s4 = inlined_call_operand.vmem [shape: f32[8,1,32], index: 4, kind: input, shape index: {}]   ;;  %s13933_s5 = inlined_call_operand.vmem [shape: f32[8,1,32], index: 5, kind: input, shape index: {}]   ;;  %s13934_s6 = inlined_call_operand.vmem [shape: f32[8,32,160], index: 6, kind: input, shape index: {}]   ;;  %s13935_s7 = inlined_call_operand.vmem [shape: f32[8,32,32], index: 7, kind: input, shape index: {}]   ;;  %s13936_s8 = inlined_call_operand.vmem [shape: f32[8,32,128], index: 8, kind: input, shape index: {}]   ;;  %s13937_s9 = inlined_call_operand.vmem [shape: f32[8,64,32], index: 9, kind: input, shape index: {}]   ;;  %s13938_s10 = inlined_call_operand.vmem [shape: f32[2,8,2,4,8,8], index: 10, kind: input, shape index: {}]   ;;  %s13939_s11 = inlined_call_operand.hbm [shape: f32[2,8,32], index: 11, kind: output, shape index: {0}]   ;;  %s13940_s12 = inlined_call_operand.vmem [shape: f32[2,8,2,8,32], index: 12, kind: output, shape index: {1}]  }
   0x1   :  { %13969 = sst [smem:[#allocation13_spill]] %s13928_s0 }
   0x2   :  { %13970 = sst [smem:[#allocation14_spill]] %s13929_s1 }
   0x3   :  { %13971 = sst [smem:[#allocation15_spill]] %s13930_s2 }
   0x4   :  { %13972 = sst [smem:[#allocation16_spill]] %s13931_s3 }
   0x5   :  { %13973 = sst [smem:[#allocation17_spill]] %s13938_s10 }
   0x6   :  { %13974 = sst [smem:[#allocation18_spill]] %s13939_s11 }
   0x7   :  { %13975 = sst [smem:[#allocation19_spill]] %s13940_s12 }
   0x8   :  { %18 = vsyncpa [#allocation3], 0 }
   0x9   :  { %20 = vsyncpa [#allocation3 + $0x1], 0  ;;  %s12057_s21 = smov 0   ;;  %s12059_s22 = smov 0  }
   0xa   :  { %s12061_s23 = smov 0   ;;  %s12063_s24 = smov 0  }
   0xb LB: > { %13976 = sst [smem:[#allocation5_spill]] %s11965_s21  ;;  %s12078_s25 = sadd.s32 4294967295, %s11977_s24   ;;  %s11977_s24 = sphi %s12063_s24, %s14010_s24   ;;  %s11973_s23 = sphi %s12061_s23, %s14012_s23   ;;  %s11969_s22 = sphi %s12059_s22, %s14014_s22   ;;  %s11965_s21 = sphi %s12057_s21, %s14013_s21  }
   0xc   : > { %13977 = sst [smem:[#allocation6_spill]] %s11973_s23  ;;  %s9512_s26 = sadd.s32 4294967294, %s11977_s24  }
   0xd   : > { %13978 = sst [smem:[#allocation7_spill]] %s11977_s24  ;;  %s12082_s27 = sadd.s32 1, %s11977_s24  }
   0xe   : > { %13979 = sst [smem:[#allocation8_spill]] %s12078_s25  ;;  %s289_s28 = sadd.s32 1, %s11973_s23 }
   0xf   : > { %13980 = sst [smem:[#allocation9_spill]] %s12082_s27  ;;  %s286_s29 = ssub.s32 %s11977_s24, %s12082_s27 }
  0x10   : > { %p299_p0 = scmp.ne.s32.totalorder %s11973_s23, %s11969_s22  ;;  %p287_p1 = scmp.eq.s32.totalorder %s286_s29, 0 }
  0x11   : > { %p300_p2 = scmp.eq.s32.totalorder %s12078_s25, 1  ;;  %p305_p3 = scmp.ne.s32.totalorder %s11969_s22, %s11965_s21 }
  0x12   : > { %p306_p4 = scmp.eq.s32.totalorder %s9512_s26, 1  ;;  %p9515_p7 = scmp.ge.s32.totalorder %s11977_s24, 1 }
  0x13   : > { %s12093_s30 = scalar_select %p287_p1, %s11973_s23, %s289_s28  }
  0x14   : > { %p12095_p5 = por %p300_p2, %p299_p0  ;;  %p12099_p6 = por %p306_p4, %p305_p3 }
  0x15   : > { %13981 = sst [smem:[#allocation10_spill]] %s12093_s30  ;;  %p405_p8 = scmp.lt.s32.totalorder %s11977_s24, 3 }
  0x16   : > { %s13982_s13 = scalar_select %p12095_p5, 1, 0 }
  0x17   : > { %s13984_s14 = scalar_select %p12099_p6, 1, 0 }
  0x18   : > { %13983 = sst [smem:[#allocation11_spill]] %s13982_s13  ;;  %p406_p9 = pnand %p9515_p7, %p405_p8 }
  0x19   : > { %13985 = sst [smem:[#allocation12_spill]] %s13984_s14  ;;  %p469_p10 = scmp.lt.s32.totalorder (!%p406_p9), %s12078_s25, 1  ;;  %vm504_vm0 = vcmask (!%p406_p9), 261120   ;;  %v522_v3 = vld [vmem:[%s13934_s6 + $0x8] sm:$0xff] (!%p406_p9)  ;;  %v524_v4 = vld [vmem:[%s13934_s6 + $0x18] sm:$0xff] (!%p406_p9)  ;;  %v521_v5 = vld [vmem:[%s13934_s6] sm:$0xff] (!%p406_p9) }
  0x1a   : > { %409 = sbr.rel (%p406_p9) target bundleno = 20320 (0x4f60), region = 64  ;;  %s13986_s0 = sld [smem:[#allocation13_spill]] (!%p406_p9)  ;;  %v11094_v6 = vpack.c.bf16 (!%p406_p9), %v524_v4, %v522_v3  ;;  %v523_v7 = vld [vmem:[%s13934_s6 + $0x10] sm:$0xff] (!%p406_p9)  ;;  %v526_v8 = vld [vmem:[%s13934_s6 + $0x28] sm:$0xff] (!%p406_p9)  ;;  %v528_v9 = vld [vmem:[%s13934_s6 + $0x38] sm:$0xff] (!%p406_p9)  ;;  %v11979_v10 = vmov (!%p406_p9), 0.0  }
  0x1b   : > { %596 = vmatprep.mubr.f32.mxu1 (!%p406_p9), %v11979_v10  ;;  %v11096_v11 = vpack.c.bf16 (!%p406_p9), %v523_v7, %v521_v5  ;;  %v11098_v12 = vpack.c.bf16 (!%p406_p9), %v528_v9, %v526_v8  ;;  %v525_v13 = vld [vmem:[%s13934_s6 + $0x20] sm:$0xff] (!%p406_p9)  ;;  %v527_v14 = vld [vmem:[%s13934_s6 + $0x30] sm:$0xff] (!%p406_p9)  ;;  %s13987_s2 = sld [smem:[#allocation15_spill]] (!%p406_p9)  ;;  %s13988_s3 = sld [smem:[#allocation16_spill]] (!%p406_p9)  ;;  %v11983_v34 = vmov (!%p406_p9), 0.0|0.0   ;;  %vm11984_vm1 = vmmov (!%p406_p9), 0  }
  0x1c   : > { %11095 = vmatprep.subr.bf16.mxu1 (!%p406_p9), %v11094_v6  ;;  %v11100_v15 = vpack.c.bf16 (!%p406_p9), %v527_v14, %v525_v13  ;;  %v9526_v21 = vld [vmem:[%s13932_s4] ss:$0 sm:$0xff] (!%p406_p9)  ;;  %s13946_s17 = smov (!%p406_p9), 96   ;;  %11106 = vmatprep.subr.bf16.mxu0 (!%p406_p9), %v11983_v34  ;;  %s13950_s23 = smov (!%p406_p9), 104   ;;  %vm679_vm2 = vcmask (!%p406_p9), 64512   ;;  %vm996_vm4 = vcmask (!%p406_p9), 130048  }
  0x1d   : > { %11097 = vmatpush1.bf16.msra.mxu1 (!%p406_p9), %v11096_v11  ;;  %10329 = vmatprep.mubr.msk.f32.mxu0 (!%p406_p9), %vm11984_vm1, %v11979_v10  ;;  %s13989_s10 = sld [smem:[#allocation17_spill]] (!%p406_p9)  ;;  %s13990_s12 = sld [smem:[#allocation19_spill]] (!%p406_p9)  ;;  %vm12217_vm3 = vmpackc.low (!%p406_p9), %vm679_vm2, %vm679_vm2  ;;  %vm1347_vm5 = vcmask (!%p406_p9), 195584   ;;  %vm1540_vm6 = vcmask (!%p406_p9), 523264  }
  0x1e   : > { %11099 = vmatprep.subr.bf16.mxu1 (!%p406_p9), %v11098_v12  ;;  %s13995_s1 = sld [smem:[#allocation14_spill]] (!%p406_p9)  ;;  %s13952_s30 = smov (!%p406_p9), 64  }
  0x1f   : > { %s14005_s21 = sld [smem:[#allocation18_spill]] (!%p406_p9) }
  0x21   : > { %s12107_s15 = scalar_select %p469_p10, %s12078_s25, 1  ;;  %11101 = vmatpush1.bf16.msra.mxu1 %v11100_v15 }
  0x22   : > { %11102 = vmatprep.subr.bf16.mxu1 %v11983_v34  ;;  %s459_s25 = sand.u32 1, %s11969_s22  }
  0x23   : > { %s12110_s16 = sshll.u32 %s12107_s15, 3  ;;  %s9972_s20 = sshll.u32 %s12107_s15, 9 }
  0x24   : > { %s472_s19 = scalar_lea.vmem %s13986_s0, %s12110_s16  ;;  %s12150_s18 = scalar_lea.vmem %s13987_s2, %s12110_s16 }
  0x25   : > { %v12116_v0 = vld [vmem:[%s472_s19] sm:$0xff]  ;;  %s13942_s19 = smov 32   ;;  %s12166_s29 = scalar_lea.vmem %s13988_s3, %s12110_s16 }
  0x26   : > { %v503_v1 = vmul.f32 %v12116_v0, %v12116_v0  ;;  %v12153_v16 = vld [vmem:[%s12150_s18] sm:$0xff]  ;;  %s13948_s16 = smov 120   ;;  %s13944_s0 = smov 112  }
  0x27   : > { %v12169_v24 = vld [vmem:[%s12166_s29] sm:$0xff]  ;;  %s12204_s28 = scalar_lea.vmem %s13989_s10, %s9972_s20  ;;  %s13994_s20 = smov 112  }
  0x28   : > { %v505_v2 = vsel %vm504_vm0, %v503_v1, 0.0  ;;  %v655_v42 = vld [vmem:[%s12204_s28] sm:$0xff]  ;;  %v656_v46 = vld [vmem:[%s12204_s28 + $0x8] sm:$0xff]  ;;  %v657_v50 = vld [vmem:[%s12204_s28 + $0x10] sm:$0xff]  ;;  %s13999_s3 = smov 104   ;;  %s14000_s10 = smov 8  }
  0x29   : > { %506 = vadd.xlane.f32.xlu0 %v505_v2  ;;  %v658_v51 = vld [vmem:[%s12204_s28 + $0x18] sm:$0xff]  ;;  %s9516_s27 = sshll.u32 %s459_s25, 3  ;;  %s14006_s11 = smov %s14005_s21 }
  0x3f   : > { %615 = vrot.lane.b32.xlu0 %v12153_v16, %s13942_s19 }
  0xb6   : > { %v507_v17 = vpop.xlane.xlu0 %506 }
  0xb7   : > { %v509_v18 = vmul.f32 0.03125, %v507_v17 }
  0xb9   : > { %v510_v19 = vadd.f32 1e-06, %v509_v18 }
  0xba   : > { %v12177_v29 = vpop.permute.xlu0 %615 }
  0xbb   : > { %11705 = vrsqrt.f32 %v510_v19 }
  0xc5   : > { %v11706_v20 = vpop.eup %11705 }
  0xc6   : > { %v512_v22 = vmul.f32 %v11706_v20, %v12116_v0 }
  0xc8   : > { %v520_v23 = vmul.f32 %v9526_v21, %v512_v22 }
  0xca   : > { %9527 = vmatmul.mubr.msk.f32.vlgmr.msra.gmra.mrb[0].mxu1 %vm504_vm0, %v520_v23 }
  0xcb   : > { %10322 = vmatprep.mubr.msk.f32.mxu1 %vm11984_vm1, %v11979_v10 }
 0x19d   : > { %v12171_v25 = vpop.f32.mrb[0].mxu1 }
 0x19e   : > { %v600_v26 = vpop.f32.mrb[1].mxu1  ;;  %v618_v32 = vmul.f32 %v12177_v29, %v12171_v25  ;;  %v603_v37 = vmul.f32 %v12171_v25, %v12153_v16 }
 0x19f   : > { %v619_v27 = vmul.f32 %v600_v26, %v12169_v24 }
 0x1a1   : > { %621 = vrot.lane.b32.xlu1 %v619_v27, %s13942_s19 }
 0x1a5   : > { %605 = vrot.lane.b32.xlu1 %v12169_v24, %s13946_s17 }
 0x213   : > { %v622_v28 = vpop.permute.xlu1 %621 }
 0x214   : > { %v624_v33 = vadd.f32 %v622_v28, %v618_v32 }
 0x217   : > { %v12179_v30 = vpop.permute.xlu1 %605 }
 0x218   : > { %v608_v31 = vmul.f32 %v12179_v30, %v12171_v25 }
 0x21a   : > { %610 = vrot.lane.b32.xlu1 %v608_v31, %s13942_s19  ;;  %s9973_s19 = sshll.u32 %s12107_s15, 7 }
 0x21b   : > { %s12211_s2 = scalar_lea.vmem %s13990_s12, %s9973_s19  ;;  %s9971_s19 = sshll.u32 %s12107_s15, 5 }
 0x21c   : > { %s12255_s26 = scalar_lea.vmem %s13995_s1, %s9971_s19  ;;  %s13996_s15 = smov 120  }
 0x21d   : > { %v12258_v60 = vld [vmem:[%s12255_s26] sm:$0xff]  ;;  %v12263_v3 = vld [vmem:[%s12255_s26 + $0x8] sm:$0xff]  ;;  %v12268_v11 = vld [vmem:[%s12255_s26 + $0x18] sm:$0xff]  ;;  %s13958_s19 = smov 8   ;;  %s13954_s1 = smov 24  }
 0x21e   : > { %643 = vrot.lane.b32.xlu1 %v624_v33, %s13948_s16  ;;  %v12271_v12 = vld [vmem:[%s12255_s26 + $0x10] sm:$0xff]  ;;  %s13997_s12 = smov 64  }
 0x222   : > { %645 = vrot.lane.b32.xlu1 %v624_v33, %s13944_s0  ;;  %s13998_s0 = smov 32  }
 0x226   : > { %647 = vrot.lane.b32.xlu1 %v624_v33, %s13950_s23 }
 0x22a   : > { %626 = vrot.lane.b32.xlu1 %v624_v33, %s13946_s17 }
 0x28c   : > { %v611_v35 = vpop.permute.xlu1 %610 }
 0x28d   : > { %v613_v38 = vadd.f32 %v611_v35, %v603_v37 }
 0x290   : > { %v644_v36 = vpop.permute.xlu1 %643 }
 0x291   : > { %659 = vrot.lane.b32.xlu0 %v644_v36, %s13946_s17  ;;  %s9359_s17 = scalar_lea.sflag [#allocation3], %s459_s25 }
 0x294   : > { %v646_v39 = vpop.permute.xlu1 %645 }
 0x295   : > { %637 = vrot.lane.b32.xlu0 %v613_v38, %s13948_s16  ;;  %s13991_s16 = smov 96  }
 0x298   : > { %v648_v40 = vpop.permute.xlu1 %647 }
 0x299   : > { %v11625_v41 = vpack.i.bf16 %v648_v40, %v646_v39  ;;  %641 = vrot.lane.b32.xlu0 %v613_v38, %s13950_s23 }
 0x29b   : > { %11626 = vrot.lane.b32.xlu1 %v11625_v41, %s13991_s16 }
 0x29c   : > { %v627_v43 = vpop.permute.xlu1 %626 }
 0x29d   : > { %629 = vst.msk [vmem:[%s12211_s2] sm:$0xff] %vm504_vm0, %v627_v43  ;;  %v11103_v45 = vpack.c.bf16 %v627_v43, %v655_v42 }
 0x29f   : > { %639 = vrot.lane.b32.xlu1 %v613_v38, %s13994_s20  ;;  %11105 = vmatpush3.bf16.xpose.msk.msra.mxu1 %vm12217_vm3, %v11103_v45  ;;  %v9529_v45 = vld [vmem:[%s12204_s28 + $0x20] sm:$0xff] }
 0x2a0   : > { %11110 = vmatprep.subr.bf16.mxu1 %v11983_v34 }
 0x2a6   : > { %10323 = vmatmul.mubr.msk.f32.vlgmr.msra.gmra.mrb[2].mxu1 %vm679_vm2, %v613_v38 }
 0x2a7   : > { %10336 = vmatprep.mubr.msk.f32.mxu1 %vm11984_vm1, %v11979_v10 }
 0x303   : > { %v660_v47 = vpop.permute.xlu0 %659 }
 0x304   : > { %v11107_v48 = vpack.c.bf16 %v660_v47, %v656_v46 }
 0x306   : > { %11109 = vmatpush3.bf16.xpose.msk.msra.mxu0 %vm12217_vm3, %v11107_v48 }
 0x307   : > { %11114 = vmatprep.subr.bf16.mxu0 %v11983_v34  ;;  %v638_v49 = vpop.permute.xlu0 %637 }
 0x30b   : > { %v642_v57 = vpop.permute.xlu0 %641 }
 0x30d   : > { %10330 = vmatmul.mubr.msk.f32.vlgmr.msra.gmra.mrb[0].mxu0 %vm679_vm2, %v638_v49  ;;  %v11627_v52 = vpop.permute.xlu1 %11626 }
 0x30e   : > { %v11629_v53 = vunpack.i.h.bf16 %v11627_v52  ;;  %v11628_v54 = vunpack.i.l.bf16 %v11627_v52  ;;  %10343 = vmatprep.mubr.msk.f32.mxu0 %vm11984_vm1, %v11979_v10 }
 0x310   : > { %v11115_v55 = vpack.c.bf16 %v11629_v53, %v658_v51  ;;  %v11111_v56 = vpack.c.bf16 %v11628_v54, %v657_v50 }
 0x311   : > { %v640_v58 = vpop.permute.xlu1 %639 }
 0x312   : > { %11113 = vmatpush3.bf16.xpose.msk.msra.mxu1 %vm12217_vm3, %v11111_v56  ;;  %11117 = vmatpush3.bf16.xpose.msk.msra.mxu0 %vm12217_vm3, %v11115_v55 }
 0x313   : > { %11118 = vmatprep.subr.bf16.mxu1 %v11983_v34  ;;  %11124 = vmatprep.subr.bf16.mxu0 %v11983_v34 }
 0x319   : > { %10337 = vmatmul.mubr.msk.f32.vlgmr.msra.gmra.mrb[4].mxu1 %vm679_vm2, %v640_v58  ;;  %10344 = vmatmul.mubr.msk.f32.vlgmr.msra.gmra.mrb[2].mxu0 %vm679_vm2, %v642_v57  ;;  %v9531_v58 = vld [vmem:[%s12204_s28 + $0x30] sm:$0xff] }
 0x31a   : > { %10350 = vmatprep.mubr.msk.f32.mxu1 %vm11984_vm1, %v11979_v10  ;;  %10364 = vmatprep.mubr.msk.f32.mxu0 %vm11984_vm1, %v11979_v10 }
 0x379   : > { %v753_v59 = vpop.f32.mrb[2].mxu1 }
 0x37a   : > { %v988_v61 = vmul.f32 0.35355338, %v753_v59  ;;  %v10324_v62 = vpop.f32.mrb[3].mxu1 }
 0x37c   : > { %v992_v63 = vadd.f32 %v988_v61, %v12258_v60 }
 0x37e   : > { %v997_v1 = vsel %vm996_vm4, %v992_v63, -inf }
 0x37f   : > { %998 = vmax.xlane.f32.xlu1 %v997_v1 }
 0x3e0   : > { %v830_v2 = vpop.f32.mrb[0].mxu0 }
 0x3e1   : > { %v989_v4 = vmul.f32 0.35355338, %v830_v2  ;;  %v10331_v5 = vpop.f32.mrb[1].mxu0  ;;  %v9530_v2 = vld [vmem:[%s12204_s28 + $0x28] sm:$0xff] }
 0x3e3   : > { %v993_v6 = vadd.f32 %v989_v4, %v12263_v3 }
 0x3e5   : > { %v1000_v7 = vsel %vm996_vm4, %v993_v6, -inf }
 0x3e6   : > { %1001 = vmax.xlane.f32.xlu0 %v1000_v7 }
 0x3ec   : > { %v907_v8 = vpop.f32.mrb[4].mxu1  ;;  %v984_v9 = vpop.f32.mrb[2].mxu0 }
 0x3ed   : > { %v990_v13 = vmul.f32 0.35355338, %v907_v8  ;;  %v991_v14 = vmul.f32 0.35355338, %v984_v9  ;;  %v10338_v15 = vpop.f32.mrb[5].mxu1  ;;  %v10345_v17 = vpop.f32.mrb[3].mxu0 }
 0x3ee   : > { %v9532_v8 = vld [vmem:[%s12204_s28 + $0x38] sm:$0xff] }
 0x3ef   : > { %v995_v18 = vadd.f32 %v991_v14, %v12268_v11  ;;  %v994_v19 = vadd.f32 %v990_v13, %v12271_v12 }
 0x3f1   : > { %v1006_v20 = vsel %vm996_vm4, %v995_v18, -inf  ;;  %v1003_v21 = vsel %vm996_vm4, %v994_v19, -inf }
 0x3f2   : > { %1007 = vmax.xlane.f32.xlu1 %v1006_v20  ;;  %1004 = vmax.xlane.f32.xlu0 %v1003_v21  ;;  %v1350_v20 = vld [vmem:[%s13935_s7 + $0x8] sm:$0xff] }
 0x403   : > { %651 = vrot.lane.b32.xlu1 %v12171_v25, %s13994_s20 }
 0x407   : > { %653 = vrot.lane.b32.xlu1 %v12171_v25, %s13950_s23  ;;  %s13956_s23 = smov 16  }
 0x408   : > { %649 = vrot.lane.b32.xlu0 %v12171_v25, %s13996_s15 }
 0x40b   : > { %631 = vrot.lane.b32.xlu1 %v12171_v25, %s13952_s30 }
 0x40c   : > { %v999_v22 = vpop.xlane.xlu1 %998 }
 0x40d   : > { %v1009_v23 = vsub.f32 %v992_v63, %v999_v22 }
 0x40f   : > { %v1013_v26 = vmul.f32 1.442695, %v1009_v23 }
 0x411   : > { %11707 = vpow2.f32 %v1013_v26  ;;  %v1351_v26 = vld [vmem:[%s13935_s7 + $0x10] sm:$0xff] }
 0x41b   : > { %v11708_v27 = vpop.eup %11707 }
 0x41c   : > { %v1021_v28 = vsel %vm996_vm4, %v11708_v27, 0.0 }
 0x427   : > { %1022 = vadd.xlane.f32.xlu0 %v1021_v28 }
 0x473   : > { %v1002_v31 = vpop.xlane.xlu0 %1001 }
 0x474   : > { %v1010_v32 = vsub.f32 %v993_v6, %v1002_v31 }
 0x476   : > { %v1015_v33 = vmul.f32 1.442695, %v1010_v32 }
 0x478   : > { %11709 = vpow2.f32 %v1015_v33 }
 0x47f   : > { %v1008_v35 = vpop.xlane.xlu1 %1007  ;;  %v1005_v36 = vpop.xlane.xlu0 %1004 }
 0x480   : > { %v1012_v37 = vsub.f32 %v995_v18, %v1008_v35  ;;  %v1011_v38 = vsub.f32 %v994_v19, %v1005_v36  ;;  %v1349_v19 = vld [vmem:[%s13935_s7] sm:$0xff] }
 0x481   : > { %v11131_v21 = vpack.c.bf16 %v1350_v20, %v1349_v19 }
 0x482   : > { %v11710_v39 = vpop.eup %11709  ;;  %v1017_v25 = vmul.f32 1.442695, %v1011_v38  ;;  %v1019_v40 = vmul.f32 1.442695, %v1012_v37 }
 0x483   : > { %v652_v41 = vpop.permute.xlu1 %651  ;;  %v1024_v42 = vsel %vm996_vm4, %v11710_v39, 0.0  ;;  %v650_v53 = vpop.permute.xlu0 %649 }
 0x484   : > { %1025 = vadd.xlane.f32.xlu1 %v1024_v42  ;;  %11711 = vpow2.f32 %v1017_v25 }
 0x485   : > { %11713 = vpow2.f32 %v1019_v40 }
 0x487   : > { %v654_v43 = vpop.permute.xlu1 %653 }
 0x488   : > { %v11630_v51 = vpack.i.bf16 %v654_v43, %v652_v41 }
 0x48b   : > { %v632_v46 = vpop.permute.xlu1 %631 }
 0x48c   : > { %9528 = vst.msk [vmem:[%s12211_s2 + $0x8] sm:$0xff] %vm504_vm0, %v632_v46  ;;  %v11119_v47 = vpack.c.bf16 %v632_v46, %v9529_v45 }
 0x48e   : > { %11120 = vmatpush3.bf16.msra.mxu1 %v11119_v47  ;;  %v11712_v48 = vpop.eup %11711 }
 0x48f   : > { %11121 = vmatprep.subr.bf16.mxu1 %v11983_v34  ;;  %v1027_v49 = vsel %vm996_vm4, %v11712_v48, 0.0  ;;  %v11714_v50 = vpop.eup %11713 }
 0x490   : > { %1028 = vadd.xlane.f32.xlu0 %v1027_v49  ;;  %v1030_v52 = vsel %vm996_vm4, %v11714_v50, 0.0  ;;  %v1443_v49 = vld [vmem:[%s13936_s8] sm:$0xff] }
 0x494   : > { %1031 = vadd.xlane.f32.xlu0 %v1030_v52  ;;  %v1446_v52 = vld [vmem:[%s13936_s8 + $0x18] sm:$0xff] }
 0x495   : > { %11631 = vrot.lane.b32.xlu1 %v11630_v51, %s13952_s30 }
 0x4aa   : > { %670 = vrot.lane.b32.xlu0 %v650_v53, %s13952_s30 }
 0x4b4   : > { %v1023_v54 = vpop.xlane.xlu0 %1022 }
 0x4b5   : > { %11715 = vrcp.f32 %v1023_v54 }
 0x4bf   : > { %v11716_v55 = vpop.eup %11715 }
 0x4c0   : > { %v1037_v56 = vmul.f32 %v11716_v55, %v11708_v27  ;;  %v1352_v27 = vld [vmem:[%s13935_s7 + $0x18] sm:$0xff] }
 0x4c1   : > { %v11134_v28 = vpack.c.bf16 %v1352_v27, %v1351_v26 }
 0x4c2   : > { %10351 = vmatmul.mubr.msk.f32.vlgmr.msra.gmra.mrb[6].mxu1 %vm996_vm4, %v1037_v56 }
 0x4c3   : > { %10357 = vmatprep.mubr.msk.f32.mxu1 %vm11984_vm1, %v11979_v10 }
 0x511   : > { %v1026_v57 = vpop.xlane.xlu1 %1025 }
 0x512   : > { %11717 = vrcp.f32 %v1026_v57 }
 0x515   : > { %v11632_v59 = vpop.permute.xlu1 %11631 }
 0x516   : > { %v11633_v61 = vunpack.i.l.bf16 %v11632_v59  ;;  %v11634_v6 = vunpack.i.h.bf16 %v11632_v59 }
 0x518   : > { %v11125_v62 = vpack.c.bf16 %v11633_v61, %v9531_v58  ;;  %v11128_v15 = vpack.c.bf16 %v11634_v6, %v9532_v8  ;;  %v9550_v58 = vld [vmem:[%s13933_s5] ss:$0 sm:$0xff] }
 0x519   : > { %v1536_v6 = vld [vmem:[%s13937_s9 + $0x20] sm:$0xff] }
 0x51a   : > { %11126 = vmatpush3.bf16.msra.mxu0 %v11125_v62  ;;  %v1532_v62 = vld [vmem:[%s13937_s9] sm:$0xff] }
 0x51b   : > { %11130 = vmatprep.subr.bf16.mxu0 %v11983_v34 }
 0x51c   : > { %v11718_v5 = vpop.eup %11717 }
 0x51d   : > { %v1029_v63 = vpop.xlane.xlu0 %1028  ;;  %v1038_v13 = vmul.f32 %v11718_v5, %v11710_v39 }
 0x51e   : > { %11719 = vrcp.f32 %v1029_v63  ;;  %v1533_v63 = vld [vmem:[%s13937_s9 + $0x8] sm:$0xff] }
 0x521   : > { %v1032_v1 = vpop.xlane.xlu0 %1031 }
 0x522   : > { %11721 = vrcp.f32 %v1032_v1  ;;  %v1534_v1 = vld [vmem:[%s13937_s9 + $0x10] sm:$0xff] }
 0x525   : > { %v671_v4 = vpop.permute.xlu0 %670 }
 0x526   : > { %v11122_v7 = vpack.c.bf16 %v671_v4, %v9530_v2  ;;  %v11143_v2 = vpack.c.bf16 %v1533_v63, %v1532_v62  ;;  %v1535_v4 = vld [vmem:[%s13937_s9 + $0x18] sm:$0xff] }
 0x527   : > { %v11146_v5 = vpack.c.bf16 %v1535_v4, %v1534_v1 }
 0x528   : > { %v11720_v9 = vpop.eup %11719  ;;  %11123 = vmatpush3.bf16.msra.mxu1 %v11122_v7  ;;  %v1537_v7 = vld [vmem:[%s13937_s9 + $0x28] sm:$0xff] }
 0x529   : > { %v1039_v14 = vmul.f32 %v11720_v9, %v11712_v48  ;;  %11127 = vmatprep.subr.bf16.mxu1 %v11983_v34  ;;  %v11149_v8 = vpack.c.bf16 %v1537_v7, %v1536_v6  ;;  %v1538_v9 = vld [vmem:[%s13937_s9 + $0x30] sm:$0xff] }
 0x52b   : > { %10358 = vmatmul.mubr.msk.f32.vlgmr.msra.gmra.mrb[8].mxu1 %vm996_vm4, %v1038_v13  ;;  %10365 = vmatmul.mubr.msk.f32.vlgmr.msra.gmra.mrb[4].mxu0 %vm996_vm4, %v1039_v14  ;;  %v1539_v13 = vld [vmem:[%s13937_s9 + $0x38] sm:$0xff] }
 0x52c   : > { %v11722_v17 = vpop.eup %11721  ;;  %11129 = vmatpush3.bf16.msra.mxu1 %v11128_v15  ;;  %10371 = vmatprep.mubr.msk.f32.mxu1 %vm11984_vm1, %v11979_v10  ;;  %v11152_v14 = vpack.c.bf16 %v1539_v13, %v1538_v9  ;;  %v9569_v13 = vld [vmem:[%s12204_s28 + $0x50] sm:$0xff] }
 0x52d   : > { %v1040_v18 = vmul.f32 %v11722_v17, %v11714_v50  ;;  %10382 = vmatprep.mubr.msk.f32.mxu0 %vm11984_vm1, %v11979_v10  ;;  %11136 = vmatprep.subr.bf16.mxu1 %v11983_v34  ;;  %v1444_v50 = vld [vmem:[%s13936_s8 + $0x8] sm:$0xff] }
 0x52e   : > { %11132 = vmatpush3.bf16.msra.mxu0 %v11131_v21  ;;  %v11137_v51 = vpack.c.bf16 %v1444_v50, %v1443_v49 }
 0x52f   : > { %10372 = vmatmul.mubr.msk.f32.vlgmr.msra.gmra.mrb[10].mxu1 %vm996_vm4, %v1040_v18  ;;  %11133 = vmatprep.subr.bf16.mxu0 %v11983_v34 }
 0x530   : > { %10393 = vmatprep.mubr.msk.f32.mxu1 %vm11984_vm1, %v11979_v10  ;;  %11138 = vmatpush3.bf16.msra.mxu1 %v11137_v51  ;;  %v9555_v51 = vld [vmem:[%s13932_s4 + $0x1] ss:$0 sm:$0xff] }
 0x531   : > { %11139 = vmatprep.subr.bf16.mxu1 %v11983_v34 }
 0x532   : > { %11135 = vmatpush3.bf16.msra.mxu0 %v11134_v28 }
 0x533   : > { %11142 = vmatprep.subr.bf16.mxu0 %v11983_v34 }
 0x595   : > { %v1110_v22 = vpop.f32.mrb[6].mxu1 }
 0x596   : > { %v10352_v23 = vpop.f32.mrb[7].mxu1 }
 0x5fe   : > { %v1183_v31 = vpop.f32.mrb[8].mxu1  ;;  %v1256_v32 = vpop.f32.mrb[4].mxu0 }
 0x5ff   : > { %1338 = vrot.lane.b32.xlu0 %v1256_v32, %s13956_s23  ;;  %v10366_v33 = vpop.f32.mrb[5].mxu0  ;;  %1334 = vrot.lane.b32.xlu1 %v1183_v31, %s13958_s19  ;;  %v10359_v35 = vpop.f32.mrb[9].mxu1  ;;  %s14002_s23 = smov 24   ;;  %s461_s19 = scalar_lea.vmem [#allocation2], %s9516_s27 }
 0x600   : > { %v9557_v35 = vld [vmem:[%s13934_s6 + $0x48] sm:$0xff]  ;;  %s9377_s13 = sshll.u32 %s461_s19, 4  ;;  %s13887_s13 = int_to_ptr.vmem [resolvable:$true] %s9377_s13 }
 0x602   : > { %v1329_v36 = vpop.f32.mrb[10].mxu1 }
 0x603   : > { %1342 = vrot.lane.b32.xlu1 %v1329_v36, %s13954_s1  ;;  %v10373_v37 = vpop.f32.mrb[11].mxu1  ;;  %v9559_v36 = vld [vmem:[%s13934_s6 + $0x58] sm:$0xff]  ;;  %s14001_s1 = smov 16  }
 0x604   : > { %v11154_v37 = vpack.c.bf16 %v9559_v36, %v9557_v35 }
 0x671   : > { %v1335_v38 = vpop.permute.xlu1 %1334  ;;  %v1339_v39 = vpop.permute.xlu0 %1338 }
 0x672   : > { %v1345_v25 = vsel %vm679_vm2, %v1110_v22, %v1335_v38  ;;  %v9556_v38 = vld [vmem:[%s13934_s6 + $0x40] sm:$0xff] }
 0x673   : > { %v1346_v40 = vsel %vm996_vm4, %v1345_v25, %v1339_v39  ;;  %v9558_v39 = vld [vmem:[%s13934_s6 + $0x50] sm:$0xff] }
 0x674   : > { %v11156_v25 = vpack.c.bf16 %v9558_v39, %v9556_v38 }
 0x675   : > { %v1343_v41 = vpop.permute.xlu1 %1342 }
 0x676   : > { %v1348_v42 = vsel %vm1347_vm5, %v1346_v40, %v1343_v41  ;;  %v9561_v40 = vld [vmem:[%s13934_s6 + $0x68] sm:$0xff]  ;;  %v9563_v41 = vld [vmem:[%s13934_s6 + $0x78] sm:$0xff] }
 0x677   : > { %10383 = vmatmul.mubr.msk.f32.vlgmr.msra.gmra.mrb[6].mxu0 %vm504_vm0, %v1348_v42  ;;  %v11158_v42 = vpack.c.bf16 %v9563_v41, %v9561_v40 }
 0x678   : > { %10412 = vmatprep.mubr.msk.f32.mxu0 %vm11984_vm1, %v11979_v10  ;;  %11144 = vmatpush3.bf16.msra.mxu0 %v11143_v2 }
 0x679   : > { %11145 = vmatprep.subr.bf16.mxu0 %v11983_v34 }
 0x67c   : > { %11147 = vmatpush3.bf16.msra.mxu0 %v11146_v5  ;;  %v9567_v5 = vld [vmem:[%s12204_s28 + $0x40] sm:$0xff] }
 0x67d   : > { %11148 = vmatprep.subr.bf16.mxu0 %v11983_v34 }
 0x680   : > { %11150 = vmatpush3.bf16.msra.mxu0 %v11149_v8 }
 0x681   : > { %11151 = vmatprep.subr.bf16.mxu0 %v11983_v34 }
 0x684   : > { %11153 = vmatpush3.bf16.msra.mxu0 %v11152_v14  ;;  %v9570_v14 = vld [vmem:[%s12204_s28 + $0x58] sm:$0xff] }
 0x685   : > { %11166 = vmatprep.subr.bf16.mxu0 %v11983_v34 }
 0x74a   : > { %v1422_v43 = vpop.f32.mrb[6].mxu0 }
 0x74b   : > { %v1426_v45 = vadd.f32 %v1422_v43, %v12116_v0  ;;  %v10384_v46 = vpop.f32.mrb[7].mxu0  ;;  %v1445_v0 = vld [vmem:[%s13936_s8 + $0x10] sm:$0xff]  ;;  %v9560_v43 = vld [vmem:[%s13934_s6 + $0x60] sm:$0xff] }
 0x74c   : > { %v11140_v53 = vpack.c.bf16 %v1446_v52, %v1445_v0 }
 0x74d   : > { %v1427_v47 = vmul.f32 %v1426_v45, %v1426_v45 }
 0x74e   : > { %11141 = vmatpush3.bf16.msra.mxu1 %v11140_v53 }
 0x74f   : > { %v1428_v48 = vsel %vm504_vm0, %v1427_v47, 0.0  ;;  %11155 = vmatprep.subr.bf16.mxu1 %v11154_v37 }
 0x750   : > { %1429 = vadd.xlane.f32.xlu0 %v1428_v48 }
 0x7dd   : > { %v1430_v54 = vpop.xlane.xlu0 %1429 }
 0x7de   : > { %v1431_v55 = vmul.f32 0.03125, %v1430_v54 }
 0x7e0   : > { %v1432_v56 = vadd.f32 1e-06, %v1431_v55 }
 0x7e2   : > { %11723 = vrsqrt.f32 %v1432_v56 }
 0x7ec   : > { %v11724_v57 = vpop.eup %11723 }
 0x7ed   : > { %v1434_v59 = vmul.f32 %v11724_v57, %v1426_v45 }
 0x7ef   : > { %v1442_v61 = vmul.f32 %v9550_v58, %v1434_v59 }
 0x7f1   : > { %10394 = vmatmul.mubr.msk.f32.vlgmr.msra.gmra.mrb[12].mxu1 %vm504_vm0, %v1442_v61 }
 0x7f2   : > { %1708 = vmatprep.mubr.f32.mxu1 %v11979_v10  ;;  %11157 = vmatpush1.bf16.msra.mxu1 %v11156_v25 }
 0x7f3   : > { %11159 = vmatprep.subr.bf16.mxu1 %v11158_v42 }
 0x8c4   : > { %v1516_v15 = vpop.f32.mrb[12].mxu1 }
 0x8c5   : > { %1528 = vrot.lane.b32.xlu1 %v1516_v15, %s13997_s12  ;;  %v10395_v17 = vpop.f32.mrb[13].mxu1  ;;  %v9552_v18 = vmul.f32 -1.442695, %v1516_v15 }
 0x8c7   : > { %11725 = vpow2.f32 %v9552_v18 }
 0x8d1   : > { %v11726_v19 = vpop.eup %11725 }
 0x8d2   : > { %v1523_v20 = vadd.f32 1.0, %v11726_v19 }
 0x8d4   : > { %11727 = vrcp.f32 %v1523_v20 }
 0x8de   : > { %v11728_v21 = vpop.eup %11727 }
 0x8df   : > { %v1526_v22 = vmul.f32 %v11728_v21, %v1516_v15 }
 0x937   : > { %v1529_v23 = vpop.permute.xlu1 %1528 }
 0x938   : > { %v1531_v26 = vmul.f32 %v1529_v23, %v1526_v22 }
 0x93a   : > { %10413 = vmatmul.mubr.msk.f32.vlgmr.msra.gmra.mrb[8].mxu0 %vm1540_vm6, %v1531_v26 }
 0x93b   : > { %10426 = vmatprep.mubr.msk.f32.mxu0 %vm11984_vm1, %v11979_v10 }
 0xa0d   : > { %v1610_v27 = vpop.f32.mrb[8].mxu0 }
 0xa0e   : > { %v12388_v28 = vadd.f32 %v1610_v27, %v1426_v45  ;;  %v10414_v31 = vpop.f32.mrb[9].mxu0  ;;  %v9562_v45 = vld [vmem:[%s13934_s6 + $0x70] sm:$0xff] }
 0xa0f   : > { %v11160_v46 = vpack.c.bf16 %v9562_v45, %v9560_v43 }
 0xa10   : > { %v1615_v32 = vmul.f32 %v12388_v28, %v12388_v28 }
 0xa11   : > { %11161 = vmatpush1.bf16.msra.mxu1 %v11160_v46 }
 0xa12   : > { %v1616_v33 = vsel %vm504_vm0, %v1615_v32, 0.0  ;;  %11162 = vmatprep.subr.bf16.mxu1 %v11983_v34 }
 0xa13   : > { %1617 = vadd.xlane.f32.xlu1 %v1616_v33 }
 0xaa0   : > { %v1618_v47 = vpop.xlane.xlu1 %1617 }
 0xaa1   : > { %v1619_v48 = vmul.f32 0.03125, %v1618_v47 }
 0xaa3   : > { %v1620_v49 = vadd.f32 1e-06, %v1619_v48 }
 0xaa5   : > { %11729 = vrsqrt.f32 %v1620_v49 }
 0xaaf   : > { %v11730_v50 = vpop.eup %11729 }
 0xab0   : > { %v1622_v0 = vmul.f32 %v11730_v50, %v12388_v28 }
 0xab2   : > { %v1631_v52 = vmul.f32 %v9555_v51, %v1622_v0 }
 0xab4   : > { %9564 = vmatmul.mubr.msk.f32.vlgmr.msra.gmra.mrb[14].mxu1 %vm504_vm0, %v1631_v52 }
 0xab5   : > { %10419 = vmatprep.mubr.msk.f32.mxu1 %vm11984_vm1, %v11979_v10 }
 0xb87   : > { %v12425_v53 = vpop.f32.mrb[14].mxu1 }
 0xb88   : > { %v1712_v54 = vpop.f32.mrb[15].mxu1  ;;  %v1722_v56 = vmul.f32 %v12425_v53, %v12177_v29  ;;  %v1716_v59 = vmul.f32 %v12425_v53, %v12179_v30  ;;  %v1715_v62 = vmul.f32 %v12425_v53, %v12153_v16  ;;  %v9568_v16 = vld [vmem:[%s12204_s28 + $0x48] sm:$0xff] }
 0xb89   : > { %v1723_v55 = vmul.f32 %v1712_v54, %v12169_v24 }
 0xb8b   : > { %1725 = vrot.lane.b32.xlu0 %v1723_v55, %s13998_s0 }
 0xbfd   : > { %v1726_v57 = vpop.permute.xlu0 %1725 }
 0xbfe   : > { %v1728_v58 = vadd.f32 %v1726_v57, %v1722_v56 }
 0xc00   : > { %1750 = vrot.lane.b32.xlu0 %v1728_v58, %s13994_s20  ;;  %1748 = vrot.lane.b32.xlu1 %v1728_v58, %s13996_s15 }
 0xc04   : > { %1718 = vrot.lane.b32.xlu0 %v1716_v59, %s13998_s0  ;;  %1752 = vrot.lane.b32.xlu1 %v1728_v58, %s13999_s3 }
 0xc08   : > { %1730 = vrot.lane.b32.xlu0 %v1728_v58, %s13991_s16 }
 0xc72   : > { %v1751_v24 = vpop.permute.xlu0 %1750  ;;  %v1749_v61 = vpop.permute.xlu1 %1748 }
 0xc73   : > { %1765 = vrot.lane.b32.xlu1 %v1749_v61, %s13991_s16 }
 0xc76   : > { %v1719_v63 = vpop.permute.xlu0 %1718  ;;  %v1753_v1 = vpop.permute.xlu1 %1752 }
 0xc77   : > { %v1721_v2 = vadd.f32 %v1719_v63, %v1715_v62  ;;  %v11635_v4 = vpack.i.bf16 %v1753_v1, %v1751_v24 }
 0xc79   : > { %1742 = vrot.lane.b32.xlu1 %v1721_v2, %s13996_s15  ;;  %11636 = vrot.lane.b32.xlu0 %v11635_v4, %s13991_s16 }
 0xc7a   : > { %v1731_v6 = vpop.permute.xlu0 %1730 }
 0xc7b   : > { %9565 = vst.msk [vmem:[%s12211_s2 + $0x10] sm:$0xff] %vm504_vm0, %v1731_v6  ;;  %v11163_v7 = vpack.c.bf16 %v1731_v6, %v9567_v5 }
 0xc7d   : > { %11165 = vmatpush3.bf16.xpose.msk.msra.mxu1 %vm12217_vm3, %v11163_v7  ;;  %1746 = vrot.lane.b32.xlu1 %v1721_v2, %s13999_s3 }
 0xc7e   : > { %1744 = vrot.lane.b32.xlu0 %v1721_v2, %s13994_s20  ;;  %11170 = vmatprep.subr.bf16.mxu1 %v11983_v34 }
 0xc84   : > { %10420 = vmatmul.mubr.msk.f32.vlgmr.msra.gmra.mrb[16].mxu1 %vm679_vm2, %v1721_v2 }
 0xc85   : > { %10433 = vmatprep.mubr.msk.f32.mxu1 %vm11984_vm1, %v11979_v10 }
 0xce5   : > { %v1766_v8 = vpop.permute.xlu1 %1765 }
 0xce6   : > { %v11167_v9 = vpack.c.bf16 %v1766_v8, %v9568_v16 }
 0xce8   : > { %11169 = vmatpush3.bf16.xpose.msk.msra.mxu0 %vm12217_vm3, %v11167_v9 }
 0xce9   : > { %11174 = vmatprep.subr.bf16.mxu0 %v11983_v34 }
 0xceb   : > { %v11637_v15 = vpop.permute.xlu0 %11636  ;;  %v1743_v21 = vpop.permute.xlu1 %1742 }
 0xcec   : > { %v11639_v17 = vunpack.i.h.bf16 %v11637_v15  ;;  %v11638_v18 = vunpack.i.l.bf16 %v11637_v15 }
 0xcee   : > { %v11175_v19 = vpack.c.bf16 %v11639_v17, %v9570_v14  ;;  %v11171_v20 = vpack.c.bf16 %v11638_v18, %v9569_v13  ;;  %v9571_v13 = vld [vmem:[%s12204_s28 + $0x60] sm:$0xff]  ;;  %v9572_v18 = vld [vmem:[%s12204_s28 + $0x68] sm:$0xff] }
 0xcef   : > { %10427 = vmatmul.mubr.msk.f32.vlgmr.msra.gmra.mrb[10].mxu0 %vm679_vm2, %v1743_v21  ;;  %v1747_v23 = vpop.permute.xlu1 %1746 }
 0xcf0   : > { %11173 = vmatpush3.bf16.xpose.msk.msra.mxu1 %vm12217_vm3, %v11171_v20  ;;  %11177 = vmatpush3.bf16.xpose.msk.msra.mxu0 %vm12217_vm3, %v11175_v19  ;;  %v1745_v22 = vpop.permute.xlu0 %1744 }
 0xcf1   : > { %10440 = vmatprep.mubr.msk.f32.mxu0 %vm11984_vm1, %v11979_v10  ;;  %11178 = vmatprep.subr.bf16.mxu1 %v11983_v34 }
 0xcf2   : > { %11184 = vmatprep.subr.bf16.mxu0 %v11983_v34 }
 0xcf7   : > { %10434 = vmatmul.mubr.msk.f32.vlgmr.msra.gmra.mrb[18].mxu1 %vm679_vm2, %v1745_v22  ;;  %10441 = vmatmul.mubr.msk.f32.vlgmr.msra.gmra.mrb[12].mxu0 %vm679_vm2, %v1747_v23 }
 0xcf8   : > { %10447 = vmatprep.mubr.msk.f32.mxu1 %vm11984_vm1, %v11979_v10  ;;  %10461 = vmatprep.mubr.msk.f32.mxu0 %vm11984_vm1, %v11979_v10 }
 0xd57   : > { %v1858_v26 = vpop.f32.mrb[16].mxu1 }
 0xd58   : > { %v2093_v27 = vmul.f32 0.35355338, %v1858_v26  ;;  %v10421_v31 = vpop.f32.mrb[17].mxu1  ;;  %v9573_v26 = vld [vmem:[%s12204_s28 + $0x70] sm:$0xff] }
 0xd5a   : > { %v2097_v32 = vadd.f32 %v2093_v27, %v12258_v60  ;;  %v9574_v27 = vld [vmem:[%s12204_s28 + $0x78] sm:$0xff] }
 0xd5c   : > { %v2101_v33 = vsel %vm996_vm4, %v2097_v32, -inf }
 0xd5d   : > { %2102 = vmax.xlane.f32.xlu0 %v2101_v33 }
 0xdc2   : > { %v1935_v35 = vpop.f32.mrb[10].mxu0 }
 0xdc3   : > { %v2094_v36 = vmul.f32 0.35355338, %v1935_v35  ;;  %v10428_v37 = vpop.f32.mrb[11].mxu0 }
 0xdc5   : > { %v2098_v38 = vadd.f32 %v2094_v36, %v12263_v3 }
 0xdc7   : > { %v2104_v39 = vsel %vm996_vm4, %v2098_v38, -inf }
 0xdc8   : > { %2105 = vmax.xlane.f32.xlu1 %v2104_v39 }
 0xdca   : > { %v2012_v25 = vpop.f32.mrb[18].mxu1  ;;  %v2089_v40 = vpop.f32.mrb[12].mxu0 }
 0xdcb   : > { %v2095_v41 = vmul.f32 0.35355338, %v2012_v25  ;;  %v2096_v42 = vmul.f32 0.35355338, %v2089_v40  ;;  %v10435_v43 = vpop.f32.mrb[19].mxu1  ;;  %v10442_v45 = vpop.f32.mrb[13].mxu0 }
 0xdcc   : > { %v9591_v40 = vld [vmem:[%s13935_s7 + $0x20] sm:$0xff] }
 0xdcd   : > { %v2099_v46 = vadd.f32 %v2095_v41, %v12271_v12  ;;  %v2100_v47 = vadd.f32 %v2096_v42, %v12268_v11  ;;  %v9592_v41 = vld [vmem:[%s13935_s7 + $0x28] sm:$0xff] }
 0xdce   : > { %v11191_v42 = vpack.c.bf16 %v9592_v41, %v9591_v40 }
 0xdcf   : > { %v2107_v60 = vsel %vm996_vm4, %v2099_v46, -inf  ;;  %v2110_v48 = vsel %vm996_vm4, %v2100_v47, -inf }
 0xdd0   : > { %2108 = vmax.xlane.f32.xlu0 %v2107_v60  ;;  %v9593_v60 = vld [vmem:[%s13935_s7 + $0x30] sm:$0xff] }
 0xdd4   : > { %2111 = vmax.xlane.f32.xlu0 %v2110_v48 }
 0xdd9   : > { %1754 = vrot.lane.b32.xlu1 %v12425_v53, %s13996_s15 }
 0xddd   : > { %1758 = vrot.lane.b32.xlu1 %v12425_v53, %s13999_s3 }
 0xdea   : > { %v2103_v3 = vpop.xlane.xlu0 %2102  ;;  %1756 = vrot.lane.b32.xlu0 %v12425_v53, %s13994_s20 }
 0xdeb   : > { %v2113_v49 = vsub.f32 %v2097_v32, %v2103_v3 }
 0xded   : > { %v2117_v12 = vmul.f32 1.442695, %v2113_v49 }
 0xdef   : > { %11731 = vpow2.f32 %v2117_v12 }
 0xdf9   : > { %v11732_v50 = vpop.eup %11731 }
 0xdfa   : > { %v2125_v11 = vsel %vm996_vm4, %v11732_v50, 0.0 }
 0xe01   : > { %2126 = vadd.xlane.f32.xlu1 %v2125_v11 }
 0xe55   : > { %v2106_v51 = vpop.xlane.xlu1 %2105 }
 0xe56   : > { %v2114_v0 = vsub.f32 %v2098_v38, %v2106_v51 }
 0xe58   : > { %v2119_v52 = vmul.f32 1.442695, %v2114_v0 }
 0xe59   : > { %v1755_v54 = vpop.permute.xlu1 %1754 }
 0xe5a   : > { %11733 = vpow2.f32 %v2119_v52  ;;  %1776 = vrot.lane.b32.xlu1 %v1755_v54, %s13997_s12 }
 0xe5d   : > { %v2109_v55 = vpop.xlane.xlu0 %2108  ;;  %v1759_v6 = vpop.permute.xlu1 %1758 }
 0xe5e   : > { %v2115_v56 = vsub.f32 %v2099_v46, %v2109_v55 }
 0xe60   : > { %v2121_v57 = vmul.f32 1.442695, %v2115_v56 }
 0xe61   : > { %v2112_v59 = vpop.xlane.xlu0 %2111 }
 0xe62   : > { %11735 = vpow2.f32 %v2121_v57  ;;  %v2116_v61 = vsub.f32 %v2100_v47, %v2112_v59  ;;  %v9594_v47 = vld [vmem:[%s13935_s7 + $0x38] sm:$0xff] }
 0xe63   : > { %v11194_v3 = vpack.c.bf16 %v9594_v47, %v9593_v60  ;;  %v9618_v60 = vld [vmem:[%s13934_s6 + $0x98] sm:$0xff] }
 0xe64   : > { %v11734_v58 = vpop.eup %11733  ;;  %v2123_v63 = vmul.f32 1.442695, %v2116_v61 }
 0xe65   : > { %v2128_v24 = vsel %vm996_vm4, %v11734_v58, 0.0  ;;  %v1757_v5 = vpop.permute.xlu0 %1756 }
 0xe66   : > { %2129 = vadd.xlane.f32.xlu0 %v2128_v24  ;;  %11737 = vpow2.f32 %v2123_v63  ;;  %v11640_v7 = vpack.i.bf16 %v1759_v6, %v1757_v5  ;;  %v9599_v63 = vld [vmem:[%s13936_s8 + $0x28] sm:$0xff] }
 0xe6c   : > { %v11736_v62 = vpop.eup %11735 }
 0xe6d   : > { %v2131_v1 = vsel %vm996_vm4, %v11736_v62, 0.0 }
 0xe6e   : > { %2132 = vadd.xlane.f32.xlu0 %v2131_v1 }
 0xe70   : > { %v11738_v2 = vpop.eup %11737 }
 0xe71   : > { %v2134_v4 = vsel %vm996_vm4, %v11738_v2, 0.0 }
 0xe7e   : > { %2135 = vadd.xlane.f32.xlu1 %v2134_v4 }
 0xe84   : > { %1736 = vrot.lane.b32.xlu0 %v12425_v53, %s13997_s12 }
 0xe8e   : > { %v2127_v16 = vpop.xlane.xlu1 %2126 }
 0xe8f   : > { %11641 = vrot.lane.b32.xlu1 %v11640_v7, %s13997_s12  ;;  %11739 = vrcp.f32 %v2127_v16 }
 0xe99   : > { %v11740_v15 = vpop.eup %11739 }
 0xe9a   : > { %v2141_v53 = vmul.f32 %v11740_v15, %v11732_v50  ;;  %v9605_v15 = vld [vmem:[%s13937_s9 + $0x48] sm:$0xff] }
 0xecc   : > { %v1777_v19 = vpop.permute.xlu1 %1776 }
 0xecd   : > { %v11182_v21 = vpack.c.bf16 %v1777_v19, %v9572_v18  ;;  %v9607_v19 = vld [vmem:[%s13937_s9 + $0x58] sm:$0xff] }
 0xef3   : > { %v2130_v8 = vpop.xlane.xlu0 %2129 }
 0xef4   : > { %11741 = vrcp.f32 %v2130_v8  ;;  %v9597_v8 = vld [vmem:[%s13933_s5 + $0x1] ss:$0 sm:$0xff] }
 0xefb   : > { %v2133_v9 = vpop.xlane.xlu0 %2132 }
 0xefc   : > { %11743 = vrcp.f32 %v2133_v9 }
 0xefe   : > { %v11742_v20 = vpop.eup %11741 }
 0xeff   : > { %v1737_v14 = vpop.permute.xlu0 %1736  ;;  %v2142_v22 = vmul.f32 %v11742_v20, %v11734_v58  ;;  %v9608_v20 = vld [vmem:[%s13937_s9 + $0x60] sm:$0xff] }
 0xf00   : > { %9566 = vst.msk [vmem:[%s12211_s2 + $0x18] sm:$0xff] %vm504_vm0, %v1737_v14  ;;  %v11179_v17 = vpack.c.bf16 %v1737_v14, %v9571_v13  ;;  %v9604_v14 = vld [vmem:[%s13937_s9 + $0x40] sm:$0xff] }
 0xf01   : > { %v11203_v18 = vpack.c.bf16 %v9605_v15, %v9604_v14 }
 0xf02   : > { %11180 = vmatpush3.bf16.msra.mxu1 %v11179_v17  ;;  %v9606_v17 = vld [vmem:[%s13937_s9 + $0x50] sm:$0xff] }
 0xf03   : > { %11181 = vmatprep.subr.bf16.mxu1 %v11983_v34 }
 0xf05   : > { %10448 = vmatmul.mubr.msk.f32.vlgmr.msra.gmra.mrb[20].mxu1 %vm996_vm4, %v2141_v53  ;;  %v11206_v53 = vpack.c.bf16 %v9607_v19, %v9606_v17  ;;  %v9626_v17 = vld [vmem:[%s12204_s28 + $0x80] sm:$0xff] }
 0xf06   : > { %11183 = vmatpush3.bf16.msra.mxu1 %v11182_v21  ;;  %10454 = vmatprep.mubr.msk.f32.mxu1 %vm11984_vm1, %v11979_v10  ;;  %v11744_v35 = vpop.eup %11743  ;;  %v9609_v21 = vld [vmem:[%s13937_s9 + $0x68] sm:$0xff] }
 0xf07   : > { %11187 = vmatprep.subr.bf16.mxu1 %v11983_v34  ;;  %v2143_v38 = vmul.f32 %v11744_v35, %v11736_v62  ;;  %v9598_v62 = vld [vmem:[%s13936_s8 + $0x20] sm:$0xff] }
 0xf08   : > { %v11197_v1 = vpack.c.bf16 %v9599_v63, %v9598_v62  ;;  %v12634_v63 = vld [vmem:[%s12166_s29] sm:$0xff] }
 0xf09   : > { %10455 = vmatmul.mubr.msk.f32.vlgmr.msra.gmra.mrb[22].mxu1 %vm996_vm4, %v2142_v22  ;;  %v11209_v22 = vpack.c.bf16 %v9609_v21, %v9608_v20 }
 0xf0a   : > { %10468 = vmatprep.mubr.msk.f32.mxu1 %vm11984_vm1, %v11979_v10 }
 0xf0b   : > { %v2136_v23 = vpop.xlane.xlu1 %2135 }
 0xf0c   : > { %11745 = vrcp.f32 %v2136_v23  ;;  %v9610_v23 = vld [vmem:[%s13937_s9 + $0x70] sm:$0xff] }
 0xf0f   : > { %v11642_v31 = vpop.permute.xlu1 %11641 }
 0xf10   : > { %v11644_v32 = vunpack.i.h.bf16 %v11642_v31  ;;  %v11643_v33 = vunpack.i.l.bf16 %v11642_v31 }
 0xf12   : > { %v11188_v36 = vpack.c.bf16 %v11644_v32, %v9574_v27  ;;  %v11185_v37 = vpack.c.bf16 %v11643_v33, %v9573_v26  ;;  %v9611_v26 = vld [vmem:[%s13937_s9 + $0x78] sm:$0xff] }
 0xf13   : > { %v11212_v27 = vpack.c.bf16 %v9611_v26, %v9610_v23  ;;  %v9629_v23 = vld [vmem:[%s12204_s28 + $0x98] sm:$0xff] }
 0xf14   : > { %11186 = vmatpush3.bf16.msra.mxu0 %v11185_v37  ;;  %11189 = vmatpush3.bf16.msra.mxu1 %v11188_v36 }
 0xf15   : > { %11190 = vmatprep.subr.bf16.mxu0 %v11983_v34  ;;  %11196 = vmatprep.subr.bf16.mxu1 %v11983_v34 }
 0xf16   : > { %v11746_v39 = vpop.eup %11745 }
 0xf17   : > { %10462 = vmatmul.mubr.msk.f32.vlgmr.msra.gmra.mrb[14].mxu0 %vm996_vm4, %v2143_v38  ;;  %v2144_v25 = vmul.f32 %v11746_v39, %v11738_v2  ;;  %v9601_v2 = vld [vmem:[%s13936_s8 + $0x38] sm:$0xff] }
 0xf18   : > { %10479 = vmatprep.mubr.msk.f32.mxu0 %vm11984_vm1, %v11979_v10  ;;  %11192 = vmatpush3.bf16.msra.mxu0 %v11191_v42 }
 0xf19   : > { %10469 = vmatmul.mubr.msk.f32.vlgmr.msra.gmra.mrb[24].mxu1 %vm996_vm4, %v2144_v25  ;;  %11193 = vmatprep.subr.bf16.mxu0 %v11983_v34 }
 0xf1a   : > { %10490 = vmatprep.mubr.msk.f32.mxu1 %vm11984_vm1, %v11979_v10  ;;  %11198 = vmatpush3.bf16.msra.mxu1 %v11197_v1 }
 0xf1b   : > { %11199 = vmatprep.subr.bf16.mxu1 %v11983_v34 }
 0xf1c   : > { %11195 = vmatpush3.bf16.msra.mxu0 %v11194_v3  ;;  %v9617_v3 = vld [vmem:[%s13934_s6 + $0x90] sm:$0xff] }
 0xf1d   : > { %11202 = vmatprep.subr.bf16.mxu0 %v11983_v34 }
 0xfd8   : > { %v2214_v43 = vpop.f32.mrb[20].mxu1 }
 0xfd9   : > { %v10449_v45 = vpop.f32.mrb[21].mxu1 }
 0xfdc   : > { %v2287_v46 = vpop.f32.mrb[22].mxu1 }
 0xfdd   : > { %2438 = vrot.lane.b32.xlu0 %v2287_v46, %s14000_s10  ;;  %v10456_v48 = vpop.f32.mrb[23].mxu1  ;;  %v9616_v46 = vld [vmem:[%s13934_s6 + $0x88] sm:$0xff] }
 0xfde   : > { %v11214_v47 = vpack.c.bf16 %v9618_v60, %v9616_v46  ;;  %v9615_v48 = vld [vmem:[%s13934_s6 + $0x80] sm:$0xff] }
 0xfea   : > { %v2360_v49 = vpop.f32.mrb[14].mxu0 }
 0xfeb   : > { %2442 = vrot.lane.b32.xlu1 %v2360_v49, %s14001_s1  ;;  %v10463_v12 = vpop.f32.mrb[15].mxu0  ;;  %v11216_v49 = vpack.c.bf16 %v9617_v3, %v9615_v48 }
 0xfec   : > { %v2433_v50 = vpop.f32.mrb[24].mxu1  ;;  %v9620_v12 = vld [vmem:[%s13934_s6 + $0xa8] sm:$0xff] }
 0xfed   : > { %2446 = vrot.lane.b32.xlu0 %v2433_v50, %s14002_s23  ;;  %v10470_v11 = vpop.f32.mrb[25].mxu1  ;;  %v9622_v50 = vld [vmem:[%s13934_s6 + $0xb8] sm:$0xff] }
 0xfee   : > { %v11218_v11 = vpack.c.bf16 %v9622_v50, %v9620_v12 }
0x104f   : > { %v2439_v51 = vpop.permute.xlu0 %2438 }
0x1050   : > { %v2449_v0 = vsel %vm679_vm2, %v2214_v43, %v2439_v51  ;;  %v9619_v51 = vld [vmem:[%s13934_s6 + $0xa0] sm:$0xff] }
0x105d   : > { %v2443_v52 = vpop.permute.xlu1 %2442 }
0x105e   : > { %v2450_v54 = vsel %vm996_vm4, %v2449_v0, %v2443_v52  ;;  %v9621_v0 = vld [vmem:[%s13934_s6 + $0xb0] sm:$0xff] }
0x105f   : > { %v2447_v55 = vpop.permute.xlu0 %2446  ;;  %v11220_v52 = vpack.c.bf16 %v9621_v0, %v9619_v51 }
0x1060   : > { %v2451_v56 = vsel %vm1347_vm5, %v2450_v54, %v2447_v55 }
0x1061   : > { %10480 = vmatmul.mubr.msk.f32.vlgmr.msra.gmra.mrb[16].mxu0 %vm504_vm0, %v2451_v56 }
0x1062   : > { %10509 = vmatprep.mubr.msk.f32.mxu0 %vm11984_vm1, %v11979_v10  ;;  %11204 = vmatpush3.bf16.msra.mxu0 %v11203_v18 }
0x1063   : > { %11205 = vmatprep.subr.bf16.mxu0 %v11983_v34 }
0x1066   : > { %11207 = vmatpush3.bf16.msra.mxu0 %v11206_v53  ;;  %v9627_v53 = vld [vmem:[%s12204_s28 + $0x88] sm:$0xff] }
0x1067   : > { %11208 = vmatprep.subr.bf16.mxu0 %v11983_v34 }
0x106a   : > { %11210 = vmatpush3.bf16.msra.mxu0 %v11209_v22  ;;  %v9628_v22 = vld [vmem:[%s12204_s28 + $0x90] sm:$0xff] }
0x106b   : > { %11211 = vmatprep.subr.bf16.mxu0 %v11983_v34 }
0x106e   : > { %11213 = vmatpush3.bf16.msra.mxu0 %v11212_v27 }
0x106f   : > { %11226 = vmatprep.subr.bf16.mxu0 %v11983_v34 }
0x1134   : > { %v2526_v57 = vpop.f32.mrb[16].mxu0 }
0x1135   : > { %v2530_v58 = vadd.f32 %v2526_v57, %v12388_v28  ;;  %v10481_v59 = vpop.f32.mrb[17].mxu0  ;;  %v9600_v28 = vld [vmem:[%s13936_s8 + $0x30] sm:$0xff] }
0x1136   : > { %v11200_v4 = vpack.c.bf16 %v9601_v2, %v9600_v28 }
0x1137   : > { %v2531_v24 = vmul.f32 %v2530_v58, %v2530_v58 }
0x1138   : > { %11201 = vmatpush3.bf16.msra.mxu1 %v11200_v4 }
0x1139   : > { %v2532_v61 = vsel %vm504_vm0, %v2531_v24, 0.0  ;;  %11215 = vmatprep.subr.bf16.mxu1 %v11214_v47  ;;  %v12693_v47 = vld [vmem:[%s12255_s26 + $0x8] sm:$0xff] }
0x113a   : > { %2533 = vadd.xlane.f32.xlu1 %v2532_v61 }
0x11c7   : > { %v2534_v5 = vpop.xlane.xlu1 %2533 }
0x11c8   : > { %v2535_v6 = vmul.f32 0.03125, %v2534_v5 }
0x11ca   : > { %v2536_v7 = vadd.f32 1e-06, %v2535_v6 }
0x11cc   : > { %11747 = vrsqrt.f32 %v2536_v7 }
0x11d6   : > { %v11748_v16 = vpop.eup %11747 }
0x11d7   : > { %v2538_v9 = vmul.f32 %v11748_v16, %v2530_v58  ;;  %v12649_v16 = vld [vmem:[%s12150_s18] sm:$0xff] }
0x11d9   : > { %v2547_v13 = vmul.f32 %v9597_v8, %v2538_v9 }
0x11db   : > { %10491 = vmatmul.mubr.msk.f32.vlgmr.msra.gmra.mrb[26].mxu1 %vm504_vm0, %v2547_v13 }
0x11dc   : > { %2814 = vmatprep.mubr.f32.mxu1 %v11979_v10  ;;  %11217 = vmatpush1.bf16.msra.mxu1 %v11216_v49 }
0x11dd   : > { %11219 = vmatprep.subr.bf16.mxu1 %v11218_v11 }
0x11e0   : > { %11221 = vmatpush1.bf16.msra.mxu1 %v11220_v52  ;;  %v12698_v52 = vld [vmem:[%s12255_s26 + $0x10] sm:$0xff] }
0x11e1   : > { %11222 = vmatprep.subr.bf16.mxu1 %v11983_v34 }
0x12ae   : > { %v2622_v31 = vpop.f32.mrb[26].mxu1 }
0x12af   : > { %2634 = vrot.lane.b32.xlu0 %v2622_v31, %s13997_s12  ;;  %v10492_v32 = vpop.f32.mrb[27].mxu1  ;;  %v9603_v33 = vmul.f32 -1.442695, %v2622_v31 }
0x12b1   : > { %11749 = vpow2.f32 %v9603_v33 }
0x12bb   : > { %v11750_v35 = vpop.eup %11749 }
0x12bc   : > { %v2629_v36 = vadd.f32 1.0, %v11750_v35 }
0x12be   : > { %11751 = vrcp.f32 %v2629_v36 }
0x12c8   : > { %v11752_v37 = vpop.eup %11751 }
0x12c9   : > { %v2632_v38 = vmul.f32 %v11752_v37, %v2622_v31 }
0x1321   : > { %v2635_v39 = vpop.permute.xlu0 %2634 }
0x1322   : > { %v2637_v25 = vmul.f32 %v2635_v39, %v2632_v38 }
0x1324   : > { %10510 = vmatmul.mubr.msk.f32.vlgmr.msra.gmra.mrb[18].mxu0 %vm1540_vm6, %v2637_v25 }
0x1325   : > { %10523 = vmatprep.mubr.msk.f32.mxu0 %vm11984_vm1, %v11979_v10 }
0x13f7   : > { %v2716_v40 = vpop.f32.mrb[18].mxu0 }
0x13f8   : > { %v12594_v41 = vadd.f32 %v2716_v40, %v2530_v58  ;;  %v10511_v42 = vpop.f32.mrb[19].mxu0  ;;  %v9614_v58 = vld [vmem:[%s13932_s4 + $0x2] ss:$0 sm:$0xff] }
0x13f9   : > { %v12688_v40 = vld [vmem:[%s12255_s26] sm:$0xff] }
0x13fa   : > { %v2721_v43 = vmul.f32 %v12594_v41, %v12594_v41 }
0x13fc   : > { %v2722_v45 = vsel %vm504_vm0, %v2721_v43, 0.0 }
0x13fd   : > { %2723 = vadd.xlane.f32.xlu0 %v2722_v45 }
0x148a   : > { %v2724_v54 = vpop.xlane.xlu0 %2723 }
0x148b   : > { %v2725_v55 = vmul.f32 0.03125, %v2724_v54 }
0x148d   : > { %v2726_v56 = vadd.f32 1e-06, %v2725_v55  ;;  %v12702_v55 = vld [vmem:[%s12255_s26 + $0x18] sm:$0xff] }
0x148f   : > { %11753 = vrsqrt.f32 %v2726_v56 }
0x1499   : > { %v11754_v57 = vpop.eup %11753 }
0x149a   : > { %v2728_v59 = vmul.f32 %v11754_v57, %v12594_v41 }
0x149c   : > { %v2737_v24 = vmul.f32 %v9614_v58, %v2728_v59 }
0x149e   : > { %9623 = vmatmul.mubr.msk.f32.vlgmr.msra.gmra.mrb[28].mxu1 %vm504_vm0, %v2737_v24 }
0x149f   : > { %10516 = vmatprep.mubr.msk.f32.mxu1 %vm11984_vm1, %v11979_v10 }
0x1571   : > { %v12631_v61 = vpop.f32.mrb[28].mxu1 }
0x1572   : > { %v2818_v62 = vpop.f32.mrb[29].mxu1  ;;  %v2828_v28 = vmul.f32 %v12631_v61, %v12177_v29  ;;  %v2822_v5 = vmul.f32 %v12631_v61, %v12179_v30  ;;  %v2821_v8 = vmul.f32 %v12649_v16, %v12631_v61 }
0x1573   : > { %v2829_v1 = vmul.f32 %v12634_v63, %v2818_v62 }
0x1575   : > { %2831 = vrot.lane.b32.xlu1 %v2829_v1, %s13998_s0 }
0x15e7   : > { %v2832_v2 = vpop.permute.xlu1 %2831 }
0x15e8   : > { %v2834_v4 = vadd.f32 %v2832_v2, %v2828_v28 }
0x15ea   : > { %2856 = vrot.lane.b32.xlu1 %v2834_v4, %s13994_s20  ;;  %2854 = vrot.lane.b32.xlu0 %v2834_v4, %s13996_s15 }
0x15ee   : > { %2824 = vrot.lane.b32.xlu1 %v2822_v5, %s13998_s0  ;;  %2858 = vrot.lane.b32.xlu0 %v2834_v4, %s13999_s3 }
0x15f2   : > { %2836 = vrot.lane.b32.xlu1 %v2834_v4, %s13991_s16 }
0x165c   : > { %v2857_v6 = vpop.permute.xlu1 %2856  ;;  %v2855_v7 = vpop.permute.xlu0 %2854 }
0x165d   : > { %2871 = vrot.lane.b32.xlu0 %v2855_v7, %s13991_s16 }
0x1660   : > { %v2825_v9 = vpop.permute.xlu1 %2824  ;;  %v2859_v13 = vpop.permute.xlu0 %2858 }
0x1661   : > { %v2827_v14 = vadd.f32 %v2825_v9, %v2821_v8  ;;  %v11645_v15 = vpack.i.bf16 %v2859_v13, %v2857_v6 }
0x1663   : > { %2848 = vrot.lane.b32.xlu0 %v2827_v14, %s13996_s15  ;;  %11646 = vrot.lane.b32.xlu1 %v11645_v15, %s13991_s16 }
0x1664   : > { %v2837_v18 = vpop.permute.xlu1 %2836 }
0x1665   : > { %9624 = vst.msk [vmem:[%s12211_s2 + $0x20] sm:$0xff] %vm504_vm0, %v2837_v18  ;;  %v11223_v19 = vpack.c.bf16 %v2837_v18, %v9626_v17 }
0x1667   : > { %11225 = vmatpush3.bf16.xpose.msk.msra.mxu1 %vm12217_vm3, %v11223_v19  ;;  %2852 = vrot.lane.b32.xlu0 %v2827_v14, %s13999_s3  ;;  %v9630_v19 = vld [vmem:[%s12204_s28 + $0xa0] sm:$0xff] }
0x1668   : > { %2850 = vrot.lane.b32.xlu1 %v2827_v14, %s13994_s20  ;;  %11230 = vmatprep.subr.bf16.mxu1 %v11983_v34 }
0x166e   : > { %10517 = vmatmul.mubr.msk.f32.vlgmr.msra.gmra.mrb[30].mxu1 %vm679_vm2, %v2827_v14 }
0x166f   : > { %10530 = vmatprep.mubr.msk.f32.mxu1 %vm11984_vm1, %v11979_v10 }
0x16cf   : > { %v2872_v20 = vpop.permute.xlu0 %2871 }
0x16d0   : > { %v11227_v21 = vpack.c.bf16 %v2872_v20, %v9627_v53 }
0x16d2   : > { %11229 = vmatpush3.bf16.xpose.msk.msra.mxu0 %vm12217_vm3, %v11227_v21 }
0x16d3   : > { %11234 = vmatprep.subr.bf16.mxu0 %v11983_v34 }
0x16d5   : > { %v11647_v26 = vpop.permute.xlu1 %11646  ;;  %v2849_v35 = vpop.permute.xlu0 %2848 }
0x16d6   : > { %v11649_v27 = vunpack.i.h.bf16 %v11647_v26  ;;  %v11648_v31 = vunpack.i.l.bf16 %v11647_v26 }
0x16d8   : > { %v11235_v32 = vpack.c.bf16 %v11649_v27, %v9629_v23  ;;  %v11231_v33 = vpack.c.bf16 %v11648_v31, %v9628_v22 }
0x16d9   : > { %10524 = vmatmul.mubr.msk.f32.vlgmr.msra.gmra.mrb[20].mxu0 %vm679_vm2, %v2849_v35  ;;  %v2853_v37 = vpop.permute.xlu0 %2852 }
0x16da   : > { %11233 = vmatpush3.bf16.xpose.msk.msra.mxu1 %vm12217_vm3, %v11231_v33  ;;  %11237 = vmatpush3.bf16.xpose.msk.msra.mxu0 %vm12217_vm3, %v11235_v32  ;;  %v2851_v36 = vpop.permute.xlu1 %2850 }
0x16db   : > { %10537 = vmatprep.mubr.msk.f32.mxu0 %vm11984_vm1, %v11979_v10  ;;  %11238 = vmatprep.subr.bf16.mxu1 %v11983_v34 }
0x16dc   : > { %11244 = vmatprep.subr.bf16.mxu0 %v11983_v34 }
0x16e1   : > { %10531 = vmatmul.mubr.msk.f32.vlgmr.msra.gmra.mrb[32].mxu1 %vm679_vm2, %v2851_v36  ;;  %10538 = vmatmul.mubr.msk.f32.vlgmr.msra.gmra.mrb[22].mxu0 %vm679_vm2, %v2853_v37  ;;  %v9632_v37 = vld [vmem:[%s12204_s28 + $0xb0] sm:$0xff] }
0x16e2   : > { %10544 = vmatprep.mubr.msk.f32.mxu1 %vm11984_vm1, %v11979_v10  ;;  %10558 = vmatprep.mubr.msk.f32.mxu0 %vm11984_vm1, %v11979_v10 }
0x1741   : > { %v2964_v38 = vpop.f32.mrb[30].mxu1 }
0x1742   : > { %v3199_v39 = vmul.f32 0.35355338, %v2964_v38  ;;  %v10518_v25 = vpop.f32.mrb[31].mxu1 }
0x1744   : > { %v3203_v42 = vadd.f32 %v12688_v40, %v3199_v39 }
0x1746   : > { %v3207_v43 = vsel %vm996_vm4, %v3203_v42, -inf }
0x1747   : > { %3208 = vmax.xlane.f32.xlu1 %v3207_v43 }
0x17ac   : > { %v3041_v45 = vpop.f32.mrb[20].mxu0 }
0x17ad   : > { %v3200_v46 = vmul.f32 0.35355338, %v3041_v45  ;;  %v10525_v60 = vpop.f32.mrb[21].mxu0  ;;  %v9631_v45 = vld [vmem:[%s12204_s28 + $0xa8] sm:$0xff] }
0x17af   : > { %v3204_v48 = vadd.f32 %v12693_v47, %v3200_v46 }
0x17b1   : > { %v3210_v3 = vsel %vm996_vm4, %v3204_v48, -inf }
0x17b2   : > { %3211 = vmax.xlane.f32.xlu0 %v3210_v3 }
0x17b4   : > { %v3118_v49 = vpop.f32.mrb[32].mxu1  ;;  %v3195_v12 = vpop.f32.mrb[22].mxu0 }
0x17b5   : > { %v3201_v50 = vmul.f32 0.35355338, %v3118_v49  ;;  %v3202_v11 = vmul.f32 0.35355338, %v3195_v12  ;;  %v10532_v51 = vpop.f32.mrb[33].mxu1  ;;  %v10539_v0 = vpop.f32.mrb[23].mxu0 }
0x17b6   : > { %v9633_v49 = vld [vmem:[%s12204_s28 + $0xb8] sm:$0xff] }
0x17b7   : > { %v3205_v54 = vadd.f32 %v12698_v52, %v3201_v50  ;;  %v3206_v56 = vadd.f32 %v12702_v55, %v3202_v11 }
0x17b9   : > { %v3213_v57 = vsel %vm996_vm4, %v3205_v54, -inf  ;;  %v3216_v58 = vsel %vm996_vm4, %v3206_v56, -inf }
0x17ba   : > { %3214 = vmax.xlane.f32.xlu0 %v3213_v57  ;;  %3217 = vmax.xlane.f32.xlu1 %v3216_v58  ;;  %v9651_v57 = vld [vmem:[%s13935_s7 + $0x48] sm:$0xff] }
0x17cb   : > { %2862 = vrot.lane.b32.xlu1 %v12631_v61, %s13994_s20 }
0x17cf   : > { %2864 = vrot.lane.b32.xlu1 %v12631_v61, %s13999_s3 }
0x17d0   : > { %2860 = vrot.lane.b32.xlu0 %v12631_v61, %s13996_s15 }
0x17d3   : > { %2842 = vrot.lane.b32.xlu1 %v12631_v61, %s13997_s12 }
0x17d4   : > { %v3209_v59 = vpop.xlane.xlu1 %3208 }
0x17d5   : > { %v3219_v24 = vsub.f32 %v3203_v42, %v3209_v59 }
0x17d7   : > { %v3223_v62 = vmul.f32 1.442695, %v3219_v24 }
0x17d9   : > { %11755 = vpow2.f32 %v3223_v62  ;;  %v9652_v62 = vld [vmem:[%s13935_s7 + $0x50] sm:$0xff] }
0x17e3   : > { %v11756_v1 = vpop.eup %11755 }
0x17e4   : > { %v3231_v28 = vsel %vm996_vm4, %v11756_v1, 0.0 }
0x17ef   : > { %3232 = vadd.xlane.f32.xlu0 %v3231_v28 }
0x183f   : > { %v3212_v2 = vpop.xlane.xlu0 %3211 }
0x1840   : > { %v3220_v4 = vsub.f32 %v3204_v48, %v3212_v2 }
0x1842   : > { %v3225_v5 = vmul.f32 1.442695, %v3220_v4 }
0x1844   : > { %11757 = vpow2.f32 %v3225_v5 }
0x1847   : > { %v3215_v6 = vpop.xlane.xlu0 %3214  ;;  %v3218_v7 = vpop.xlane.xlu1 %3217 }
0x1848   : > { %v3221_v8 = vsub.f32 %v3205_v54, %v3215_v6  ;;  %v3222_v9 = vsub.f32 %v3206_v56, %v3218_v7  ;;  %v9650_v56 = vld [vmem:[%s13935_s7 + $0x40] sm:$0xff] }
0x1849   : > { %v11251_v58 = vpack.c.bf16 %v9651_v57, %v9650_v56 }
0x184a   : > { %v3227_v13 = vmul.f32 1.442695, %v3221_v8  ;;  %v3229_v61 = vmul.f32 1.442695, %v3222_v9 }
0x184b   : > { %v2863_v14 = vpop.permute.xlu1 %2862  ;;  %v2861_v31 = vpop.permute.xlu0 %2860 }
0x184c   : > { %11759 = vpow2.f32 %v3227_v13 }
0x184d   : > { %11761 = vpow2.f32 %v3229_v61 }
0x184e   : > { %v11758_v15 = vpop.eup %11757 }
0x184f   : > { %v2865_v17 = vpop.permute.xlu1 %2864  ;;  %v3234_v18 = vsel %vm996_vm4, %v11758_v15, 0.0 }
0x1850   : > { %3235 = vadd.xlane.f32.xlu1 %v3234_v18  ;;  %v11650_v27 = vpack.i.bf16 %v2865_v17, %v2863_v14 }
0x1853   : > { %v2843_v53 = vpop.permute.xlu1 %2842 }
0x1854   : > { %9625 = vst.msk [vmem:[%s12211_s2 + $0x28] sm:$0xff] %vm504_vm0, %v2843_v53  ;;  %v11239_v20 = vpack.c.bf16 %v2843_v53, %v9630_v19 }
0x1856   : > { %v11760_v21 = vpop.eup %11759  ;;  %11240 = vmatpush3.bf16.msra.mxu1 %v11239_v20 }
0x1857   : > { %v3237_v22 = vsel %vm996_vm4, %v11760_v21, 0.0  ;;  %11241 = vmatprep.subr.bf16.mxu1 %v11983_v34  ;;  %v11762_v23 = vpop.eup %11761 }
0x1858   : > { %3238 = vadd.xlane.f32.xlu0 %v3237_v22  ;;  %v3240_v26 = vsel %vm996_vm4, %v11762_v23, 0.0  ;;  %v9657_v22 = vld [vmem:[%s13936_s8 + $0x40] sm:$0xff] }
0x185c   : > { %3241 = vadd.xlane.f32.xlu0 %v3240_v26 }
0x1861   : > { %11651 = vrot.lane.b32.xlu1 %v11650_v27, %s13997_s12  ;;  %v9660_v27 = vld [vmem:[%s13936_s8 + $0x58] sm:$0xff] }
0x1872   : > { %2882 = vrot.lane.b32.xlu0 %v2861_v31, %s13997_s12 }
0x187c   : > { %v3233_v32 = vpop.xlane.xlu0 %3232 }
0x187d   : > { %11763 = vrcp.f32 %v3233_v32 }
0x1887   : > { %v11764_v33 = vpop.eup %11763 }
0x1888   : > { %v3247_v35 = vmul.f32 %v11764_v33, %v11756_v1  ;;  %v9653_v1 = vld [vmem:[%s13935_s7 + $0x58] sm:$0xff] }
0x1889   : > { %v11254_v28 = vpack.c.bf16 %v9653_v1, %v9652_v62 }
0x188a   : > { %10545 = vmatmul.mubr.msk.f32.vlgmr.msra.gmra.mrb[34].mxu1 %vm996_vm4, %v3247_v35 }
0x188b   : > { %10551 = vmatprep.mubr.msk.f32.mxu1 %vm11984_vm1, %v11979_v10 }
0x18dd   : > { %v3236_v36 = vpop.xlane.xlu1 %3235 }
0x18de   : > { %11765 = vrcp.f32 %v3236_v36 }
0x18e1   : > { %v11652_v38 = vpop.permute.xlu1 %11651 }
0x18e2   : > { %v11653_v39 = vunpack.i.l.bf16 %v11652_v38  ;;  %v11654_v48 = vunpack.i.h.bf16 %v11652_v38 }
0x18e4   : > { %v11245_v25 = vpack.c.bf16 %v11653_v39, %v9632_v37  ;;  %v11248_v51 = vpack.c.bf16 %v11654_v48, %v9633_v49  ;;  %v9656_v37 = vld [vmem:[%s13933_s5 + $0x2] ss:$0 sm:$0xff] }
0x18e5   : > { %v3239_v42 = vpop.xlane.xlu0 %3238  ;;  %v9667_v48 = vld [vmem:[%s13937_s9 + $0xa0] sm:$0xff] }
0x18e6   : > { %11767 = vrcp.f32 %v3239_v42  ;;  %11246 = vmatpush3.bf16.msra.mxu0 %v11245_v25  ;;  %v9663_v25 = vld [vmem:[%s13937_s9 + $0x80] sm:$0xff]  ;;  %v9664_v42 = vld [vmem:[%s13937_s9 + $0x88] sm:$0xff] }
0x18e7   : > { %11250 = vmatprep.subr.bf16.mxu0 %v11983_v34 }
0x18e8   : > { %v11766_v60 = vpop.eup %11765 }
0x18e9   : > { %v3242_v43 = vpop.xlane.xlu0 %3241  ;;  %v3248_v50 = vmul.f32 %v11766_v60, %v11758_v15 }
0x18ea   : > { %11769 = vrcp.f32 %v3242_v43  ;;  %v9665_v43 = vld [vmem:[%s13937_s9 + $0x90] sm:$0xff] }
0x18ed   : > { %v2883_v46 = vpop.permute.xlu0 %2882 }
0x18ee   : > { %v11242_v3 = vpack.c.bf16 %v2883_v46, %v9631_v45  ;;  %v11263_v45 = vpack.c.bf16 %v9664_v42, %v9663_v25  ;;  %v9666_v46 = vld [vmem:[%s13937_s9 + $0x98] sm:$0xff] }
0x18ef   : > { %v11266_v60 = vpack.c.bf16 %v9666_v46, %v9665_v43 }
0x18f0   : > { %v11768_v12 = vpop.eup %11767  ;;  %11243 = vmatpush3.bf16.msra.mxu1 %v11242_v3  ;;  %v9668_v3 = vld [vmem:[%s13937_s9 + $0xa8] sm:$0xff] }
0x18f1   : > { %v3249_v11 = vmul.f32 %v11768_v12, %v11760_v21  ;;  %11247 = vmatprep.subr.bf16.mxu1 %v11983_v34  ;;  %v11269_v49 = vpack.c.bf16 %v9668_v3, %v9667_v48  ;;  %v9669_v12 = vld [vmem:[%s13937_s9 + $0xb0] sm:$0xff] }
0x18f3   : > { %10552 = vmatmul.mubr.msk.f32.vlgmr.msra.gmra.mrb[36].mxu1 %vm996_vm4, %v3248_v50  ;;  %10559 = vmatmul.mubr.msk.f32.vlgmr.msra.gmra.mrb[24].mxu0 %vm996_vm4, %v3249_v11  ;;  %v9670_v50 = vld [vmem:[%s13937_s9 + $0xb8] sm:$0xff] }
0x18f4   : > { %v11770_v0 = vpop.eup %11769  ;;  %11249 = vmatpush3.bf16.msra.mxu1 %v11248_v51  ;;  %10565 = vmatprep.mubr.msk.f32.mxu1 %vm11984_vm1, %v11979_v10  ;;  %v11272_v11 = vpack.c.bf16 %v9670_v50, %v9669_v12  ;;  %v9687_v50 = vld [vmem:[%s12204_s28 + $0xd0] sm:$0xff] }
0x18f5   : > { %v3250_v54 = vmul.f32 %v11770_v0, %v11762_v23  ;;  %10576 = vmatprep.mubr.msk.f32.mxu0 %vm11984_vm1, %v11979_v10  ;;  %11256 = vmatprep.subr.bf16.mxu1 %v11983_v34  ;;  %v9658_v23 = vld [vmem:[%s13936_s8 + $0x48] sm:$0xff] }
0x18f6   : > { %11252 = vmatpush3.bf16.msra.mxu0 %v11251_v58  ;;  %v11257_v26 = vpack.c.bf16 %v9658_v23, %v9657_v22 }
0x18f7   : > { %10566 = vmatmul.mubr.msk.f32.vlgmr.msra.gmra.mrb[38].mxu1 %vm996_vm4, %v3250_v54  ;;  %11253 = vmatprep.subr.bf16.mxu0 %v11983_v34 }
0x18f8   : > { %10587 = vmatprep.mubr.msk.f32.mxu1 %vm11984_vm1, %v11979_v10  ;;  %11258 = vmatpush3.bf16.msra.mxu1 %v11257_v26  ;;  %v9673_v26 = vld [vmem:[%s13932_s4 + $0x3] ss:$0 sm:$0xff] }
0x18f9   : > { %11259 = vmatprep.subr.bf16.mxu1 %v11983_v34 }
0x18fa   : > { %11255 = vmatpush3.bf16.msra.mxu0 %v11254_v28 }
0x18fb   : > { %11262 = vmatprep.subr.bf16.mxu0 %v11983_v34 }
0x195d   : > { %v3320_v59 = vpop.f32.mrb[34].mxu1 }
0x195e   : > { %v10546_v24 = vpop.f32.mrb[35].mxu1 }
0x19c6   : > { %v3393_v2 = vpop.f32.mrb[36].mxu1  ;;  %v3466_v4 = vpop.f32.mrb[24].mxu0 }
0x19c7   : > { %3544 = vrot.lane.b32.xlu1 %v3393_v2, %s14000_s10  ;;  %v10553_v5 = vpop.f32.mrb[37].mxu1  ;;  %3548 = vrot.lane.b32.xlu0 %v3466_v4, %s14001_s1  ;;  %v10560_v6 = vpop.f32.mrb[25].mxu0 }
0x19c8   : > { %v9675_v6 = vld [vmem:[%s13934_s6 + $0xc8] sm:$0xff] }
0x19ca   : > { %v3539_v7 = vpop.f32.mrb[38].mxu1 }
0x19cb   : > { %3552 = vrot.lane.b32.xlu1 %v3539_v7, %s14002_s23  ;;  %v10567_v8 = vpop.f32.mrb[39].mxu1  ;;  %v9677_v7 = vld [vmem:[%s13934_s6 + $0xd8] sm:$0xff] }
0x19cc   : > { %v11274_v8 = vpack.c.bf16 %v9677_v7, %v9675_v6 }
0x1a39   : > { %v3545_v9 = vpop.permute.xlu1 %3544  ;;  %v3549_v61 = vpop.permute.xlu0 %3548 }
0x1a3a   : > { %v3555_v13 = vsel %vm679_vm2, %v3320_v59, %v3545_v9  ;;  %v9674_v9 = vld [vmem:[%s13934_s6 + $0xc0] sm:$0xff] }
0x1a3b   : > { %v3556_v14 = vsel %vm996_vm4, %v3555_v13, %v3549_v61  ;;  %v9676_v13 = vld [vmem:[%s13934_s6 + $0xd0] sm:$0xff] }
0x1a3c   : > { %v11276_v61 = vpack.c.bf16 %v9676_v13, %v9674_v9 }
0x1a3d   : > { %v3553_v15 = vpop.permute.xlu1 %3552 }
0x1a3e   : > { %v3557_v17 = vsel %vm1347_vm5, %v3556_v14, %v3553_v15  ;;  %v9679_v14 = vld [vmem:[%s13934_s6 + $0xe8] sm:$0xff]  ;;  %v9681_v15 = vld [vmem:[%s13934_s6 + $0xf8] sm:$0xff] }
0x1a3f   : > { %10577 = vmatmul.mubr.msk.f32.vlgmr.msra.gmra.mrb[26].mxu0 %vm504_vm0, %v3557_v17  ;;  %v11278_v17 = vpack.c.bf16 %v9681_v15, %v9679_v14 }
0x1a40   : > { %10606 = vmatprep.mubr.msk.f32.mxu0 %vm11984_vm1, %v11979_v10  ;;  %11264 = vmatpush3.bf16.msra.mxu0 %v11263_v45 }
0x1a41   : > { %11265 = vmatprep.subr.bf16.mxu0 %v11983_v34 }
0x1a44   : > { %11267 = vmatpush3.bf16.msra.mxu0 %v11266_v60  ;;  %v9685_v60 = vld [vmem:[%s12204_s28 + $0xc0] sm:$0xff] }
0x1a45   : > { %11268 = vmatprep.subr.bf16.mxu0 %v11983_v34 }
0x1a48   : > { %11270 = vmatpush3.bf16.msra.mxu0 %v11269_v49 }
0x1a49   : > { %11271 = vmatprep.subr.bf16.mxu0 %v11983_v34 }
0x1a4c   : > { %11273 = vmatpush3.bf16.msra.mxu0 %v11272_v11  ;;  %v9688_v11 = vld [vmem:[%s12204_s28 + $0xd8] sm:$0xff] }
0x1a4d   : > { %11286 = vmatprep.subr.bf16.mxu0 %v11983_v34 }
0x1b12   : > { %v3632_v18 = vpop.f32.mrb[26].mxu0 }
0x1b13   : > { %v3636_v19 = vadd.f32 %v3632_v18, %v12594_v41  ;;  %v10578_v53 = vpop.f32.mrb[27].mxu0  ;;  %v9659_v41 = vld [vmem:[%s13936_s8 + $0x50] sm:$0xff]  ;;  %v9678_v18 = vld [vmem:[%s13934_s6 + $0xe0] sm:$0xff] }
0x1b14   : > { %v11260_v31 = vpack.c.bf16 %v9660_v27, %v9659_v41 }
0x1b15   : > { %v3637_v20 = vmul.f32 %v3636_v19, %v3636_v19 }
0x1b16   : > { %11261 = vmatpush3.bf16.msra.mxu1 %v11260_v31 }
0x1b17   : > { %v3638_v21 = vsel %vm504_vm0, %v3637_v20, 0.0  ;;  %11275 = vmatprep.subr.bf16.mxu1 %v11274_v8 }
0x1b18   : > { %3639 = vadd.xlane.f32.xlu0 %v3638_v21 }
0x1ba5   : > { %v3640_v32 = vpop.xlane.xlu0 %3639 }
0x1ba6   : > { %v3641_v33 = vmul.f32 0.03125, %v3640_v32 }
0x1ba8   : > { %v3642_v35 = vadd.f32 1e-06, %v3641_v33 }
0x1baa   : > { %11771 = vrsqrt.f32 %v3642_v35 }
0x1bb4   : > { %v11772_v36 = vpop.eup %11771 }
0x1bb5   : > { %v3644_v38 = vmul.f32 %v11772_v36, %v3636_v19 }
0x1bb7   : > { %v3653_v39 = vmul.f32 %v9656_v37, %v3644_v38 }
0x1bb9   : > { %10588 = vmatmul.mubr.msk.f32.vlgmr.msra.gmra.mrb[40].mxu1 %vm504_vm0, %v3653_v39 }
0x1bba   : > { %3920 = vmatprep.mubr.f32.mxu1 %v11979_v10  ;;  %11277 = vmatpush1.bf16.msra.mxu1 %v11276_v61 }
0x1bbb   : > { %11279 = vmatprep.subr.bf16.mxu1 %v11278_v17 }
0x1c8c   : > { %v3728_v51 = vpop.f32.mrb[40].mxu1 }
0x1c8d   : > { %3740 = vrot.lane.b32.xlu1 %v3728_v51, %s13997_s12  ;;  %v10589_v0 = vpop.f32.mrb[41].mxu1  ;;  %v9662_v54 = vmul.f32 -1.442695, %v3728_v51 }
0x1c8f   : > { %11773 = vpow2.f32 %v9662_v54 }
0x1c99   : > { %v11774_v56 = vpop.eup %11773 }
0x1c9a   : > { %v3735_v57 = vadd.f32 1.0, %v11774_v56 }
0x1c9c   : > { %11775 = vrcp.f32 %v3735_v57 }
0x1ca6   : > { %v11776_v58 = vpop.eup %11775 }
0x1ca7   : > { %v3738_v59 = vmul.f32 %v11776_v58, %v3728_v51 }
0x1cff   : > { %v3741_v24 = vpop.permute.xlu1 %3740 }
0x1d00   : > { %v3743_v62 = vmul.f32 %v3741_v24, %v3738_v59 }
0x1d02   : > { %10607 = vmatmul.mubr.msk.f32.vlgmr.msra.gmra.mrb[28].mxu0 %vm1540_vm6, %v3743_v62 }
0x1d03   : > { %10620 = vmatprep.mubr.msk.f32.mxu0 %vm11984_vm1, %v11979_v10 }
0x1dd5   : > { %v3822_v1 = vpop.f32.mrb[28].mxu0 }
0x1dd6   : > { %v12818_v28 = vadd.f32 %v3822_v1, %v3636_v19  ;;  %v10608_v2 = vpop.f32.mrb[29].mxu0  ;;  %v9680_v19 = vld [vmem:[%s13934_s6 + $0xf0] sm:$0xff] }
0x1dd7   : > { %v11280_v53 = vpack.c.bf16 %v9680_v19, %v9678_v18 }
0x1dd8   : > { %v3827_v4 = vmul.f32 %v12818_v28, %v12818_v28 }
0x1dd9   : > { %11281 = vmatpush1.bf16.msra.mxu1 %v11280_v53 }
0x1dda   : > { %v3828_v5 = vsel %vm504_vm0, %v3827_v4, 0.0  ;;  %11282 = vmatprep.subr.bf16.mxu1 %v11983_v34 }
0x1ddb   : > { %3829 = vadd.xlane.f32.xlu1 %v3828_v5 }
0x1e68   : > { %v3830_v20 = vpop.xlane.xlu1 %3829 }
0x1e69   : > { %v3831_v21 = vmul.f32 0.03125, %v3830_v20 }
0x1e6b   : > { %v3832_v22 = vadd.f32 1e-06, %v3831_v21 }
0x1e6d   : > { %11777 = vrsqrt.f32 %v3832_v22 }
0x1e77   : > { %v11778_v23 = vpop.eup %11777 }
0x1e78   : > { %v3834_v41 = vmul.f32 %v11778_v23, %v12818_v28 }
0x1e7a   : > { %v3843_v27 = vmul.f32 %v9673_v26, %v3834_v41 }
0x1e7c   : > { %9682 = vmatmul.mubr.msk.f32.vlgmr.msra.gmra.mrb[42].mxu1 %vm504_vm0, %v3843_v27 }
0x1e7d   : > { %10613 = vmatprep.mubr.msk.f32.mxu1 %vm11984_vm1, %v11979_v10 }
0x1f4f   : > { %v12855_v31 = vpop.f32.mrb[42].mxu1 }
0x1f50   : > { %v3924_v32 = vpop.f32.mrb[43].mxu1  ;;  %v3934_v35 = vmul.f32 %v12855_v31, %v12177_v29  ;;  %v3928_v38 = vmul.f32 %v12855_v31, %v12179_v30  ;;  %v3927_v25 = vmul.f32 %v12649_v16, %v12855_v31  ;;  %v9686_v16 = vld [vmem:[%s12204_s28 + $0xc8] sm:$0xff] }
0x1f51   : > { %v3935_v33 = vmul.f32 %v12634_v63, %v3924_v32 }
0x1f53   : > { %3937 = vrot.lane.b32.xlu0 %v3935_v33, %s13998_s0 }
0x1fc5   : > { %v3938_v36 = vpop.permute.xlu0 %3937 }
0x1fc6   : > { %v3940_v37 = vadd.f32 %v3938_v36, %v3934_v35 }
0x1fc8   : > { %3962 = vrot.lane.b32.xlu0 %v3940_v37, %s13994_s20  ;;  %3960 = vrot.lane.b32.xlu1 %v3940_v37, %s13996_s15 }
0x1fcc   : > { %3930 = vrot.lane.b32.xlu0 %v3928_v38, %s13998_s0  ;;  %3964 = vrot.lane.b32.xlu1 %v3940_v37, %s13999_s3 }
0x1fd0   : > { %3942 = vrot.lane.b32.xlu0 %v3940_v37, %s13991_s16 }
0x203a   : > { %v3963_v63 = vpop.permute.xlu0 %3962  ;;  %v3961_v39 = vpop.permute.xlu1 %3960 }
0x203b   : > { %3977 = vrot.lane.b32.xlu1 %v3961_v39, %s13991_s16 }
0x203e   : > { %v3931_v42 = vpop.permute.xlu0 %3930  ;;  %v3965_v43 = vpop.permute.xlu1 %3964 }
0x203f   : > { %v3933_v45 = vadd.f32 %v3931_v42, %v3927_v25  ;;  %v11655_v46 = vpack.i.bf16 %v3965_v43, %v3963_v63 }
0x2041   : > { %3954 = vrot.lane.b32.xlu1 %v3933_v45, %s13996_s15  ;;  %11656 = vrot.lane.b32.xlu0 %v11655_v46, %s13991_s16 }
0x2042   : > { %v3943_v48 = vpop.permute.xlu0 %3942 }
0x2043   : > { %9683 = vst.msk [vmem:[%s12211_s2 + $0x30] sm:$0xff] %vm504_vm0, %v3943_v48  ;;  %v11283_v3 = vpack.c.bf16 %v3943_v48, %v9685_v60 }
0x2045   : > { %11285 = vmatpush3.bf16.xpose.msk.msra.mxu1 %vm12217_vm3, %v11283_v3  ;;  %3958 = vrot.lane.b32.xlu1 %v3933_v45, %s13999_s3 }
0x2046   : > { %3956 = vrot.lane.b32.xlu0 %v3933_v45, %s13994_s20  ;;  %11290 = vmatprep.subr.bf16.mxu1 %v11983_v34 }
0x204c   : > { %10614 = vmatmul.mubr.msk.f32.vlgmr.msra.gmra.mrb[44].mxu1 %vm679_vm2, %v3933_v45 }
0x204d   : > { %10627 = vmatprep.mubr.msk.f32.mxu1 %vm11984_vm1, %v11979_v10 }
0x20ad   : > { %v3978_v49 = vpop.permute.xlu1 %3977 }
0x20ae   : > { %v11287_v12 = vpack.c.bf16 %v3978_v49, %v9686_v16 }
0x20b0   : > { %11289 = vmatpush3.bf16.xpose.msk.msra.mxu0 %vm12217_vm3, %v11287_v12 }
0x20b1   : > { %11294 = vmatprep.subr.bf16.mxu0 %v11983_v34 }
0x20b3   : > { %v11657_v51 = vpop.permute.xlu0 %11656  ;;  %v3955_v58 = vpop.permute.xlu1 %3954 }
0x20b4   : > { %v11659_v0 = vunpack.i.h.bf16 %v11657_v51  ;;  %v11658_v54 = vunpack.i.l.bf16 %v11657_v51 }
0x20b6   : > { %v11295_v56 = vpack.c.bf16 %v11659_v0, %v9688_v11  ;;  %v11291_v57 = vpack.c.bf16 %v11658_v54, %v9687_v50  ;;  %v9689_v50 = vld [vmem:[%s12204_s28 + $0xe0] sm:$0xff]  ;;  %v9690_v54 = vld [vmem:[%s12204_s28 + $0xe8] sm:$0xff] }
0x20b7   : > { %10621 = vmatmul.mubr.msk.f32.vlgmr.msra.gmra.mrb[30].mxu0 %vm679_vm2, %v3955_v58  ;;  %v3959_v24 = vpop.permute.xlu1 %3958 }
0x20b8   : > { %11293 = vmatpush3.bf16.xpose.msk.msra.mxu1 %vm12217_vm3, %v11291_v57  ;;  %11297 = vmatpush3.bf16.xpose.msk.msra.mxu0 %vm12217_vm3, %v11295_v56  ;;  %v3957_v59 = vpop.permute.xlu0 %3956 }
0x20b9   : > { %10634 = vmatprep.mubr.msk.f32.mxu0 %vm11984_vm1, %v11979_v10  ;;  %11298 = vmatprep.subr.bf16.mxu1 %v11983_v34 }
0x20ba   : > { %11304 = vmatprep.subr.bf16.mxu0 %v11983_v34 }
0x20bf   : > { %10628 = vmatmul.mubr.msk.f32.vlgmr.msra.gmra.mrb[46].mxu1 %vm679_vm2, %v3957_v59  ;;  %10635 = vmatmul.mubr.msk.f32.vlgmr.msra.gmra.mrb[32].mxu0 %vm679_vm2, %v3959_v24 }
0x20c0   : > { %10641 = vmatprep.mubr.msk.f32.mxu1 %vm11984_vm1, %v11979_v10  ;;  %10655 = vmatprep.mubr.msk.f32.mxu0 %vm11984_vm1, %v11979_v10 }
0x211f   : > { %v4070_v62 = vpop.f32.mrb[44].mxu1 }
0x2120   : > { %v4305_v1 = vmul.f32 0.35355338, %v4070_v62  ;;  %v10615_v2 = vpop.f32.mrb[45].mxu1  ;;  %v9691_v62 = vld [vmem:[%s12204_s28 + $0xf0] sm:$0xff] }
0x2122   : > { %v4309_v4 = vadd.f32 %v12688_v40, %v4305_v1  ;;  %v9692_v1 = vld [vmem:[%s12204_s28 + $0xf8] sm:$0xff] }
0x2124   : > { %v4313_v5 = vsel %vm996_vm4, %v4309_v4, -inf }
0x2125   : > { %4314 = vmax.xlane.f32.xlu0 %v4313_v5 }
0x218a   : > { %v4147_v6 = vpop.f32.mrb[30].mxu0 }
0x218b   : > { %v4306_v7 = vmul.f32 0.35355338, %v4147_v6  ;;  %v10622_v8 = vpop.f32.mrb[31].mxu0 }
0x218d   : > { %v4310_v9 = vadd.f32 %v12693_v47, %v4306_v7 }
0x218f   : > { %v4316_v13 = vsel %vm996_vm4, %v4310_v9, -inf }
0x2190   : > { %4317 = vmax.xlane.f32.xlu1 %v4316_v13 }
0x2192   : > { %v4224_v61 = vpop.f32.mrb[46].mxu1  ;;  %v4301_v14 = vpop.f32.mrb[32].mxu0 }
0x2193   : > { %v4307_v15 = vmul.f32 0.35355338, %v4224_v61  ;;  %v4308_v17 = vmul.f32 0.35355338, %v4301_v14  ;;  %v10629_v18 = vpop.f32.mrb[47].mxu1  ;;  %v10636_v19 = vpop.f32.mrb[33].mxu0 }
0x2194   : > { %v9709_v14 = vld [vmem:[%s13935_s7 + $0x60] sm:$0xff] }
0x2195   : > { %v4311_v53 = vadd.f32 %v12698_v52, %v4307_v15  ;;  %v4312_v40 = vadd.f32 %v12702_v55, %v4308_v17  ;;  %v9710_v15 = vld [vmem:[%s13935_s7 + $0x68] sm:$0xff] }
0x2196   : > { %v11311_v17 = vpack.c.bf16 %v9710_v15, %v9709_v14 }
0x2197   : > { %v4319_v20 = vsel %vm996_vm4, %v4311_v53, -inf  ;;  %v4322_v21 = vsel %vm996_vm4, %v4312_v40, -inf }
0x2198   : > { %4320 = vmax.xlane.f32.xlu0 %v4319_v20  ;;  %v9712_v20 = vld [vmem:[%s13935_s7 + $0x78] sm:$0xff] }
0x219c   : > { %4323 = vmax.xlane.f32.xlu0 %v4322_v21 }
0x21a1   : > { %3966 = vrot.lane.b32.xlu1 %v12855_v31, %s13996_s15 }
0x21a5   : > { %3970 = vrot.lane.b32.xlu1 %v12855_v31, %s13999_s3 }
0x21b2   : > { %v4315_v47 = vpop.xlane.xlu0 %4314  ;;  %3968 = vrot.lane.b32.xlu0 %v12855_v31, %s13994_s20 }
0x21b3   : > { %v4325_v22 = vsub.f32 %v4309_v4, %v4315_v47 }
0x21b5   : > { %v4329_v52 = vmul.f32 1.442695, %v4325_v22 }
0x21b7   : > { %11779 = vpow2.f32 %v4329_v52 }
0x21c1   : > { %v11780_v55 = vpop.eup %11779 }
0x21c2   : > { %v4337_v23 = vsel %vm996_vm4, %v11780_v55, 0.0 }
0x21c9   : > { %4338 = vadd.xlane.f32.xlu1 %v4337_v23 }
0x221d   : > { %v4318_v26 = vpop.xlane.xlu1 %4317 }
0x221e   : > { %v4326_v41 = vsub.f32 %v4310_v9, %v4318_v26 }
0x2220   : > { %v4331_v27 = vmul.f32 1.442695, %v4326_v41 }
0x2221   : > { %v3967_v32 = vpop.permute.xlu1 %3966 }
0x2222   : > { %11781 = vpow2.f32 %v4331_v27  ;;  %3988 = vrot.lane.b32.xlu1 %v3967_v32, %s13997_s12 }
0x2225   : > { %v4321_v33 = vpop.xlane.xlu0 %4320  ;;  %v3971_v48 = vpop.permute.xlu1 %3970 }
0x2226   : > { %v4327_v35 = vsub.f32 %v4311_v53, %v4321_v33 }
0x2228   : > { %v4333_v36 = vmul.f32 1.442695, %v4327_v35 }
0x2229   : > { %v4324_v38 = vpop.xlane.xlu0 %4323 }
0x222a   : > { %11783 = vpow2.f32 %v4333_v36  ;;  %v4328_v39 = vsub.f32 %v4312_v40, %v4324_v38  ;;  %v9711_v40 = vld [vmem:[%s13935_s7 + $0x70] sm:$0xff] }
0x222b   : > { %v11314_v47 = vpack.c.bf16 %v9712_v20, %v9711_v40  ;;  %v9736_v40 = vld [vmem:[%s13934_s6 + $0x118] sm:$0xff] }
0x222c   : > { %v11782_v37 = vpop.eup %11781  ;;  %v4335_v42 = vmul.f32 1.442695, %v4328_v39 }
0x222d   : > { %v4340_v63 = vsel %vm996_vm4, %v11782_v37, 0.0  ;;  %v3969_v60 = vpop.permute.xlu0 %3968 }
0x222e   : > { %4341 = vadd.xlane.f32.xlu0 %v4340_v63  ;;  %11785 = vpow2.f32 %v4335_v42  ;;  %v11660_v3 = vpack.i.bf16 %v3971_v48, %v3969_v60  ;;  %v9717_v42 = vld [vmem:[%s13936_s8 + $0x68] sm:$0xff] }
0x2234   : > { %v11784_v25 = vpop.eup %11783 }
0x2235   : > { %v4343_v43 = vsel %vm996_vm4, %v11784_v25, 0.0 }
0x2236   : > { %4344 = vadd.xlane.f32.xlu0 %v4343_v43 }
0x2238   : > { %v11786_v45 = vpop.eup %11785 }
0x2239   : > { %v4346_v46 = vsel %vm996_vm4, %v11786_v45, 0.0 }
0x2246   : > { %4347 = vadd.xlane.f32.xlu1 %v4346_v46 }
0x224c   : > { %3948 = vrot.lane.b32.xlu0 %v12855_v31, %s13997_s12 }
0x2256   : > { %v4339_v16 = vpop.xlane.xlu1 %4338 }
0x2257   : > { %11661 = vrot.lane.b32.xlu1 %v11660_v3, %s13997_s12  ;;  %11787 = vrcp.f32 %v4339_v16 }
0x2261   : > { %v11788_v51 = vpop.eup %11787 }
0x2262   : > { %v4353_v31 = vmul.f32 %v11788_v51, %v11780_v55  ;;  %v9723_v51 = vld [vmem:[%s13937_s9 + $0xc8] sm:$0xff] }
0x2294   : > { %v3989_v56 = vpop.permute.xlu1 %3988 }
0x2295   : > { %v11302_v58 = vpack.c.bf16 %v3989_v56, %v9690_v54  ;;  %v9725_v56 = vld [vmem:[%s13937_s9 + $0xd8] sm:$0xff] }
0x22bb   : > { %v4342_v49 = vpop.xlane.xlu0 %4341 }
0x22bc   : > { %11789 = vrcp.f32 %v4342_v49  ;;  %v9715_v49 = vld [vmem:[%s13933_s5 + $0x3] ss:$0 sm:$0xff] }
0x22c3   : > { %v4345_v12 = vpop.xlane.xlu0 %4344 }
0x22c4   : > { %11791 = vrcp.f32 %v4345_v12 }
0x22c6   : > { %v11790_v57 = vpop.eup %11789 }
0x22c7   : > { %v3949_v11 = vpop.permute.xlu0 %3948  ;;  %v4354_v59 = vmul.f32 %v11790_v57, %v11782_v37  ;;  %v9726_v57 = vld [vmem:[%s13937_s9 + $0xe0] sm:$0xff] }
0x22c8   : > { %9684 = vst.msk [vmem:[%s12211_s2 + $0x38] sm:$0xff] %vm504_vm0, %v3949_v11  ;;  %v11299_v0 = vpack.c.bf16 %v3949_v11, %v9689_v50  ;;  %v9722_v11 = vld [vmem:[%s13937_s9 + $0xc0] sm:$0xff] }
0x22c9   : > { %v11323_v54 = vpack.c.bf16 %v9723_v51, %v9722_v11 }
0x22ca   : > { %11300 = vmatpush3.bf16.msra.mxu1 %v11299_v0  ;;  %v9724_v0 = vld [vmem:[%s13937_s9 + $0xd0] sm:$0xff] }
0x22cb   : > { %11301 = vmatprep.subr.bf16.mxu1 %v11983_v34 }
0x22cd   : > { %10642 = vmatmul.mubr.msk.f32.vlgmr.msra.gmra.mrb[48].mxu1 %vm996_vm4, %v4353_v31  ;;  %v11326_v31 = vpack.c.bf16 %v9725_v56, %v9724_v0  ;;  %v9744_v0 = vld [vmem:[%s12204_s28 + $0x100] sm:$0xff] }
0x22ce   : > { %11303 = vmatpush3.bf16.msra.mxu1 %v11302_v58  ;;  %10648 = vmatprep.mubr.msk.f32.mxu1 %vm11984_vm1, %v11979_v10  ;;  %v11792_v6 = vpop.eup %11791  ;;  %v9727_v58 = vld [vmem:[%s13937_s9 + $0xe8] sm:$0xff] }
0x22cf   : > { %11307 = vmatprep.subr.bf16.mxu1 %v11983_v34  ;;  %v4355_v9 = vmul.f32 %v11792_v6, %v11784_v25  ;;  %v9716_v25 = vld [vmem:[%s13936_s8 + $0x60] sm:$0xff] }
0x22d0   : > { %v11317_v43 = vpack.c.bf16 %v9717_v42, %v9716_v25  ;;  %v13064_v42 = vld [vmem:[%s12166_s29] sm:$0xff] }
0x22d1   : > { %10649 = vmatmul.mubr.msk.f32.vlgmr.msra.gmra.mrb[50].mxu1 %vm996_vm4, %v4354_v59  ;;  %v11329_v59 = vpack.c.bf16 %v9727_v58, %v9726_v57 }
0x22d2   : > { %10662 = vmatprep.mubr.msk.f32.mxu1 %vm11984_vm1, %v11979_v10 }
0x22d3   : > { %v4348_v24 = vpop.xlane.xlu1 %4347 }
0x22d4   : > { %11793 = vrcp.f32 %v4348_v24  ;;  %v9728_v24 = vld [vmem:[%s13937_s9 + $0xf0] sm:$0xff] }
0x22d7   : > { %v11662_v2 = vpop.permute.xlu1 %11661 }
0x22d8   : > { %v11664_v4 = vunpack.i.h.bf16 %v11662_v2  ;;  %v11663_v5 = vunpack.i.l.bf16 %v11662_v2 }
0x22da   : > { %v11308_v7 = vpack.c.bf16 %v11664_v4, %v9692_v1  ;;  %v11305_v8 = vpack.c.bf16 %v11663_v5, %v9691_v62  ;;  %v9729_v62 = vld [vmem:[%s13937_s9 + $0xf8] sm:$0xff] }
0x22db   : > { %v11332_v1 = vpack.c.bf16 %v9729_v62, %v9728_v24  ;;  %v9747_v24 = vld [vmem:[%s12204_s28 + $0x118] sm:$0xff] }
0x22dc   : > { %11306 = vmatpush3.bf16.msra.mxu0 %v11305_v8  ;;  %11309 = vmatpush3.bf16.msra.mxu1 %v11308_v7 }
0x22dd   : > { %11310 = vmatprep.subr.bf16.mxu0 %v11983_v34  ;;  %11316 = vmatprep.subr.bf16.mxu1 %v11983_v34 }
0x22de   : > { %v11794_v13 = vpop.eup %11793 }
0x22df   : > { %10656 = vmatmul.mubr.msk.f32.vlgmr.msra.gmra.mrb[34].mxu0 %vm996_vm4, %v4355_v9  ;;  %v4356_v61 = vmul.f32 %v11794_v13, %v11786_v45  ;;  %v9719_v45 = vld [vmem:[%s13936_s8 + $0x78] sm:$0xff] }
0x22e0   : > { %10673 = vmatprep.mubr.msk.f32.mxu0 %vm11984_vm1, %v11979_v10  ;;  %11312 = vmatpush3.bf16.msra.mxu0 %v11311_v17 }
0x22e1   : > { %10663 = vmatmul.mubr.msk.f32.vlgmr.msra.gmra.mrb[52].mxu1 %vm996_vm4, %v4356_v61  ;;  %11313 = vmatprep.subr.bf16.mxu0 %v11983_v34 }
0x22e2   : > { %10684 = vmatprep.mubr.msk.f32.mxu1 %vm11984_vm1, %v11979_v10  ;;  %11318 = vmatpush3.bf16.msra.mxu1 %v11317_v43 }
0x22e3   : > { %11319 = vmatprep.subr.bf16.mxu1 %v11983_v34 }
0x22e4   : > { %11315 = vmatpush3.bf16.msra.mxu0 %v11314_v47  ;;  %v9735_v47 = vld [vmem:[%s13934_s6 + $0x110] sm:$0xff] }
0x22e5   : > { %11322 = vmatprep.subr.bf16.mxu0 %v11983_v34 }
0x23a0   : > { %v4426_v18 = vpop.f32.mrb[48].mxu1 }
0x23a1   : > { %v10643_v19 = vpop.f32.mrb[49].mxu1 }
0x23a4   : > { %v4499_v53 = vpop.f32.mrb[50].mxu1 }
0x23a5   : > { %4650 = vrot.lane.b32.xlu0 %v4499_v53, %s14000_s10  ;;  %v10650_v21 = vpop.f32.mrb[51].mxu1  ;;  %v9734_v53 = vld [vmem:[%s13934_s6 + $0x108] sm:$0xff] }
0x23a6   : > { %v11334_v20 = vpack.c.bf16 %v9736_v40, %v9734_v53  ;;  %v9733_v21 = vld [vmem:[%s13934_s6 + $0x100] sm:$0xff] }
0x23b2   : > { %v4572_v22 = vpop.f32.mrb[34].mxu0 }
0x23b3   : > { %4654 = vrot.lane.b32.xlu1 %v4572_v22, %s14001_s1  ;;  %v10657_v52 = vpop.f32.mrb[35].mxu0  ;;  %v11336_v22 = vpack.c.bf16 %v9735_v47, %v9733_v21 }
0x23b4   : > { %v4645_v55 = vpop.f32.mrb[52].mxu1  ;;  %v9738_v52 = vld [vmem:[%s13934_s6 + $0x128] sm:$0xff] }
0x23b5   : > { %4658 = vrot.lane.b32.xlu0 %v4645_v55, %s14002_s23  ;;  %v10664_v23 = vpop.f32.mrb[53].mxu1  ;;  %v9740_v55 = vld [vmem:[%s13934_s6 + $0x138] sm:$0xff] }
0x23b6   : > { %v11338_v23 = vpack.c.bf16 %v9740_v55, %v9738_v52 }
0x2417   : > { %v4651_v26 = vpop.permute.xlu0 %4650 }
0x2418   : > { %v4661_v41 = vsel %vm679_vm2, %v4426_v18, %v4651_v26  ;;  %v9737_v26 = vld [vmem:[%s13934_s6 + $0x120] sm:$0xff] }
0x2425   : > { %v4655_v27 = vpop.permute.xlu1 %4654 }
0x2426   : > { %v4662_v32 = vsel %vm996_vm4, %v4661_v41, %v4655_v27  ;;  %v9739_v41 = vld [vmem:[%s13934_s6 + $0x130] sm:$0xff] }
0x2427   : > { %v4659_v33 = vpop.permute.xlu0 %4658  ;;  %v11340_v27 = vpack.c.bf16 %v9739_v41, %v9737_v26 }
0x2428   : > { %v4663_v35 = vsel %vm1347_vm5, %v4662_v32, %v4659_v33 }
0x2429   : > { %10674 = vmatmul.mubr.msk.f32.vlgmr.msra.gmra.mrb[36].mxu0 %vm504_vm0, %v4663_v35 }
0x242a   : > { %10703 = vmatprep.mubr.msk.f32.mxu0 %vm11984_vm1, %v11979_v10  ;;  %11324 = vmatpush3.bf16.msra.mxu0 %v11323_v54 }
0x242b   : > { %11325 = vmatprep.subr.bf16.mxu0 %v11983_v34 }
0x242e   : > { %11327 = vmatpush3.bf16.msra.mxu0 %v11326_v31  ;;  %v9745_v31 = vld [vmem:[%s12204_s28 + $0x108] sm:$0xff] }
0x242f   : > { %11328 = vmatprep.subr.bf16.mxu0 %v11983_v34 }
0x2432   : > { %11330 = vmatpush3.bf16.msra.mxu0 %v11329_v59  ;;  %v9746_v59 = vld [vmem:[%s12204_s28 + $0x110] sm:$0xff] }
0x2433   : > { %11331 = vmatprep.subr.bf16.mxu0 %v11983_v34 }
0x2436   : > { %11333 = vmatpush3.bf16.msra.mxu0 %v11332_v1 }
0x2437   : > { %11346 = vmatprep.subr.bf16.mxu0 %v11983_v34 }
0x24fc   : > { %v4738_v36 = vpop.f32.mrb[36].mxu0 }
0x24fd   : > { %v4742_v37 = vadd.f32 %v4738_v36, %v12818_v28  ;;  %v10675_v38 = vpop.f32.mrb[37].mxu0  ;;  %v9718_v28 = vld [vmem:[%s13936_s8 + $0x70] sm:$0xff] }
0x24fe   : > { %v11320_v46 = vpack.c.bf16 %v9719_v45, %v9718_v28 }
0x24ff   : > { %v4743_v63 = vmul.f32 %v4742_v37, %v4742_v37 }
0x2500   : > { %11321 = vmatpush3.bf16.msra.mxu1 %v11320_v46 }
0x2501   : > { %v4744_v39 = vsel %vm504_vm0, %v4743_v63, 0.0  ;;  %11335 = vmatprep.subr.bf16.mxu1 %v11334_v20  ;;  %v13123_v20 = vld [vmem:[%s12255_s26 + $0x8] sm:$0xff] }
0x2502   : > { %4745 = vadd.xlane.f32.xlu1 %v4744_v39 }
0x258f   : > { %v4746_v60 = vpop.xlane.xlu1 %4745 }
0x2590   : > { %v4747_v48 = vmul.f32 0.03125, %v4746_v60 }
0x2592   : > { %v4748_v3 = vadd.f32 1e-06, %v4747_v48 }
0x2594   : > { %11795 = vrsqrt.f32 %v4748_v3 }
0x259e   : > { %v11796_v16 = vpop.eup %11795 }
0x259f   : > { %v4750_v12 = vmul.f32 %v11796_v16, %v4742_v37  ;;  %v13079_v16 = vld [vmem:[%s12150_s18] sm:$0xff] }
0x25a1   : > { %v4759_v50 = vmul.f32 %v9715_v49, %v4750_v12 }
0x25a3   : > { %10685 = vmatmul.mubr.msk.f32.vlgmr.msra.gmra.mrb[54].mxu1 %vm504_vm0, %v4759_v50 }
0x25a4   : > { %5026 = vmatprep.mubr.f32.mxu1 %v11979_v10  ;;  %11337 = vmatpush1.bf16.msra.mxu1 %v11336_v22 }
0x25a5   : > { %11339 = vmatprep.subr.bf16.mxu1 %v11338_v23 }
0x25a8   : > { %11341 = vmatpush1.bf16.msra.mxu1 %v11340_v27  ;;  %v13128_v27 = vld [vmem:[%s12255_s26 + $0x10] sm:$0xff] }
0x25a9   : > { %11342 = vmatprep.subr.bf16.mxu1 %v11983_v34 }
0x2676   : > { %v4834_v2 = vpop.f32.mrb[54].mxu1 }
0x2677   : > { %4846 = vrot.lane.b32.xlu0 %v4834_v2, %s13997_s12  ;;  %v10686_v4 = vpop.f32.mrb[55].mxu1  ;;  %v9721_v5 = vmul.f32 -1.442695, %v4834_v2 }
0x2679   : > { %11797 = vpow2.f32 %v9721_v5 }
0x2683   : > { %v11798_v6 = vpop.eup %11797 }
0x2684   : > { %v4841_v7 = vadd.f32 1.0, %v11798_v6 }
0x2686   : > { %11799 = vrcp.f32 %v4841_v7 }
0x2690   : > { %v11800_v8 = vpop.eup %11799 }
0x2691   : > { %v4844_v9 = vmul.f32 %v11800_v8, %v4834_v2 }
0x26e9   : > { %v4847_v13 = vpop.permute.xlu0 %4846 }
0x26ea   : > { %v4849_v61 = vmul.f32 %v4847_v13, %v4844_v9 }
0x26ec   : > { %10704 = vmatmul.mubr.msk.f32.vlgmr.msra.gmra.mrb[38].mxu0 %vm1540_vm6, %v4849_v61 }
0x26ed   : > { %10717 = vmatprep.mubr.msk.f32.mxu0 %vm11984_vm1, %v11979_v10 }
0x27bf   : > { %v4928_v14 = vpop.f32.mrb[38].mxu0 }
0x27c0   : > { %v13024_v15 = vadd.f32 %v4928_v14, %v4742_v37  ;;  %v10705_v17 = vpop.f32.mrb[39].mxu0  ;;  %v9732_v37 = vld [vmem:[%s13932_s4 + $0x4] ss:$0 sm:$0xff] }
0x27c1   : > { %v13118_v14 = vld [vmem:[%s12255_s26] sm:$0xff] }
0x27c2   : > { %v4933_v18 = vmul.f32 %v13024_v15, %v13024_v15 }
0x27c4   : > { %v4934_v19 = vsel %vm504_vm0, %v4933_v18, 0.0 }
0x27c5   : > { %4935 = vadd.xlane.f32.xlu0 %v4934_v19 }
0x2852   : > { %v4936_v32 = vpop.xlane.xlu0 %4935 }
0x2853   : > { %v4937_v33 = vmul.f32 0.03125, %v4936_v32 }
0x2855   : > { %v4938_v35 = vadd.f32 1e-06, %v4937_v33  ;;  %v13132_v33 = vld [vmem:[%s12255_s26 + $0x18] sm:$0xff] }
0x2857   : > { %11801 = vrsqrt.f32 %v4938_v35 }
0x2861   : > { %v11802_v36 = vpop.eup %11801 }
0x2862   : > { %v4940_v38 = vmul.f32 %v11802_v36, %v13024_v15 }
0x2864   : > { %v4949_v63 = vmul.f32 %v9732_v37, %v4940_v38 }
0x2866   : > { %9741 = vmatmul.mubr.msk.f32.vlgmr.msra.gmra.mrb[56].mxu1 %vm504_vm0, %v4949_v63 }
0x2867   : > { %10710 = vmatprep.mubr.msk.f32.mxu1 %vm11984_vm1, %v11979_v10 }
0x2939   : > { %v13061_v39 = vpop.f32.mrb[56].mxu1 }
0x293a   : > { %v5030_v25 = vpop.f32.mrb[57].mxu1  ;;  %v5040_v28 = vmul.f32 %v13061_v39, %v12177_v29  ;;  %v5034_v60 = vmul.f32 %v13061_v39, %v12179_v30  ;;  %v5033_v49 = vmul.f32 %v13079_v16, %v13061_v39 }
0x293b   : > { %v5041_v43 = vmul.f32 %v13064_v42, %v5030_v25 }
0x293d   : > { %5043 = vrot.lane.b32.xlu1 %v5041_v43, %s13998_s0 }
0x29af   : > { %v5044_v45 = vpop.permute.xlu1 %5043 }
0x29b0   : > { %v5046_v46 = vadd.f32 %v5044_v45, %v5040_v28 }
0x29b2   : > { %5068 = vrot.lane.b32.xlu1 %v5046_v46, %s13994_s20  ;;  %5066 = vrot.lane.b32.xlu0 %v5046_v46, %s13996_s15 }
0x29b6   : > { %5036 = vrot.lane.b32.xlu1 %v5034_v60, %s13998_s0  ;;  %5070 = vrot.lane.b32.xlu0 %v5046_v46, %s13999_s3 }
0x29ba   : > { %5048 = vrot.lane.b32.xlu1 %v5046_v46, %s13991_s16 }
0x2a24   : > { %v5069_v48 = vpop.permute.xlu1 %5068  ;;  %v5067_v3 = vpop.permute.xlu0 %5066 }
0x2a25   : > { %5083 = vrot.lane.b32.xlu0 %v5067_v3, %s13991_s16 }
0x2a28   : > { %v5037_v12 = vpop.permute.xlu1 %5036  ;;  %v5071_v50 = vpop.permute.xlu0 %5070 }
0x2a29   : > { %v5039_v11 = vadd.f32 %v5037_v12, %v5033_v49  ;;  %v11665_v51 = vpack.i.bf16 %v5071_v50, %v5069_v48 }
0x2a2b   : > { %5060 = vrot.lane.b32.xlu0 %v5039_v11, %s13996_s15  ;;  %11666 = vrot.lane.b32.xlu1 %v11665_v51, %s13991_s16 }
0x2a2c   : > { %v5049_v54 = vpop.permute.xlu1 %5048 }
0x2a2d   : > { %9742 = vst.msk [vmem:[%s12211_s2 + $0x40] sm:$0xff] %vm504_vm0, %v5049_v54  ;;  %v11343_v56 = vpack.c.bf16 %v5049_v54, %v9744_v0 }
0x2a2f   : > { %11345 = vmatpush3.bf16.xpose.msk.msra.mxu1 %vm12217_vm3, %v11343_v56  ;;  %5064 = vrot.lane.b32.xlu0 %v5039_v11, %s13999_s3  ;;  %v9748_v56 = vld [vmem:[%s12204_s28 + $0x120] sm:$0xff] }
0x2a30   : > { %5062 = vrot.lane.b32.xlu1 %v5039_v11, %s13994_s20  ;;  %11350 = vmatprep.subr.bf16.mxu1 %v11983_v34 }
0x2a36   : > { %10711 = vmatmul.mubr.msk.f32.vlgmr.msra.gmra.mrb[58].mxu1 %vm679_vm2, %v5039_v11 }
0x2a37   : > { %10724 = vmatprep.mubr.msk.f32.mxu1 %vm11984_vm1, %v11979_v10 }
0x2a97   : > { %v5084_v57 = vpop.permute.xlu0 %5083 }
0x2a98   : > { %v11347_v58 = vpack.c.bf16 %v5084_v57, %v9745_v31 }
0x2a9a   : > { %11349 = vmatpush3.bf16.xpose.msk.msra.mxu0 %vm12217_vm3, %v11347_v58 }
0x2a9b   : > { %11354 = vmatprep.subr.bf16.mxu0 %v11983_v34 }
0x2a9d   : > { %v11667_v62 = vpop.permute.xlu1 %11666  ;;  %v5061_v6 = vpop.permute.xlu0 %5060 }
0x2a9e   : > { %v11669_v1 = vunpack.i.h.bf16 %v11667_v62  ;;  %v11668_v2 = vunpack.i.l.bf16 %v11667_v62 }
0x2aa0   : > { %v11355_v4 = vpack.c.bf16 %v11669_v1, %v9747_v24  ;;  %v11351_v5 = vpack.c.bf16 %v11668_v2, %v9746_v59 }
0x2aa1   : > { %10718 = vmatmul.mubr.msk.f32.vlgmr.msra.gmra.mrb[40].mxu0 %vm679_vm2, %v5061_v6  ;;  %v5065_v8 = vpop.permute.xlu0 %5064 }
0x2aa2   : > { %11353 = vmatpush3.bf16.xpose.msk.msra.mxu1 %vm12217_vm3, %v11351_v5  ;;  %11357 = vmatpush3.bf16.xpose.msk.msra.mxu0 %vm12217_vm3, %v11355_v4  ;;  %v5063_v7 = vpop.permute.xlu1 %5062 }
0x2aa3   : > { %10731 = vmatprep.mubr.msk.f32.mxu0 %vm11984_vm1, %v11979_v10  ;;  %11358 = vmatprep.subr.bf16.mxu1 %v11983_v34 }
0x2aa4   : > { %11364 = vmatprep.subr.bf16.mxu0 %v11983_v34 }
0x2aa9   : > { %10725 = vmatmul.mubr.msk.f32.vlgmr.msra.gmra.mrb[60].mxu1 %vm679_vm2, %v5063_v7  ;;  %10732 = vmatmul.mubr.msk.f32.vlgmr.msra.gmra.mrb[42].mxu0 %vm679_vm2, %v5065_v8  ;;  %v9750_v8 = vld [vmem:[%s12204_s28 + $0x130] sm:$0xff] }
0x2aaa   : > { %10738 = vmatprep.mubr.msk.f32.mxu1 %vm11984_vm1, %v11979_v10  ;;  %10752 = vmatprep.mubr.msk.f32.mxu0 %vm11984_vm1, %v11979_v10 }
0x2b09   : > { %v5176_v9 = vpop.f32.mrb[58].mxu1 }
0x2b0a   : > { %v5411_v13 = vmul.f32 0.35355338, %v5176_v9  ;;  %v10712_v61 = vpop.f32.mrb[59].mxu1 }
0x2b0c   : > { %v5415_v17 = vadd.f32 %v13118_v14, %v5411_v13 }
0x2b0e   : > { %v5419_v18 = vsel %vm996_vm4, %v5415_v17, -inf }
0x2b0f   : > { %5420 = vmax.xlane.f32.xlu1 %v5419_v18 }
0x2b74   : > { %v5253_v19 = vpop.f32.mrb[40].mxu0 }
0x2b75   : > { %v5412_v53 = vmul.f32 0.35355338, %v5253_v19  ;;  %v10719_v40 = vpop.f32.mrb[41].mxu0  ;;  %v9749_v19 = vld [vmem:[%s12204_s28 + $0x128] sm:$0xff] }
0x2b77   : > { %v5416_v21 = vadd.f32 %v13123_v20, %v5412_v53 }
0x2b79   : > { %v5422_v47 = vsel %vm996_vm4, %v5416_v21, -inf }
0x2b7a   : > { %5423 = vmax.xlane.f32.xlu0 %v5422_v47 }
0x2b7c   : > { %v5330_v22 = vpop.f32.mrb[60].mxu1  ;;  %v5407_v52 = vpop.f32.mrb[42].mxu0 }
0x2b7d   : > { %v5413_v55 = vmul.f32 0.35355338, %v5330_v22  ;;  %v5414_v23 = vmul.f32 0.35355338, %v5407_v52  ;;  %v10726_v26 = vpop.f32.mrb[61].mxu1  ;;  %v10733_v41 = vpop.f32.mrb[43].mxu0 }
0x2b7e   : > { %v9751_v22 = vld [vmem:[%s12204_s28 + $0x138] sm:$0xff] }
0x2b7f   : > { %v5417_v32 = vadd.f32 %v13128_v27, %v5413_v55  ;;  %v5418_v35 = vadd.f32 %v13132_v33, %v5414_v23 }
0x2b81   : > { %v5425_v36 = vsel %vm996_vm4, %v5417_v32, -inf  ;;  %v5428_v37 = vsel %vm996_vm4, %v5418_v35, -inf }
0x2b82   : > { %5426 = vmax.xlane.f32.xlu0 %v5425_v36  ;;  %5429 = vmax.xlane.f32.xlu1 %v5428_v37  ;;  %v9769_v36 = vld [vmem:[%s13935_s7 + $0x88] sm:$0xff] }
0x2b93   : > { %5074 = vrot.lane.b32.xlu1 %v13061_v39, %s13994_s20 }
0x2b97   : > { %5076 = vrot.lane.b32.xlu1 %v13061_v39, %s13999_s3 }
0x2b98   : > { %5072 = vrot.lane.b32.xlu0 %v13061_v39, %s13996_s15 }
0x2b9b   : > { %5054 = vrot.lane.b32.xlu1 %v13061_v39, %s13997_s12 }
0x2b9c   : > { %v5421_v38 = vpop.xlane.xlu1 %5420 }
0x2b9d   : > { %v5431_v63 = vsub.f32 %v5415_v17, %v5421_v38 }
0x2b9f   : > { %v5435_v25 = vmul.f32 1.442695, %v5431_v63 }
0x2ba1   : > { %11803 = vpow2.f32 %v5435_v25  ;;  %v9770_v25 = vld [vmem:[%s13935_s7 + $0x90] sm:$0xff] }
0x2bab   : > { %v11804_v43 = vpop.eup %11803 }
0x2bac   : > { %v5443_v28 = vsel %vm996_vm4, %v11804_v43, 0.0 }
0x2bb7   : > { %5444 = vadd.xlane.f32.xlu0 %v5443_v28 }
0x2c07   : > { %v5424_v45 = vpop.xlane.xlu0 %5423 }
0x2c08   : > { %v5432_v46 = vsub.f32 %v5416_v21, %v5424_v45 }
0x2c0a   : > { %v5437_v60 = vmul.f32 1.442695, %v5432_v46 }
0x2c0c   : > { %11805 = vpow2.f32 %v5437_v60 }
0x2c0f   : > { %v5427_v48 = vpop.xlane.xlu0 %5426  ;;  %v5430_v3 = vpop.xlane.xlu1 %5429 }
0x2c10   : > { %v5433_v49 = vsub.f32 %v5417_v32, %v5427_v48  ;;  %v5434_v12 = vsub.f32 %v5418_v35, %v5430_v3  ;;  %v9768_v35 = vld [vmem:[%s13935_s7 + $0x80] sm:$0xff] }
0x2c11   : > { %v11371_v37 = vpack.c.bf16 %v9769_v36, %v9768_v35 }
0x2c12   : > { %v5439_v50 = vmul.f32 1.442695, %v5433_v49  ;;  %v5441_v39 = vmul.f32 1.442695, %v5434_v12 }
0x2c13   : > { %v5075_v11 = vpop.permute.xlu1 %5074  ;;  %v5073_v2 = vpop.permute.xlu0 %5072 }
0x2c14   : > { %11807 = vpow2.f32 %v5439_v50 }
0x2c15   : > { %11809 = vpow2.f32 %v5441_v39 }
0x2c16   : > { %v11806_v51 = vpop.eup %11805 }
0x2c17   : > { %v5077_v0 = vpop.permute.xlu1 %5076  ;;  %v5446_v54 = vsel %vm996_vm4, %v11806_v51, 0.0 }
0x2c18   : > { %5447 = vadd.xlane.f32.xlu1 %v5446_v54  ;;  %v11670_v1 = vpack.i.bf16 %v5077_v0, %v5075_v11 }
0x2c1b   : > { %v5055_v31 = vpop.permute.xlu1 %5054 }
0x2c1c   : > { %9743 = vst.msk [vmem:[%s12211_s2 + $0x48] sm:$0xff] %vm504_vm0, %v5055_v31  ;;  %v11359_v57 = vpack.c.bf16 %v5055_v31, %v9748_v56 }
0x2c1e   : > { %v11808_v58 = vpop.eup %11807  ;;  %11360 = vmatpush3.bf16.msra.mxu1 %v11359_v57 }
0x2c1f   : > { %v5449_v59 = vsel %vm996_vm4, %v11808_v58, 0.0  ;;  %11361 = vmatprep.subr.bf16.mxu1 %v11983_v34  ;;  %v11810_v24 = vpop.eup %11809 }
0x2c20   : > { %5450 = vadd.xlane.f32.xlu0 %v5449_v59  ;;  %v5452_v62 = vsel %vm996_vm4, %v11810_v24, 0.0  ;;  %v9775_v59 = vld [vmem:[%s13936_s8 + $0x80] sm:$0xff] }
0x2c24   : > { %5453 = vadd.xlane.f32.xlu0 %v5452_v62 }
0x2c29   : > { %11671 = vrot.lane.b32.xlu1 %v11670_v1, %s13997_s12  ;;  %v9778_v1 = vld [vmem:[%s13936_s8 + $0x98] sm:$0xff] }
0x2c3a   : > { %5094 = vrot.lane.b32.xlu0 %v5073_v2, %s13997_s12 }
0x2c44   : > { %v5445_v4 = vpop.xlane.xlu0 %5444 }
0x2c45   : > { %11811 = vrcp.f32 %v5445_v4 }
0x2c4f   : > { %v11812_v5 = vpop.eup %11811 }
0x2c50   : > { %v5459_v6 = vmul.f32 %v11812_v5, %v11804_v43  ;;  %v9771_v43 = vld [vmem:[%s13935_s7 + $0x98] sm:$0xff] }
0x2c51   : > { %v11374_v28 = vpack.c.bf16 %v9771_v43, %v9770_v25 }
0x2c52   : > { %10739 = vmatmul.mubr.msk.f32.vlgmr.msra.gmra.mrb[62].mxu1 %vm996_vm4, %v5459_v6 }
0x2c53   : > { %10745 = vmatprep.mubr.msk.f32.mxu1 %vm11984_vm1, %v11979_v10 }
0x2ca5   : > { %v5448_v7 = vpop.xlane.xlu1 %5447 }
0x2ca6   : > { %11813 = vrcp.f32 %v5448_v7 }
0x2ca9   : > { %v11672_v9 = vpop.permute.xlu1 %11671 }
0x2caa   : > { %v11673_v13 = vunpack.i.l.bf16 %v11672_v9  ;;  %v11674_v21 = vunpack.i.h.bf16 %v11672_v9 }
0x2cac   : > { %v11365_v61 = vpack.c.bf16 %v11673_v13, %v9750_v8  ;;  %v11368_v26 = vpack.c.bf16 %v11674_v21, %v9751_v22  ;;  %v9774_v8 = vld [vmem:[%s13933_s5 + $0x4] ss:$0 sm:$0xff] }
0x2cad   : > { %v5451_v17 = vpop.xlane.xlu0 %5450  ;;  %v9785_v21 = vld [vmem:[%s13937_s9 + $0x120] sm:$0xff] }
0x2cae   : > { %11815 = vrcp.f32 %v5451_v17  ;;  %11366 = vmatpush3.bf16.msra.mxu0 %v11365_v61  ;;  %v9781_v61 = vld [vmem:[%s13937_s9 + $0x100] sm:$0xff]  ;;  %v9782_v17 = vld [vmem:[%s13937_s9 + $0x108] sm:$0xff] }
0x2caf   : > { %11370 = vmatprep.subr.bf16.mxu0 %v11983_v34 }
0x2cb0   : > { %v11814_v40 = vpop.eup %11813 }
0x2cb1   : > { %v5454_v18 = vpop.xlane.xlu0 %5453  ;;  %v5460_v55 = vmul.f32 %v11814_v40, %v11806_v51 }
0x2cb2   : > { %11817 = vrcp.f32 %v5454_v18  ;;  %v9783_v18 = vld [vmem:[%s13937_s9 + $0x110] sm:$0xff] }
0x2cb5   : > { %v5095_v53 = vpop.permute.xlu0 %5094 }
0x2cb6   : > { %v11362_v47 = vpack.c.bf16 %v5095_v53, %v9749_v19  ;;  %v11383_v19 = vpack.c.bf16 %v9782_v17, %v9781_v61  ;;  %v9784_v53 = vld [vmem:[%s13937_s9 + $0x118] sm:$0xff] }
0x2cb7   : > { %v11386_v40 = vpack.c.bf16 %v9784_v53, %v9783_v18 }
0x2cb8   : > { %v11816_v52 = vpop.eup %11815  ;;  %11363 = vmatpush3.bf16.msra.mxu1 %v11362_v47  ;;  %v9786_v47 = vld [vmem:[%s13937_s9 + $0x128] sm:$0xff] }
0x2cb9   : > { %v5461_v23 = vmul.f32 %v11816_v52, %v11808_v58  ;;  %11367 = vmatprep.subr.bf16.mxu1 %v11983_v34  ;;  %v11389_v22 = vpack.c.bf16 %v9786_v47, %v9785_v21  ;;  %v9787_v52 = vld [vmem:[%s13937_s9 + $0x130] sm:$0xff] }
0x2cbb   : > { %10746 = vmatmul.mubr.msk.f32.vlgmr.msra.gmra.mrb[64].mxu1 %vm996_vm4, %v5460_v55  ;;  %10753 = vmatmul.mubr.msk.f32.vlgmr.msra.gmra.mrb[44].mxu0 %vm996_vm4, %v5461_v23  ;;  %v9788_v55 = vld [vmem:[%s13937_s9 + $0x138] sm:$0xff] }
0x2cbc   : > { %v11818_v41 = vpop.eup %11817  ;;  %11369 = vmatpush3.bf16.msra.mxu1 %v11368_v26  ;;  %10759 = vmatprep.mubr.msk.f32.mxu1 %vm11984_vm1, %v11979_v10  ;;  %v11392_v23 = vpack.c.bf16 %v9788_v55, %v9787_v52  ;;  %v9805_v55 = vld [vmem:[%s12204_s28 + $0x150] sm:$0xff] }
0x2cbd   : > { %v5462_v32 = vmul.f32 %v11818_v41, %v11810_v24  ;;  %10770 = vmatprep.mubr.msk.f32.mxu0 %vm11984_vm1, %v11979_v10  ;;  %11376 = vmatprep.subr.bf16.mxu1 %v11983_v34  ;;  %v9776_v24 = vld [vmem:[%s13936_s8 + $0x88] sm:$0xff] }
0x2cbe   : > { %11372 = vmatpush3.bf16.msra.mxu0 %v11371_v37  ;;  %v11377_v62 = vpack.c.bf16 %v9776_v24, %v9775_v59 }
0x2cbf   : > { %10760 = vmatmul.mubr.msk.f32.vlgmr.msra.gmra.mrb[66].mxu1 %vm996_vm4, %v5462_v32  ;;  %11373 = vmatprep.subr.bf16.mxu0 %v11983_v34 }
0x2cc0   : > { %10781 = vmatprep.mubr.msk.f32.mxu1 %vm11984_vm1, %v11979_v10  ;;  %11378 = vmatpush3.bf16.msra.mxu1 %v11377_v62  ;;  %v9791_v62 = vld [vmem:[%s13932_s4 + $0x5] ss:$0 sm:$0xff] }
0x2cc1   : > { %11379 = vmatprep.subr.bf16.mxu1 %v11983_v34 }
0x2cc2   : > { %11375 = vmatpush3.bf16.msra.mxu0 %v11374_v28 }
0x2cc3   : > { %11382 = vmatprep.subr.bf16.mxu0 %v11983_v34 }
0x2d25   : > { %v5532_v38 = vpop.f32.mrb[62].mxu1 }
0x2d26   : > { %v10740_v63 = vpop.f32.mrb[63].mxu1 }
0x2d8e   : > { %v5605_v45 = vpop.f32.mrb[64].mxu1  ;;  %v5678_v46 = vpop.f32.mrb[44].mxu0 }
0x2d8f   : > { %5756 = vrot.lane.b32.xlu1 %v5605_v45, %s14000_s10  ;;  %v10747_v60 = vpop.f32.mrb[65].mxu1  ;;  %5760 = vrot.lane.b32.xlu0 %v5678_v46, %s14001_s1  ;;  %v10754_v48 = vpop.f32.mrb[45].mxu0 }
0x2d90   : > { %v9793_v48 = vld [vmem:[%s13934_s6 + $0x148] sm:$0xff] }
0x2d92   : > { %v5751_v3 = vpop.f32.mrb[66].mxu1 }
0x2d93   : > { %5764 = vrot.lane.b32.xlu1 %v5751_v3, %s14002_s23  ;;  %v10761_v49 = vpop.f32.mrb[67].mxu1  ;;  %v9795_v3 = vld [vmem:[%s13934_s6 + $0x158] sm:$0xff] }
0x2d94   : > { %v11394_v49 = vpack.c.bf16 %v9795_v3, %v9793_v48 }
0x2e01   : > { %v5757_v12 = vpop.permute.xlu1 %5756  ;;  %v5761_v39 = vpop.permute.xlu0 %5760 }
0x2e02   : > { %v5767_v50 = vsel %vm679_vm2, %v5532_v38, %v5757_v12  ;;  %v9792_v12 = vld [vmem:[%s13934_s6 + $0x140] sm:$0xff] }
0x2e03   : > { %v5768_v11 = vsel %vm996_vm4, %v5767_v50, %v5761_v39  ;;  %v9794_v50 = vld [vmem:[%s13934_s6 + $0x150] sm:$0xff] }
0x2e04   : > { %v11396_v39 = vpack.c.bf16 %v9794_v50, %v9792_v12 }
0x2e05   : > { %v5765_v51 = vpop.permute.xlu1 %5764 }
0x2e06   : > { %v5769_v0 = vsel %vm1347_vm5, %v5768_v11, %v5765_v51  ;;  %v9797_v11 = vld [vmem:[%s13934_s6 + $0x168] sm:$0xff]  ;;  %v9799_v51 = vld [vmem:[%s13934_s6 + $0x178] sm:$0xff] }
0x2e07   : > { %10771 = vmatmul.mubr.msk.f32.vlgmr.msra.gmra.mrb[46].mxu0 %vm504_vm0, %v5769_v0  ;;  %v11398_v0 = vpack.c.bf16 %v9799_v51, %v9797_v11 }
0x2e08   : > { %10800 = vmatprep.mubr.msk.f32.mxu0 %vm11984_vm1, %v11979_v10  ;;  %11384 = vmatpush3.bf16.msra.mxu0 %v11383_v19 }
0x2e09   : > { %11385 = vmatprep.subr.bf16.mxu0 %v11983_v34 }
0x2e0c   : > { %11387 = vmatpush3.bf16.msra.mxu0 %v11386_v40  ;;  %v9803_v40 = vld [vmem:[%s12204_s28 + $0x140] sm:$0xff] }
0x2e0d   : > { %11388 = vmatprep.subr.bf16.mxu0 %v11983_v34 }
0x2e10   : > { %11390 = vmatpush3.bf16.msra.mxu0 %v11389_v22 }
0x2e11   : > { %11391 = vmatprep.subr.bf16.mxu0 %v11983_v34 }
0x2e14   : > { %11393 = vmatpush3.bf16.msra.mxu0 %v11392_v23  ;;  %v9806_v23 = vld [vmem:[%s12204_s28 + $0x158] sm:$0xff] }
0x2e15   : > { %11406 = vmatprep.subr.bf16.mxu0 %v11983_v34 }
0x2eda   : > { %v5844_v54 = vpop.f32.mrb[46].mxu0 }
0x2edb   : > { %v5848_v56 = vadd.f32 %v5844_v54, %v13024_v15  ;;  %v10772_v31 = vpop.f32.mrb[47].mxu0  ;;  %v9777_v15 = vld [vmem:[%s13936_s8 + $0x90] sm:$0xff]  ;;  %v9796_v54 = vld [vmem:[%s13934_s6 + $0x160] sm:$0xff] }
0x2edc   : > { %v11380_v2 = vpack.c.bf16 %v9778_v1, %v9777_v15 }
0x2edd   : > { %v5849_v57 = vmul.f32 %v5848_v56, %v5848_v56 }
0x2ede   : > { %11381 = vmatpush3.bf16.msra.mxu1 %v11380_v2 }
0x2edf   : > { %v5850_v58 = vsel %vm504_vm0, %v5849_v57, 0.0  ;;  %11395 = vmatprep.subr.bf16.mxu1 %v11394_v49 }
0x2ee0   : > { %5851 = vadd.xlane.f32.xlu0 %v5850_v58 }
0x2f6d   : > { %v5852_v4 = vpop.xlane.xlu0 %5851 }
0x2f6e   : > { %v5853_v5 = vmul.f32 0.03125, %v5852_v4 }
0x2f70   : > { %v5854_v6 = vadd.f32 1e-06, %v5853_v5 }
0x2f72   : > { %11819 = vrsqrt.f32 %v5854_v6 }
0x2f7c   : > { %v11820_v7 = vpop.eup %11819 }
0x2f7d   : > { %v5856_v9 = vmul.f32 %v11820_v7, %v5848_v56 }
0x2f7f   : > { %v5865_v13 = vmul.f32 %v9774_v8, %v5856_v9 }
0x2f81   : > { %10782 = vmatmul.mubr.msk.f32.vlgmr.msra.gmra.mrb[68].mxu1 %vm504_vm0, %v5865_v13 }
0x2f82   : > { %6132 = vmatprep.mubr.f32.mxu1 %v11979_v10  ;;  %11397 = vmatpush1.bf16.msra.mxu1 %v11396_v39 }
0x2f83   : > { %11399 = vmatprep.subr.bf16.mxu1 %v11398_v0 }
0x3054   : > { %v5940_v26 = vpop.f32.mrb[68].mxu1 }
0x3055   : > { %5952 = vrot.lane.b32.xlu1 %v5940_v26, %s13997_s12  ;;  %v10783_v41 = vpop.f32.mrb[69].mxu1  ;;  %v9780_v32 = vmul.f32 -1.442695, %v5940_v26 }
0x3057   : > { %11821 = vpow2.f32 %v9780_v32 }
0x3061   : > { %v11822_v35 = vpop.eup %11821 }
0x3062   : > { %v5947_v36 = vadd.f32 1.0, %v11822_v35 }
0x3064   : > { %11823 = vrcp.f32 %v5947_v36 }
0x306e   : > { %v11824_v37 = vpop.eup %11823 }
0x306f   : > { %v5950_v38 = vmul.f32 %v11824_v37, %v5940_v26 }
0x30c7   : > { %v5953_v63 = vpop.permute.xlu1 %5952 }
0x30c8   : > { %v5955_v25 = vmul.f32 %v5953_v63, %v5950_v38 }
0x30ca   : > { %10801 = vmatmul.mubr.msk.f32.vlgmr.msra.gmra.mrb[48].mxu0 %vm1540_vm6, %v5955_v25 }
0x30cb   : > { %10814 = vmatprep.mubr.msk.f32.mxu0 %vm11984_vm1, %v11979_v10 }
0x319d   : > { %v6034_v43 = vpop.f32.mrb[48].mxu0 }
0x319e   : > { %v13248_v28 = vadd.f32 %v6034_v43, %v5848_v56  ;;  %v10802_v45 = vpop.f32.mrb[49].mxu0  ;;  %v9798_v56 = vld [vmem:[%s13934_s6 + $0x170] sm:$0xff] }
0x319f   : > { %v11400_v31 = vpack.c.bf16 %v9798_v56, %v9796_v54 }
0x31a0   : > { %v6039_v46 = vmul.f32 %v13248_v28, %v13248_v28 }
0x31a1   : > { %11401 = vmatpush1.bf16.msra.mxu1 %v11400_v31 }
0x31a2   : > { %v6040_v60 = vsel %vm504_vm0, %v6039_v46, 0.0  ;;  %11402 = vmatprep.subr.bf16.mxu1 %v11983_v34 }
0x31a3   : > { %6041 = vadd.xlane.f32.xlu1 %v6040_v60 }
0x3230   : > { %v6042_v57 = vpop.xlane.xlu1 %6041 }
0x3231   : > { %v6043_v58 = vmul.f32 0.03125, %v6042_v57 }
0x3233   : > { %v6044_v59 = vadd.f32 1e-06, %v6043_v58 }
0x3235   : > { %11825 = vrsqrt.f32 %v6044_v59 }
0x323f   : > { %v11826_v24 = vpop.eup %11825 }
0x3240   : > { %v6046_v15 = vmul.f32 %v11826_v24, %v13248_v28 }
0x3242   : > { %v6055_v1 = vmul.f32 %v9791_v62, %v6046_v15 }
0x3244   : > { %9800 = vmatmul.mubr.msk.f32.vlgmr.msra.gmra.mrb[70].mxu1 %vm504_vm0, %v6055_v1 }
0x3245   : > { %10807 = vmatprep.mubr.msk.f32.mxu1 %vm11984_vm1, %v11979_v10 }
0x3317   : > { %v13285_v2 = vpop.f32.mrb[70].mxu1 }
0x3318   : > { %v6136_v4 = vpop.f32.mrb[71].mxu1  ;;  %v6146_v6 = vmul.f32 %v13285_v2, %v12177_v29  ;;  %v6140_v9 = vmul.f32 %v13285_v2, %v12179_v30  ;;  %v6139_v61 = vmul.f32 %v13079_v16, %v13285_v2  ;;  %v9804_v16 = vld [vmem:[%s12204_s28 + $0x148] sm:$0xff] }
0x3319   : > { %v6147_v5 = vmul.f32 %v13064_v42, %v6136_v4 }
0x331b   : > { %6149 = vrot.lane.b32.xlu0 %v6147_v5, %s13998_s0 }
0x338d   : > { %v6150_v7 = vpop.permute.xlu0 %6149 }
0x338e   : > { %v6152_v8 = vadd.f32 %v6150_v7, %v6146_v6 }
0x3390   : > { %6174 = vrot.lane.b32.xlu0 %v6152_v8, %s13994_s20  ;;  %6172 = vrot.lane.b32.xlu1 %v6152_v8, %s13996_s15 }
0x3394   : > { %6142 = vrot.lane.b32.xlu0 %v6140_v9, %s13998_s0  ;;  %6176 = vrot.lane.b32.xlu1 %v6152_v8, %s13999_s3 }
0x3398   : > { %6154 = vrot.lane.b32.xlu0 %v6152_v8, %s13991_s16 }
0x3402   : > { %v6175_v42 = vpop.permute.xlu0 %6174  ;;  %v6173_v13 = vpop.permute.xlu1 %6172 }
0x3403   : > { %6189 = vrot.lane.b32.xlu1 %v6173_v13, %s13991_s16 }
0x3406   : > { %v6143_v17 = vpop.permute.xlu0 %6142  ;;  %v6177_v18 = vpop.permute.xlu1 %6176 }
0x3407   : > { %v6145_v19 = vadd.f32 %v6143_v17, %v6139_v61  ;;  %v11675_v53 = vpack.i.bf16 %v6177_v18, %v6175_v42 }
0x3409   : > { %6166 = vrot.lane.b32.xlu1 %v6145_v19, %s13996_s15  ;;  %11676 = vrot.lane.b32.xlu0 %v11675_v53, %s13991_s16 }
0x340a   : > { %v6155_v21 = vpop.permute.xlu0 %6154 }
0x340b   : > { %9801 = vst.msk [vmem:[%s12211_s2 + $0x50] sm:$0xff] %vm504_vm0, %v6155_v21  ;;  %v11403_v47 = vpack.c.bf16 %v6155_v21, %v9803_v40 }
0x340d   : > { %11405 = vmatpush3.bf16.xpose.msk.msra.mxu1 %vm12217_vm3, %v11403_v47  ;;  %6170 = vrot.lane.b32.xlu1 %v6145_v19, %s13999_s3 }
0x340e   : > { %6168 = vrot.lane.b32.xlu0 %v6145_v19, %s13994_s20  ;;  %11410 = vmatprep.subr.bf16.mxu1 %v11983_v34 }
0x3414   : > { %10808 = vmatmul.mubr.msk.f32.vlgmr.msra.gmra.mrb[72].mxu1 %vm679_vm2, %v6145_v19 }
0x3415   : > { %10821 = vmatprep.mubr.msk.f32.mxu1 %vm11984_vm1, %v11979_v10 }
0x3475   : > { %v6190_v22 = vpop.permute.xlu1 %6189 }
0x3476   : > { %v11407_v52 = vpack.c.bf16 %v6190_v22, %v9804_v16 }
0x3478   : > { %11409 = vmatpush3.bf16.xpose.msk.msra.mxu0 %vm12217_vm3, %v11407_v52 }
0x3479   : > { %11414 = vmatprep.subr.bf16.mxu0 %v11983_v34 }
0x347b   : > { %v11677_v26 = vpop.permute.xlu0 %11676  ;;  %v6167_v37 = vpop.permute.xlu1 %6166 }
0x347c   : > { %v11679_v41 = vunpack.i.h.bf16 %v11677_v26  ;;  %v11678_v32 = vunpack.i.l.bf16 %v11677_v26 }
0x347e   : > { %v11415_v35 = vpack.c.bf16 %v11679_v41, %v9806_v23  ;;  %v11411_v36 = vpack.c.bf16 %v11678_v32, %v9805_v55  ;;  %v9807_v55 = vld [vmem:[%s12204_s28 + $0x160] sm:$0xff]  ;;  %v9808_v32 = vld [vmem:[%s12204_s28 + $0x168] sm:$0xff] }
0x347f   : > { %10815 = vmatmul.mubr.msk.f32.vlgmr.msra.gmra.mrb[50].mxu0 %vm679_vm2, %v6167_v37  ;;  %v6171_v63 = vpop.permute.xlu1 %6170 }
0x3480   : > { %11413 = vmatpush3.bf16.xpose.msk.msra.mxu1 %vm12217_vm3, %v11411_v36  ;;  %11417 = vmatpush3.bf16.xpose.msk.msra.mxu0 %vm12217_vm3, %v11415_v35  ;;  %v6169_v38 = vpop.permute.xlu0 %6168 }
0x3481   : > { %10828 = vmatprep.mubr.msk.f32.mxu0 %vm11984_vm1, %v11979_v10  ;;  %11418 = vmatprep.subr.bf16.mxu1 %v11983_v34 }
0x3482   : > { %11424 = vmatprep.subr.bf16.mxu0 %v11983_v34 }
0x3487   : > { %10822 = vmatmul.mubr.msk.f32.vlgmr.msra.gmra.mrb[74].mxu1 %vm679_vm2, %v6169_v38  ;;  %10829 = vmatmul.mubr.msk.f32.vlgmr.msra.gmra.mrb[52].mxu0 %vm679_vm2, %v6171_v63 }
0x3488   : > { %10835 = vmatprep.mubr.msk.f32.mxu1 %vm11984_vm1, %v11979_v10  ;;  %10849 = vmatprep.mubr.msk.f32.mxu0 %vm11984_vm1, %v11979_v10 }
0x34e7   : > { %v6282_v25 = vpop.f32.mrb[72].mxu1 }
0x34e8   : > { %v6517_v43 = vmul.f32 0.35355338, %v6282_v25  ;;  %v10809_v45 = vpop.f32.mrb[73].mxu1  ;;  %v9809_v25 = vld [vmem:[%s12204_s28 + $0x170] sm:$0xff] }
0x34ea   : > { %v6521_v46 = vadd.f32 %v13118_v14, %v6517_v43  ;;  %v9810_v43 = vld [vmem:[%s12204_s28 + $0x178] sm:$0xff] }
0x34ec   : > { %v6525_v60 = vsel %vm996_vm4, %v6521_v46, -inf }
0x34ed   : > { %6526 = vmax.xlane.f32.xlu0 %v6525_v60 }
0x3552   : > { %v6359_v48 = vpop.f32.mrb[50].mxu0 }
0x3553   : > { %v6518_v3 = vmul.f32 0.35355338, %v6359_v48  ;;  %v10816_v49 = vpop.f32.mrb[51].mxu0 }
0x3555   : > { %v6522_v12 = vadd.f32 %v13123_v20, %v6518_v3 }
0x3557   : > { %v6528_v50 = vsel %vm996_vm4, %v6522_v12, -inf }
0x3558   : > { %6529 = vmax.xlane.f32.xlu1 %v6528_v50 }
0x355a   : > { %v6436_v39 = vpop.f32.mrb[74].mxu1  ;;  %v6513_v11 = vpop.f32.mrb[52].mxu0 }
0x355b   : > { %v6519_v51 = vmul.f32 0.35355338, %v6436_v39  ;;  %v6520_v0 = vmul.f32 0.35355338, %v6513_v11  ;;  %v10823_v54 = vpop.f32.mrb[75].mxu1  ;;  %v10830_v56 = vpop.f32.mrb[53].mxu0 }
0x355c   : > { %v9827_v11 = vld [vmem:[%s13935_s7 + $0xa0] sm:$0xff] }
0x355d   : > { %v6523_v31 = vadd.f32 %v13128_v27, %v6519_v51  ;;  %v6524_v14 = vadd.f32 %v13132_v33, %v6520_v0  ;;  %v9828_v51 = vld [vmem:[%s13935_s7 + $0xa8] sm:$0xff] }
0x355e   : > { %v11431_v0 = vpack.c.bf16 %v9828_v51, %v9827_v11 }
0x355f   : > { %v6531_v57 = vsel %vm996_vm4, %v6523_v31, -inf  ;;  %v6534_v58 = vsel %vm996_vm4, %v6524_v14, -inf }
0x3560   : > { %6532 = vmax.xlane.f32.xlu0 %v6531_v57  ;;  %v9830_v57 = vld [vmem:[%s13935_s7 + $0xb8] sm:$0xff] }
0x3564   : > { %6535 = vmax.xlane.f32.xlu0 %v6534_v58 }
0x3569   : > { %6178 = vrot.lane.b32.xlu1 %v13285_v2, %s13996_s15 }
0x356d   : > { %6182 = vrot.lane.b32.xlu1 %v13285_v2, %s13999_s3 }
0x357a   : > { %v6527_v20 = vpop.xlane.xlu0 %6526  ;;  %6180 = vrot.lane.b32.xlu0 %v13285_v2, %s13994_s20 }
0x357b   : > { %v6537_v59 = vsub.f32 %v6521_v46, %v6527_v20 }
0x357d   : > { %v6541_v27 = vmul.f32 1.442695, %v6537_v59 }
0x357f   : > { %11827 = vpow2.f32 %v6541_v27 }
0x3589   : > { %v11828_v33 = vpop.eup %11827 }
0x358a   : > { %v6549_v24 = vsel %vm996_vm4, %v11828_v33, 0.0 }
0x3591   : > { %6550 = vadd.xlane.f32.xlu1 %v6549_v24 }
0x35e5   : > { %v6530_v62 = vpop.xlane.xlu1 %6529 }
0x35e6   : > { %v6538_v15 = vsub.f32 %v6522_v12, %v6530_v62 }
0x35e8   : > { %v6543_v1 = vmul.f32 1.442695, %v6538_v15 }
0x35e9   : > { %v6179_v4 = vpop.permute.xlu1 %6178 }
0x35ea   : > { %11829 = vpow2.f32 %v6543_v1  ;;  %6200 = vrot.lane.b32.xlu1 %v6179_v4, %s13997_s12 }
0x35ed   : > { %v6533_v5 = vpop.xlane.xlu0 %6532  ;;  %v6183_v21 = vpop.permute.xlu1 %6182 }
0x35ee   : > { %v6539_v6 = vsub.f32 %v6523_v31, %v6533_v5 }
0x35f0   : > { %v6545_v7 = vmul.f32 1.442695, %v6539_v6 }
0x35f1   : > { %v6536_v9 = vpop.xlane.xlu0 %6535 }
0x35f2   : > { %11831 = vpow2.f32 %v6545_v7  ;;  %v6540_v13 = vsub.f32 %v6524_v14, %v6536_v9  ;;  %v9829_v14 = vld [vmem:[%s13935_s7 + $0xb0] sm:$0xff] }
0x35f3   : > { %v11434_v20 = vpack.c.bf16 %v9830_v57, %v9829_v14  ;;  %v9854_v14 = vld [vmem:[%s13934_s6 + $0x198] sm:$0xff] }
0x35f4   : > { %v11830_v8 = vpop.eup %11829  ;;  %v6547_v17 = vmul.f32 1.442695, %v6540_v13 }
0x35f5   : > { %v6552_v42 = vsel %vm996_vm4, %v11830_v8, 0.0  ;;  %v6181_v40 = vpop.permute.xlu0 %6180 }
0x35f6   : > { %6553 = vadd.xlane.f32.xlu0 %v6552_v42  ;;  %11833 = vpow2.f32 %v6547_v17  ;;  %v11680_v47 = vpack.i.bf16 %v6183_v21, %v6181_v40  ;;  %v9835_v17 = vld [vmem:[%s13936_s8 + $0xa8] sm:$0xff] }
0x35fc   : > { %v11832_v61 = vpop.eup %11831 }
0x35fd   : > { %v6555_v18 = vsel %vm996_vm4, %v11832_v61, 0.0 }
0x35fe   : > { %6556 = vadd.xlane.f32.xlu0 %v6555_v18 }
0x3600   : > { %v11834_v19 = vpop.eup %11833 }
0x3601   : > { %v6558_v53 = vsel %vm996_vm4, %v11834_v19, 0.0 }
0x360e   : > { %6559 = vadd.xlane.f32.xlu1 %v6558_v53 }
0x3614   : > { %6160 = vrot.lane.b32.xlu0 %v13285_v2, %s13997_s12 }
0x361e   : > { %v6551_v16 = vpop.xlane.xlu1 %6550 }
0x361f   : > { %11681 = vrot.lane.b32.xlu1 %v11680_v47, %s13997_s12  ;;  %11835 = vrcp.f32 %v6551_v16 }
0x3629   : > { %v11836_v26 = vpop.eup %11835 }
0x362a   : > { %v6565_v2 = vmul.f32 %v11836_v26, %v11828_v33  ;;  %v9841_v26 = vld [vmem:[%s13937_s9 + $0x148] sm:$0xff] }
0x365c   : > { %v6201_v35 = vpop.permute.xlu1 %6200 }
0x365d   : > { %v11422_v37 = vpack.c.bf16 %v6201_v35, %v9808_v32  ;;  %v9843_v35 = vld [vmem:[%s13937_s9 + $0x158] sm:$0xff] }
0x3683   : > { %v6554_v22 = vpop.xlane.xlu0 %6553 }
0x3684   : > { %11837 = vrcp.f32 %v6554_v22  ;;  %v9833_v22 = vld [vmem:[%s13933_s5 + $0x5] ss:$0 sm:$0xff] }
0x368b   : > { %v6557_v52 = vpop.xlane.xlu0 %6556 }
0x368c   : > { %11839 = vrcp.f32 %v6557_v52 }
0x368e   : > { %v11838_v36 = vpop.eup %11837 }
0x368f   : > { %v6161_v23 = vpop.permute.xlu0 %6160  ;;  %v6566_v38 = vmul.f32 %v11838_v36, %v11830_v8  ;;  %v9844_v36 = vld [vmem:[%s13937_s9 + $0x160] sm:$0xff] }
0x3690   : > { %9802 = vst.msk [vmem:[%s12211_s2 + $0x58] sm:$0xff] %vm504_vm0, %v6161_v23  ;;  %v11419_v41 = vpack.c.bf16 %v6161_v23, %v9807_v55  ;;  %v9840_v23 = vld [vmem:[%s13937_s9 + $0x140] sm:$0xff] }
0x3691   : > { %v11443_v32 = vpack.c.bf16 %v9841_v26, %v9840_v23 }
0x3692   : > { %11420 = vmatpush3.bf16.msra.mxu1 %v11419_v41  ;;  %v9842_v41 = vld [vmem:[%s13937_s9 + $0x150] sm:$0xff] }
0x3693   : > { %11421 = vmatprep.subr.bf16.mxu1 %v11983_v34 }
0x3695   : > { %10836 = vmatmul.mubr.msk.f32.vlgmr.msra.gmra.mrb[76].mxu1 %vm996_vm4, %v6565_v2  ;;  %v11446_v2 = vpack.c.bf16 %v9843_v35, %v9842_v41  ;;  %v9862_v41 = vld [vmem:[%s12204_s28 + $0x180] sm:$0xff] }
0x3696   : > { %11423 = vmatpush3.bf16.msra.mxu1 %v11422_v37  ;;  %10842 = vmatprep.mubr.msk.f32.mxu1 %vm11984_vm1, %v11979_v10  ;;  %v11840_v48 = vpop.eup %11839  ;;  %v9845_v37 = vld [vmem:[%s13937_s9 + $0x168] sm:$0xff] }
0x3697   : > { %11427 = vmatprep.subr.bf16.mxu1 %v11983_v34  ;;  %v6567_v12 = vmul.f32 %v11840_v48, %v11832_v61  ;;  %v9834_v61 = vld [vmem:[%s13936_s8 + $0xa0] sm:$0xff] }
0x3698   : > { %v11437_v18 = vpack.c.bf16 %v9835_v17, %v9834_v61  ;;  %v13494_v17 = vld [vmem:[%s12166_s29] sm:$0xff]  ;;  %s14003_s29 = sld [smem:[#allocation8_spill]] }
0x3699   : > { %10843 = vmatmul.mubr.msk.f32.vlgmr.msra.gmra.mrb[78].mxu1 %vm996_vm4, %v6566_v38  ;;  %v11449_v38 = vpack.c.bf16 %v9845_v37, %v9844_v36 }
0x369a   : > { %10856 = vmatprep.mubr.msk.f32.mxu1 %vm11984_vm1, %v11979_v10 }
0x369b   : > { %v6560_v63 = vpop.xlane.xlu1 %6559 }
0x369c   : > { %11841 = vrcp.f32 %v6560_v63  ;;  %v9846_v63 = vld [vmem:[%s13937_s9 + $0x170] sm:$0xff] }
0x369e   : > { %s9968_s14 = sshll.u32 %s14003_s29, 7 }
0x369f   : > { %v11682_v45 = vpop.permute.xlu1 %11681  ;;  %s13885_s24 = scalar_lea.hbm %s14005_s21, %s9968_s14 }
0x36a0   : > { %v11684_v46 = vunpack.i.h.bf16 %v11682_v45  ;;  %v11683_v60 = vunpack.i.l.bf16 %v11682_v45 }
0x36a2   : > { %v11428_v3 = vpack.c.bf16 %v11684_v46, %v9810_v43  ;;  %v11425_v49 = vpack.c.bf16 %v11683_v60, %v9809_v25  ;;  %v9847_v25 = vld [vmem:[%s13937_s9 + $0x178] sm:$0xff] }
0x36a3   : > { %v11452_v43 = vpack.c.bf16 %v9847_v25, %v9846_v63  ;;  %v9865_v63 = vld [vmem:[%s12204_s28 + $0x198] sm:$0xff] }
0x36a4   : > { %11426 = vmatpush3.bf16.msra.mxu0 %v11425_v49  ;;  %11429 = vmatpush3.bf16.msra.mxu1 %v11428_v3 }
0x36a5   : > { %11430 = vmatprep.subr.bf16.mxu0 %v11983_v34  ;;  %11436 = vmatprep.subr.bf16.mxu1 %v11983_v34 }
0x36a6   : > { %v11842_v50 = vpop.eup %11841 }
0x36a7   : > { %v6568_v39 = vmul.f32 %v11842_v50, %v11834_v19  ;;  %10850 = vmatmul.mubr.msk.f32.vlgmr.msra.gmra.mrb[54].mxu0 %vm996_vm4, %v6567_v12  ;;  %v9837_v19 = vld [vmem:[%s13936_s8 + $0xb8] sm:$0xff] }
0x36a8   : > { %10867 = vmatprep.mubr.msk.f32.mxu0 %vm11984_vm1, %v11979_v10  ;;  %11432 = vmatpush3.bf16.msra.mxu0 %v11431_v0 }
0x36a9   : > { %10857 = vmatmul.mubr.msk.f32.vlgmr.msra.gmra.mrb[80].mxu1 %vm996_vm4, %v6568_v39  ;;  %11433 = vmatprep.subr.bf16.mxu0 %v11983_v34 }
0x36aa   : > { %10878 = vmatprep.mubr.msk.f32.mxu1 %vm11984_vm1, %v11979_v10  ;;  %11438 = vmatpush3.bf16.msra.mxu1 %v11437_v18 }
0x36ab   : > { %11439 = vmatprep.subr.bf16.mxu1 %v11983_v34 }
0x36ac   : > { %11435 = vmatpush3.bf16.msra.mxu0 %v11434_v20  ;;  %v9853_v20 = vld [vmem:[%s13934_s6 + $0x190] sm:$0xff] }
0x36ad   : > { %11442 = vmatprep.subr.bf16.mxu0 %v11983_v34 }
0x3768   : > { %v6638_v54 = vpop.f32.mrb[76].mxu1 }
0x3769   : > { %v10837_v56 = vpop.f32.mrb[77].mxu1 }
0x376c   : > { %v6711_v31 = vpop.f32.mrb[78].mxu1 }
0x376d   : > { %6862 = vrot.lane.b32.xlu0 %v6711_v31, %s14000_s10  ;;  %v10844_v58 = vpop.f32.mrb[79].mxu1  ;;  %v9852_v31 = vld [vmem:[%s13934_s6 + $0x188] sm:$0xff] }
0x376e   : > { %v11454_v57 = vpack.c.bf16 %v9854_v14, %v9852_v31  ;;  %v9851_v58 = vld [vmem:[%s13934_s6 + $0x180] sm:$0xff] }
0x377a   : > { %v6784_v59 = vpop.f32.mrb[54].mxu0 }
0x377b   : > { %6866 = vrot.lane.b32.xlu1 %v6784_v59, %s14001_s1  ;;  %v10851_v27 = vpop.f32.mrb[55].mxu0  ;;  %v11456_v59 = vpack.c.bf16 %v9853_v20, %v9851_v58 }
0x377c   : > { %v6857_v33 = vpop.f32.mrb[80].mxu1  ;;  %v9856_v27 = vld [vmem:[%s13934_s6 + $0x1a8] sm:$0xff] }
0x377d   : > { %6870 = vrot.lane.b32.xlu0 %v6857_v33, %s14002_s23  ;;  %v10858_v24 = vpop.f32.mrb[81].mxu1  ;;  %v9858_v33 = vld [vmem:[%s13934_s6 + $0x1b8] sm:$0xff] }
0x377e   : > { %v11458_v24 = vpack.c.bf16 %v9858_v33, %v9856_v27 }
0x37df   : > { %v6863_v62 = vpop.permute.xlu0 %6862 }
0x37e0   : > { %v6873_v15 = vsel %vm679_vm2, %v6638_v54, %v6863_v62  ;;  %v9855_v62 = vld [vmem:[%s13934_s6 + $0x1a0] sm:$0xff] }
0x37ed   : > { %v6867_v1 = vpop.permute.xlu1 %6866 }
0x37ee   : > { %v6874_v4 = vsel %vm996_vm4, %v6873_v15, %v6867_v1  ;;  %v9857_v15 = vld [vmem:[%s13934_s6 + $0x1b0] sm:$0xff] }
0x37ef   : > { %v6871_v5 = vpop.permute.xlu0 %6870  ;;  %v11460_v1 = vpack.c.bf16 %v9857_v15, %v9855_v62 }
0x37f0   : > { %v6875_v6 = vsel %vm1347_vm5, %v6874_v4, %v6871_v5 }
0x37f1   : > { %10868 = vmatmul.mubr.msk.f32.vlgmr.msra.gmra.mrb[56].mxu0 %vm504_vm0, %v6875_v6 }
0x37f2   : > { %10897 = vmatprep.mubr.msk.f32.mxu0 %vm11984_vm1, %v11979_v10  ;;  %11444 = vmatpush3.bf16.msra.mxu0 %v11443_v32 }
0x37f3   : > { %11445 = vmatprep.subr.bf16.mxu0 %v11983_v34 }
0x37f6   : > { %11447 = vmatpush3.bf16.msra.mxu0 %v11446_v2  ;;  %v9863_v2 = vld [vmem:[%s12204_s28 + $0x188] sm:$0xff] }
0x37f7   : > { %11448 = vmatprep.subr.bf16.mxu0 %v11983_v34 }
0x37fa   : > { %11450 = vmatpush3.bf16.msra.mxu0 %v11449_v38  ;;  %v9864_v38 = vld [vmem:[%s12204_s28 + $0x190] sm:$0xff] }
0x37fb   : > { %11451 = vmatprep.subr.bf16.mxu0 %v11983_v34 }
0x37fe   : > { %11453 = vmatpush3.bf16.msra.mxu0 %v11452_v43 }
0x37ff   : > { %11466 = vmatprep.subr.bf16.mxu0 %v11983_v34 }
0x38c4   : > { %v6950_v7 = vpop.f32.mrb[56].mxu0 }
0x38c5   : > { %v6954_v8 = vadd.f32 %v6950_v7, %v13248_v28  ;;  %v10869_v9 = vpop.f32.mrb[57].mxu0  ;;  %v9836_v28 = vld [vmem:[%s13936_s8 + $0xb0] sm:$0xff] }
0x38c6   : > { %v11440_v53 = vpack.c.bf16 %v9837_v19, %v9836_v28 }
0x38c7   : > { %v6955_v42 = vmul.f32 %v6954_v8, %v6954_v8 }
0x38c8   : > { %11441 = vmatpush3.bf16.msra.mxu1 %v11440_v53 }
0x38c9   : > { %v6956_v13 = vsel %vm504_vm0, %v6955_v42, 0.0  ;;  %11455 = vmatprep.subr.bf16.mxu1 %v11454_v57  ;;  %v13553_v57 = vld [vmem:[%s12255_s26 + $0x8] sm:$0xff] }
0x38ca   : > { %6957 = vadd.xlane.f32.xlu1 %v6956_v13 }
0x3957   : > { %v6958_v40 = vpop.xlane.xlu1 %6957 }
0x3958   : > { %v6959_v21 = vmul.f32 0.03125, %v6958_v40 }
0x395a   : > { %v6960_v47 = vadd.f32 1e-06, %v6959_v21 }
0x395c   : > { %11843 = vrsqrt.f32 %v6960_v47 }
0x3966   : > { %v11844_v16 = vpop.eup %11843 }
0x3967   : > { %v6962_v52 = vmul.f32 %v11844_v16, %v6954_v8  ;;  %v13509_v16 = vld [vmem:[%s12150_s18] sm:$0xff] }
0x3969   : > { %v6971_v55 = vmul.f32 %v9833_v22, %v6962_v52 }
0x396b   : > { %10879 = vmatmul.mubr.msk.f32.vlgmr.msra.gmra.mrb[82].mxu1 %vm504_vm0, %v6971_v55 }
0x396c   : > { %7238 = vmatprep.mubr.f32.mxu1 %v11979_v10  ;;  %11457 = vmatpush1.bf16.msra.mxu1 %v11456_v59 }
0x396d   : > { %11459 = vmatprep.subr.bf16.mxu1 %v11458_v24 }
0x3970   : > { %11461 = vmatpush1.bf16.msra.mxu1 %v11460_v1  ;;  %v13558_v1 = vld [vmem:[%s12255_s26 + $0x10] sm:$0xff] }
0x3971   : > { %11462 = vmatprep.subr.bf16.mxu1 %v11983_v34 }
0x3a3e   : > { %v7046_v45 = vpop.f32.mrb[82].mxu1 }
0x3a3f   : > { %7058 = vrot.lane.b32.xlu0 %v7046_v45, %s13997_s12  ;;  %v10880_v46 = vpop.f32.mrb[83].mxu1  ;;  %v9839_v60 = vmul.f32 -1.442695, %v7046_v45 }
0x3a41   : > { %11845 = vpow2.f32 %v9839_v60 }
0x3a4b   : > { %v11846_v48 = vpop.eup %11845 }
0x3a4c   : > { %v7053_v3 = vadd.f32 1.0, %v11846_v48 }
0x3a4e   : > { %11847 = vrcp.f32 %v7053_v3 }
0x3a58   : > { %v11848_v49 = vpop.eup %11847 }
0x3a59   : > { %v7056_v12 = vmul.f32 %v11848_v49, %v7046_v45 }
0x3ab1   : > { %v7059_v50 = vpop.permute.xlu0 %7058 }
0x3ab2   : > { %v7061_v39 = vmul.f32 %v7059_v50, %v7056_v12 }
0x3ab4   : > { %10898 = vmatmul.mubr.msk.f32.vlgmr.msra.gmra.mrb[58].mxu0 %vm1540_vm6, %v7061_v39 }
0x3ab5   : > { %10911 = vmatprep.mubr.msk.f32.mxu0 %vm11984_vm1, %v11979_v10 }
0x3b87   : > { %v7140_v11 = vpop.f32.mrb[58].mxu0 }
0x3b88   : > { %v13454_v51 = vadd.f32 %v7140_v11, %v6954_v8  ;;  %v10899_v0 = vpop.f32.mrb[59].mxu0  ;;  %v9850_v8 = vld [vmem:[%s13932_s4 + $0x6] ss:$0 sm:$0xff] }
0x3b89   : > { %v13548_v11 = vld [vmem:[%s12255_s26] sm:$0xff] }
0x3b8a   : > { %v7145_v54 = vmul.f32 %v13454_v51, %v13454_v51 }
0x3b8c   : > { %v7146_v56 = vsel %vm504_vm0, %v7145_v54, 0.0 }
0x3b8d   : > { %7147 = vadd.xlane.f32.xlu0 %v7146_v56 }
0x3c1a   : > { %v7148_v4 = vpop.xlane.xlu0 %7147 }
0x3c1b   : > { %v7149_v5 = vmul.f32 0.03125, %v7148_v4 }
0x3c1d   : > { %v7150_v6 = vadd.f32 1e-06, %v7149_v5  ;;  %v13562_v5 = vld [vmem:[%s12255_s26 + $0x18] sm:$0xff] }
0x3c1f   : > { %11849 = vrsqrt.f32 %v7150_v6 }
0x3c29   : > { %v11850_v7 = vpop.eup %11849 }
0x3c2a   : > { %v7152_v9 = vmul.f32 %v11850_v7, %v13454_v51 }
0x3c2c   : > { %v7161_v42 = vmul.f32 %v9850_v8, %v7152_v9 }
0x3c2e   : > { %9859 = vmatmul.mubr.msk.f32.vlgmr.msra.gmra.mrb[84].mxu1 %vm504_vm0, %v7161_v42 }
0x3c2f   : > { %10904 = vmatprep.mubr.msk.f32.mxu1 %vm11984_vm1, %v11979_v10 }
0x3d01   : > { %v13491_v13 = vpop.f32.mrb[84].mxu1 }
0x3d02   : > { %v7242_v61 = vpop.f32.mrb[85].mxu1  ;;  %v7252_v28 = vmul.f32 %v13491_v13, %v12177_v29  ;;  %v7246_v40 = vmul.f32 %v13491_v13, %v12179_v30  ;;  %v7245_v22 = vmul.f32 %v13509_v16, %v13491_v13 }
0x3d03   : > { %v7253_v18 = vmul.f32 %v13494_v17, %v7242_v61 }
0x3d05   : > { %7255 = vrot.lane.b32.xlu1 %v7253_v18, %s13998_s0 }
0x3d77   : > { %v7256_v19 = vpop.permute.xlu1 %7255 }
0x3d78   : > { %v7258_v53 = vadd.f32 %v7256_v19, %v7252_v28 }
0x3d7a   : > { %7280 = vrot.lane.b32.xlu1 %v7258_v53, %s13994_s20  ;;  %7278 = vrot.lane.b32.xlu0 %v7258_v53, %s13996_s15 }
0x3d7e   : > { %7248 = vrot.lane.b32.xlu1 %v7246_v40, %s13998_s0  ;;  %7282 = vrot.lane.b32.xlu0 %v7258_v53, %s13999_s3 }
0x3d82   : > { %7260 = vrot.lane.b32.xlu1 %v7258_v53, %s13991_s16 }
0x3dec   : > { %v7281_v21 = vpop.permute.xlu1 %7280  ;;  %v7279_v47 = vpop.permute.xlu0 %7278 }
0x3ded   : > { %7295 = vrot.lane.b32.xlu0 %v7279_v47, %s13991_s16 }
0x3df0   : > { %v7249_v52 = vpop.permute.xlu1 %7248  ;;  %v7283_v55 = vpop.permute.xlu0 %7282 }
0x3df1   : > { %v7251_v23 = vadd.f32 %v7249_v52, %v7245_v22  ;;  %v11685_v26 = vpack.i.bf16 %v7283_v55, %v7281_v21 }
0x3df3   : > { %7272 = vrot.lane.b32.xlu0 %v7251_v23, %s13996_s15  ;;  %11686 = vrot.lane.b32.xlu1 %v11685_v26, %s13991_s16 }
0x3df4   : > { %v7261_v32 = vpop.permute.xlu1 %7260 }
0x3df5   : > { %9860 = vst.msk [vmem:[%s12211_s2 + $0x60] sm:$0xff] %vm504_vm0, %v7261_v32  ;;  %v11463_v35 = vpack.c.bf16 %v7261_v32, %v9862_v41 }
0x3df7   : > { %11465 = vmatpush3.bf16.xpose.msk.msra.mxu1 %vm12217_vm3, %v11463_v35  ;;  %7276 = vrot.lane.b32.xlu0 %v7251_v23, %s13999_s3  ;;  %v9866_v35 = vld [vmem:[%s12204_s28 + $0x1a0] sm:$0xff] }
0x3df8   : > { %7274 = vrot.lane.b32.xlu1 %v7251_v23, %s13994_s20  ;;  %11470 = vmatprep.subr.bf16.mxu1 %v11983_v34 }
0x3dfe   : > { %10905 = vmatmul.mubr.msk.f32.vlgmr.msra.gmra.mrb[86].mxu1 %vm679_vm2, %v7251_v23 }
0x3dff   : > { %10918 = vmatprep.mubr.msk.f32.mxu1 %vm11984_vm1, %v11979_v10 }
0x3e5f   : > { %v7296_v36 = vpop.permute.xlu0 %7295 }
0x3e60   : > { %v11467_v37 = vpack.c.bf16 %v7296_v36, %v9863_v2 }
0x3e62   : > { %11469 = vmatpush3.bf16.xpose.msk.msra.mxu0 %vm12217_vm3, %v11467_v37 }
0x3e63   : > { %11474 = vmatprep.subr.bf16.mxu0 %v11983_v34 }
0x3e65   : > { %v11687_v25 = vpop.permute.xlu1 %11686  ;;  %v7273_v48 = vpop.permute.xlu0 %7272 }
0x3e66   : > { %v11689_v43 = vunpack.i.h.bf16 %v11687_v25  ;;  %v11688_v45 = vunpack.i.l.bf16 %v11687_v25 }
0x3e68   : > { %v11475_v46 = vpack.c.bf16 %v11689_v43, %v9865_v63  ;;  %v11471_v60 = vpack.c.bf16 %v11688_v45, %v9864_v38 }
0x3e69   : > { %10912 = vmatmul.mubr.msk.f32.vlgmr.msra.gmra.mrb[60].mxu0 %vm679_vm2, %v7273_v48  ;;  %v7277_v49 = vpop.permute.xlu0 %7276 }
0x3e6a   : > { %11473 = vmatpush3.bf16.xpose.msk.msra.mxu1 %vm12217_vm3, %v11471_v60  ;;  %11477 = vmatpush3.bf16.xpose.msk.msra.mxu0 %vm12217_vm3, %v11475_v46  ;;  %v7275_v3 = vpop.permute.xlu1 %7274 }
0x3e6b   : > { %10925 = vmatprep.mubr.msk.f32.mxu0 %vm11984_vm1, %v11979_v10  ;;  %11478 = vmatprep.subr.bf16.mxu1 %v11983_v34 }
0x3e6c   : > { %11484 = vmatprep.subr.bf16.mxu0 %v11983_v34 }
0x3e71   : > { %10919 = vmatmul.mubr.msk.f32.vlgmr.msra.gmra.mrb[88].mxu1 %vm679_vm2, %v7275_v3  ;;  %10926 = vmatmul.mubr.msk.f32.vlgmr.msra.gmra.mrb[62].mxu0 %vm679_vm2, %v7277_v49  ;;  %v9868_v49 = vld [vmem:[%s12204_s28 + $0x1b0] sm:$0xff] }
0x3e72   : > { %10932 = vmatprep.mubr.msk.f32.mxu1 %vm11984_vm1, %v11979_v10  ;;  %10946 = vmatprep.mubr.msk.f32.mxu0 %vm11984_vm1, %v11979_v10 }
0x3ed1   : > { %v7388_v12 = vpop.f32.mrb[86].mxu1 }
0x3ed2   : > { %v7623_v50 = vmul.f32 0.35355338, %v7388_v12  ;;  %v10906_v39 = vpop.f32.mrb[87].mxu1 }
0x3ed4   : > { %v7627_v0 = vadd.f32 %v13548_v11, %v7623_v50 }
0x3ed6   : > { %v7631_v54 = vsel %vm996_vm4, %v7627_v0, -inf }
0x3ed7   : > { %7632 = vmax.xlane.f32.xlu1 %v7631_v54 }
0x3f3c   : > { %v7465_v56 = vpop.f32.mrb[60].mxu0 }
0x3f3d   : > { %v7624_v31 = vmul.f32 0.35355338, %v7465_v56  ;;  %v10913_v14 = vpop.f32.mrb[61].mxu0  ;;  %v9867_v56 = vld [vmem:[%s12204_s28 + $0x1a8] sm:$0xff] }
0x3f3f   : > { %v7628_v58 = vadd.f32 %v13553_v57, %v7624_v31 }
0x3f41   : > { %v7634_v20 = vsel %vm996_vm4, %v7628_v58, -inf }
0x3f42   : > { %7635 = vmax.xlane.f32.xlu0 %v7634_v20 }
0x3f44   : > { %v7542_v59 = vpop.f32.mrb[88].mxu1  ;;  %v7619_v27 = vpop.f32.mrb[62].mxu0 }
0x3f45   : > { %v7625_v33 = vmul.f32 0.35355338, %v7542_v59  ;;  %v7626_v24 = vmul.f32 0.35355338, %v7619_v27  ;;  %v10920_v62 = vpop.f32.mrb[89].mxu1  ;;  %v10927_v15 = vpop.f32.mrb[63].mxu0 }
0x3f46   : > { %v9869_v59 = vld [vmem:[%s12204_s28 + $0x1b8] sm:$0xff] }
0x3f47   : > { %v7629_v4 = vadd.f32 %v13558_v1, %v7625_v33  ;;  %v7630_v6 = vadd.f32 %v13562_v5, %v7626_v24 }
0x3f49   : > { %v7637_v7 = vsel %vm996_vm4, %v7629_v4, -inf  ;;  %v7640_v8 = vsel %vm996_vm4, %v7630_v6, -inf }
0x3f4a   : > { %7638 = vmax.xlane.f32.xlu0 %v7637_v7  ;;  %7641 = vmax.xlane.f32.xlu1 %v7640_v8  ;;  %v9887_v7 = vld [vmem:[%s13935_s7 + $0xc8] sm:$0xff] }
0x3f5b   : > { %7286 = vrot.lane.b32.xlu1 %v13491_v13, %s13994_s20 }
0x3f5f   : > { %7288 = vrot.lane.b32.xlu1 %v13491_v13, %s13999_s3 }
0x3f60   : > { %7284 = vrot.lane.b32.xlu0 %v13491_v13, %s13996_s15 }
0x3f63   : > { %7266 = vrot.lane.b32.xlu1 %v13491_v13, %s13997_s12 }
0x3f64   : > { %v7633_v9 = vpop.xlane.xlu1 %7632 }
0x3f65   : > { %v7643_v42 = vsub.f32 %v7627_v0, %v7633_v9 }
0x3f67   : > { %v7647_v61 = vmul.f32 1.442695, %v7643_v42 }
0x3f69   : > { %11851 = vpow2.f32 %v7647_v61  ;;  %v9888_v61 = vld [vmem:[%s13935_s7 + $0xd0] sm:$0xff] }
0x3f73   : > { %v11852_v18 = vpop.eup %11851 }
0x3f74   : > { %v7655_v28 = vsel %vm996_vm4, %v11852_v18, 0.0 }
0x3f7f   : > { %7656 = vadd.xlane.f32.xlu0 %v7655_v28 }
0x3fcf   : > { %v7636_v19 = vpop.xlane.xlu0 %7635 }
0x3fd0   : > { %v7644_v53 = vsub.f32 %v7628_v58, %v7636_v19 }
0x3fd2   : > { %v7649_v40 = vmul.f32 1.442695, %v7644_v53 }
0x3fd4   : > { %11853 = vpow2.f32 %v7649_v40 }
0x3fd7   : > { %v7639_v21 = vpop.xlane.xlu0 %7638  ;;  %v7642_v47 = vpop.xlane.xlu1 %7641 }
0x3fd8   : > { %v7645_v22 = vsub.f32 %v7629_v4, %v7639_v21  ;;  %v7646_v52 = vsub.f32 %v7630_v6, %v7642_v47  ;;  %v9886_v6 = vld [vmem:[%s13935_s7 + $0xc0] sm:$0xff] }
0x3fd9   : > { %v11491_v8 = vpack.c.bf16 %v9887_v7, %v9886_v6 }
0x3fda   : > { %v7651_v55 = vmul.f32 1.442695, %v7645_v22  ;;  %v7653_v13 = vmul.f32 1.442695, %v7646_v52 }
0x3fdb   : > { %v7287_v23 = vpop.permute.xlu1 %7286  ;;  %v7285_v45 = vpop.permute.xlu0 %7284 }
0x3fdc   : > { %11855 = vpow2.f32 %v7651_v55 }
0x3fdd   : > { %11857 = vpow2.f32 %v7653_v13 }
0x3fde   : > { %v11854_v26 = vpop.eup %11853 }
0x3fdf   : > { %v7289_v41 = vpop.permute.xlu1 %7288  ;;  %v7658_v32 = vsel %vm996_vm4, %v11854_v26, 0.0 }
0x3fe0   : > { %7659 = vadd.xlane.f32.xlu1 %v7658_v32  ;;  %v11690_v43 = vpack.i.bf16 %v7289_v41, %v7287_v23 }
0x3fe3   : > { %v7267_v2 = vpop.permute.xlu1 %7266 }
0x3fe4   : > { %9861 = vst.msk [vmem:[%s12211_s2 + $0x68] sm:$0xff] %vm504_vm0, %v7267_v2  ;;  %v11479_v36 = vpack.c.bf16 %v7267_v2, %v9866_v35 }
0x3fe6   : > { %v11856_v37 = vpop.eup %11855  ;;  %11480 = vmatpush3.bf16.msra.mxu1 %v11479_v36 }
0x3fe7   : > { %v7661_v38 = vsel %vm996_vm4, %v11856_v37, 0.0  ;;  %11481 = vmatprep.subr.bf16.mxu1 %v11983_v34  ;;  %v11858_v63 = vpop.eup %11857 }
0x3fe8   : > { %7662 = vadd.xlane.f32.xlu0 %v7661_v38  ;;  %v7664_v25 = vsel %vm996_vm4, %v11858_v63, 0.0  ;;  %v9893_v38 = vld [vmem:[%s13936_s8 + $0xc0] sm:$0xff] }
0x3fec   : > { %7665 = vadd.xlane.f32.xlu0 %v7664_v25 }
0x3ff1   : > { %11691 = vrot.lane.b32.xlu1 %v11690_v43, %s13997_s12  ;;  %v9896_v43 = vld [vmem:[%s13936_s8 + $0xd8] sm:$0xff] }
0x4002   : > { %7306 = vrot.lane.b32.xlu0 %v7285_v45, %s13997_s12 }
0x400c   : > { %v7657_v46 = vpop.xlane.xlu0 %7656 }
0x400d   : > { %11859 = vrcp.f32 %v7657_v46 }
0x4017   : > { %v11860_v60 = vpop.eup %11859 }
0x4018   : > { %v7671_v48 = vmul.f32 %v11860_v60, %v11852_v18  ;;  %v9889_v18 = vld [vmem:[%s13935_s7 + $0xd8] sm:$0xff] }
0x4019   : > { %v11494_v28 = vpack.c.bf16 %v9889_v18, %v9888_v61 }
0x401a   : > { %10933 = vmatmul.mubr.msk.f32.vlgmr.msra.gmra.mrb[90].mxu1 %vm996_vm4, %v7671_v48 }
0x401b   : > { %10939 = vmatprep.mubr.msk.f32.mxu1 %vm11984_vm1, %v11979_v10 }
0x406d   : > { %v7660_v3 = vpop.xlane.xlu1 %7659 }
0x406e   : > { %11861 = vrcp.f32 %v7660_v3 }
0x4071   : > { %v11692_v12 = vpop.permute.xlu1 %11691 }
0x4072   : > { %v11693_v50 = vunpack.i.l.bf16 %v11692_v12  ;;  %v11694_v58 = vunpack.i.h.bf16 %v11692_v12 }
0x4074   : > { %v11485_v39 = vpack.c.bf16 %v11693_v50, %v9868_v49  ;;  %v11488_v62 = vpack.c.bf16 %v11694_v58, %v9869_v59  ;;  %v9892_v49 = vld [vmem:[%s13933_s5 + $0x6] ss:$0 sm:$0xff] }
0x4075   : > { %v7663_v0 = vpop.xlane.xlu0 %7662  ;;  %v9903_v58 = vld [vmem:[%s13937_s9 + $0x1a0] sm:$0xff] }
0x4076   : > { %11863 = vrcp.f32 %v7663_v0  ;;  %11486 = vmatpush3.bf16.msra.mxu0 %v11485_v39  ;;  %v9899_v39 = vld [vmem:[%s13937_s9 + $0x180] sm:$0xff]  ;;  %v9900_v0 = vld [vmem:[%s13937_s9 + $0x188] sm:$0xff] }
0x4077   : > { %11490 = vmatprep.subr.bf16.mxu0 %v11983_v34 }
0x4078   : > { %v11862_v14 = vpop.eup %11861 }
0x4079   : > { %v7666_v54 = vpop.xlane.xlu0 %7665  ;;  %v7672_v33 = vmul.f32 %v11862_v14, %v11854_v26 }
0x407a   : > { %11865 = vrcp.f32 %v7666_v54  ;;  %v9901_v54 = vld [vmem:[%s13937_s9 + $0x190] sm:$0xff] }
0x407d   : > { %v7307_v31 = vpop.permute.xlu0 %7306 }
0x407e   : > { %v11482_v20 = vpack.c.bf16 %v7307_v31, %v9867_v56  ;;  %v11503_v56 = vpack.c.bf16 %v9900_v0, %v9899_v39  ;;  %v9902_v31 = vld [vmem:[%s13937_s9 + $0x198] sm:$0xff] }
0x407f   : > { %v11506_v14 = vpack.c.bf16 %v9902_v31, %v9901_v54 }
0x4080   : > { %v11864_v27 = vpop.eup %11863  ;;  %11483 = vmatpush3.bf16.msra.mxu1 %v11482_v20  ;;  %v9904_v20 = vld [vmem:[%s13937_s9 + $0x1a8] sm:$0xff] }
0x4081   : > { %v7673_v24 = vmul.f32 %v11864_v27, %v11856_v37  ;;  %11487 = vmatprep.subr.bf16.mxu1 %v11983_v34  ;;  %v11509_v59 = vpack.c.bf16 %v9904_v20, %v9903_v58  ;;  %v9905_v27 = vld [vmem:[%s13937_s9 + $0x1b0] sm:$0xff] }
0x4083   : > { %10940 = vmatmul.mubr.msk.f32.vlgmr.msra.gmra.mrb[92].mxu1 %vm996_vm4, %v7672_v33  ;;  %10947 = vmatmul.mubr.msk.f32.vlgmr.msra.gmra.mrb[64].mxu0 %vm996_vm4, %v7673_v24  ;;  %v9906_v33 = vld [vmem:[%s13937_s9 + $0x1b8] sm:$0xff] }
0x4084   : > { %v11866_v15 = vpop.eup %11865  ;;  %11489 = vmatpush3.bf16.msra.mxu1 %v11488_v62  ;;  %10953 = vmatprep.mubr.msk.f32.mxu1 %vm11984_vm1, %v11979_v10  ;;  %v11512_v24 = vpack.c.bf16 %v9906_v33, %v9905_v27  ;;  %v9924_v27 = vld [vmem:[%s12204_s28 + $0x1d8] sm:$0xff] }
0x4085   : > { %v7674_v4 = vmul.f32 %v11866_v15, %v11858_v63  ;;  %10964 = vmatprep.mubr.msk.f32.mxu0 %vm11984_vm1, %v11979_v10  ;;  %11496 = vmatprep.subr.bf16.mxu1 %v11983_v34  ;;  %v9894_v63 = vld [vmem:[%s13936_s8 + $0xc8] sm:$0xff] }
0x4086   : > { %11492 = vmatpush3.bf16.msra.mxu0 %v11491_v8  ;;  %v11497_v25 = vpack.c.bf16 %v9894_v63, %v9893_v38 }
0x4087   : > { %10954 = vmatmul.mubr.msk.f32.vlgmr.msra.gmra.mrb[94].mxu1 %vm996_vm4, %v7674_v4  ;;  %11493 = vmatprep.subr.bf16.mxu0 %v11983_v34 }
0x4088   : > { %10975 = vmatprep.mubr.msk.f32.mxu1 %vm11984_vm1, %v11979_v10  ;;  %11498 = vmatpush3.bf16.msra.mxu1 %v11497_v25  ;;  %v9909_v25 = vld [vmem:[%s13932_s4 + $0x7] ss:$0 sm:$0xff] }
0x4089   : > { %11499 = vmatprep.subr.bf16.mxu1 %v11983_v34 }
0x408a   : > { %11495 = vmatpush3.bf16.msra.mxu0 %v11494_v28 }
0x408b   : > { %11502 = vmatprep.subr.bf16.mxu0 %v11983_v34 }
0x40ed   : > { %v7744_v9 = vpop.f32.mrb[90].mxu1 }
0x40ee   : > { %v10934_v42 = vpop.f32.mrb[91].mxu1 }
0x4156   : > { %v7817_v19 = vpop.f32.mrb[92].mxu1  ;;  %v7890_v53 = vpop.f32.mrb[64].mxu0 }
0x4157   : > { %7968 = vrot.lane.b32.xlu1 %v7817_v19, %s14000_s10  ;;  %v10941_v40 = vpop.f32.mrb[93].mxu1  ;;  %7972 = vrot.lane.b32.xlu0 %v7890_v53, %s14001_s1  ;;  %v10948_v21 = vpop.f32.mrb[65].mxu0 }
0x4158   : > { %v9911_v21 = vld [vmem:[%s13934_s6 + $0x1c8] sm:$0xff] }
0x415a   : > { %v7963_v47 = vpop.f32.mrb[94].mxu1 }
0x415b   : > { %7976 = vrot.lane.b32.xlu1 %v7963_v47, %s14002_s23  ;;  %v10955_v22 = vpop.f32.mrb[95].mxu1  ;;  %v9913_v47 = vld [vmem:[%s13934_s6 + $0x1d8] sm:$0xff] }
0x415c   : > { %v11514_v22 = vpack.c.bf16 %v9913_v47, %v9911_v21 }
0x41c9   : > { %v7969_v52 = vpop.permute.xlu1 %7968  ;;  %v7973_v13 = vpop.permute.xlu0 %7972 }
0x41ca   : > { %v7979_v55 = vsel %vm679_vm2, %v7744_v9, %v7969_v52  ;;  %v9910_v52 = vld [vmem:[%s13934_s6 + $0x1c0] sm:$0xff] }
0x41cb   : > { %v7980_v23 = vsel %vm996_vm4, %v7979_v55, %v7973_v13  ;;  %v9912_v55 = vld [vmem:[%s13934_s6 + $0x1d0] sm:$0xff] }
0x41cc   : > { %v11516_v13 = vpack.c.bf16 %v9912_v55, %v9910_v52 }
0x41cd   : > { %v7977_v26 = vpop.permute.xlu1 %7976 }
0x41ce   : > { %v7981_v41 = vsel %vm1347_vm5, %v7980_v23, %v7977_v26  ;;  %v9915_v23 = vld [vmem:[%s13934_s6 + $0x1e8] sm:$0xff]  ;;  %v9917_v26 = vld [vmem:[%s13934_s6 + $0x1f8] sm:$0xff] }
0x41cf   : > { %10965 = vmatmul.mubr.msk.f32.vlgmr.msra.gmra.mrb[66].mxu0 %vm504_vm0, %v7981_v41  ;;  %v11518_v41 = vpack.c.bf16 %v9917_v26, %v9915_v23 }
0x41d0   : > { %10994 = vmatprep.mubr.msk.f32.mxu0 %vm11984_vm1, %v11979_v10  ;;  %11504 = vmatpush3.bf16.msra.mxu0 %v11503_v56 }
0x41d1   : > { %11505 = vmatprep.subr.bf16.mxu0 %v11983_v34 }
0x41d4   : > { %11507 = vmatpush3.bf16.msra.mxu0 %v11506_v14 }
0x41d5   : > { %11508 = vmatprep.subr.bf16.mxu0 %v11983_v34 }
0x41d8   : > { %11510 = vmatpush3.bf16.msra.mxu0 %v11509_v59  ;;  %v9923_v59 = vld [vmem:[%s12204_s28 + $0x1d0] sm:$0xff] }
0x41d9   : > { %11511 = vmatprep.subr.bf16.mxu0 %v11983_v34 }
0x41dc   : > { %11513 = vmatpush3.bf16.msra.mxu0 %v11512_v24 }
0x41dd   : > { %11526 = vmatprep.subr.bf16.mxu0 %v11983_v34 }
0x42a2   : > { %v8056_v32 = vpop.f32.mrb[66].mxu0 }
0x42a3   : > { %v8060_v35 = vadd.f32 %v8056_v32, %v13454_v51  ;;  %v10966_v2 = vpop.f32.mrb[67].mxu0  ;;  %v9895_v51 = vld [vmem:[%s13936_s8 + $0xd0] sm:$0xff]  ;;  %v9914_v32 = vld [vmem:[%s13934_s6 + $0x1e0] sm:$0xff] }
0x42a4   : > { %v11500_v45 = vpack.c.bf16 %v9896_v43, %v9895_v51 }
0x42a5   : > { %v8061_v36 = vmul.f32 %v8060_v35, %v8060_v35 }
0x42a6   : > { %11501 = vmatpush3.bf16.msra.mxu1 %v11500_v45 }
0x42a7   : > { %v8062_v37 = vsel %vm504_vm0, %v8061_v36, 0.0  ;;  %11515 = vmatprep.subr.bf16.mxu1 %v11514_v22 }
0x42a8   : > { %8063 = vadd.xlane.f32.xlu0 %v8062_v37 }
0x4335   : > { %v8064_v46 = vpop.xlane.xlu0 %8063 }
0x4336   : > { %v8065_v60 = vmul.f32 0.03125, %v8064_v46 }
0x4338   : > { %v8066_v48 = vadd.f32 1e-06, %v8065_v60 }
0x433a   : > { %11867 = vrsqrt.f32 %v8066_v48 }
0x4344   : > { %v11868_v3 = vpop.eup %11867 }
0x4345   : > { %v8068_v12 = vmul.f32 %v11868_v3, %v8060_v35 }
0x4347   : > { %v8077_v50 = vmul.f32 %v9892_v49, %v8068_v12 }
0x4349   : > { %10976 = vmatmul.mubr.msk.f32.vlgmr.msra.gmra.mrb[96].mxu1 %vm504_vm0, %v8077_v50 }
0x434a   : > { %8344 = vmatprep.mubr.f32.mxu1 %v11979_v10  ;;  %11517 = vmatpush1.bf16.msra.mxu1 %v11516_v13 }
0x434b   : > { %11519 = vmatprep.subr.bf16.mxu1 %v11518_v41 }
0x441c   : > { %v8152_v62 = vpop.f32.mrb[96].mxu1 }
0x441d   : > { %8164 = vrot.lane.b32.xlu1 %v8152_v62, %s13997_s12  ;;  %v10977_v15 = vpop.f32.mrb[97].mxu1  ;;  %v9898_v4 = vmul.f32 -1.442695, %v8152_v62 }
0x441f   : > { %11869 = vpow2.f32 %v9898_v4 }
0x4429   : > { %v11870_v6 = vpop.eup %11869 }
0x442a   : > { %v8159_v7 = vadd.f32 1.0, %v11870_v6 }
0x442c   : > { %11871 = vrcp.f32 %v8159_v7 }
0x4436   : > { %v11872_v8 = vpop.eup %11871 }
0x4437   : > { %v8162_v9 = vmul.f32 %v11872_v8, %v8152_v62 }
0x448f   : > { %v8165_v42 = vpop.permute.xlu1 %8164 }
0x4490   : > { %v8167_v61 = vmul.f32 %v8165_v42, %v8162_v9 }
0x4492   : > { %10995 = vmatmul.mubr.msk.f32.vlgmr.msra.gmra.mrb[68].mxu0 %vm1540_vm6, %v8167_v61 }
0x4493   : > { %11008 = vmatprep.mubr.msk.f32.mxu0 %vm11984_vm1, %v11979_v10 }
0x4565   : > { %v8246_v18 = vpop.f32.mrb[68].mxu0 }
0x4566   : > { %v13678_v28 = vadd.f32 %v8246_v18, %v8060_v35  ;;  %v10996_v19 = vpop.f32.mrb[69].mxu0  ;;  %v9916_v35 = vld [vmem:[%s13934_s6 + $0x1f0] sm:$0xff] }
0x4567   : > { %v11520_v2 = vpack.c.bf16 %v9916_v35, %v9914_v32 }
0x4568   : > { %v8251_v53 = vmul.f32 %v13678_v28, %v13678_v28 }
0x4569   : > { %11521 = vmatpush1.bf16.msra.mxu1 %v11520_v2 }
0x456a   : > { %v8252_v40 = vsel %vm504_vm0, %v8251_v53, 0.0  ;;  %11522 = vmatprep.subr.bf16.mxu1 %v11983_v34 }
0x456b   : > { %8253 = vadd.xlane.f32.xlu1 %v8252_v40 }
0x45f8   : > { %v8254_v36 = vpop.xlane.xlu1 %8253 }
0x45f9   : > { %v8255_v37 = vmul.f32 0.03125, %v8254_v36 }
0x45fb   : > { %v8256_v38 = vadd.f32 1e-06, %v8255_v37 }
0x45fd   : > { %11873 = vrsqrt.f32 %v8256_v38 }
0x4607   : > { %v11874_v63 = vpop.eup %11873 }
0x4608   : > { %v8258_v51 = vmul.f32 %v11874_v63, %v13678_v28 }
0x460a   : > { %v8267_v43 = vmul.f32 %v9909_v25, %v8258_v51 }
0x460c   : > { %9918 = vmatmul.mubr.msk.f32.vlgmr.msra.gmra.mrb[98].mxu1 %vm504_vm0, %v8267_v43 }
0x460d   : > { %11001 = vmatprep.mubr.msk.f32.mxu1 %vm11984_vm1, %v11979_v10 }
0x46df   : > { %v13715_v45 = vpop.f32.mrb[98].mxu1 }
0x46e0   : > { %v8348_v46 = vpop.f32.mrb[99].mxu1  ;;  %v8358_v48 = vmul.f32 %v13715_v45, %v12177_v29  ;;  %v8352_v12 = vmul.f32 %v13715_v45, %v12179_v30  ;;  %v8351_v29 = vmul.f32 %v13509_v16, %v13715_v45  ;;  %v9921_v30 = vld [vmem:[%s12204_s28 + $0x1c0] sm:$0xff]  ;;  %v9922_v16 = vld [vmem:[%s12204_s28 + $0x1c8] sm:$0xff] }
0x46e1   : > { %v8359_v60 = vmul.f32 %v13494_v17, %v8348_v46 }
0x46e3   : > { %8361 = vrot.lane.b32.xlu0 %v8359_v60, %s13998_s0 }
0x4755   : > { %v8362_v3 = vpop.permute.xlu0 %8361 }
0x4756   : > { %v8364_v49 = vadd.f32 %v8362_v3, %v8358_v48 }
0x4758   : > { %8386 = vrot.lane.b32.xlu0 %v8364_v49, %s13994_s20  ;;  %8384 = vrot.lane.b32.xlu1 %v8364_v49, %s13996_s15 }
0x475c   : > { %8354 = vrot.lane.b32.xlu0 %v8352_v12, %s13998_s0  ;;  %8388 = vrot.lane.b32.xlu1 %v8364_v49, %s13999_s3 }
0x4760   : > { %8366 = vrot.lane.b32.xlu0 %v8364_v49, %s13991_s16 }
0x47ca   : > { %v8387_v17 = vpop.permute.xlu0 %8386  ;;  %v8385_v50 = vpop.permute.xlu1 %8384 }
0x47cb   : > { %8401 = vrot.lane.b32.xlu1 %v8385_v50, %s13991_s16 }
0x47ce   : > { %v8355_v39 = vpop.permute.xlu0 %8354  ;;  %v8389_v0 = vpop.permute.xlu1 %8388 }
0x47cf   : > { %v8357_v54 = vadd.f32 %v8355_v39, %v8351_v29  ;;  %v11695_v56 = vpack.i.bf16 %v8389_v0, %v8387_v17 }
0x47d1   : > { %8378 = vrot.lane.b32.xlu1 %v8357_v54, %s13996_s15  ;;  %11696 = vrot.lane.b32.xlu0 %v11695_v56, %s13991_s16  ;;  %s11991_s16 = smov [#allocation2]  }
0x47d2   : > { %v8367_v31 = vpop.permute.xlu0 %8366 }
0x47d3   : > { %9919 = vst.msk [vmem:[%s12211_s2 + $0x70] sm:$0xff] %vm504_vm0, %v8367_v31  ;;  %v11523_v14 = vpack.c.bf16 %v8367_v31, %v9921_v30 }
0x47d5   : > { %11525 = vmatpush3.bf16.xpose.msk.msra.mxu1 %vm12217_vm3, %v11523_v14  ;;  %8382 = vrot.lane.b32.xlu1 %v8357_v54, %s13999_s3 }
0x47d6   : > { %8380 = vrot.lane.b32.xlu0 %v8357_v54, %s13994_s20  ;;  %11530 = vmatprep.subr.bf16.mxu1 %v11983_v34 }
0x47dc   : > { %11002 = vmatmul.mubr.msk.f32.vlgmr.msra.gmra.mrb[100].mxu1 %vm679_vm2, %v8357_v54 }
0x47dd   : > { %11015 = vmatprep.mubr.msk.f32.mxu1 %vm11984_vm1, %v11979_v10 }
0x483d   : > { %v8402_v58 = vpop.permute.xlu1 %8401 }
0x483e   : > { %v11527_v20 = vpack.c.bf16 %v8402_v58, %v9922_v16  ;;  %v9925_v16 = vld [vmem:[%s12204_s28 + $0x1e0] sm:$0xff] }
0x4840   : > { %11529 = vmatpush3.bf16.xpose.msk.msra.mxu0 %vm12217_vm3, %v11527_v20 }
0x4841   : > { %11534 = vmatprep.subr.bf16.mxu0 %v11983_v34 }
0x4843   : > { %v11697_v33 = vpop.permute.xlu0 %11696  ;;  %v8379_v6 = vpop.permute.xlu1 %8378 }
0x4844   : > { %v11699_v24 = vunpack.i.h.bf16 %v11697_v33  ;;  %v11698_v62 = vunpack.i.l.bf16 %v11697_v33 }
0x4846   : > { %v11535_v15 = vpack.c.bf16 %v11699_v24, %v9924_v27  ;;  %v11531_v4 = vpack.c.bf16 %v11698_v62, %v9923_v59  ;;  %v9926_v27 = vld [vmem:[%s12204_s28 + $0x1e8] sm:$0xff] }
0x4847   : > { %11009 = vmatmul.mubr.msk.f32.vlgmr.msra.gmra.mrb[70].mxu0 %vm679_vm2, %v8379_v6  ;;  %v8383_v8 = vpop.permute.xlu1 %8382  ;;  %v9927_v6 = vld [vmem:[%s12204_s28 + $0x1f0] sm:$0xff] }
0x4848   : > { %11533 = vmatpush3.bf16.xpose.msk.msra.mxu1 %vm12217_vm3, %v11531_v4  ;;  %11537 = vmatpush3.bf16.xpose.msk.msra.mxu0 %vm12217_vm3, %v11535_v15  ;;  %v8381_v7 = vpop.permute.xlu0 %8380 }
0x4849   : > { %11022 = vmatprep.mubr.msk.f32.mxu0 %vm11984_vm1, %v11979_v10  ;;  %11538 = vmatprep.subr.bf16.mxu1 %v11983_v34 }
0x484a   : > { %11544 = vmatprep.subr.bf16.mxu0 %v11983_v34 }
0x484f   : > { %11016 = vmatmul.mubr.msk.f32.vlgmr.msra.gmra.mrb[102].mxu1 %vm679_vm2, %v8381_v7  ;;  %11023 = vmatmul.mubr.msk.f32.vlgmr.msra.gmra.mrb[72].mxu0 %vm679_vm2, %v8383_v8  ;;  %v9928_v7 = vld [vmem:[%s12204_s28 + $0x1f8] sm:$0xff]  ;;  %s11919_s28 = sshll.u32 %s11991_s16, 4  ;;  %s11920_s28 = int_to_ptr.vmem [resolvable:$false] %s11919_s28 }
0x4850   : > { %11029 = vmatprep.mubr.msk.f32.mxu1 %vm11984_vm1, %v11979_v10  ;;  %11043 = vmatprep.mubr.msk.f32.mxu0 %vm11984_vm1, %v11979_v10  ;;  %p11922_p0 = scmp.lt.s32.totalorder %s13887_s13, %s11920_s28 }
0x48af   : > { %v8494_v44 = vpop.f32.mrb[100].mxu1 }
0x48b0   : > { %v8729_v9 = vmul.f32 0.35355338, %v8494_v44  ;;  %v11003_v42 = vpop.f32.mrb[101].mxu1 }
0x48b2   : > { %v8733_v61 = vadd.f32 %v13548_v11, %v8729_v9 }
0x48b4   : > { %v8737_v18 = vsel %vm996_vm4, %v8733_v61, -inf }
0x48b5   : > { %8738 = vmax.xlane.f32.xlu0 %v8737_v18 }
0x491a   : > { %v8571_v19 = vpop.f32.mrb[70].mxu0 }
0x491b   : > { %v8730_v53 = vmul.f32 0.35355338, %v8571_v19  ;;  %v11010_v40 = vpop.f32.mrb[71].mxu0 }
0x491d   : > { %v8734_v21 = vadd.f32 %v13553_v57, %v8730_v53 }
0x491f   : > { %v8740_v47 = vsel %vm996_vm4, %v8734_v21, -inf }
0x4920   : > { %8741 = vmax.xlane.f32.xlu1 %v8740_v47  ;;  %v9946_v47 = vld [vmem:[%s13935_s7 + $0xe8] sm:$0xff] }
0x4922   : > { %v8648_v22 = vpop.f32.mrb[102].mxu1  ;;  %v8725_v52 = vpop.f32.mrb[72].mxu0 }
0x4923   : > { %v8731_v55 = vmul.f32 0.35355338, %v8648_v22  ;;  %v8732_v13 = vmul.f32 0.35355338, %v8725_v52  ;;  %v11017_v23 = vpop.f32.mrb[103].mxu1  ;;  %v11024_v26 = vpop.f32.mrb[73].mxu0 }
0x4924   : > { %v9947_v23 = vld [vmem:[%s13935_s7 + $0xf0] sm:$0xff]  ;;  %v9948_v26 = vld [vmem:[%s13935_s7 + $0xf8] sm:$0xff] }
0x4925   : > { %v8735_v41 = vadd.f32 %v13558_v1, %v8731_v55  ;;  %v8736_v11 = vadd.f32 %v13562_v5, %v8732_v13 }
0x4927   : > { %v8743_v32 = vsel %vm996_vm4, %v8735_v41, -inf  ;;  %v8746_v35 = vsel %vm996_vm4, %v8736_v11, -inf }
0x4928   : > { %8744 = vmax.xlane.f32.xlu0 %v8743_v32 }
0x492c   : > { %8747 = vmax.xlane.f32.xlu0 %v8746_v35 }
0x4931   : > { %8390 = vrot.lane.b32.xlu1 %v13715_v45, %s13996_s15 }
0x4935   : > { %8394 = vrot.lane.b32.xlu1 %v13715_v45, %s13999_s3 }
0x4942   : > { %v8739_v57 = vpop.xlane.xlu0 %8738  ;;  %8392 = vrot.lane.b32.xlu0 %v13715_v45, %s13994_s20  ;;  %s11921_s20 = scalar_lea.vmem %s11920_s28, 256 }
0x4943   : > { %v8749_v2 = vsub.f32 %v8733_v61, %v8739_v57 }
0x4945   : > { %v8753_v1 = vmul.f32 1.442695, %v8749_v2 }
0x4947   : > { %11875 = vpow2.f32 %v8753_v1 }
0x4951   : > { %v11876_v5 = vpop.eup %11875 }
0x4952   : > { %v8761_v36 = vsel %vm996_vm4, %v11876_v5, 0.0 }
0x4959   : > { %8762 = vadd.xlane.f32.xlu1 %v8761_v36 }
0x49ad   : > { %v8742_v37 = vpop.xlane.xlu1 %8741 }
0x49ae   : > { %v8750_v38 = vsub.f32 %v8734_v21, %v8742_v37  ;;  %v9945_v21 = vld [vmem:[%s13935_s7 + $0xe0] sm:$0xff] }
0x49af   : > { %v11551_v22 = vpack.c.bf16 %v9946_v47, %v9945_v21 }
0x49b0   : > { %v8755_v63 = vmul.f32 1.442695, %v8750_v38 }
0x49b1   : > { %v8391_v25 = vpop.permute.xlu1 %8390 }
0x49b2   : > { %11877 = vpow2.f32 %v8755_v63  ;;  %8412 = vrot.lane.b32.xlu1 %v8391_v25, %s13997_s12 }
0x49b5   : > { %v8745_v51 = vpop.xlane.xlu0 %8744  ;;  %v8395_v54 = vpop.permute.xlu1 %8394 }
0x49b6   : > { %v8751_v43 = vsub.f32 %v8735_v41, %v8745_v51 }
0x49b8   : > { %v8757_v46 = vmul.f32 1.442695, %v8751_v43 }
0x49b9   : > { %v8748_v48 = vpop.xlane.xlu0 %8747 }
0x49ba   : > { %11879 = vpow2.f32 %v8757_v46  ;;  %v8752_v49 = vsub.f32 %v8736_v11, %v8748_v48  ;;  %v11554_v11 = vpack.c.bf16 %v9948_v26, %v9947_v23  ;;  %v9952_v48 = vld [vmem:[%s13936_s8 + $0xe0] sm:$0xff] }
0x49bc   : > { %v11878_v60 = vpop.eup %11877  ;;  %v8759_v17 = vmul.f32 1.442695, %v8752_v49 }
0x49bd   : > { %v8764_v3 = vsel %vm996_vm4, %v11878_v60, 0.0  ;;  %v8393_v0 = vpop.permute.xlu0 %8392 }
0x49be   : > { %8765 = vadd.xlane.f32.xlu0 %v8764_v3  ;;  %11881 = vpow2.f32 %v8759_v17  ;;  %v11700_v56 = vpack.i.bf16 %v8395_v54, %v8393_v0  ;;  %v9953_v3 = vld [vmem:[%s13936_s8 + $0xe8] sm:$0xff]  ;;  %v9951_v0 = vld [vmem:[%s13933_s5 + $0x7] ss:$0 sm:$0xff] }
0x49bf   : > { %v11557_v49 = vpack.c.bf16 %v9953_v3, %v9952_v48 }
0x49c4   : > { %v11880_v12 = vpop.eup %11879 }
0x49c5   : > { %v8767_v50 = vsel %vm996_vm4, %v11880_v12, 0.0 }
0x49c6   : > { %8768 = vadd.xlane.f32.xlu0 %v8767_v50 }
0x49c8   : > { %v11882_v29 = vpop.eup %11881 }
0x49c9   : > { %v8770_v39 = vsel %vm996_vm4, %v11882_v29, 0.0 }
0x49d6   : > { %8771 = vadd.xlane.f32.xlu1 %v8770_v39 }
0x49dc   : > { %8372 = vrot.lane.b32.xlu0 %v13715_v45, %s13997_s12 }
0x49e6   : > { %v8763_v30 = vpop.xlane.xlu1 %8762 }
0x49e7   : > { %11701 = vrot.lane.b32.xlu1 %v11700_v56, %s13997_s12  ;;  %11883 = vrcp.f32 %v8763_v30  ;;  %v9958_v30 = vld [vmem:[%s13937_s9 + $0x1c0] sm:$0xff] }
0x49f1   : > { %v11884_v20 = vpop.eup %11883 }
0x49f2   : > { %v8777_v45 = vmul.f32 %v11884_v20, %v11876_v5 }
0x4a24   : > { %v8413_v33 = vpop.permute.xlu1 %8412 }
0x4a25   : > { %v11542_v62 = vpack.c.bf16 %v8413_v33, %v9926_v27  ;;  %v9963_v27 = vld [vmem:[%s13937_s9 + $0x1e8] sm:$0xff] }
0x4a4b   : > { %v8766_v31 = vpop.xlane.xlu0 %8765 }
0x4a4c   : > { %11885 = vrcp.f32 %v8766_v31  ;;  %v9959_v31 = vld [vmem:[%s13937_s9 + $0x1c8] sm:$0xff] }
0x4a53   : > { %v8769_v14 = vpop.xlane.xlu0 %8768 }
0x4a54   : > { %11887 = vrcp.f32 %v8769_v14  ;;  %v9960_v14 = vld [vmem:[%s13937_s9 + $0x1d0] sm:$0xff] }
0x4a56   : > { %v11886_v24 = vpop.eup %11885 }
0x4a57   : > { %v8373_v58 = vpop.permute.xlu0 %8372  ;;  %v8778_v15 = vmul.f32 %v11886_v24, %v11878_v60  ;;  %v9965_v24 = vld [vmem:[%s13937_s9 + $0x1f8] sm:$0xff] }
0x4a58   : > { %9920 = vst.msk [vmem:[%s12211_s2 + $0x78] sm:$0xff] %vm504_vm0, %v8373_v58  ;;  %v11539_v59 = vpack.c.bf16 %v8373_v58, %v9925_v16  ;;  %v11563_v16 = vpack.c.bf16 %v9959_v31, %v9958_v30  ;;  %v9961_v58 = vld [vmem:[%s13937_s9 + $0x1d8] sm:$0xff]  ;;  %s11915_s2 = scalar_lea.vmem %s13887_s13, 128 }
0x4a59   : > { %v11566_v20 = vpack.c.bf16 %v9961_v58, %v9960_v14  ;;  %p11916_p11 = scmp.ne.s32.totalorder %s13887_s13, %s11915_s2  ;;  %p11923_p1 = scmp.lt.s32.totalorder %s11921_s20, %s11915_s2 }
0x4a5a   : > { %11540 = vmatpush3.bf16.msra.mxu1 %v11539_v59  ;;  %v9962_v59 = vld [vmem:[%s13937_s9 + $0x1e0] sm:$0xff] }
0x4a5b   : > { %11541 = vmatprep.subr.bf16.mxu1 %v11983_v34  ;;  %v11569_v33 = vpack.c.bf16 %v9963_v27, %v9962_v59  ;;  %p11917_p12 = pnand %p11916_p11, %p12095_p5  ;;  %p11924_p2 = por %p11923_p1, %p11922_p0 }
0x4a5d   : > { %11030 = vmatmul.mubr.msk.f32.vlgmr.msra.gmra.mrb[104].mxu1 %vm996_vm4, %v8777_v45  ;;  %v9964_v45 = vld [vmem:[%s13937_s9 + $0x1f0] sm:$0xff]  ;;  %p11918_p13 = pneg %p11917_p12 }
0x4a5e   : > { %11543 = vmatpush3.bf16.msra.mxu1 %v11542_v62  ;;  %11036 = vmatprep.mubr.msk.f32.mxu1 %vm11984_vm1, %v11979_v10  ;;  %v11888_v42 = vpop.eup %11887  ;;  %v11572_v62 = vpack.c.bf16 %v9965_v24, %v9964_v45 }
0x4a5f   : > { %11547 = vmatprep.subr.bf16.mxu1 %v11983_v34  ;;  %v8779_v19 = vmul.f32 %v11888_v42, %v11880_v12  ;;  %p11925_p3 = pnand %p11924_p2, %p11918_p13 }
0x4a61   : > { %11037 = vmatmul.mubr.msk.f32.vlgmr.msra.gmra.mrb[106].mxu1 %vm996_vm4, %v8778_v15 }
0x4a62   : > { %11050 = vmatprep.mubr.msk.f32.mxu1 %vm11984_vm1, %v11979_v10 }
0x4a63   : > { %v8772_v4 = vpop.xlane.xlu1 %8771 }
0x4a64   : > { %11889 = vrcp.f32 %v8772_v4 }
0x4a67   : > { %v11702_v8 = vpop.permute.xlu1 %11701 }
0x4a68   : > { %v11704_v44 = vunpack.i.h.bf16 %v11702_v8  ;;  %v11703_v9 = vunpack.i.l.bf16 %v11702_v8 }
0x4a6a   : > { %v11548_v61 = vpack.c.bf16 %v11704_v44, %v9928_v7  ;;  %v11545_v18 = vpack.c.bf16 %v11703_v9, %v9927_v6 }
0x4a6c   : > { %11546 = vmatpush3.bf16.msra.mxu0 %v11545_v18  ;;  %11549 = vmatpush3.bf16.msra.mxu1 %v11548_v61 }
0x4a6d   : > { %11550 = vmatprep.subr.bf16.mxu0 %v11983_v34  ;;  %11556 = vmatprep.subr.bf16.mxu1 %v11983_v34 }
0x4a6e   : > { %v11890_v53 = vpop.eup %11889 }
0x4a6f   : > { %v8780_v40 = vmul.f32 %v11890_v53, %v11882_v29  ;;  %11044 = vmatmul.mubr.msk.f32.vlgmr.msra.gmra.mrb[74].mxu0 %vm996_vm4, %v8779_v19 }
0x4a70   : > { %11061 = vmatprep.mubr.msk.f32.mxu0 %vm11984_vm1, %v11979_v10  ;;  %11552 = vmatpush3.bf16.msra.mxu0 %v11551_v22 }
0x4a71   : > { %11051 = vmatmul.mubr.msk.f32.vlgmr.msra.gmra.mrb[108].mxu1 %vm996_vm4, %v8780_v40  ;;  %11553 = vmatprep.subr.bf16.mxu0 %v11983_v34 }
0x4a72   : > { %11072 = vmatprep.mubr.msk.f32.mxu1 %vm11984_vm1, %v11979_v10  ;;  %11558 = vmatpush3.bf16.msra.mxu1 %v11557_v49 }
0x4a73   : > { %11559 = vmatprep.subr.bf16.mxu1 %v11983_v34 }
0x4a74   : > { %11555 = vmatpush3.bf16.msra.mxu0 %v11554_v11 }
0x4a75   : > { %11562 = vmatprep.subr.bf16.mxu0 %v11983_v34 }
0x4b30   : > { %v8850_v52 = vpop.f32.mrb[104].mxu1 }
0x4b31   : > { %v11031_v55 = vpop.f32.mrb[105].mxu1 }
0x4b34   : > { %v8923_v13 = vpop.f32.mrb[106].mxu1 }
0x4b35   : > { %9074 = vrot.lane.b32.xlu0 %v8923_v13, %s14000_s10  ;;  %v11038_v41 = vpop.f32.mrb[107].mxu1 }
0x4b42   : > { %v8996_v32 = vpop.f32.mrb[74].mxu0 }
0x4b43   : > { %9078 = vrot.lane.b32.xlu1 %v8996_v32, %s14001_s1  ;;  %v11045_v35 = vpop.f32.mrb[75].mxu0 }
0x4b44   : > { %v9069_v57 = vpop.f32.mrb[108].mxu1 }
0x4b45   : > { %9082 = vrot.lane.b32.xlu0 %v9069_v57, %s14002_s23  ;;  %v11052_v2 = vpop.f32.mrb[109].mxu1 }
0x4ba7   : > { %v9075_v1 = vpop.permute.xlu0 %9074 }
0x4ba8   : > { %v9085_v5 = vsel %vm679_vm2, %v8850_v52, %v9075_v1 }
0x4bb5   : > { %v9079_v36 = vpop.permute.xlu1 %9078 }
0x4bb6   : > { %v9086_v37 = vsel %vm996_vm4, %v9085_v5, %v9079_v36 }
0x4bb7   : > { %v9083_v38 = vpop.permute.xlu0 %9082 }
0x4bb8   : > { %v9087_v63 = vsel %vm1347_vm5, %v9086_v37, %v9083_v38 }
0x4bb9   : > { %11062 = vmatmul.mubr.msk.f32.vlgmr.msra.gmra.mrb[76].mxu0 %vm504_vm0, %v9087_v63 }
0x4bba   : > { %11091 = vmatprep.mubr.msk.f32.mxu0 %vm11984_vm1, %v11979_v10  ;;  %v9954_v10 = vld [vmem:[%s13936_s8 + $0xf0] sm:$0xff]  ;;  %11564 = vmatpush3.bf16.msra.mxu0 %v11563_v16 }
0x4bbb   : > { %11565 = vmatprep.subr.bf16.mxu0 %v11983_v34 }
0x4bbe   : > { %11567 = vmatpush3.bf16.msra.mxu0 %v11566_v20 }
0x4bbf   : > { %11568 = vmatprep.subr.bf16.mxu0 %v11983_v34 }
0x4bc2   : > { %11570 = vmatpush3.bf16.msra.mxu0 %v11569_v33 }
0x4bc3   : > { %11571 = vmatprep.subr.bf16.mxu0 %v11983_v34 }
0x4bc6   : > { %11573 = vmatpush3.bf16.msra.mxu0 %v11572_v62 }
0x4c8c   : > { %v9162_v25 = vpop.f32.mrb[76].mxu0 }
0x4c8d   : > { %v9166_v51 = vadd.f32 %v9162_v25, %v13678_v28  ;;  %v11063_v43 = vpop.f32.mrb[77].mxu0  ;;  %v9955_v28 = vld [vmem:[%s13936_s8 + $0xf8] sm:$0xff] }
0x4c8e   : > { %v11560_v12 = vpack.c.bf16 %v9955_v28, %v9954_v10 }
0x4c8f   : > { %v9167_v46 = vmul.f32 %v9166_v51, %v9166_v51 }
0x4c90   : > { %11561 = vmatpush3.bf16.msra.mxu1 %v11560_v12 }
0x4c91   : > { %v9168_v60 = vsel %vm504_vm0, %v9167_v46, 0.0 }
0x4c92   : > { %9169 = vadd.xlane.f32.xlu1 %v9168_v60 }
0x4d1f   : > { %v9170_v17 = vpop.xlane.xlu1 %9169 }
0x4d20   : > { %v9171_v50 = vmul.f32 0.03125, %v9170_v17 }
0x4d22   : > { %v9172_v29 = vadd.f32 1e-06, %v9171_v50 }
0x4d24   : > { %11891 = vrsqrt.f32 %v9172_v29 }
0x4d2e   : > { %v11892_v39 = vpop.eup %11891 }
0x4d2f   : > { %v9174_v54 = vmul.f32 %v11892_v39, %v9166_v51 }
0x4d31   : > { %v9183_v56 = vmul.f32 %v9951_v0, %v9174_v54 }
0x4d33   : > { %11073 = vmatmul.mubr.msk.f32.vlgmr.msra.gmra.mrb[110].mxu1 %vm504_vm0, %v9183_v56 }
0x4e06   : > { %v9258_v15 = vpop.f32.mrb[110].mxu1 }
0x4e07   : > { %9270 = vrot.lane.b32.xlu0 %v9258_v15, %s13997_s12  ;;  %v11074_v4 = vpop.f32.mrb[111].mxu1  ;;  %v9957_v6 = vmul.f32 -1.442695, %v9258_v15 }
0x4e09   : > { %11893 = vpow2.f32 %v9957_v6 }
0x4e13   : > { %v11894_v7 = vpop.eup %11893 }
0x4e14   : > { %v9265_v8 = vadd.f32 1.0, %v11894_v7 }
0x4e16   : > { %11895 = vrcp.f32 %v9265_v8 }
0x4e20   : > { %v11896_v44 = vpop.eup %11895 }
0x4e21   : > { %v9268_v9 = vmul.f32 %v11896_v44, %v9258_v15 }
0x4e79   : > { %v9271_v42 = vpop.permute.xlu0 %9270 }
0x4e7a   : > { %v9273_v61 = vmul.f32 %v9271_v42, %v9268_v9 }
0x4e7c   : > { %11092 = vmatmul.mubr.msk.f32.vlgmr.msra.gmra.mrb[78].mxu0 %vm1540_vm6, %v9273_v61 }
0x4f4f   : > { %v9352_v34 = vpop.f32.mrb[78].mxu0 }
0x4f50   : > { %v9356_v18 = vadd.f32 %v9352_v34, %v9166_v51  ;;  %v11093_v19 = vpop.f32.mrb[79].mxu0 }
0x4f52   : > { %9357 = vst.msk [vmem:[%s461_s19] sm:$0xff] %vm504_vm0, %v9356_v18 }
0x4f53   : > { %11928 = shalt.err (!%p11925_p3)
}
0x4f54   : > { %s11929_s15 = scalar_lea.hbm %s13885_s24, 128  ;;  %s11933_s18 = scalar_lea.hbm %s14006_s11, 256 }
0x4f55   : > { %p11930_p4 = scmp.ne.s32.totalorder %s13885_s24, %s11929_s15  ;;  %p11934_p9 = scmp.lt.u32.totalorder %s13885_s24, %s14006_s11 }
0x4f56   : > { %p11935_p10 = scmp.lt.u32.totalorder %s11933_s18, %s11929_s15  ;;  %p11937_p12 = scmp.lt.u32.totalorder %s11929_s15, %s13885_s24 }
0x4f57   : > { %p11931_p7 = pnand %p11930_p4, %p12095_p5 }
0x4f58   : > { %p11936_p11 = por %p11935_p10, %p11934_p9 }
0x4f59   : > { %p11932_p8 = pneg %p11931_p7 }
0x4f5a   : > { %p11938_p13 = por %p11937_p12, %p11936_p11 }
0x4f5c   : > { %p11939_p0 = pnand %p11938_p13, %p11932_p8 }
0x4f5e   : > { %11942 = shalt.err (!%p11939_p0)
}
0x4f5f   : > { %11574 = dma.vmem_to_hbm [thread:$0]  (%p12095_p5), %s13887_s13, 128, %s13885_s24, %s9359_s17  }
0x4f60 PF: > { %s14007_s23 = sld [smem:[#allocation7_spill]]  ;;  %s14008_s29 = sld [smem:[#allocation5_spill]] }
0x4f66   : > { %p11580_p1 = scmp.ge.s32.totalorder %s14007_s23, 2  ;;  %s9392_s27 = sand.u32 1, %s14008_s29  }
0x4f67   : > { %s9393_s14 = scalar_lea.sflag [#allocation3], %s9392_s27 }
0x4f68   : > { %p11577_p2 = pnand %p11580_p1, %p12099_p6 }
0x4f6a   : > { %11960 = dma.done.wait (!%p11577_p2), %s9393_s14, 128  }
0x4f6b   : > { %11962 = vsyncadd (!%p11577_p2), %s9393_s14, 4294967168  ;;  %s14010_s24 = sld [smem:[#allocation9_spill]]  ;;  %s14011_s19 = sld [smem:[#allocation6_spill]] }
0x4f6c   : > { %s14012_s23 = sld [smem:[#allocation10_spill]]  ;;  %s14013_s21 = smov %s11969_s22 }
0x4f71   : > { %p23_p3 = scmp.ge.s32.totalorder %s14010_s24, 4   ;;  %s14014_s22 = smov %s14011_s19 }
0x4f73   :  { %25 = sbr.rel (!%p23_p3) target bundleno = 11 (0xb), region = 195 }
0x4f7a   :  { %9406 = vsyncpa [#allocation3], 1 }
0x4f7b   :  { %9408 = vsyncpa [#allocation3 + $0x1], 1 }

</bundles_post_ra>
